<compile_context>
chip_gen: v5e
topology: v5e:2x2
jax: 0.10.0
libtpu: 0.0.40
codegen_flags: <defaults>
</compile_context>

<pallas_src>
import functools

import jax
import jax.numpy as jnp
from jax import lax
from jax.experimental import pallas as pl
from jax.experimental.pallas import tpu as pltpu

# ---- module hyper-params (from model.py) ------------------------------------
VECTOR_DIMENSION = 384                          # C
N_HEADS = 16                                    # H
DIMENSION_HEAD = VECTOR_DIMENSION // N_HEADS    # Dh = 24
BLOCK_SIZE = 300                                # upper bound on T
Q_TILE = 128                                    # query tile for causal skipping


def _mha_kernel(x_ref, wqkv_ref, wo_ref, bo_ref, o_ref,
                *, n_heads, dim_head, q_tile):
    """One batch tile per grid step.

    x_ref    : (Bt, C, T)    VMEM, bf16 (pre-transposed activations)
    wqkv_ref : (3*H*Dh, C)   VMEM, bf16 ([Wq*1/sqrt(Dh); Wk; Wv]^T)
    wo_ref   : (H*Dh, C)     VMEM, bf16 (output projection weight)
    bo_ref   : (1, C)        VMEM, f32  (output projection bias)
    o_ref    : (Bt, T, C)    VMEM, f32
    """
    Bt, C, T = x_ref.shape
    H, Dh = n_heads, dim_head
    HD = H * Dh
    n_q = -(-T // q_tile)                         # static ceil-div

    wqkv = wqkv_ref[...]                          # (3*HD, C) bf16
    wo = wo_ref[...]                              # (HD, C)   bf16
    bo = bo_ref[...]                              # (1, C)    f32

    for b in range(Bt):                           # small static unroll (Bt <= 2)
        # ---- Q/K/V projections: one long MXU stream (M=3*HD, K=C) ----------
        xT = x_ref[b]                                                   # (C, T) bf16
        qkvT = jnp.dot(wqkv, xT, preferred_element_type=jnp.float32)    # (3HD, T) f32
        # Head split is a pure major-dim reshape (lane dim untouched).
        qkvT = qkvT.reshape(3, H, Dh, T).astype(jnp.bfloat16)
        qhT, khT, vhT = qkvT[0], qkvT[1], qkvT[2]                        # (H, Dh, T)

        # ---- causal query tiling: skip key blocks above the diagonal --------
        for qi in range(n_q):
            q_lo = qi * q_tile
            q_hi = min(T, q_lo + q_tile)
            tq = q_hi - q_lo
            k_hi = q_hi                            # causal bound for this tile

            q_t = qhT[:, :, q_lo:q_hi]             # (H, Dh, tq)  bf16
            k_t = khT[:, :, :k_hi]                 # (H, Dh, k_hi) bf16
            v_t = vhT[:, :, :k_hi]                 # (H, Dh, k_hi) bf16

            # scores[h, t, s] = q_h[:, t] . k_h[:, s]  (scale folded into Wq);
            # contract the Dh dim of both operands -> no Q transpose needed.
            att = lax.dot_general(
                q_t, k_t,
                dimension_numbers=(((1,), (1,)), ((0,), (0,))),
                preferred_element_type=jnp.float32)                      # (H, tq, k_hi)

            # Causal mask inside the tile + numerically-stable f32 softmax.
            row = lax.broadcasted_iota(jnp.int32, (tq, k_hi), 0) + q_lo
            col = lax.broadcasted_iota(jnp.int32, (tq, k_hi), 1)
            causal = (row >= col)[None, :, :]                            # (1, tq, k_hi)
            att = jnp.where(causal, att, jnp.float32(-jnp.inf))
            att_max = jnp.max(att, axis=-1, keepdims=True)
            p = jnp.exp(att - att_max)
            denom = jnp.sum(p, axis=-1, keepdims=True)
            p = (p * pl.reciprocal(denom, approx=True)).astype(jnp.bfloat16)

            # out^T[h, d, t] = sum_s v^T[h, d, s] * p[h, t, s]
            outT = lax.dot_general(
                v_t, p,
                dimension_numbers=(((2,), (2,)), ((0,), (0,))),
                preferred_element_type=jnp.float32)                      # (H, Dh, tq)

            # Merge heads (major-dim merge) and project; (tq, C) store is
            # lane-dense (C = 384 = 3*128).
            cat = outT.reshape(HD, tq).T.astype(jnp.bfloat16)            # (tq, HD)
            out = jnp.dot(cat, wo, preferred_element_type=jnp.float32) + bo
            o_ref[b, q_lo:q_hi, :] = out.astype(o_ref.dtype)


def _default_vmem_limit_bytes():
    """Raise the scoped-VMEM limit above the 16/32 MiB defaults so the
    (H, Tq, T) f32 score tiles fit at T near BLOCK_SIZE, while staying under
    v7x's 64 MiB physical VMEM."""
    try:
        cap = getattr(pltpu.get_tpu_info(), "vmem_capacity_bytes", None)
        if cap:
            return int(min(cap * 3 // 4, 96 * 1024 * 1024))
    except Exception:
        pass
    return 48 * 1024 * 1024


def multi_head_attention(x, wq, wk, wv, wo, bo,
                         *, n_heads=N_HEADS, dim_head=DIMENSION_HEAD,
                         q_tile=Q_TILE):
    """x: (B, T, C) float32.  wq/wk/wv: (C, H*Dh), wo: (H*Dh, C), bo: (1, C).

    Returns (B, T, C) float32 (causal MHA + output projection, eval mode).
    """
    B, T, C = x.shape
    HD = n_heads * dim_head
    assert wq.shape == (C, HD) and wk.shape == (C, HD) and wv.shape == (C, HD)
    assert wo.shape == (HD, C) and bo.shape == (1, C)
    assert T <= BLOCK_SIZE

    inv_scale = 1.0 / (float(dim_head) ** 0.5)

    # Host-side layout prep (pure plumbing, done once, fuses in XLA):
    #  * x transposed to (B, C, T): kernel never transposes activations,
    #  * Wq/Wk/Wv stacked into one (3*HD, C) matrix, 1/sqrt(Dh) folded into Wq,
    #  * MXU inputs bf16; bias stays f32.
    x_t = jnp.transpose(x, (0, 2, 1)).astype(jnp.bfloat16)               # (B, C, T)
    wqkv_t = jnp.concatenate([wq * inv_scale, wk, wv], axis=1).T.astype(
        jnp.bfloat16)                                                     # (3HD, C)
    wo_b = wo.astype(jnp.bfloat16)                                        # (HD, C)
    bo_f = bo.astype(jnp.float32)                                         # (1, C)

    # Batch tile: amortize per-grid-step overhead (v5e/v6e) while keeping live
    # intermediates small enough for v7x's 64 MiB VMEM.
    bt = 2 if B % 2 == 0 else 1

    kernel = functools.partial(_mha_kernel, n_heads=n_heads,
                               dim_head=dim_head, q_tile=q_tile)

    return pl.pallas_call(
        kernel,
        out_shape=jax.ShapeDtypeStruct((B, T, C), x.dtype),
        grid_spec=pltpu.PrefetchScalarGridSpec(
            num_scalar_prefetch=0,
            grid=(B // bt,),
            in_specs=[
                pl.BlockSpec((bt, C, T), lambda i: (i, 0, 0)),   # x^T (bf16)
                pl.BlockSpec((3 * HD, C), lambda i: (0, 0)),     # stacked QKV weights
                pl.BlockSpec((HD, C), lambda i: (0, 0)),         # Wo
                pl.BlockSpec((1, C), lambda i: (0, 0)),          # bo
            ],
            out_specs=pl.BlockSpec((bt, T, C), lambda i: (i, 0, 0)),
        ),
        compiler_params=pltpu.CompilerParams(
            dimension_semantics=("parallel",),
            vmem_limit_bytes=_default_vmem_limit_bytes()),
    )(x_t, wqkv_t, wo_b, bo_f)


def _reference(x, wq, wk, wv, wo, bo, n_heads, dim_head):
    """Plain-JAX f32 reference mirroring the PyTorch forward (eval mode)."""
    B, T, C = x.shape
    q = x @ wq
    k = x @ wk
    v = x @ wv
    q = q.reshape(B, T, n_heads, dim_head).transpose(0, 2, 1, 3)
    k = k.reshape(B, T, n_heads, dim_head).transpose(0, 2, 1, 3)
    v = v.reshape(B, T, n_heads, dim_head).transpose(0, 2, 1, 3)
    att = jnp.einsum("bhqd,bhkd->bhqk", q, k) / (dim_head ** 0.5)
    mask = jnp.tril(jnp.ones((T, T), dtype=bool))
    att = jnp.where(mask, att, -jnp.inf)
    att = jax.nn.softmax(att, axis=-1)
    out = jnp.einsum("bhqk,bhkd->bhqd", att, v)
    out = out.transpose(0, 2, 1, 3).reshape(B, T, n_heads * dim_head)
    return out @ wo + bo


if __name__ == "__main__":
    # Small, module-consistent shapes: channel dim must be VECTOR_DIMENSION (384).
    B, T, C = 2, 16, VECTOR_DIMENSION
    H, DH = N_HEADS, DIMENSION_HEAD
    HD = H * DH

    key = jax.random.PRNGKey(0)
    kx, kq, kk, kv, kwo, kbo = jax.random.split(key, 6)

    scale_in = 1.0 / (C ** 0.5)      # ~ PyTorch Linear default init scale
    scale_hd = 1.0 / (HD ** 0.5)

    x = jax.random.normal(kx, (B, T, C), dtype=jnp.float32)
    # Stacked per-head projection weights laid out as (in_features, out_features)
    # (PyTorch stores (out, in) and does x @ W.T; the wrapper re-transposes).
    wq = jax.random.uniform(kq, (C, HD), jnp.float32, -scale_in, scale_in)
    wk = jax.random.uniform(kk, (C, HD), jnp.float32, -scale_in, scale_in)
    wv = jax.random.uniform(kv, (C, HD), jnp.float32, -scale_in, scale_in)
    wo = jax.random.uniform(kwo, (HD, C), jnp.float32, -scale_hd, scale_hd)
    bo = jax.random.uniform(kbo, (1, C), jnp.float32, -scale_hd, scale_hd)

    out = multi_head_attention(x, wq, wk, wv, wo, bo)
    out = jax.block_until_ready(out)

    ref = _reference(x, wq, wk, wv, wo, bo, H, DH)
    assert out.shape == (B, T, C)
    # bf16 MXU inputs + approx reciprocal -> tolerance relaxed accordingly
    # (f32 accumulation kept everywhere).
    max_err = jnp.max(jnp.abs(out - ref))
    assert jnp.allclose(out, ref, atol=3e-2, rtol=3e-2), f"max err {max_err}"

    print("KERNEL_OK")
</pallas_src>

<mosaic_0001>
module attributes {stable_mosaic.version = 11 : i64} {
  func.func @_mha_kernel(%arg0: i32, %arg1: memref<2x384x16xbf16, #tpu.memory_space<vmem>>, %arg2: memref<1152x384xbf16, #tpu.memory_space<vmem>>, %arg3: memref<384x384xbf16, #tpu.memory_space<vmem>>, %arg4: memref<1x384xf32, #tpu.memory_space<vmem>>, %arg5: memref<2x16x384xf32, #tpu.memory_space<vmem>>) attributes {dimension_semantics = [#tpu.dimension_semantics<parallel>], iteration_bounds = array<i64: 1>, scalar_prefetch = 0 : i64, scratch_operands = 0 : i64, tpu.core_type = #tpu.core_type<tc>, window_params = [{transform_indices = @transform_0, window_bounds = array<i64: 2, 384, 16>}, {pipeline_mode = #tpu.pipeline_mode<synchronous>, transform_indices = @transform_1, window_bounds = array<i64: 1152, 384>}, {pipeline_mode = #tpu.pipeline_mode<synchronous>, transform_indices = @transform_2, window_bounds = array<i64: 384, 384>}, {pipeline_mode = #tpu.pipeline_mode<synchronous>, transform_indices = @transform_3, window_bounds = array<i64: 1, 384>}, {transform_indices = @transform_4, window_bounds = array<i64: 2, 16, 384>}]} {
    %c0 = arith.constant 0 : index
    %c0_0 = arith.constant 0 : index
    %0 = vector.load %arg2[%c0, %c0_0] : memref<1152x384xbf16, #tpu.memory_space<vmem>>, vector<1152x384xbf16>
    %c0_1 = arith.constant 0 : index
    %c0_2 = arith.constant 0 : index
    %1 = vector.load %arg3[%c0_1, %c0_2] : memref<384x384xbf16, #tpu.memory_space<vmem>>, vector<384x384xbf16>
    %c0_3 = arith.constant 0 : index
    %c0_4 = arith.constant 0 : index
    %2 = vector.load %arg4[%c0_3, %c0_4] : memref<1x384xf32, #tpu.memory_space<vmem>>, vector<1x384xf32>
    %c0_5 = arith.constant 0 : index
    %c0_6 = arith.constant 0 : index
    %c0_7 = arith.constant 0 : index
    %3 = vector.load %arg1[%c0_5, %c0_6, %c0_7] : memref<2x384x16xbf16, #tpu.memory_space<vmem>>, vector<1x384x16xbf16>
    %4 = vector.shape_cast %3 : vector<1x384x16xbf16> to vector<384x16xbf16>
    %cst = arith.constant dense<0.000000e+00> : vector<1152x16xf32>
    %5 = tpu.matmul %0, %4, %cst {dimension_numbers = #tpu.dot_dimension_numbers<[1], [0], [0], [1], [0, 0, 1, 1], [], []>} : vector<1152x384xbf16>, vector<384x16xbf16>, vector<1152x16xf32> -> vector<1152x16xf32>
    %6 = vector.shape_cast %5 : vector<1152x16xf32> to vector<3x16x24x16xf32>
    %7 = arith.truncf %6 : vector<3x16x24x16xf32> to vector<3x16x24x16xbf16>
    %8 = vector.extract_strided_slice %7 {offsets = [0, 0, 0, 0], sizes = [1, 16, 24, 16], strides = [1, 1, 1, 1]} : vector<3x16x24x16xbf16> to vector<1x16x24x16xbf16>
    %9 = vector.shape_cast %8 : vector<1x16x24x16xbf16> to vector<16x24x16xbf16>
    %10 = vector.extract_strided_slice %7 {offsets = [1, 0, 0, 0], sizes = [1, 16, 24, 16], strides = [1, 1, 1, 1]} : vector<3x16x24x16xbf16> to vector<1x16x24x16xbf16>
    %11 = vector.shape_cast %10 : vector<1x16x24x16xbf16> to vector<16x24x16xbf16>
    %12 = vector.extract_strided_slice %7 {offsets = [2, 0, 0, 0], sizes = [1, 16, 24, 16], strides = [1, 1, 1, 1]} : vector<3x16x24x16xbf16> to vector<1x16x24x16xbf16>
    %13 = vector.shape_cast %12 : vector<1x16x24x16xbf16> to vector<16x24x16xbf16>
    %cst_8 = arith.constant dense<0.000000e+00> : vector<16x16x16xf32>
    %14 = tpu.matmul %9, %11, %cst_8 {dimension_numbers = #tpu.dot_dimension_numbers<[1], [1], [2], [2], [0, 0, 0, 2, 1, 2], [0], [0]>} : vector<16x24x16xbf16>, vector<16x24x16xbf16>, vector<16x16x16xf32> -> vector<16x16x16xf32>
    %15 = tpu.iota {dimensions = array<i32: 0>} : vector<16x16xi32>
    %c0_i32 = arith.constant 0 : i32
    %16 = vector.broadcast %c0_i32 : i32 to vector<16x16xi32>
    %17 = arith.addi %15, %16 : vector<16x16xi32>
    %18 = tpu.iota {dimensions = array<i32: 1>} : vector<16x16xi32>
    %19 = arith.cmpi sge, %17, %18 : vector<16x16xi32>
    %20 = vector.shape_cast %19 : vector<16x16xi1> to vector<1x16x16xi1>
    %cst_9 = arith.constant 0xFF800000 : f32
    %21 = vector.shape_cast %20 : vector<1x16x16xi1> to vector<1x16x16xi1>
    %22 = vector.broadcast %21 : vector<1x16x16xi1> to vector<16x16x16xi1>
    %23 = vector.broadcast %cst_9 : f32 to vector<16x16x16xf32>
    %24 = arith.select %22, %14, %23 : vector<16x16x16xi1>, vector<16x16x16xf32>
    %cst_10 = arith.constant dense<0xFF800000> : vector<16x16xf32>
    %25 = vector.multi_reduction <maximumf>, %24, %cst_10 [2] : vector<16x16x16xf32> to vector<16x16xf32>
    %26 = vector.shape_cast %25 : vector<16x16xf32> to vector<16x16x1xf32>
    %27 = vector.broadcast %26 : vector<16x16x1xf32> to vector<16x16x16xf32>
    %28 = arith.subf %24, %27 : vector<16x16x16xf32>
    %29 = math.exp %28 : vector<16x16x16xf32>
    %cst_11 = arith.constant dense<0.000000e+00> : vector<16x16xf32>
    %30 = vector.multi_reduction <add>, %29, %cst_11 [2] : vector<16x16x16xf32> to vector<16x16xf32>
    %31 = vector.shape_cast %30 : vector<16x16xf32> to vector<16x16x1xf32>
    %32 = tpu.reciprocal %31 {approx = true} : vector<16x16x1xf32> -> vector<16x16x1xf32>
    %33 = vector.broadcast %32 : vector<16x16x1xf32> to vector<16x16x16xf32>
    %34 = arith.mulf %29, %33 : vector<16x16x16xf32>
    %35 = arith.truncf %34 : vector<16x16x16xf32> to vector<16x16x16xbf16>
    %cst_12 = arith.constant dense<0.000000e+00> : vector<16x24x16xf32>
    %36 = tpu.matmul %13, %35, %cst_12 {dimension_numbers = #tpu.dot_dimension_numbers<[2], [2], [1], [1], [0, 0, 0, 1, 1, 1], [0], [0]>} : vector<16x24x16xbf16>, vector<16x16x16xbf16>, vector<16x24x16xf32> -> vector<16x24x16xf32>
    %37 = vector.shape_cast %36 : vector<16x24x16xf32> to vector<384x16xf32>
    %38 = tpu.transpose %37, [1, 0] : vector<384x16xf32> -> vector<16x384xf32>
    %39 = arith.truncf %38 : vector<16x384xf32> to vector<16x384xbf16>
    %cst_13 = arith.constant dense<0.000000e+00> : vector<16x384xf32>
    %40 = tpu.matmul %39, %1, %cst_13 {dimension_numbers = #tpu.dot_dimension_numbers<[1], [0], [0], [1], [0, 0, 1, 1], [], []>} : vector<16x384xbf16>, vector<384x384xbf16>, vector<16x384xf32> -> vector<16x384xf32>
    %41 = vector.broadcast %2 : vector<1x384xf32> to vector<16x384xf32>
    %42 = arith.addf %40, %41 : vector<16x384xf32>
    %c0_14 = arith.constant 0 : index
    %c0_15 = arith.constant 0 : index
    %c0_16 = arith.constant 0 : index
    %43 = vector.load %arg5[%c0_14, %c0_15, %c0_16] : memref<2x16x384xf32, #tpu.memory_space<vmem>>, vector<1x16x384xf32>
    %44 = vector.shape_cast %43 : vector<1x16x384xf32> to vector<16x384xf32>
    %45 = vector.shape_cast %42 : vector<16x384xf32> to vector<1x16x384xf32>
    tpu.vector_store %arg5[%c0_14, %c0_15, %c0_16], %45 {strides = array<i32>} : memref<2x16x384xf32, #tpu.memory_space<vmem>>, vector<1x16x384xf32>,
    %c1 = arith.constant 1 : index
    %c0_17 = arith.constant 0 : index
    %c0_18 = arith.constant 0 : index
    %46 = vector.load %arg1[%c1, %c0_17, %c0_18] : memref<2x384x16xbf16, #tpu.memory_space<vmem>>, vector<1x384x16xbf16>
    %47 = vector.shape_cast %46 : vector<1x384x16xbf16> to vector<384x16xbf16>
    %cst_19 = arith.constant dense<0.000000e+00> : vector<1152x16xf32>
    %48 = tpu.matmul %0, %47, %cst_19 {dimension_numbers = #tpu.dot_dimension_numbers<[1], [0], [0], [1], [0, 0, 1, 1], [], []>} : vector<1152x384xbf16>, vector<384x16xbf16>, vector<1152x16xf32> -> vector<1152x16xf32>
    %49 = vector.shape_cast %48 : vector<1152x16xf32> to vector<3x16x24x16xf32>
    %50 = arith.truncf %49 : vector<3x16x24x16xf32> to vector<3x16x24x16xbf16>
    %51 = vector.extract_strided_slice %50 {offsets = [0, 0, 0, 0], sizes = [1, 16, 24, 16], strides = [1, 1, 1, 1]} : vector<3x16x24x16xbf16> to vector<1x16x24x16xbf16>
    %52 = vector.shape_cast %51 : vector<1x16x24x16xbf16> to vector<16x24x16xbf16>
    %53 = vector.extract_strided_slice %50 {offsets = [1, 0, 0, 0], sizes = [1, 16, 24, 16], strides = [1, 1, 1, 1]} : vector<3x16x24x16xbf16> to vector<1x16x24x16xbf16>
    %54 = vector.shape_cast %53 : vector<1x16x24x16xbf16> to vector<16x24x16xbf16>
    %55 = vector.extract_strided_slice %50 {offsets = [2, 0, 0, 0], sizes = [1, 16, 24, 16], strides = [1, 1, 1, 1]} : vector<3x16x24x16xbf16> to vector<1x16x24x16xbf16>
    %56 = vector.shape_cast %55 : vector<1x16x24x16xbf16> to vector<16x24x16xbf16>
    %cst_20 = arith.constant dense<0.000000e+00> : vector<16x16x16xf32>
    %57 = tpu.matmul %52, %54, %cst_20 {dimension_numbers = #tpu.dot_dimension_numbers<[1], [1], [2], [2], [0, 0, 0, 2, 1, 2], [0], [0]>} : vector<16x24x16xbf16>, vector<16x24x16xbf16>, vector<16x16x16xf32> -> vector<16x16x16xf32>
    %58 = tpu.iota {dimensions = array<i32: 0>} : vector<16x16xi32>
    %c0_i32_21 = arith.constant 0 : i32
    %59 = vector.broadcast %c0_i32_21 : i32 to vector<16x16xi32>
    %60 = arith.addi %58, %59 : vector<16x16xi32>
    %61 = tpu.iota {dimensions = array<i32: 1>} : vector<16x16xi32>
    %62 = arith.cmpi sge, %60, %61 : vector<16x16xi32>
    %63 = vector.shape_cast %62 : vector<16x16xi1> to vector<1x16x16xi1>
    %cst_22 = arith.constant 0xFF800000 : f32
    %64 = vector.shape_cast %63 : vector<1x16x16xi1> to vector<1x16x16xi1>
    %65 = vector.broadcast %64 : vector<1x16x16xi1> to vector<16x16x16xi1>
    %66 = vector.broadcast %cst_22 : f32 to vector<16x16x16xf32>
    %67 = arith.select %65, %57, %66 : vector<16x16x16xi1>, vector<16x16x16xf32>
    %cst_23 = arith.constant dense<0xFF800000> : vector<16x16xf32>
    %68 = vector.multi_reduction <maximumf>, %67, %cst_23 [2] : vector<16x16x16xf32> to vector<16x16xf32>
    %69 = vector.shape_cast %68 : vector<16x16xf32> to vector<16x16x1xf32>
    %70 = vector.broadcast %69 : vector<16x16x1xf32> to vector<16x16x16xf32>
    %71 = arith.subf %67, %70 : vector<16x16x16xf32>
    %72 = math.exp %71 : vector<16x16x16xf32>
    %cst_24 = arith.constant dense<0.000000e+00> : vector<16x16xf32>
    %73 = vector.multi_reduction <add>, %72, %cst_24 [2] : vector<16x16x16xf32> to vector<16x16xf32>
    %74 = vector.shape_cast %73 : vector<16x16xf32> to vector<16x16x1xf32>
    %75 = tpu.reciprocal %74 {approx = true} : vector<16x16x1xf32> -> vector<16x16x1xf32>
    %76 = vector.broadcast %75 : vector<16x16x1xf32> to vector<16x16x16xf32>
    %77 = arith.mulf %72, %76 : vector<16x16x16xf32>
    %78 = arith.truncf %77 : vector<16x16x16xf32> to vector<16x16x16xbf16>
    %cst_25 = arith.constant dense<0.000000e+00> : vector<16x24x16xf32>
    %79 = tpu.matmul %56, %78, %cst_25 {dimension_numbers = #tpu.dot_dimension_numbers<[2], [2], [1], [1], [0, 0, 0, 1, 1, 1], [0], [0]>} : vector<16x24x16xbf16>, vector<16x16x16xbf16>, vector<16x24x16xf32> -> vector<16x24x16xf32>
    %80 = vector.shape_cast %79 : vector<16x24x16xf32> to vector<384x16xf32>
    %81 = tpu.transpose %80, [1, 0] : vector<384x16xf32> -> vector<16x384xf32>
    %82 = arith.truncf %81 : vector<16x384xf32> to vector<16x384xbf16>
    %cst_26 = arith.constant dense<0.000000e+00> : vector<16x384xf32>
    %83 = tpu.matmul %82, %1, %cst_26 {dimension_numbers = #tpu.dot_dimension_numbers<[1], [0], [0], [1], [0, 0, 1, 1], [], []>} : vector<16x384xbf16>, vector<384x384xbf16>, vector<16x384xf32> -> vector<16x384xf32>
    %84 = vector.broadcast %2 : vector<1x384xf32> to vector<16x384xf32>
    %85 = arith.addf %83, %84 : vector<16x384xf32>
    %c1_27 = arith.constant 1 : index
    %c0_28 = arith.constant 0 : index
    %c0_29 = arith.constant 0 : index
    %86 = vector.load %arg5[%c1_27, %c0_28, %c0_29] : memref<2x16x384xf32, #tpu.memory_space<vmem>>, vector<1x16x384xf32>
    %87 = vector.shape_cast %86 : vector<1x16x384xf32> to vector<16x384xf32>
    %88 = vector.shape_cast %85 : vector<16x384xf32> to vector<1x16x384xf32>
    tpu.vector_store %arg5[%c1_27, %c0_28, %c0_29], %88 {strides = array<i32>} : memref<2x16x384xf32, #tpu.memory_space<vmem>>, vector<1x16x384xf32>,
    return
  }
  func.func @transform_0(%arg0: i32) -> (i32, i32, i32) {
    %c0_i32 = arith.constant 0 : i32
    %c0_i32_0 = arith.constant 0 : i32
    %c0_i32_1 = arith.constant 0 : i32
    return %arg0, %c0_i32, %c0_i32_0 : i32, i32, i32
  }
  func.func @transform_1(%arg0: i32) -> (i32, i32) {
    %c0_i32 = arith.constant 0 : i32
    %c0_i32_0 = arith.constant 0 : i32
    %c0_i32_1 = arith.constant 0 : i32
    return %c0_i32, %c0_i32_0 : i32, i32
  }
  func.func @transform_2(%arg0: i32) -> (i32, i32) {
    %c0_i32 = arith.constant 0 : i32
    %c0_i32_0 = arith.constant 0 : i32
    %c0_i32_1 = arith.constant 0 : i32
    return %c0_i32, %c0_i32_0 : i32, i32
  }
  func.func @transform_3(%arg0: i32) -> (i32, i32) {
    %c0_i32 = arith.constant 0 : i32
    %c0_i32_0 = arith.constant 0 : i32
    %c0_i32_1 = arith.constant 0 : i32
    return %c0_i32, %c0_i32_0 : i32, i32
  }
  func.func @transform_4(%arg0: i32) -> (i32, i32, i32) {
    %c0_i32 = arith.constant 0 : i32
    %c0_i32_0 = arith.constant 0 : i32
    %c0_i32_1 = arith.constant 0 : i32
    return %arg0, %c0_i32, %c0_i32_0 : i32, i32, i32
  }
}

</mosaic_0001>

<bundles_post_ra>
// kernel: tpu_custom_call.1
= control target key start
LH: loop header
LB: loop body
LE: loop exit
PB: predicated region body
PF: predicated region fallthrough
CT: control target
= control target key end

     0   :  { %9 = vsyncpa [#allocation3], 0  ;;  %s14925_s0 = inlined_call_operand.vmem [shape: bf16[2,384,16], index: 0, kind: input, shape index: {}]   ;;  %s14926_s1 = inlined_call_operand.hbm [shape: bf16[1152,384], index: 1, kind: input, shape index: {}]   ;;  %s14927_s2 = inlined_call_operand.hbm [shape: bf16[384,384], index: 2, kind: input, shape index: {}]   ;;  %s14928_s3 = inlined_call_operand.vmem [shape: f32[1,384], index: 3, kind: input, shape index: {}]   ;;  %s14929_s4 = inlined_call_operand.hbm [shape: f32[2,16,384], index: 4, kind: output, shape index: {}]  }
   0x1   :  { %10 = vsyncpa [#allocation6], 0 }
   0x2   :  { %11 = vsyncpa [#allocation4], 0  ;;  %s18_s17 = sshll.u32 %s14926_s1, 4  ;;  %s11565_s18 = smov [#allocation2]   ;;  %s19_s17 = int_to_ptr.hbm [resolvable:$true] %s18_s17 }
   0x3   :  { %s20_s19 = sshll.u32 %s11565_s18, 4  ;;  %s31_s22 = sshll.u32 %s14927_s2, 4  ;;  %s21_s19 = int_to_ptr.vmem [resolvable:$true] %s20_s19  ;;  %s32_s22 = int_to_ptr.hbm [resolvable:$true] %s31_s22 }
   0x4   :  { %s11566_s23 = smov 192   ;;  %s11567_s24 = smov 12  }
   0x5   :  { %26 = dma.hbm_to_vmem [thread:$0]  %s19_s17, 27648, %s21_s19, [#allocation3], %s11566_s23, %s11566_s23, %s11567_s24  }
   0x6   :  { %s11568_s25 = smov [#allocation5]  }
   0x7   :  { %s33_s26 = sshll.u32 %s11568_s25, 4  ;;  %s34_s26 = int_to_ptr.vmem [resolvable:$true] %s33_s26 }
   0x8   :  { %39 = dma.hbm_to_vmem [thread:$0]  %s32_s22, 9216, %s34_s26, [#allocation6], %s11566_s23, %s11566_s23, %s11567_s24  }
   0x9   :  { %11559 = dma.done.wait [#allocation3], 27648  }
   0xa   :  { %11560 = vsyncadd [#allocation3], 4294939648 }
   0xb   :  { %11561 = dma.done.wait [#allocation6], 9216  }
   0xc   :  { %11562 = vsyncadd [#allocation6], 4294958080  ;;  %v11018_v0 = vld [vmem:[%s14925_s0 + $0x38] sm:$0xff]  ;;  %v11017_v2 = vld [vmem:[%s14925_s0 + $0x30] sm:$0xff]  ;;  %vm3070_vm0 = vcmask 1043456   ;;  %vm3066_vm1 = vcmask 195584  }
   0xd   :  { %v11026_v1 = vld [vmem:[%s14925_s0 + $0x78] sm:$0xff]  ;;  %11059 = vmatpush.bf16.msra.mxu3 %v11018_v0  ;;  %v11025_v3 = vld [vmem:[%s14925_s0 + $0x70] sm:$0xff]  ;;  %1780 = vmatpush.bf16.msra.mxu0 %v11018_v0  ;;  %v11016_v4 = vld [vmem:[%s14925_s0 + $0x28] sm:$0xff]  ;;  %vm3956_vm3 = vcmask 130048   ;;  %s9221_s14 = sshll.u32 %s14929_s4, 4  ;;  %s11570_s15 = smov 384   ;;  %s9222_s14 = int_to_ptr.hbm [resolvable:$true] %s9221_s14 }
   0xe   :  { %11067 = vmatpush.bf16.msra.mxu2 %v11026_v1  ;;  %2149 = vmatpush.bf16.msra.mxu1 %v11026_v1  ;;  %v11024_v5 = vld [vmem:[%s14925_s0 + $0x68] sm:$0xff]  ;;  %v11015_v6 = vld [vmem:[%s14925_s0 + $0x20] sm:$0xff]  ;;  %v11014_v8 = vld [vmem:[%s14925_s0 + $0x18] sm:$0xff]  ;;  %s11571_s16 = smov 24  }
   0xf   :  { %v11023_v7 = vld [vmem:[%s14925_s0 + $0x60] sm:$0xff]  ;;  %v11022_v9 = vld [vmem:[%s14925_s0 + $0x58] sm:$0xff]  ;;  %v11013_v10 = vld [vmem:[%s14925_s0 + $0x10] sm:$0xff] }
  0x10   :  { %v11021_v11 = vld [vmem:[%s14925_s0 + $0x50] sm:$0xff]  ;;  %v11012_v12 = vld [vmem:[%s14925_s0 + $0x8] sm:$0xff]  ;;  %v11011_v14 = vld [vmem:[%s14925_s0] sm:$0xff] }
  0x11   :  { %11060 = vmatpush.bf16.msra.mxu3 %v11017_v2  ;;  %1781 = vmatpush.bf16.msra.mxu0 %v11017_v2  ;;  %v11020_v13 = vld [vmem:[%s14925_s0 + $0x48] sm:$0xff]  ;;  %v11019_v15 = vld [vmem:[%s14925_s0 + $0x40] sm:$0xff]  ;;  %v10065_v16 = vld [vmem:[#allocation2 + $0x678] sm:$0xf] }
  0x12   :  { %11068 = vmatpush.bf16.msra.mxu2 %v11025_v3  ;;  %2150 = vmatpush.bf16.msra.mxu1 %v11025_v3  ;;  %v10931_v17 = vld [vmem:[#allocation2 + $0x680] sm:$0xf0]  ;;  %v10930_v18 = vld [vmem:[#allocation2 + $0x67c] sm:$0xf]  ;;  %v10067_v19 = vld [vmem:[#allocation2 + $0x684] sm:$0xf0] }
  0x13   :  { %v11034_v20 = vld [vmem:[%s14925_s0 + $0xb8] sm:$0xff]  ;;  %v11654_v21 = vor.u32 %v10931_v17, %v10065_v16  ;;  %v11656_v22 = vor.u32 %v10930_v18, %v10067_v19  ;;  %v11033_v23 = vld [vmem:[%s14925_s0 + $0xb0] sm:$0xff]  ;;  %v9237_v24 = vld [vmem:[#allocation2] sm:$0xf] }
  0x14   :  { %v10724_v25 = vld [vmem:[#allocation2 + $0x8] sm:$0xf0]  ;;  %v10723_v26 = vld [vmem:[#allocation2 + $0x4] sm:$0xf]  ;;  %v9239_v27 = vld [vmem:[#allocation2 + $0xc] sm:$0xf0] }
  0x15   :  { %11061 = vmatpush.bf16.msra.mxu3 %v11016_v4  ;;  %1782 = vmatpush.bf16.msra.mxu0 %v11016_v4  ;;  %15223 = vst [vmem:[#allocation11_spill] sm:$0xff] %v11654_v21  ;;  %v11032_v28 = vld [vmem:[%s14925_s0 + $0xa8] sm:$0xff]  ;;  %v11666_v29 = vor.u32 %v10724_v25, %v9237_v24  ;;  %v11668_v30 = vor.u32 %v10723_v26, %v9239_v27  ;;  %v11031_v31 = vld [vmem:[%s14925_s0 + $0xa0] sm:$0xff]  ;;  %v10077_v32 = vld [vmem:[#allocation2 + $0x690] sm:$0xf] }
  0x16   :  { %11069 = vmatpush.bf16.msra.mxu2 %v11024_v5  ;;  %2151 = vmatpush.bf16.msra.mxu1 %v11024_v5  ;;  %15224 = vst [vmem:[#allocation12_spill] sm:$0xff] %v11656_v22  ;;  %v10934_v33 = vld [vmem:[#allocation2 + $0x698] sm:$0xf0]  ;;  %v10933_v34 = vld [vmem:[#allocation2 + $0x694] sm:$0xf]  ;;  %v11028_v45 = vld [vmem:[%s14925_s0 + $0x88] sm:$0xff] }
  0x17   :  { %15225 = vst [vmem:[#allocation13_spill] sm:$0xff] %v11666_v29  ;;  %v10079_v35 = vld [vmem:[#allocation2 + $0x69c] sm:$0xf0]  ;;  %v11030_v36 = vld [vmem:[%s14925_s0 + $0x98] sm:$0xff]  ;;  %v11678_v37 = vor.u32 %v10934_v33, %v10077_v32  ;;  %v11029_v39 = vld [vmem:[%s14925_s0 + $0x90] sm:$0xff] }
  0x18   :  { %15226 = vst [vmem:[#allocation14_spill] sm:$0xff] %v11668_v30  ;;  %v11680_v38 = vor.u32 %v10933_v34, %v10079_v35  ;;  %v9249_v40 = vld [vmem:[#allocation2 + $0x18] sm:$0xf]  ;;  %v10727_v41 = vld [vmem:[#allocation2 + $0x20] sm:$0xf0] }
  0x19   :  { %11062 = vmatpush.bf16.msra.mxu3 %v11015_v6  ;;  %1783 = vmatpush.bf16.msra.mxu0 %v11015_v6  ;;  %15227 = vst [vmem:[#allocation15_spill] sm:$0xff] %v11678_v37  ;;  %v10726_v42 = vld [vmem:[#allocation2 + $0x1c] sm:$0xf]  ;;  %v11687_v43 = vor.u32 %v10727_v41, %v9249_v40  ;;  %v9251_v44 = vld [vmem:[#allocation2 + $0x24] sm:$0xf0]  ;;  %v11027_v47 = vld [vmem:[%s14925_s0 + $0x80] sm:$0xff] }
  0x1a   :  { %11070 = vmatpush.bf16.msra.mxu2 %v11023_v7  ;;  %2152 = vmatpush.bf16.msra.mxu1 %v11023_v7  ;;  %15228 = vst [vmem:[#allocation16_spill] sm:$0xff] %v11680_v38  ;;  %v11692_v46 = vor.u32 %v10726_v42, %v9251_v44  ;;  %v10089_v48 = vld [vmem:[#allocation2 + $0x6a8] sm:$0xf]  ;;  %v10937_v49 = vld [vmem:[#allocation2 + $0x6b0] sm:$0xf0] }
  0x1b   :  { %15229 = vst [vmem:[#allocation17_spill] sm:$0xff] %v11687_v43  ;;  %v10936_v50 = vld [vmem:[#allocation2 + $0x6ac] sm:$0xf]  ;;  %v10091_v51 = vld [vmem:[#allocation2 + $0x6b4] sm:$0xf0]  ;;  %v11699_v52 = vor.u32 %v10937_v49, %v10089_v48 }
  0x1c   :  { %15230 = vst [vmem:[#allocation18_spill] sm:$0xff] %v11692_v46  ;;  %v11701_v53 = vor.u32 %v10936_v50, %v10091_v51  ;;  %v9261_v54 = vld [vmem:[#allocation2 + $0x30] sm:$0xf]  ;;  %v10730_v55 = vld [vmem:[#allocation2 + $0x38] sm:$0xf0] }
  0x1d   :  { %11063 = vmatpush.bf16.msra.mxu3 %v11014_v8  ;;  %1784 = vmatpush.bf16.msra.mxu0 %v11014_v8  ;;  %15231 = vst [vmem:[#allocation19_spill] sm:$0xff] %v11699_v52  ;;  %v10729_v56 = vld [vmem:[#allocation2 + $0x34] sm:$0xf]  ;;  %v11705_v57 = vor.u32 %v10730_v55, %v9261_v54  ;;  %v9263_v58 = vld [vmem:[#allocation2 + $0x3c] sm:$0xf0] }
  0x1e   :  { %11071 = vmatpush.bf16.msra.mxu2 %v11022_v9  ;;  %2153 = vmatpush.bf16.msra.mxu1 %v11022_v9  ;;  %15232 = vst [vmem:[#allocation20_spill] sm:$0xff] %v11701_v53  ;;  %v11707_v59 = vor.u32 %v10729_v56, %v9263_v58  ;;  %v9245_v60 = vld [vmem:[#allocation2 + $0x8] sm:$0xf]  ;;  %v10725_v61 = vld [vmem:[#allocation2 + $0x10] sm:$0xf0] }
  0x1f   :  { %15233 = vst [vmem:[#allocation21_spill] sm:$0xff] %v11705_v57  ;;  %v11711_v62 = vor.u32 %v10725_v61, %v9245_v60  ;;  %v9273_v63 = vld [vmem:[#allocation2 + $0x48] sm:$0xf]  ;;  %v10733_v0 = vld [vmem:[#allocation2 + $0x50] sm:$0xf0] }
  0x20   :  { %15234 = vst [vmem:[#allocation22_spill] sm:$0xff] %v11707_v59  ;;  %v10732_v1 = vld [vmem:[#allocation2 + $0x4c] sm:$0xf]  ;;  %v11714_v2 = vor.u32 %v10733_v0, %v9273_v63  ;;  %v9275_v3 = vld [vmem:[#allocation2 + $0x54] sm:$0xf0] }
  0x21   :  { %11064 = vmatpush.bf16.msra.mxu3 %v11013_v10  ;;  %1785 = vmatpush.bf16.msra.mxu0 %v11013_v10  ;;  %15235 = vst [vmem:[#allocation23_spill] sm:$0xff] %v11711_v62  ;;  %v11716_v4 = vor.u32 %v10732_v1, %v9275_v3  ;;  %v9257_v5 = vld [vmem:[#allocation2 + $0x20] sm:$0xf]  ;;  %v10728_v6 = vld [vmem:[#allocation2 + $0x28] sm:$0xf0] }
  0x22   :  { %11072 = vmatpush.bf16.msra.mxu2 %v11021_v11  ;;  %2154 = vmatpush.bf16.msra.mxu1 %v11021_v11  ;;  %15236 = vst [vmem:[#allocation24_spill] sm:$0xff] %v11714_v2  ;;  %v11720_v7 = vor.u32 %v10728_v6, %v9257_v5  ;;  %v9285_v8 = vld [vmem:[#allocation2 + $0x60] sm:$0xf]  ;;  %v10736_v9 = vld [vmem:[#allocation2 + $0x68] sm:$0xf0] }
  0x23   :  { %15237 = vst [vmem:[#allocation25_spill] sm:$0xff] %v11716_v4  ;;  %v10735_v10 = vld [vmem:[#allocation2 + $0x64] sm:$0xf]  ;;  %v11723_v11 = vor.u32 %v10736_v9, %v9285_v8  ;;  %v9297_v17 = vld [vmem:[#allocation2 + $0x78] sm:$0xf] }
  0x24   :  { %15238 = vst [vmem:[#allocation26_spill] sm:$0xff] %v11720_v7  ;;  %v10739_v18 = vld [vmem:[#allocation2 + $0x80] sm:$0xf0]  ;;  %v10738_v19 = vld [vmem:[#allocation2 + $0x7c] sm:$0xf] }
  0x25   :  { %11065 = vmatpush.bf16.msra.mxu3 %v11012_v12  ;;  %1786 = vmatpush.bf16.msra.mxu0 %v11012_v12  ;;  %15239 = vst [vmem:[#allocation27_spill] sm:$0xff] %v11723_v11  ;;  %v9287_v12 = vld [vmem:[#allocation2 + $0x6c] sm:$0xf0]  ;;  %v10734_v26 = vld [vmem:[#allocation2 + $0x58] sm:$0xf0] }
  0x26   :  { %11073 = vmatpush.bf16.msra.mxu2 %v11020_v13  ;;  %2155 = vmatpush.bf16.msra.mxu1 %v11020_v13  ;;  %v11725_v13 = vor.u32 %v10735_v10, %v9287_v12  ;;  %v9281_v25 = vld [vmem:[#allocation2 + $0x50] sm:$0xf]  ;;  %v10742_v33 = vld [vmem:[#allocation2 + $0x98] sm:$0xf0]  ;;  %v10741_v34 = vld [vmem:[#allocation2 + $0x94] sm:$0xf] }
  0x27   :  { %v11738_v27 = vor.u32 %v10734_v26, %v9281_v25  ;;  %v9309_v32 = vld [vmem:[#allocation2 + $0x90] sm:$0xf]  ;;  %v9305_v41 = vld [vmem:[#allocation2 + $0x80] sm:$0xf]  ;;  %v10740_v42 = vld [vmem:[#allocation2 + $0x88] sm:$0xf0] }
  0x28   :  { %15240 = vst [vmem:[#allocation28_spill] sm:$0xff] %v11725_v13  ;;  %v11741_v35 = vor.u32 %v10742_v33, %v9309_v32  ;;  %v9321_v44 = vld [vmem:[#allocation2 + $0xa8] sm:$0xf]  ;;  %v9323_v49 = vld [vmem:[#allocation2 + $0xb4] sm:$0xf0]  ;;  %v11754_v51 = vor.u32 %v10740_v42, %v9305_v41 }
  0x29   :  { %11066 = vmatpush.bf16.msra.mxu3 %v11011_v14  ;;  %1787 = vmatpush.bf16.msra.mxu0 %v11011_v14  ;;  %v9269_v14 = vld [vmem:[#allocation2 + $0x38] sm:$0xf]  ;;  %15244 = vst [vmem:[#allocation32_spill] sm:$0xff] %v11738_v27  ;;  %v10743_v63 = vld [vmem:[#allocation2 + $0xa0] sm:$0xf0] }
  0x2a   :  { %11074 = vmatpush.bf16.msra.mxu2 %v11019_v15  ;;  %2156 = vmatpush.bf16.msra.mxu1 %v11019_v15  ;;  %v10731_v15 = vld [vmem:[#allocation2 + $0x40] sm:$0xf0]  ;;  %15245 = vst [vmem:[#allocation33_spill] sm:$0xff] %v11741_v35  ;;  %v9317_v61 = vld [vmem:[#allocation2 + $0x98] sm:$0xf] }
  0x2b   :  { %v11729_v16 = vor.u32 %v10731_v15, %v9269_v14  ;;  %15250 = vst [vmem:[#allocation38_spill] sm:$0xff] %v11754_v51  ;;  %v9333_v0 = vld [vmem:[#allocation2 + $0xc0] sm:$0xf]  ;;  %v10748_v1 = vld [vmem:[#allocation2 + $0xc8] sm:$0xf0]  ;;  %v11773_v12 = vor.u32 %v10743_v63, %v9317_v61 }
  0x2c   :  { %2133 = vmatmul.bf16.vlgmr.msra.gmra.mxu3 %v11654_v21  ;;  %1788 = vmatmul.bf16.vlgmr.msra.gmra.mxu0 %v11666_v29  ;;  %v10747_v3 = vld [vmem:[#allocation2 + $0xc4] sm:$0xf]  ;;  %v11765_v5 = vor.u32 %v10748_v1, %v9333_v0  ;;  %v9335_v6 = vld [vmem:[#allocation2 + $0xcc] sm:$0xf0]  ;;  %v10746_v25 = vld [vmem:[#allocation2 + $0xb8] sm:$0xf0] }
  0x2d   :  { %2502 = vmatmul.bf16.vlgmr.msra.gmra.mxu2 %v11656_v22  ;;  %2157 = vmatmul.bf16.vlgmr.msra.gmra.mxu1 %v11668_v30  ;;  %15241 = vst [vmem:[#allocation29_spill] sm:$0xff] %v11729_v16  ;;  %v11771_v10 = vor.u32 %v10747_v3, %v9335_v6  ;;  %v10751_v32 = vld [vmem:[#allocation2 + $0xe0] sm:$0xf0]  ;;  %v10750_v33 = vld [vmem:[#allocation2 + $0xdc] sm:$0xf] }
  0x2e   :  { %2518 = vmatpush.bf16.msrb.mxu2 %v11034_v20  ;;  %v11732_v20 = vor.u32 %v10739_v18, %v9297_v17  ;;  %15251 = vst [vmem:[#allocation39_spill] sm:$0xff] %v11765_v5  ;;  %v9341_v63 = vld [vmem:[#allocation2 + $0xc8] sm:$0xf]  ;;  %v10749_v0 = vld [vmem:[#allocation2 + $0xd0] sm:$0xf0] }
  0x2f   :  { %15252 = vst [vmem:[#allocation40_spill] sm:$0xff] %v11771_v10  ;;  %v9357_v6 = vld [vmem:[#allocation2 + $0xf0] sm:$0xf] }
  0x30   :  { %15242 = vst [vmem:[#allocation30_spill] sm:$0xff] %v11732_v20 }
  0x31   :  { %15253 = vst [vmem:[#allocation41_spill] sm:$0xff] %v11773_v12 }
  0x32   :  { %2519 = vmatpush.bf16.msrb.mxu2 %v11033_v23  ;;  %v9299_v23 = vld [vmem:[#allocation2 + $0x84] sm:$0xf0] }
  0x33   :  { %v11734_v24 = vor.u32 %v10738_v19, %v9299_v23  ;;  %v9329_v23 = vld [vmem:[#allocation2 + $0xb0] sm:$0xf] }
  0x35   :  { %15243 = vst [vmem:[#allocation31_spill] sm:$0xff] %v11734_v24 }
  0x36   :  { %2520 = vmatpush.bf16.msrb.mxu2 %v11032_v28  ;;  %v9293_v28 = vld [vmem:[#allocation2 + $0x68] sm:$0xf] }
  0x3a   :  { %2521 = vmatpush.bf16.msrb.mxu2 %v11031_v31  ;;  %v10737_v31 = vld [vmem:[#allocation2 + $0x70] sm:$0xf0] }
  0x3b   :  { %v11745_v40 = vor.u32 %v10737_v31, %v9293_v28  ;;  %v9345_v31 = vld [vmem:[#allocation2 + $0xd8] sm:$0xf] }
  0x3c   :  { %2138 = vmatmul.bf16.gmra.mxu3 %v11678_v37  ;;  %1793 = vmatmul.bf16.gmra.mxu0 %v11687_v43 }
  0x3d   :  { %2507 = vmatmul.bf16.gmra.mxu2 %v11680_v38  ;;  %2162 = vmatmul.bf16.gmra.mxu1 %v11692_v46  ;;  %15247 = vst [vmem:[#allocation35_spill] sm:$0xff] %v11745_v40  ;;  %v9371_v38 = vld [vmem:[#allocation2 + $0x114] sm:$0xf0] }
  0x3e   :  { %2522 = vmatpush.bf16.msrb.mxu2 %v11030_v36  ;;  %v9311_v36 = vld [vmem:[#allocation2 + $0x9c] sm:$0xf0] }
  0x42   :  { %2523 = vmatpush.bf16.msrb.mxu2 %v11029_v39  ;;  %v11743_v39 = vor.u32 %v10741_v34, %v9311_v36  ;;  %v11788_v34 = vor.u32 %v10751_v32, %v9345_v31  ;;  %v9347_v36 = vld [vmem:[#allocation2 + $0xe4] sm:$0xf0] }
  0x44   :  { %15246 = vst [vmem:[#allocation34_spill] sm:$0xff] %v11743_v39 }
  0x45   :  { %15255 = vst [vmem:[#allocation43_spill] sm:$0xff] %v11788_v34 }
  0x46   :  { %2524 = vmatpush.bf16.msrb.mxu2 %v11028_v45  ;;  %v10745_v45 = vld [vmem:[#allocation2 + $0xb0] sm:$0xf0] }
  0x47   :  { %v11750_v48 = vor.u32 %v10745_v45, %v9321_v44  ;;  %v11794_v44 = vor.u32 %v10750_v33, %v9347_v36  ;;  %v11796_v45 = vor.u32 %v10746_v25, %v9329_v23  ;;  %v9359_v25 = vld [vmem:[#allocation2 + $0xfc] sm:$0xf0]  ;;  %v11809_v33 = vor.u32 %v10749_v0, %v9341_v63  ;;  %v10757_v63 = vld [vmem:[#allocation2 + $0x110] sm:$0xf0]  ;;  %v10756_v0 = vld [vmem:[#allocation2 + $0x10c] sm:$0xf] }
  0x48   :  { %v11824_v22 = vor.u32 %v10756_v0, %v9371_v38  ;;  %v9381_v38 = vld [vmem:[#allocation2 + $0x120] sm:$0xf] }
  0x49   :  { %15248 = vst [vmem:[#allocation36_spill] sm:$0xff] %v11750_v48 }
  0x4a   :  { %2525 = vmatpush.bf16.msrb.mxu2 %v11027_v47  ;;  %v10744_v47 = vld [vmem:[#allocation2 + $0xac] sm:$0xf]  ;;  %15256 = vst [vmem:[#allocation44_spill] sm:$0xff] %v11794_v44 }
  0x4b   :  { %v11752_v50 = vor.u32 %v10744_v47, %v9323_v49  ;;  %15257 = vst [vmem:[#allocation45_spill] sm:$0xff] %v11796_v45 }
  0x4c   :  { %2143 = vmatmul.bf16.gmra.mxu3 %v11699_v52  ;;  %1798 = vmatmul.bf16.gmra.mxu0 %v11705_v57  ;;  %15261 = vst [vmem:[#allocation49_spill] sm:$0xff] %v11809_v33 }
  0x4d   :  { %2512 = vmatmul.bf16.gmra.mxu2 %v11701_v53  ;;  %2167 = vmatmul.bf16.gmra.mxu1 %v11707_v59  ;;  %15249 = vst [vmem:[#allocation37_spill] sm:$0xff] %v11752_v50  ;;  %v9917_v59 = vld [vmem:[#allocation2 + $0x548] sm:$0xf] }
  0x4e   :  { %15263 = vst [vmem:[#allocation51_spill] sm:$0xff] %v11824_v22 }
  0x5c   :  { %1803 = vmatmul.bf16.gmra.mxu0 %v11714_v2  ;;  %v9743_v2 = vld [vmem:[#allocation2 + $0x3fc] sm:$0xf0] }
  0x5d   :  { %2526 = vmatmul.bf16.vlgmr.msrb.gmra.mxu2 %v11711_v62  ;;  %2172 = vmatmul.bf16.gmra.mxu1 %v11716_v4  ;;  %v9851_v62 = vld [vmem:[#allocation2 + $0x4d4] sm:$0xf0] }
  0x6c   :  { %1808 = vmatmul.bf16.gmra.mxu0 %v11723_v11 }
  0x6d   :  { %2531 = vmatmul.bf16.gmra.mxu2 %v11720_v7  ;;  %2177 = vmatmul.bf16.gmra.mxu1 %v11725_v13  ;;  %v10893_v7 = vld [vmem:[#allocation2 + $0x550] sm:$0xf0] }
  0x7c   :  { %1813 = vmatmul.bf16.gmra.mxu0 %v11732_v20 }
  0x7d   :  { %2536 = vmatmul.bf16.gmra.mxu2 %v11729_v16  ;;  %2182 = vmatmul.bf16.gmra.mxu1 %v11734_v24 }
  0x8c   :  { %1818 = vmatmul.bf16.gmra.mxu0 %v11741_v35 }
  0x8d   :  { %2541 = vmatmul.bf16.gmra.mxu2 %v11738_v27  ;;  %2187 = vmatmul.bf16.gmra.mxu1 %v11743_v39 }
  0x9c   :  { %1823 = vmatmul.bf16.gmra.mxu0 %v11750_v48 }
  0x9d   :  { %2546 = vmatmul.bf16.gmra.mxu2 %v11745_v40  ;;  %2192 = vmatmul.bf16.gmra.mxu1 %v11752_v50 }
  0xa9   :  { %v11761_v58 = vpop.f32.mrf.mxu0 }
  0xaa   :  { %v11763_v60 = vpop.f32.mrf.mxu1 }
  0xac   :  { %1828 = vmatmul.bf16.gmra.mxu0 %v11765_v5 }
  0xad   :  { %2551 = vmatmul.bf16.gmra.mxu2 %v11754_v51  ;;  %2197 = vmatmul.bf16.gmra.mxu1 %v11771_v10  ;;  %v10849_v51 = vld [vmem:[#allocation2 + $0x3f4] sm:$0xf] }
  0xaf   :  { %v2134_v54 = vpop.f32.mrf.mxu3 }
  0xb0   :  { %v2503_v55 = vpop.f32.mrf.mxu2 }
  0xb1   :  { %v11759_v56 = vadd.f32 %v2503_v55, %v2134_v54  ;;  %v11778_v14 = vpop.f32.mrf.mxu0 }
  0xb2   :  { %v11780_v15 = vpop.f32.mrf.mxu1 }
  0xb7   :  { %v11767_v8 = vpop.f32.mrf.mxu3 }
  0xb8   :  { %v11769_v9 = vpop.f32.mrf.mxu2 }
  0xb9   :  { %v11784_v26 = vpop.f32.mrf.mxu0 }
  0xba   :  { %v11786_v28 = vpop.f32.mrf.mxu1 }
  0xbc   :  { %1833 = vmatmul.bf16.gmra.mxu0 %v11788_v34 }
  0xbd   :  { %2556 = vmatmul.bf16.gmra.mxu2 %v11773_v12  ;;  %2202 = vmatmul.bf16.gmra.mxu1 %v11794_v44  ;;  %v10837_v12 = vld [vmem:[#allocation2 + $0x394] sm:$0xf] }
  0xbf   :  { %v2139_v17 = vpop.f32.mrf.mxu3 }
  0xc0   :  { %v2508_v18 = vpop.f32.mrf.mxu2 }
  0xc1   :  { %v11782_v19 = vadd.f32 %v2508_v18, %v2139_v17  ;;  %v1796_v47 = vpop.f32.mrf.mxu0  ;;  %v10754_v17 = vld [vmem:[#allocation2 + $0xf8] sm:$0xf0]  ;;  %v10753_v18 = vld [vmem:[#allocation2 + $0xf4] sm:$0xf] }
  0xc2   :  { %v2165_v49 = vpop.f32.mrf.mxu1  ;;  %v11803_v23 = vor.u32 %v10754_v17, %v9357_v6  ;;  %v11807_v32 = vor.u32 %v10753_v18, %v9359_v25  ;;  %v9353_v6 = vld [vmem:[#allocation2 + $0xe0] sm:$0xf]  ;;  %v10752_v17 = vld [vmem:[#allocation2 + $0xe8] sm:$0xf0]  ;;  %v9369_v18 = vld [vmem:[#allocation2 + $0x108] sm:$0xf] }
  0xc3   :  { %15254 = vst [vmem:[#allocation42_spill] sm:$0xff] %v11782_v19  ;;  %v11822_v25 = vor.u32 %v10757_v63, %v9369_v18  ;;  %v11826_v21 = vor.u32 %v10752_v17, %v9353_v6  ;;  %v10755_v18 = vld [vmem:[#allocation2 + $0x100] sm:$0xf0]  ;;  %v10760_v6 = vld [vmem:[#allocation2 + $0x128] sm:$0xf0] }
  0xc4   :  { %15258 = vst [vmem:[#allocation46_spill] sm:$0xff] %v11803_v23  ;;  %v10759_v17 = vld [vmem:[#allocation2 + $0x124] sm:$0xf]  ;;  %v11839_v0 = vor.u32 %v10760_v6, %v9381_v38 }
  0xc5   :  { %15260 = vst [vmem:[#allocation48_spill] sm:$0xff] %v11807_v32 }
  0xc6   :  { %15262 = vst [vmem:[#allocation50_spill] sm:$0xff] %v11822_v25 }
  0xc7   :  { %v11790_v41 = vpop.f32.mrf.mxu3  ;;  %15264 = vst [vmem:[#allocation52_spill] sm:$0xff] %v11826_v21 }
  0xc8   :  { %v11792_v42 = vpop.f32.mrf.mxu2  ;;  %15265 = vst [vmem:[#allocation53_spill] sm:$0xff] %v11839_v0 }
  0xc9   :  { %v1799_v1 = vpop.f32.mrf.mxu0 }
  0xca   :  { %v2168_v3 = vpop.f32.mrf.mxu1 }
  0xcb   :  { %v2169_v6 = vadd.f32 %v2168_v3, %v1799_v1  ;;  %v10763_v1 = vld [vmem:[#allocation2 + $0x140] sm:$0xf0]  ;;  %v10762_v3 = vld [vmem:[#allocation2 + $0x13c] sm:$0xf] }
  0xcc   :  { %1838 = vmatmul.bf16.gmra.mxu0 %v11803_v23 }
  0xcd   :  { %2561 = vmatmul.bf16.gmra.mxu2 %v11796_v45  ;;  %2207 = vmatmul.bf16.gmra.mxu1 %v11807_v32  ;;  %v9365_v32 = vld [vmem:[#allocation2 + $0xf8] sm:$0xf]  ;;  %v2166_v45 = vadd.f32 %v2165_v49, %v1796_v47  ;;  %v9377_v47 = vld [vmem:[#allocation2 + $0x110] sm:$0xf] }
  0xce   :  { %v11847_v35 = vor.u32 %v10755_v18, %v9365_v32 }
  0xcf   :  { %v2144_v54 = vpop.f32.mrf.mxu3 }
  0xd0   :  { %v2513_v55 = vpop.f32.mrf.mxu2  ;;  %15267 = vst [vmem:[#allocation55_spill] sm:$0xff] %v11847_v35 }
  0xd1   :  { %v11801_v61 = vadd.f32 %v2513_v55, %v2144_v54  ;;  %v11814_v36 = vpop.f32.mrf.mxu0 }
  0xd2   :  { %v11816_v54 = vpop.f32.mrf.mxu1 }
  0xd8   :  { %v11805_v31 = vpop.f32.mrf.mxu2 }
  0xd9   :  { %15259 = vst [vmem:[#allocation47_spill] sm:$0xff] %v11805_v31  ;;  %v11818_v53 = vpop.f32.mrf.mxu0 }
  0xda   :  { %v11820_v52 = vpop.f32.mrf.mxu1 }
  0xdc   :  { %1843 = vmatmul.bf16.gmra.mxu0 %v11822_v25  ;;  %v9383_v25 = vld [vmem:[#allocation2 + $0x12c] sm:$0xf0] }
  0xdd   :  { %2566 = vmatmul.bf16.gmra.mxu2 %v11809_v33  ;;  %2212 = vmatmul.bf16.gmra.mxu1 %v11824_v22  ;;  %v11841_v44 = vor.u32 %v10759_v17, %v9383_v25  ;;  %v2161_v33 = vadd.f32 %v11780_v15, %v11778_v14 }
  0xdf   :  { %15266 = vst [vmem:[#allocation54_spill] sm:$0xff] %v11841_v44 }
  0xe0   :  { %v2527_v55 = vpop.f32.mrf.mxu2 }
  0xe1   :  { %v11831_v23 = vpop.f32.mrf.mxu0 }
  0xe2   :  { %v11833_v34 = vpop.f32.mrf.mxu1 }
  0xe8   :  { %v2529_v37 = vpop.f32.mrf.mxu2 }
  0xe9   :  { %v11835_v63 = vpop.f32.mrf.mxu0  ;;  %v2530_v10 = vadd.f32 %v2529_v37, %v2161_v33 }
  0xea   :  { %v11837_v48 = vpop.f32.mrf.mxu1 }
  0xec   :  { %1848 = vmatmul.bf16.gmra.mxu0 %v11839_v0 }
  0xed   :  { %2571 = vmatmul.bf16.gmra.mxu2 %v11826_v21  ;;  %v2159_v21 = vadd.f32 %v11763_v60, %v11761_v58  ;;  %2217 = vmatmul.bf16.gmra.mxu1 %v11841_v44  ;;  %v2888_v58 = vpack.c.bf16 %v2530_v10, %v2530_v10  ;;  %v2164_v10 = vadd.f32 %v11786_v28, %v11784_v26 }
  0xef   :  { %v2528_v38 = vadd.f32 %v2527_v55, %v2159_v21  ;;  %v3035_v18 = vunpack.c.l.b16 %v2888_v58  ;;  %v10758_v21 = vld [vmem:[#allocation2 + $0x118] sm:$0xf0] }
  0xf0   :  { %v2532_v5 = vpop.f32.mrf.mxu2 }
  0xf1   :  { %v11852_v25 = vpop.f32.mrf.mxu0  ;;  %v2887_v14 = vpack.c.bf16 %v2528_v38, %v2528_v38  ;;  %v9395_v38 = vld [vmem:[#allocation2 + $0x144] sm:$0xf0] }
  0xf2   :  { %v11854_v17 = vpop.f32.mrf.mxu1  ;;  %v11864_v58 = vor.u32 %v10762_v3, %v9395_v38 }
  0xf3   :  { %v3034_v50 = vunpack.c.l.b16 %v2887_v14  ;;  %v2533_v14 = vadd.f32 %v2532_v5, %v2164_v10 }
  0xf4   :  { %15269 = vst [vmem:[#allocation57_spill] sm:$0xff] %v11864_v58 }
  0xf5   :  { %v3037_v33 = vpack.c.b16 %v3035_v18, %v3034_v50 }
  0xf8   :  { %v2534_v22 = vpop.f32.mrf.mxu2 }
  0xf9   :  { %v2535_v20 = vadd.f32 %v2534_v22, %v2166_v45  ;;  %v11856_v49 = vpop.f32.mrf.mxu0  ;;  %v9393_v45 = vld [vmem:[#allocation2 + $0x138] sm:$0xf] }
  0xfa   :  { %v11858_v22 = vpop.f32.mrf.mxu1  ;;  %v11862_v55 = vor.u32 %v10763_v1, %v9393_v45  ;;  %v10766_v45 = vld [vmem:[#allocation2 + $0x158] sm:$0xf0]  ;;  %v10765_v1 = vld [vmem:[#allocation2 + $0x154] sm:$0xf] }
  0xfb   :  { %v2890_v15 = vpack.c.bf16 %v2535_v20, %v2535_v20 }
  0xfc   :  { %15268 = vst [vmem:[#allocation56_spill] sm:$0xff] %v11862_v55  ;;  %1853 = vmatmul.bf16.gmra.mxu0 %v11862_v55  ;;  %v2176_v55 = vadd.f32 %v11833_v34, %v11831_v23 }
  0xfd   :  { %2576 = vmatmul.bf16.gmra.mxu2 %v11847_v35  ;;  %v3091_v44 = vunpack.c.l.b16 %v2890_v15  ;;  %2222 = vmatmul.bf16.gmra.mxu1 %v11864_v58 }
 0x100   :  { %v2537_v60 = vpop.f32.mrf.mxu2 }
 0x101   :  { %v2538_v32 = vadd.f32 %v2537_v60, %v2169_v6  ;;  %v11868_v60 = vor.u32 %v10758_v21, %v9377_v47  ;;  %v11873_v50 = vpop.f32.mrf.mxu0  ;;  %v9405_v21 = vld [vmem:[#allocation2 + $0x150] sm:$0xf] }
 0x102   :  { %v11875_v28 = vpop.f32.mrf.mxu1 }
 0x103   :  { %v2891_v0 = vpack.c.bf16 %v2538_v32, %v2538_v32  ;;  %15270 = vst [vmem:[#allocation58_spill] sm:$0xff] %v11868_v60 }
 0x105   :  { %v3092_v37 = vunpack.c.l.b16 %v2891_v0  ;;  %v2171_v0 = vadd.f32 %v11816_v54, %v11814_v36  ;;  %v9389_v54 = vld [vmem:[#allocation2 + $0x128] sm:$0xf] }
 0x107   :  { %v3094_v20 = vpack.c.b16 %v3092_v37, %v3091_v44  ;;  %v2889_v44 = vpack.c.bf16 %v2533_v14, %v2533_v14  ;;  %v10761_v37 = vld [vmem:[#allocation2 + $0x130] sm:$0xf0] }
 0x108   :  { %v2539_v6 = vpop.f32.mrf.mxu2 }
 0x109   :  { %11083 = vxpose.binary.xlu0.c.b16.start [1/4] (short) (narrow) %v3094_v20, %v3037_v33, 16  ;;  %v2540_v26 = vadd.f32 %v2539_v6, %v2171_v0  ;;  %v3036_v18 = vunpack.c.l.b16 %v2889_v44  ;;  %v11877_v47 = vpop.f32.mrf.mxu0  ;;  %v11881_v33 = vor.u32 %v10766_v45, %v9405_v21  ;;  %v9407_v20 = vld [vmem:[#allocation2 + $0x15c] sm:$0xf0]  ;;  %v11885_v0 = vor.u32 %v10761_v37, %v9389_v54  ;;  %v9417_v21 = vld [vmem:[#allocation2 + $0x168] sm:$0xf] }
 0x10a   :  { %v11879_v10 = vpop.f32.mrf.mxu1  ;;  %v11883_v6 = vor.u32 %v10765_v1, %v9407_v20  ;;  %v10769_v45 = vld [vmem:[#allocation2 + $0x170] sm:$0xf0]  ;;  %v10768_v1 = vld [vmem:[#allocation2 + $0x16c] sm:$0xf] }
 0x10b   :  { %v2892_v15 = vpack.c.bf16 %v2540_v26, %v2540_v26  ;;  %v3038_v5 = vpack.c.b16 %v3036_v18, %v3036_v18  ;;  %15271 = vst [vmem:[#allocation59_spill] sm:$0xff] %v11881_v33  ;;  %v10764_v18 = vld [vmem:[#allocation2 + $0x148] sm:$0xf0]  ;;  %v11898_v37 = vor.u32 %v10769_v45, %v9417_v21  ;;  %v2181_v21 = vadd.f32 %v11854_v17, %v11852_v25 }
 0x10c   :  { %15272 = vst [vmem:[#allocation60_spill] sm:$0xff] %v11883_v6  ;;  %1858 = vmatmul.bf16.gmra.mxu0 %v11881_v33  ;;  %v2174_v33 = vadd.f32 %v11820_v52, %v11818_v53 }
 0x10d   :  { %2581 = vmatmul.bf16.gmra.mxu2 %v11868_v60  ;;  %v3093_v36 = vunpack.c.l.b16 %v2892_v15  ;;  %15273 = vst [vmem:[#allocation61_spill] sm:$0xff] %v11885_v0  ;;  %2227 = vmatmul.bf16.gmra.mxu1 %v11883_v6  ;;  %v9401_v15 = vld [vmem:[#allocation2 + $0x140] sm:$0xf] }
 0x10e   :  { %15274 = vst [vmem:[#allocation62_spill] sm:$0xff] %v11898_v37  ;;  %v11906_v6 = vor.u32 %v10764_v18, %v9401_v15 }
 0x10f   :  { %v3095_v3 = vpack.c.b16 %v3093_v36, %v3093_v36 }
 0x110   :  { %v2542_v32 = vpop.f32.mrf.mxu2  ;;  %15276 = vst [vmem:[#allocation64_spill] sm:$0xff] %v11906_v6 }
 0x111   :  { %v11890_v14 = vpop.f32.mrf.mxu0  ;;  %v2543_v45 = vadd.f32 %v2542_v32, %v2174_v33  ;;  %v9413_v32 = vld [vmem:[#allocation2 + $0x158] sm:$0xf]  ;;  %v10767_v33 = vld [vmem:[#allocation2 + $0x160] sm:$0xf0] }
 0x112   :  { %v11892_v26 = vpop.f32.mrf.mxu1 }
 0x113   :  { %v2893_v15 = vpack.c.bf16 %v2543_v45, %v2543_v45 }
 0x118   :  { %v2544_v38 = vpop.f32.mrf.mxu2 }
 0x119   :  { %11084 = vxpose.binary.xlu0.c.b16.end [2/4] (short) (narrow) %v3095_v3, %v3038_v5, 16  ;;  %v11894_v36 = vpop.f32.mrf.mxu0  ;;  %v9419_v5 = vld [vmem:[#allocation2 + $0x174] sm:$0xf0]  ;;  %v2545_v58 = vadd.f32 %v2544_v38, %v2176_v55 }
 0x11a   :  { %v11896_v54 = vpop.f32.mrf.mxu1  ;;  %v11900_v20 = vor.u32 %v10768_v1, %v9419_v5  ;;  %v2184_v1 = vadd.f32 %v11858_v22, %v11856_v49  ;;  %v9429_v22 = vld [vmem:[#allocation2 + $0x180] sm:$0xf] }
 0x11b   :  { %v2894_v53 = vpack.c.bf16 %v2545_v58, %v2545_v58  ;;  %v2179_v58 = vadd.f32 %v11837_v48, %v11835_v63 }
 0x11c   :  { %15275 = vst [vmem:[#allocation63_spill] sm:$0xff] %v11900_v20  ;;  %1863 = vmatmul.bf16.gmra.mxu0 %v11898_v37 }
 0x11d   :  { %2586 = vmatmul.bf16.gmra.mxu2 %v11885_v0  ;;  %2232 = vmatmul.bf16.gmra.mxu1 %v11900_v20  ;;  %v3147_v55 = vunpack.c.l.b16 %v2894_v53  ;;  %v3146_v20 = vunpack.c.l.b16 %v2893_v15  ;;  %v11929_v15 = vor.u32 %v10767_v33, %v9413_v32  ;;  %v9441_v32 = vld [vmem:[#allocation2 + $0x198] sm:$0xf]  ;;  %v10775_v33 = vld [vmem:[#allocation2 + $0x1a0] sm:$0xf0] }
 0x11f   :  { %15279 = vst [vmem:[#allocation67_spill] sm:$0xff] %v11929_v15 }
 0x120   :  { %v2547_v44 = vpop.f32.mrf.mxu2 }
 0x121   :  { %v11915_v52 = vpop.f32.mrf.mxu0  ;;  %v2548_v48 = vadd.f32 %v2547_v44, %v2179_v58  ;;  %v11942_v58 = vor.u32 %v10775_v33, %v9441_v32  ;;  %v9453_v33 = vld [vmem:[#allocation2 + $0x1b0] sm:$0xf] }
 0x122   :  { %v11917_v34 = vpop.f32.mrf.mxu1 }
 0x123   :  { %15280 = vst [vmem:[#allocation68_spill] sm:$0xff] %v11942_v58 }
 0x128   :  { %v2549_v3 = vpop.f32.mrf.mxu2 }
 0x129   :  { %v2550_v5 = vadd.f32 %v2549_v3, %v2181_v21  ;;  %v11919_v49 = vpop.f32.mrf.mxu0  ;;  %v10772_v3 = vld [vmem:[#allocation2 + $0x188] sm:$0xf0]  ;;  %v10771_v21 = vld [vmem:[#allocation2 + $0x184] sm:$0xf] }
 0x12a   :  { %v2198_v45 = vpop.f32.mrf.mxu1 }
 0x12b   :  { %v2896_v18 = vpack.c.bf16 %v2550_v5, %v2550_v5  ;;  %v11923_v5 = vor.u32 %v10772_v3, %v9429_v22  ;;  %v10774_v22 = vld [vmem:[#allocation2 + $0x19c] sm:$0xf] }
 0x12d   :  { %2591 = vmatmul.bf16.gmra.mxu2 %v11906_v6  ;;  %v3201_v25 = vunpack.c.l.b16 %v2896_v18  ;;  %v3149_v6 = vpack.c.b16 %v3147_v55, %v3146_v20  ;;  %15277 = vst [vmem:[#allocation65_spill] sm:$0xff] %v11923_v5  ;;  %1868 = vmatmul.bf16.gmra.mxu0 %v11923_v5  ;;  %v2895_v18 = vpack.c.bf16 %v2548_v48, %v2548_v48 }
 0x12e   :  { %v2189_v5 = vadd.f32 %v11879_v10, %v11877_v47 }
 0x130   :  { %v2552_v23 = vpop.f32.mrf.mxu2 }
 0x131   :  { %v2553_v37 = vadd.f32 %v2552_v23, %v2184_v1  ;;  %v9431_v1 = vld [vmem:[#allocation2 + $0x18c] sm:$0xf0]  ;;  %v2186_v23 = vadd.f32 %v11875_v28, %v11873_v50  ;;  %v11934_v20 = vpop.f32.mrf.mxu0 }
 0x132   :  { %v11925_v53 = vor.u32 %v10771_v21, %v9431_v1  ;;  %v9425_v28 = vld [vmem:[#allocation2 + $0x170] sm:$0xf]  ;;  %v9443_v1 = vld [vmem:[#allocation2 + $0x1a4] sm:$0xf0] }
 0x133   :  { %v2897_v38 = vpack.c.bf16 %v2553_v37, %v2553_v37 }
 0x134   :  { %15278 = vst [vmem:[#allocation66_spill] sm:$0xff] %v11925_v53  ;;  %2237 = vmatmul.bf16.gmra.mxu1 %v11925_v53 }
 0x135   :  { %v3202_v17 = vunpack.c.l.b16 %v2897_v38  ;;  %v11936_v38 = vpop.f32.mrf.mxu1 }
 0x137   :  { %v3204_v0 = vpack.c.b16 %v3202_v17, %v3201_v25  ;;  %v3148_v17 = vunpack.c.l.b16 %v2895_v18 }
 0x138   :  { %v2554_v37 = vpop.f32.mrf.mxu2 }
 0x139   :  { %11087 = vxpose.binary.xlu1.c.b16.start [1/4] (short) (narrow) %v3204_v0, %v3149_v6, 16  ;;  %v2555_v63 = vadd.f32 %v2554_v37, %v2186_v23  ;;  %v10770_v6 = vld [vmem:[#allocation2 + $0x178] sm:$0xf0]  ;;  %v11938_v0 = vpop.f32.mrf.mxu0  ;;  %v3150_v44 = vpack.c.b16 %v3148_v17, %v3148_v17  ;;  %v11944_v23 = vor.u32 %v10774_v22, %v9443_v1  ;;  %v9437_v17 = vld [vmem:[#allocation2 + $0x188] sm:$0xf] }
 0x13a   :  { %v11946_v48 = vor.u32 %v10770_v6, %v9425_v28  ;;  %v10778_v22 = vld [vmem:[#allocation2 + $0x1b8] sm:$0xf0] }
 0x13b   :  { %v2898_v55 = vpack.c.bf16 %v2555_v63, %v2555_v63  ;;  %15281 = vst [vmem:[#allocation69_spill] sm:$0xff] %v11944_v23  ;;  %v11959_v6 = vor.u32 %v10778_v22, %v9453_v33  ;;  %v2196_v33 = vadd.f32 %v11917_v34, %v11915_v52  ;;  %v9449_v34 = vld [vmem:[#allocation2 + $0x1a0] sm:$0xf] }
 0x13c   :  { %15282 = vst [vmem:[#allocation70_spill] sm:$0xff] %v11946_v48 }
 0x13d   :  { %2596 = vmatmul.bf16.gmra.mxu2 %v11929_v15  ;;  %v3203_v50 = vunpack.c.l.b16 %v2898_v55  ;;  %v11940_v21 = vpop.f32.mrf.mxu1  ;;  %1873 = vmatmul.bf16.gmra.mxu0 %v11942_v58  ;;  %15283 = vst [vmem:[#allocation71_spill] sm:$0xff] %v11959_v6 }
 0x13f   :  { %v3205_v3 = vpack.c.b16 %v3203_v50, %v3203_v50  ;;  %v10773_v50 = vld [vmem:[#allocation2 + $0x190] sm:$0xf0] }
 0x140   :  { %v2557_v25 = vpop.f32.mrf.mxu2  ;;  %v11967_v53 = vor.u32 %v10773_v50, %v9437_v17 }
 0x141   :  { %v11951_v63 = vpop.f32.mrf.mxu0  ;;  %v2558_v22 = vadd.f32 %v2557_v25, %v2189_v5  ;;  %v10776_v5 = vld [vmem:[#allocation2 + $0x1a8] sm:$0xf0]  ;;  %v10781_v25 = vld [vmem:[#allocation2 + $0x1d0] sm:$0xf0] }
 0x142   :  { %15285 = vst [vmem:[#allocation73_spill] sm:$0xff] %v11967_v53 }
 0x143   :  { %v2899_v17 = vpack.c.bf16 %v2558_v22, %v2558_v22 }
 0x144   :  { %2242 = vmatmul.bf16.gmra.mxu1 %v11944_v23  ;;  %v2191_v23 = vadd.f32 %v11892_v26, %v11890_v14 }
 0x145   :  { %v11953_v18 = vpop.f32.mrf.mxu1 }
 0x148   :  { %v2559_v37 = vpop.f32.mrf.mxu2 }
 0x149   :  { %11088 = vxpose.binary.xlu1.c.b16.end [2/4] (short) (narrow) %v3205_v3, %v3150_v44, 16  ;;  %v11955_v32 = vpop.f32.mrf.mxu0  ;;  %v10777_v44 = vld [vmem:[#allocation2 + $0x1b4] sm:$0xf]  ;;  %v9455_v3 = vld [vmem:[#allocation2 + $0x1bc] sm:$0xf0] }
 0x14a   :  { %v11961_v58 = vor.u32 %v10777_v44, %v9455_v3  ;;  %v2199_v44 = vadd.f32 %v2198_v45, %v11919_v49  ;;  %v9465_v45 = vld [vmem:[#allocation2 + $0x1c8] sm:$0xf] }
 0x14c   :  { %15284 = vst [vmem:[#allocation72_spill] sm:$0xff] %v11961_v58 }
 0x14d   :  { %2601 = vmatmul.bf16.gmra.mxu2 %v11946_v48  ;;  %v11957_v28 = vpop.f32.mrf.mxu1  ;;  %1878 = vmatmul.bf16.gmra.mxu0 %v11959_v6  ;;  %v2560_v48 = vadd.f32 %v2559_v37, %v2191_v23  ;;  %v3256_v23 = vunpack.c.l.b16 %v2899_v17  ;;  %v11989_v17 = vor.u32 %v10776_v5, %v9449_v34  ;;  %v9477_v5 = vld [vmem:[#allocation2 + $0x1e0] sm:$0xf] }
 0x14f   :  { %v2900_v10 = vpack.c.bf16 %v2560_v48, %v2560_v48  ;;  %v2194_v48 = vadd.f32 %v11896_v54, %v11894_v36  ;;  %15288 = vst [vmem:[#allocation76_spill] sm:$0xff] %v11989_v17 }
 0x150   :  { %v2562_v55 = vpop.f32.mrf.mxu2 }
 0x151   :  { %v11975_v47 = vpop.f32.mrf.mxu0  ;;  %v2563_v36 = vadd.f32 %v2562_v55, %v2194_v48 }
 0x154   :  { %2247 = vmatmul.bf16.gmra.mxu1 %v11961_v58  ;;  %v3257_v58 = vunpack.c.l.b16 %v2900_v10 }
 0x155   :  { %v11977_v14 = vpop.f32.mrf.mxu1 }
 0x158   :  { %v2564_v1 = vpop.f32.mrf.mxu2 }
 0x159   :  { %v2565_v3 = vadd.f32 %v2564_v1, %v2196_v33  ;;  %v11979_v49 = vpop.f32.mrf.mxu0  ;;  %v10780_v1 = vld [vmem:[#allocation2 + $0x1cc] sm:$0xf]  ;;  %v3259_v33 = vpack.c.b16 %v3257_v58, %v3256_v23  ;;  %v2901_v58 = vpack.c.bf16 %v2563_v36, %v2563_v36 }
 0x15b   :  { %v2902_v50 = vpack.c.bf16 %v2565_v3, %v2565_v3  ;;  %v11983_v3 = vor.u32 %v10781_v25, %v9465_v45  ;;  %v10784_v45 = vld [vmem:[#allocation2 + $0x1e8] sm:$0xf0]  ;;  %v10783_v25 = vld [vmem:[#allocation2 + $0x1e4] sm:$0xf] }
 0x15d   :  { %2606 = vmatmul.bf16.gmra.mxu2 %v11967_v53  ;;  %v3311_v15 = vunpack.c.l.b16 %v2902_v50  ;;  %v2213_v22 = vpop.f32.mrf.mxu1  ;;  %15286 = vst [vmem:[#allocation74_spill] sm:$0xff] %v11983_v3  ;;  %1883 = vmatmul.bf16.gmra.mxu0 %v11983_v3  ;;  %v2204_v3 = vadd.f32 %v11940_v21, %v11938_v0 }
 0x160   :  { %v2567_v26 = vpop.f32.mrf.mxu2 }
 0x161   :  { %v2568_v6 = vadd.f32 %v2567_v26, %v2199_v44  ;;  %v9467_v44 = vld [vmem:[#allocation2 + $0x1d4] sm:$0xf0]  ;;  %v2201_v26 = vadd.f32 %v11936_v38, %v11934_v20  ;;  %v10779_v38 = vld [vmem:[#allocation2 + $0x1c0] sm:$0xf0] }
 0x162   :  { %v11985_v10 = vor.u32 %v10780_v1, %v9467_v44  ;;  %v9479_v44 = vld [vmem:[#allocation2 + $0x1ec] sm:$0xf0] }
 0x163   :  { %v2903_v37 = vpack.c.bf16 %v2568_v6, %v2568_v6 }
 0x164   :  { %15287 = vst [vmem:[#allocation75_spill] sm:$0xff] %v11985_v10  ;;  %2252 = vmatmul.bf16.gmra.mxu1 %v11985_v10 }
 0x165   :  { %v3312_v52 = vunpack.c.l.b16 %v2903_v37  ;;  %v11996_v37 = vpop.f32.mrf.mxu1 }
 0x167   :  { %v3314_v53 = vpack.c.b16 %v3312_v52, %v3311_v15  ;;  %v11994_v15 = vpop.f32.mrf.mxu0  ;;  %v3258_v52 = vunpack.c.l.b16 %v2901_v58 }
 0x168   :  { %v2569_v6 = vpop.f32.mrf.mxu2 }
 0x169   :  { %11091 = vxpose.binary.xlu2.c.b16.start [1/4] (short) (narrow) %v3314_v53, %v3259_v33, 16  ;;  %v2570_v54 = vadd.f32 %v2569_v6, %v2201_v26  ;;  %v9461_v53 = vld [vmem:[#allocation2 + $0x1b8] sm:$0xf]  ;;  %v3260_v55 = vpack.c.b16 %v3258_v52, %v3258_v52  ;;  %v12002_v33 = vor.u32 %v10784_v45, %v9477_v5  ;;  %v9473_v52 = vld [vmem:[#allocation2 + $0x1d0] sm:$0xf] }
 0x16a   :  { %v12004_v26 = vor.u32 %v10783_v25, %v9479_v44  ;;  %v12006_v36 = vor.u32 %v10779_v38, %v9461_v53  ;;  %v9489_v5 = vld [vmem:[#allocation2 + $0x1f8] sm:$0xf]  ;;  %v10787_v45 = vld [vmem:[#allocation2 + $0x200] sm:$0xf0]  ;;  %v10786_v25 = vld [vmem:[#allocation2 + $0x1fc] sm:$0xf] }
 0x16b   :  { %v2904_v50 = vpack.c.bf16 %v2570_v54, %v2570_v54  ;;  %15289 = vst [vmem:[#allocation77_spill] sm:$0xff] %v12002_v33  ;;  %v12019_v38 = vor.u32 %v10787_v45, %v9489_v5  ;;  %v2211_v5 = vadd.f32 %v11977_v14, %v11975_v47  ;;  %v9485_v14 = vld [vmem:[#allocation2 + $0x1e8] sm:$0xf] }
 0x16c   :  { %15290 = vst [vmem:[#allocation78_spill] sm:$0xff] %v12004_v26 }
 0x16d   :  { %2611 = vmatmul.bf16.gmra.mxu2 %v11989_v17  ;;  %v3313_v20 = vunpack.c.l.b16 %v2904_v50  ;;  %v12000_v48 = vpop.f32.mrf.mxu1  ;;  %15291 = vst [vmem:[#allocation79_spill] sm:$0xff] %v12006_v36  ;;  %1888 = vmatmul.bf16.gmra.mxu0 %v12002_v33 }
 0x16e   :  { %15292 = vst [vmem:[#allocation80_spill] sm:$0xff] %v12019_v38 }
 0x16f   :  { %v11998_v34 = vpop.f32.mrf.mxu0  ;;  %v3315_v1 = vpack.c.b16 %v3313_v20, %v3313_v20  ;;  %v10782_v20 = vld [vmem:[#allocation2 + $0x1d8] sm:$0xf0] }
 0x170   :  { %v2572_v23 = vpop.f32.mrf.mxu2  ;;  %v12027_v10 = vor.u32 %v10782_v20, %v9473_v52 }
 0x171   :  { %v2573_v45 = vadd.f32 %v2572_v23, %v2204_v3  ;;  %v10785_v3 = vld [vmem:[#allocation2 + $0x1f0] sm:$0xf0] }
 0x172   :  { %15294 = vst [vmem:[#allocation82_spill] sm:$0xff] %v12027_v10  ;;  %v10789_v23 = vld [vmem:[#allocation2 + $0x214] sm:$0xf] }
 0x173   :  { %v2905_v52 = vpack.c.bf16 %v2573_v45, %v2573_v45 }
 0x174   :  { %2257 = vmatmul.bf16.gmra.mxu1 %v12004_v26  ;;  %v2206_v26 = vadd.f32 %v11953_v18, %v11951_v63 }
 0x175   :  { %v12013_v58 = vpop.f32.mrf.mxu1 }
 0x177   :  { %v12011_v54 = vpop.f32.mrf.mxu0 }
 0x178   :  { %v2574_v6 = vpop.f32.mrf.mxu2 }
 0x179   :  { %11092 = vxpose.binary.xlu2.c.b16.end [2/4] (short) (narrow) %v3315_v1, %v3260_v55, 16  ;;  %v9491_v55 = vld [vmem:[#allocation2 + $0x204] sm:$0xf0] }
 0x17a   :  { %v12021_v33 = vor.u32 %v10786_v25, %v9491_v55  ;;  %v2214_v25 = vadd.f32 %v2213_v22, %v11979_v49  ;;  %v9501_v49 = vld [vmem:[#allocation2 + $0x210] sm:$0xf]  ;;  %v10790_v22 = vld [vmem:[#allocation2 + $0x218] sm:$0xf0] }
 0x17b   :  { %v12041_v45 = vor.u32 %v10790_v22, %v9501_v49  ;;  %v10792_v49 = vld [vmem:[#allocation2 + $0x22c] sm:$0xf] }
 0x17c   :  { %15293 = vst [vmem:[#allocation81_spill] sm:$0xff] %v12021_v33 }
 0x17d   :  { %2616 = vmatmul.bf16.gmra.mxu2 %v12006_v36  ;;  %v12017_v53 = vpop.f32.mrf.mxu1  ;;  %1893 = vmatmul.bf16.gmra.mxu0 %v12019_v38  ;;  %v2575_v36 = vadd.f32 %v2574_v6, %v2206_v26  ;;  %v3366_v26 = vunpack.c.l.b16 %v2905_v52  ;;  %15295 = vst [vmem:[#allocation83_spill] sm:$0xff] %v12041_v45 }
 0x17f   :  { %v12015_v44 = vpop.f32.mrf.mxu0  ;;  %v2906_v0 = vpack.c.bf16 %v2575_v36, %v2575_v36  ;;  %v2209_v36 = vadd.f32 %v11957_v28, %v11955_v32 }
 0x180   :  { %v2577_v50 = vpop.f32.mrf.mxu2 }
 0x181   :  { %v2578_v32 = vadd.f32 %v2577_v50, %v2209_v36 }
 0x184   :  { %2262 = vmatmul.bf16.gmra.mxu1 %v12021_v33  ;;  %v3367_v33 = vunpack.c.l.b16 %v2906_v0  ;;  %v2216_v0 = vadd.f32 %v11996_v37, %v11994_v15  ;;  %v9497_v37 = vld [vmem:[#allocation2 + $0x200] sm:$0xf] }
 0x185   :  { %v12037_v63 = vpop.f32.mrf.mxu1 }
 0x187   :  { %v12035_v21 = vpop.f32.mrf.mxu0 }
 0x188   :  { %v2579_v1 = vpop.f32.mrf.mxu2 }
 0x189   :  { %v2580_v55 = vadd.f32 %v2579_v1, %v2211_v5  ;;  %v3369_v5 = vpack.c.b16 %v3367_v33, %v3366_v26 }
 0x18b   :  { %v2908_v20 = vpack.c.bf16 %v2580_v55, %v2580_v55 }
 0x18d   :  { %2621 = vmatmul.bf16.gmra.mxu2 %v12027_v10  ;;  %v3421_v17 = vunpack.c.l.b16 %v2908_v20  ;;  %v2228_v60 = vpop.f32.mrf.mxu1  ;;  %1898 = vmatmul.bf16.gmra.mxu0 %v12041_v45  ;;  %v2221_v45 = vadd.f32 %v12013_v58, %v12011_v54 }
 0x18f   :  { %v1859_v10 = vpop.f32.mrf.mxu0 }
 0x190   :  { %v2582_v18 = vpop.f32.mrf.mxu2 }
 0x191   :  { %v2583_v38 = vadd.f32 %v2582_v18, %v2214_v25  ;;  %v9503_v25 = vld [vmem:[#allocation2 + $0x21c] sm:$0xf0]  ;;  %v12047_v18 = vor.u32 %v10785_v3, %v9485_v14  ;;  %v9513_v14 = vld [vmem:[#allocation2 + $0x228] sm:$0xf]  ;;  %v10793_v3 = vld [vmem:[#allocation2 + $0x230] sm:$0xf0] }
 0x193   :  { %v2909_v6 = vpack.c.bf16 %v2583_v38, %v2583_v38  ;;  %v12043_v38 = vor.u32 %v10789_v23, %v9503_v25  ;;  %15297 = vst [vmem:[#allocation85_spill] sm:$0xff] %v12047_v18 }
 0x195   :  { %v3422_v47 = vunpack.c.l.b16 %v2909_v6  ;;  %15296 = vst [vmem:[#allocation84_spill] sm:$0xff] %v12043_v38  ;;  %2267 = vmatmul.bf16.gmra.mxu1 %v12043_v38  ;;  %v12054_v20 = vpop.f32.mrf.mxu1 }
 0x197   :  { %v3424_v1 = vpack.c.b16 %v3422_v47, %v3421_v17  ;;  %v2907_v17 = vpack.c.bf16 %v2578_v32, %v2578_v32  ;;  %v12052_v52 = vpop.f32.mrf.mxu0  ;;  %v10788_v47 = vld [vmem:[#allocation2 + $0x208] sm:$0xf0] }
 0x198   :  { %v2584_v55 = vpop.f32.mrf.mxu2 }
 0x199   :  { %11095 = vxpose.binary.xlu0.c.b16.start [1/4] (short) (narrow) %v3424_v1, %v3369_v5, 16  ;;  %v2585_v28 = vadd.f32 %v2584_v55, %v2216_v0  ;;  %v3368_v26 = vunpack.c.l.b16 %v2907_v17  ;;  %v12060_v1 = vor.u32 %v10793_v3, %v9513_v14  ;;  %v9515_v5 = vld [vmem:[#allocation2 + $0x234] sm:$0xf0]  ;;  %v12064_v0 = vor.u32 %v10788_v47, %v9497_v37  ;;  %v10796_v14 = vld [vmem:[#allocation2 + $0x248] sm:$0xf0] }
 0x19a   :  { %v12062_v55 = vor.u32 %v10792_v49, %v9515_v5  ;;  %v10795_v3 = vld [vmem:[#allocation2 + $0x244] sm:$0xf] }
 0x19b   :  { %v2910_v33 = vpack.c.bf16 %v2585_v28, %v2585_v28  ;;  %v3370_v22 = vpack.c.b16 %v3368_v26, %v3368_v26  ;;  %15298 = vst [vmem:[#allocation86_spill] sm:$0xff] %v12060_v1  ;;  %v10791_v26 = vld [vmem:[#allocation2 + $0x220] sm:$0xf0] }
 0x19c   :  { %15299 = vst [vmem:[#allocation87_spill] sm:$0xff] %v12062_v55 }
 0x19d   :  { %2626 = vmatmul.bf16.gmra.mxu2 %v12047_v18  ;;  %v3423_v15 = vunpack.c.l.b16 %v2910_v33  ;;  %v12058_v36 = vpop.f32.mrf.mxu1  ;;  %15300 = vst [vmem:[#allocation88_spill] sm:$0xff] %v12064_v0  ;;  %1903 = vmatmul.bf16.gmra.mxu0 %v12060_v1  ;;  %v9509_v33 = vld [vmem:[#allocation2 + $0x218] sm:$0xf]  ;;  %v2219_v1 = vadd.f32 %v12000_v48, %v11998_v34 }
 0x19f   :  { %v3425_v23 = vpack.c.b16 %v3423_v15, %v3423_v15  ;;  %v12056_v50 = vpop.f32.mrf.mxu0  ;;  %v9525_v15 = vld [vmem:[#allocation2 + $0x240] sm:$0xf] }
 0x1a0   :  { %v2587_v6 = vpop.f32.mrf.mxu2  ;;  %v12077_v47 = vor.u32 %v10796_v14, %v9525_v15  ;;  %v2226_v15 = vadd.f32 %v12037_v63, %v12035_v21  ;;  %v9521_v21 = vld [vmem:[#allocation2 + $0x230] sm:$0xf]  ;;  %v10794_v63 = vld [vmem:[#allocation2 + $0x238] sm:$0xf0] }
 0x1a1   :  { %v2588_v14 = vadd.f32 %v2587_v6, %v2219_v1  ;;  %v10798_v6 = vld [vmem:[#allocation2 + $0x25c] sm:$0xf] }
 0x1a2   :  { %15301 = vst [vmem:[#allocation89_spill] sm:$0xff] %v12077_v47 }
 0x1a3   :  { %v2911_v58 = vpack.c.bf16 %v2588_v14, %v2588_v14 }
 0x1a5   :  { %2272 = vmatmul.bf16.gmra.mxu1 %v12062_v55  ;;  %v12071_v28 = vpop.f32.mrf.mxu1  ;;  %v12085_v55 = vor.u32 %v10791_v26, %v9509_v33 }
 0x1a7   :  { %v12069_v32 = vpop.f32.mrf.mxu0  ;;  %15303 = vst [vmem:[#allocation91_spill] sm:$0xff] %v12085_v55 }
 0x1a8   :  { %v2589_v25 = vpop.f32.mrf.mxu2 }
 0x1a9   :  { %11096 = vxpose.binary.xlu0.c.b16.end [2/4] (short) (narrow) %v3425_v23, %v3370_v22, 16  ;;  %v9527_v22 = vld [vmem:[#allocation2 + $0x24c] sm:$0xf0]  ;;  %v2590_v38 = vadd.f32 %v2589_v25, %v2221_v45  ;;  %v3476_v45 = vunpack.c.l.b16 %v2911_v58 }
 0x1aa   :  { %v12079_v5 = vor.u32 %v10795_v3, %v9527_v22 }
 0x1ab   :  { %v2912_v22 = vpack.c.bf16 %v2590_v38, %v2590_v38  ;;  %v2224_v38 = vadd.f32 %v12017_v53, %v12015_v44 }
 0x1ac   :  { %15302 = vst [vmem:[#allocation90_spill] sm:$0xff] %v12079_v5 }
 0x1ad   :  { %2631 = vmatmul.bf16.gmra.mxu2 %v12064_v0  ;;  %1908 = vmatmul.bf16.gmra.mxu0 %v12077_v47  ;;  %v2229_v0 = vadd.f32 %v2228_v60, %v1859_v10  ;;  %v3477_v47 = vunpack.c.l.b16 %v2912_v22  ;;  %v9537_v60 = vld [vmem:[#allocation2 + $0x258] sm:$0xf]  ;;  %v10799_v10 = vld [vmem:[#allocation2 + $0x260] sm:$0xf0] }
 0x1ae   :  { %v12098_v14 = vor.u32 %v10799_v10, %v9537_v60  ;;  %v9533_v60 = vld [vmem:[#allocation2 + $0x248] sm:$0xf] }
 0x1af   :  { %v12073_v49 = vpop.f32.mrf.mxu0 }
 0x1b0   :  { %v2592_v17 = vpop.f32.mrf.mxu2  ;;  %15304 = vst [vmem:[#allocation92_spill] sm:$0xff] %v12098_v14 }
 0x1b1   :  { %v12075_v37 = vpop.f32.mrf.mxu1  ;;  %v2593_v44 = vadd.f32 %v2592_v17, %v2224_v38  ;;  %v9549_v38 = vld [vmem:[#allocation2 + $0x270] sm:$0xf] }
 0x1b5   :  { %2277 = vmatmul.bf16.gmra.mxu1 %v12079_v5 }
 0x1b7   :  { %v12092_v34 = vpop.f32.mrf.mxu0 }
 0x1b8   :  { %v2594_v23 = vpop.f32.mrf.mxu2 }
 0x1b9   :  { %v2595_v3 = vadd.f32 %v2594_v23, %v2226_v15  ;;  %v12094_v48 = vpop.f32.mrf.mxu1  ;;  %v3479_v23 = vpack.c.b16 %v3477_v47, %v3476_v45 }
 0x1bb   :  { %v2914_v33 = vpack.c.bf16 %v2595_v3, %v2595_v3 }
 0x1bd   :  { %2636 = vmatmul.bf16.gmra.mxu2 %v12085_v55  ;;  %v3531_v25 = vunpack.c.l.b16 %v2914_v33  ;;  %1913 = vmatmul.bf16.gmra.mxu0 %v12098_v14 }
 0x1bf   :  { %v1874_v15 = vpop.f32.mrf.mxu0 }
 0x1c0   :  { %v2597_v54 = vpop.f32.mrf.mxu2 }
 0x1c1   :  { %v2598_v26 = vadd.f32 %v2597_v54, %v2229_v0  ;;  %v2243_v55 = vpop.f32.mrf.mxu1  ;;  %v9539_v0 = vld [vmem:[#allocation2 + $0x264] sm:$0xf0]  ;;  %v12104_v54 = vor.u32 %v10794_v63, %v9521_v21 }
 0x1c2   :  { %v12100_v22 = vor.u32 %v10798_v6, %v9539_v0 }
 0x1c3   :  { %v2915_v5 = vpack.c.bf16 %v2598_v26, %v2598_v26  ;;  %15306 = vst [vmem:[#allocation94_spill] sm:$0xff] %v12104_v54 }
 0x1c4   :  { %15305 = vst [vmem:[#allocation93_spill] sm:$0xff] %v12100_v22 }
 0x1c5   :  { %v3532_v18 = vunpack.c.l.b16 %v2915_v5  ;;  %v2231_v5 = vadd.f32 %v12054_v20, %v12052_v52  ;;  %2282 = vmatmul.bf16.gmra.mxu1 %v12100_v22  ;;  %v10797_v52 = vld [vmem:[#allocation2 + $0x250] sm:$0xf0] }
 0x1c6   :  { %v12113_v17 = vor.u32 %v10797_v52, %v9533_v60 }
 0x1c7   :  { %v3534_v1 = vpack.c.b16 %v3532_v18, %v3531_v25  ;;  %v2913_v18 = vpack.c.bf16 %v2593_v44, %v2593_v44  ;;  %v1876_v58 = vpop.f32.mrf.mxu0  ;;  %v9551_v44 = vld [vmem:[#allocation2 + $0x27c] sm:$0xf0] }
 0x1c8   :  { %v2599_v3 = vpop.f32.mrf.mxu2  ;;  %15307 = vst [vmem:[#allocation95_spill] sm:$0xff] %v12113_v17 }
 0x1c9   :  { %11099 = vxpose.binary.xlu1.c.b16.start [1/4] (short) (narrow) %v3534_v1, %v3479_v23, 16  ;;  %v2600_v53 = vadd.f32 %v2599_v3, %v2231_v5  ;;  %v2245_v33 = vpop.f32.mrf.mxu1  ;;  %v3478_v45 = vunpack.c.l.b16 %v2913_v18  ;;  %v10802_v1 = vld [vmem:[#allocation2 + $0x278] sm:$0xf0]  ;;  %v10801_v23 = vld [vmem:[#allocation2 + $0x274] sm:$0xf] }
 0x1ca   :  { %v12120_v5 = vor.u32 %v10802_v1, %v9549_v38  ;;  %v12122_v18 = vor.u32 %v10801_v23, %v9551_v44  ;;  %v2241_v23 = vadd.f32 %v12094_v48, %v12092_v34  ;;  %v9557_v34 = vld [vmem:[#allocation2 + $0x278] sm:$0xf]  ;;  %v10803_v48 = vld [vmem:[#allocation2 + $0x280] sm:$0xf0] }
 0x1cb   :  { %v2916_v47 = vpack.c.bf16 %v2600_v53, %v2600_v53  ;;  %v3480_v20 = vpack.c.b16 %v3478_v45, %v3478_v45  ;;  %v10800_v45 = vld [vmem:[#allocation2 + $0x268] sm:$0xf0] }
 0x1cc   :  { %15308 = vst [vmem:[#allocation96_spill] sm:$0xff] %v12120_v5 }
 0x1cd   :  { %2641 = vmatmul.bf16.gmra.mxu2 %v12104_v54  ;;  %v3533_v25 = vunpack.c.l.b16 %v2916_v47  ;;  %15309 = vst [vmem:[#allocation97_spill] sm:$0xff] %v12122_v18  ;;  %1918 = vmatmul.bf16.gmra.mxu0 %v12120_v5  ;;  %v9545_v47 = vld [vmem:[#allocation2 + $0x260] sm:$0xf]  ;;  %v2244_v5 = vadd.f32 %v2243_v55, %v1874_v15  ;;  %v2239_v55 = vadd.f32 %v12075_v37, %v12073_v49 }
 0x1ce   :  { %v12134_v38 = vor.u32 %v10800_v45, %v9545_v47 }
 0x1cf   :  { %v3535_v21 = vpack.c.b16 %v3533_v25, %v3533_v25  ;;  %v12109_v63 = vpop.f32.mrf.mxu0 }
 0x1d0   :  { %v2602_v26 = vpop.f32.mrf.mxu2  ;;  %15310 = vst [vmem:[#allocation98_spill] sm:$0xff] %v12134_v38 }
 0x1d1   :  { %v12111_v10 = vpop.f32.mrf.mxu1 }
 0x1d5   :  { %2287 = vmatmul.bf16.gmra.mxu1 %v12122_v18 }
 0x1d7   :  { %v12116_v0 = vpop.f32.mrf.mxu0 }
 0x1d8   :  { %v2604_v6 = vpop.f32.mrf.mxu2 }
 0x1d9   :  { %11100 = vxpose.binary.xlu1.c.b16.end [2/4] (short) (narrow) %v3535_v21, %v3480_v20, 16  ;;  %v12118_v3 = vpop.f32.mrf.mxu1  ;;  %v2234_v20 = vadd.f32 %v12058_v36, %v12056_v50  ;;  %v2236_v21 = vadd.f32 %v12071_v28, %v12069_v32 }
 0x1db   :  { %v2605_v1 = vadd.f32 %v2604_v6, %v2236_v21  ;;  %v2603_v44 = vadd.f32 %v2602_v26, %v2234_v20 }
 0x1dd   :  { %2646 = vmatmul.bf16.gmra.mxu2 %v12113_v17  ;;  %v2918_v18 = vpack.c.bf16 %v2605_v1, %v2605_v1  ;;  %v2917_v36 = vpack.c.bf16 %v2603_v44, %v2603_v44  ;;  %v12145_v44 = vor.u32 %v10803_v48, %v9557_v34 }
 0x1df   :  { %v12126_v25 = vpop.f32.mrf.mxu0  ;;  %v3587_v28 = vunpack.c.l.b16 %v2918_v18  ;;  %v3586_v6 = vunpack.c.l.b16 %v2917_v36  ;;  %15311 = vst [vmem:[#allocation99_spill] sm:$0xff] %v12145_v44 }
 0x1e0   :  { %v2607_v53 = vpop.f32.mrf.mxu2 }
 0x1e1   :  { %v12128_v60 = vpop.f32.mrf.mxu1  ;;  %v3589_v26 = vpack.c.b16 %v3587_v28, %v3586_v6  ;;  %v9569_v28 = vld [vmem:[#allocation2 + $0x290] sm:$0xf]  ;;  %v9561_v6 = vld [vmem:[#allocation2 + $0x288] sm:$0xf] }
 0x1e7   :  { %v12139_v22 = vpop.f32.mrf.mxu0 }
 0x1e8   :  { %v2609_v52 = vpop.f32.mrf.mxu2 }
 0x1e9   :  { %v2610_v14 = vadd.f32 %v2609_v52, %v2241_v23  ;;  %v12141_v17 = vpop.f32.mrf.mxu1  ;;  %v2246_v23 = vadd.f32 %v2245_v33, %v1876_v58  ;;  %v10805_v58 = vld [vmem:[#allocation2 + $0x290] sm:$0xf0]  ;;  %v10804_v33 = vld [vmem:[#allocation2 + $0x28c] sm:$0xf] }
 0x1ea   :  { %v12152_v48 = vor.u32 %v10805_v58, %v9561_v6  ;;  %v10808_v6 = vld [vmem:[#allocation2 + $0x2a8] sm:$0xf0]  ;;  %v10807_v58 = vld [vmem:[#allocation2 + $0x2a4] sm:$0xf] }
 0x1eb   :  { %v2920_v54 = vpack.c.bf16 %v2610_v14, %v2610_v14  ;;  %v2608_v14 = vadd.f32 %v2607_v53, %v2239_v55  ;;  %v9563_v55 = vld [vmem:[#allocation2 + $0x294] sm:$0xf0] }
 0x1ec   :  { %15312 = vst [vmem:[#allocation100_spill] sm:$0xff] %v12152_v48  ;;  %1923 = vmatmul.bf16.gmra.mxu0 %v12152_v48  ;;  %v2251_v48 = vadd.f32 %v12118_v3, %v12116_v0 }
 0x1ed   :  { %2651 = vmatmul.bf16.gmra.mxu2 %v12134_v38  ;;  %v3641_v45 = vunpack.c.l.b16 %v2920_v54  ;;  %v2919_v54 = vpack.c.bf16 %v2608_v14, %v2608_v14 }
 0x1ef   :  { %v1889_v52 = vpop.f32.mrf.mxu0  ;;  %v3588_v37 = vunpack.c.l.b16 %v2919_v54 }
 0x1f0   :  { %v2612_v50 = vpop.f32.mrf.mxu2 }
 0x1f1   :  { %v2613_v32 = vadd.f32 %v2612_v50, %v2244_v5  ;;  %v2258_v20 = vpop.f32.mrf.mxu1 }
 0x1f3   :  { %v2921_v47 = vpack.c.bf16 %v2613_v32, %v2613_v32 }
 0x1f5   :  { %v3642_v21 = vunpack.c.l.b16 %v2921_v47  ;;  %v10806_v47 = vld [vmem:[#allocation2 + $0x298] sm:$0xf0] }
 0x1f7   :  { %v3644_v15 = vpack.c.b16 %v3642_v21, %v3641_v45  ;;  %v12148_v50 = vpop.f32.mrf.mxu0  ;;  %v3590_v45 = vpack.c.b16 %v3588_v37, %v3588_v37  ;;  %v10809_v37 = vld [vmem:[#allocation2 + $0x2b0] sm:$0xf0] }
 0x1f8   :  { %v2614_v1 = vpop.f32.mrf.mxu2 }
 0x1f9   :  { %11103 = vxpose.binary.xlu2.c.b16.start [1/4] (short) (narrow) %v3644_v15, %v3589_v26, 16  ;;  %v2615_v5 = vadd.f32 %v2614_v1, %v2246_v23  ;;  %v12150_v36 = vpop.f32.mrf.mxu1  ;;  %v12156_v1 = vor.u32 %v10804_v33, %v9563_v55  ;;  %v12158_v23 = vor.u32 %v10806_v47, %v9569_v28  ;;  %v9575_v47 = vld [vmem:[#allocation2 + $0x2ac] sm:$0xf0] }
 0x1fa   :  { %v2249_v55 = vadd.f32 %v12111_v10, %v12109_v63 }
 0x1fb   :  { %v2922_v18 = vpack.c.bf16 %v2615_v5, %v2615_v5  ;;  %15313 = vst [vmem:[#allocation101_spill] sm:$0xff] %v12156_v1  ;;  %2292 = vmatmul.bf16.gmra.mxu1 %v12156_v1 }
 0x1fc   :  { %15314 = vst [vmem:[#allocation102_spill] sm:$0xff] %v12158_v23 }
 0x1fd   :  { %2656 = vmatmul.bf16.gmra.mxu2 %v12145_v44  ;;  %v3643_v32 = vunpack.c.l.b16 %v2922_v18  ;;  %v9581_v18 = vld [vmem:[#allocation2 + $0x2a8] sm:$0xf] }
 0x1ff   :  { %v3645_v21 = vpack.c.b16 %v3643_v32, %v3643_v32  ;;  %v1894_v53 = vpop.f32.mrf.mxu0  ;;  %v9573_v32 = vld [vmem:[#allocation2 + $0x2a0] sm:$0xf] }
 0x200   :  { %v2617_v49 = vpop.f32.mrf.mxu2  ;;  %v12167_v28 = vor.u32 %v10808_v6, %v9573_v32  ;;  %v2256_v6 = vadd.f32 %v12141_v17, %v12139_v22  ;;  %v9593_v22 = vld [vmem:[#allocation2 + $0x2c0] sm:$0xf]  ;;  %v10812_v17 = vld [vmem:[#allocation2 + $0x2c8] sm:$0xf0] }
 0x201   :  { %v2263_v34 = vpop.f32.mrf.mxu1 }
 0x202   :  { %v12154_v26 = vadd.f32 %v2263_v34, %v1894_v53  ;;  %15315 = vst [vmem:[#allocation103_spill] sm:$0xff] %v12167_v28  ;;  %v12171_v34 = vor.u32 %v10807_v58, %v9575_v47  ;;  %1928 = vmatmul.bf16.gmra.mxu0 %v12167_v28 }
 0x204   :  { %15316 = vst [vmem:[#allocation104_spill] sm:$0xff] %v12171_v34 }
 0x207   :  { %v12163_v14 = vpop.f32.mrf.mxu0 }
 0x208   :  { %v2619_v15 = vpop.f32.mrf.mxu2 }
 0x209   :  { %11104 = vxpose.binary.xlu2.c.b16.end [2/4] (short) (narrow) %v3645_v21, %v3590_v45, 16  ;;  %v12165_v5 = vpop.f32.mrf.mxu1  ;;  %v2620_v32 = vadd.f32 %v2619_v15, %v2251_v48 }
 0x20b   :  { %2297 = vmatmul.bf16.gmra.mxu1 %v12171_v34  ;;  %v2924_v47 = vpack.c.bf16 %v2620_v32, %v2620_v32 }
 0x20d   :  { %2661 = vmatmul.bf16.gmra.mxu2 %v12158_v23  ;;  %v12177_v23 = vor.u32 %v10809_v37, %v9581_v18  ;;  %v3697_v28 = vunpack.c.l.b16 %v2924_v47 }
 0x20f   :  { %v1899_v33 = vpop.f32.mrf.mxu0  ;;  %15317 = vst [vmem:[#allocation105_spill] sm:$0xff] %v12177_v23 }
 0x210   :  { %v2622_v54 = vpop.f32.mrf.mxu2 }
 0x212   :  { %v2268_v45 = vpop.f32.mrf.mxu1 }
 0x213   :  { %v12169_v53 = vadd.f32 %v2268_v45, %v1899_v33  ;;  %v2618_v33 = vadd.f32 %v2617_v49, %v2249_v55  ;;  %v2259_v45 = vadd.f32 %v2258_v20, %v1889_v52  ;;  %v9585_v52 = vld [vmem:[#allocation2 + $0x2b8] sm:$0xf]  ;;  %v10811_v20 = vld [vmem:[#allocation2 + $0x2c0] sm:$0xf0]  ;;  %v10810_v49 = vld [vmem:[#allocation2 + $0x2bc] sm:$0xf] }
 0x215   :  { %v2923_v3 = vpack.c.bf16 %v2618_v33, %v2618_v33  ;;  %v12190_v33 = vor.u32 %v10811_v20, %v9585_v52 }
 0x217   :  { %v12184_v63 = vpop.f32.mrf.mxu0  ;;  %v3696_v48 = vunpack.c.l.b16 %v2923_v3  ;;  %15318 = vst [vmem:[#allocation106_spill] sm:$0xff] %v12190_v33  ;;  %v12196_v3 = vor.u32 %v10812_v17, %v9593_v22  ;;  %1933 = vmatmul.bf16.gmra.mxu0 %v12190_v33  ;;  %v10814_v22 = vld [vmem:[#allocation2 + $0x2d8] sm:$0xf0]  ;;  %v10813_v17 = vld [vmem:[#allocation2 + $0x2d4] sm:$0xf] }
 0x218   :  { %v2624_v21 = vpop.f32.mrf.mxu2 }
 0x219   :  { %v2625_v58 = vadd.f32 %v2624_v21, %v2256_v6  ;;  %v2254_v21 = vadd.f32 %v12128_v60, %v12126_v25  ;;  %v3699_v32 = vpack.c.b16 %v3697_v28, %v3696_v48  ;;  %15320 = vst [vmem:[#allocation108_spill] sm:$0xff] %v12196_v3 }
 0x21a   :  { %v12186_v10 = vpop.f32.mrf.mxu1 }
 0x21b   :  { %v2926_v18 = vpack.c.bf16 %v2625_v58, %v2625_v58  ;;  %v2623_v25 = vadd.f32 %v2622_v54, %v2254_v21  ;;  %v2266_v54 = vadd.f32 %v12165_v5, %v12163_v14  ;;  %v9599_v21 = vld [vmem:[#allocation2 + $0x2dc] sm:$0xf0]  ;;  %v9633_v14 = vld [vmem:[#allocation2 + $0x318] sm:$0xf] }
 0x21d   :  { %2666 = vmatmul.bf16.gmra.mxu2 %v12177_v23  ;;  %v3751_v15 = vunpack.c.l.b16 %v2926_v18 }
 0x21f   :  { %v1904_v6 = vpop.f32.mrf.mxu0 }
 0x220   :  { %v2627_v0 = vpop.f32.mrf.mxu2 }
 0x221   :  { %v2628_v37 = vadd.f32 %v2627_v0, %v2259_v45  ;;  %v9587_v45 = vld [vmem:[#allocation2 + $0x2c4] sm:$0xf0] }
 0x222   :  { %v2273_v23 = vpop.f32.mrf.mxu1  ;;  %v12192_v0 = vor.u32 %v10810_v49, %v9587_v45 }
 0x223   :  { %v2927_v34 = vpack.c.bf16 %v2628_v37, %v2628_v37  ;;  %v2274_v47 = vadd.f32 %v2273_v23, %v1904_v6 }
 0x224   :  { %15319 = vst [vmem:[#allocation107_spill] sm:$0xff] %v12192_v0  ;;  %2302 = vmatmul.bf16.gmra.mxu1 %v12192_v0 }
 0x225   :  { %v3752_v1 = vunpack.c.l.b16 %v2927_v34  ;;  %v2261_v34 = vadd.f32 %v12150_v36, %v12148_v50  ;;  %v10815_v50 = vld [vmem:[#allocation2 + $0x2e0] sm:$0xf0]  ;;  %v9597_v36 = vld [vmem:[#allocation2 + $0x2d0] sm:$0xf] }
 0x226   :  { %v12204_v49 = vor.u32 %v10814_v22, %v9597_v36  ;;  %v9611_v36 = vld [vmem:[#allocation2 + $0x2f4] sm:$0xf0] }
 0x227   :  { %v3754_v55 = vpack.c.b16 %v3752_v1, %v3751_v15  ;;  %v2925_v1 = vpack.c.bf16 %v2623_v25, %v2623_v25  ;;  %v9605_v15 = vld [vmem:[#allocation2 + $0x2d8] sm:$0xf] }
 0x228   :  { %v2629_v58 = vpop.f32.mrf.mxu2  ;;  %15321 = vst [vmem:[#allocation109_spill] sm:$0xff] %v12204_v49  ;;  %v12208_v45 = vor.u32 %v10815_v50, %v9605_v15  ;;  %1938 = vmatmul.bf16.gmra.mxu0 %v12204_v49  ;;  %v10816_v15 = vld [vmem:[#allocation2 + $0x2ec] sm:$0xf]  ;;  %v10822_v49 = vld [vmem:[#allocation2 + $0x31c] sm:$0xf] }
 0x229   :  { %11107 = vxpose.binary.xlu2.c.b16.start [1/4] (short) (narrow) %v3754_v55, %v3699_v32, 16  ;;  %v2630_v60 = vadd.f32 %v2629_v58, %v2261_v34  ;;  %v3698_v37 = vunpack.c.l.b16 %v2925_v1  ;;  %v12206_v32 = vor.u32 %v10813_v17, %v9599_v21  ;;  %v9617_v1 = vld [vmem:[#allocation2 + $0x2f0] sm:$0xf]  ;;  %v12228_v17 = vor.u32 %v10816_v15, %v9611_v36  ;;  %v10820_v15 = vld [vmem:[#allocation2 + $0x308] sm:$0xf0] }
 0x22a   :  { %15323 = vst [vmem:[#allocation111_spill] sm:$0xff] %v12208_v45  ;;  %v10819_v36 = vld [vmem:[#allocation2 + $0x304] sm:$0xf] }
 0x22b   :  { %v2928_v28 = vpack.c.bf16 %v2630_v60, %v2630_v60  ;;  %v3700_v52 = vpack.c.b16 %v3698_v37, %v3698_v37  ;;  %15322 = vst [vmem:[#allocation110_spill] sm:$0xff] %v12206_v32  ;;  %v9609_v37 = vld [vmem:[#allocation2 + $0x2e8] sm:$0xf] }
 0x22c   :  { %15325 = vst [vmem:[#allocation113_spill] sm:$0xff] %v12228_v17 }
 0x22d   :  { %2671 = vmatmul.bf16.gmra.mxu2 %v12196_v3  ;;  %v3753_v48 = vunpack.c.l.b16 %v2928_v28  ;;  %v10818_v28 = vld [vmem:[#allocation2 + $0x2f8] sm:$0xf0] }
 0x22f   :  { %v3755_v20 = vpack.c.b16 %v3753_v48, %v3753_v48  ;;  %v10817_v48 = vld [vmem:[#allocation2 + $0x2f0] sm:$0xf0] }
 0x230   :  { %v2632_v18 = vpop.f32.mrf.mxu2  ;;  %v12226_v50 = vor.u32 %v10817_v48, %v9609_v37  ;;  %v10821_v37 = vld [vmem:[#allocation2 + $0x310] sm:$0xf0]  ;;  %v9621_v48 = vld [vmem:[#allocation2 + $0x300] sm:$0xf] }
 0x231   :  { %v2633_v23 = vadd.f32 %v2632_v18, %v12154_v26  ;;  %v12222_v18 = vpop.f32.mrf.mxu0 }
 0x232   :  { %15324 = vst [vmem:[#allocation112_spill] sm:$0xff] %v12226_v50 }
 0x233   :  { %v2929_v6 = vpack.c.bf16 %v2633_v23, %v2633_v23  ;;  %v12224_v23 = vpop.f32.mrf.mxu1 }
 0x234   :  { %2307 = vmatmul.bf16.gmra.mxu1 %v12206_v32 }
 0x235   :  { %v12212_v34 = vunpack.c.l.b16 %v2929_v6 }
 0x238   :  { %v2634_v55 = vpop.f32.mrf.mxu2  ;;  %1943 = vmatmul.bf16.gmra.mxu0 %v12226_v50  ;;  %v10823_v50 = vld [vmem:[#allocation2 + $0x320] sm:$0xf0] }
 0x239   :  { %v2635_v26 = vadd.f32 %v2634_v55, %v2266_v54  ;;  %11108 = vxpose.binary.xlu2.c.b16.end [2/4] (short) (narrow) %v3755_v20, %v3700_v52, 16  ;;  %v12230_v52 = vor.u32 %v10818_v28, %v9617_v1  ;;  %v1909_v54 = vpop.f32.mrf.mxu0  ;;  %v9629_v28 = vld [vmem:[#allocation2 + $0x308] sm:$0xf] }
 0x23b   :  { %v2930_v58 = vpack.c.bf16 %v2635_v26, %v2635_v26  ;;  %15326 = vst [vmem:[#allocation114_spill] sm:$0xff] %v12230_v52  ;;  %v2278_v21 = vpop.f32.mrf.mxu1 }
 0x23c   :  { %v2279_v33 = vadd.f32 %v2278_v21, %v1909_v54  ;;  %v9647_v54 = vld [vmem:[#allocation2 + $0x33c] sm:$0xf0] }
 0x23d   :  { %v12214_v25 = vunpack.c.l.b16 %v2930_v58  ;;  %2676 = vmatmul.bf16.gmra.mxu2 %v12208_v45 }
 0x240   :  { %v2637_v5 = vpop.f32.mrf.mxu2 }
 0x241   :  { %v12220_v60 = vadd.f32 %v2637_v5, %v12169_v53  ;;  %v2271_v53 = vadd.f32 %v12186_v10, %v12184_v63  ;;  %v12243_v10 = vor.u32 %v10820_v15, %v9621_v48  ;;  %v9641_v48 = vld [vmem:[#allocation2 + $0x320] sm:$0xf]  ;;  %v10824_v15 = vld [vmem:[#allocation2 + $0x328] sm:$0xf0] }
 0x243   :  { %15327 = vst [vmem:[#allocation115_spill] sm:$0xff] %v12243_v10 }
 0x244   :  { %2312 = vmatmul.bf16.gmra.mxu1 %v12228_v17 }
 0x248   :  { %v2639_v22 = vpop.f32.mrf.mxu2  ;;  %1948 = vmatmul.bf16.gmra.mxu0 %v12243_v10 }
 0x249   :  { %v2640_v20 = vadd.f32 %v2639_v22, %v2271_v53  ;;  %v9623_v22 = vld [vmem:[#allocation2 + $0x30c] sm:$0xf0] }
 0x24b   :  { %v2932_v6 = vpack.c.bf16 %v2640_v20, %v2640_v20  ;;  %v12247_v20 = vor.u32 %v10819_v36, %v9623_v22  ;;  %v12254_v36 = vor.u32 %v10823_v50, %v9633_v14 }
 0x24d   :  { %2681 = vmatmul.bf16.gmra.mxu2 %v12230_v52  ;;  %v12237_v5 = vunpack.c.l.b16 %v2932_v6  ;;  %15328 = vst [vmem:[#allocation116_spill] sm:$0xff] %v12247_v20  ;;  %v2280_v6 = vpop.f32.mrf.mxu1  ;;  %v12258_v52 = vor.u32 %v10824_v15, %v9641_v48  ;;  %v9653_v48 = vld [vmem:[#allocation2 + $0x338] sm:$0xf]  ;;  %v10827_v15 = vld [vmem:[#allocation2 + $0x340] sm:$0xf0] }
 0x24e   :  { %15330 = vst [vmem:[#allocation118_spill] sm:$0xff] %v12254_v36 }
 0x24f   :  { %15332 = vst [vmem:[#allocation120_spill] sm:$0xff] %v12258_v52 }
 0x250   :  { %v2642_v55 = vpop.f32.mrf.mxu2 }
 0x251   :  { %v2643_v26 = vadd.f32 %v2642_v55, %v2274_v47  ;;  %v12249_v47 = vor.u32 %v10821_v37, %v9629_v28  ;;  %v1911_v55 = vpop.f32.mrf.mxu0  ;;  %v9635_v28 = vld [vmem:[#allocation2 + $0x324] sm:$0xf0] }
 0x252   :  { %v12256_v22 = vor.u32 %v10822_v49, %v9635_v28  ;;  %v2281_v17 = vadd.f32 %v2280_v6, %v1911_v55  ;;  %v11085_v55 = vpop.trf.xlu0 }
 0x253   :  { %v2933_v58 = vpack.c.bf16 %v2643_v26, %v2643_v26  ;;  %15329 = vst [vmem:[#allocation117_spill] sm:$0xff] %v12249_v47 }
 0x254   :  { %2317 = vmatmul.bf16.gmra.mxu1 %v12247_v20  ;;  %15331 = vst [vmem:[#allocation119_spill] sm:$0xff] %v12256_v22 }
 0x255   :  { %v12239_v1 = vunpack.c.l.b16 %v2933_v58  ;;  %v2283_v63 = vpop.f32.mrf.mxu1 }
 0x258   :  { %v12245_v53 = vpop.f32.mrf.mxu2  ;;  %1953 = vmatmul.bf16.gmra.mxu0 %v12254_v36 }
 0x259   :  { %v1914_v58 = vpop.f32.mrf.mxu0 }
 0x25a   :  { %v2284_v10 = vadd.f32 %v2283_v63, %v1914_v58  ;;  %v9645_v63 = vld [vmem:[#allocation2 + $0x330] sm:$0xf]  ;;  %v10826_v58 = vld [vmem:[#allocation2 + $0x338] sm:$0xf0] }
 0x25b   :  { %v12263_v38 = vor.u32 %v10826_v58, %v9645_v63  ;;  %v9659_v58 = vld [vmem:[#allocation2 + $0x354] sm:$0xf0] }
 0x25d   :  { %2686 = vmatmul.bf16.gmra.mxu2 %v12249_v47  ;;  %v2285_v20 = vpop.f32.mrf.mxu1  ;;  %15333 = vst [vmem:[#allocation121_spill] sm:$0xff] %v12263_v38 }
 0x260   :  { %v2647_v26 = vpop.f32.mrf.mxu2 }
 0x261   :  { %v1916_v47 = vpop.f32.mrf.mxu0  ;;  %v2648_v32 = vadd.f32 %v2647_v26, %v2279_v33 }
 0x264   :  { %2322 = vmatmul.bf16.gmra.mxu1 %v12256_v22  ;;  %v2935_v22 = vpack.c.bf16 %v2648_v32, %v2648_v32 }
 0x265   :  { %v2288_v0 = vpop.f32.mrf.mxu1 }
 0x268   :  { %v2649_v37 = vpop.f32.mrf.mxu2  ;;  %1958 = vmatmul.bf16.gmra.mxu0 %v12263_v38  ;;  %v10834_v38 = vld [vmem:[#allocation2 + $0x37c] sm:$0xf] }
 0x269   :  { %v2650_v45 = vadd.f32 %v2649_v37, %v2281_v17  ;;  %v1919_v36 = vpop.f32.mrf.mxu0 }
 0x26b   :  { %v2936_v49 = vpack.c.bf16 %v2650_v45, %v2650_v45  ;;  %v3060_v45 = vunpack.c.l.b16 %v2935_v22  ;;  %v10830_v22 = vld [vmem:[#allocation2 + $0x358] sm:$0xf0] }
 0x26d   :  { %2691 = vmatmul.bf16.gmra.mxu2 %v12258_v52  ;;  %v10825_v52 = vld [vmem:[#allocation2 + $0x334] sm:$0xf]  ;;  %v3061_v17 = vunpack.c.l.b16 %v2936_v49  ;;  %v2290_v26 = vpop.f32.mrf.mxu1 }
 0x26e   :  { %v10829_v49 = vld [vmem:[#allocation2 + $0x350] sm:$0xf0] }
 0x26f   :  { %v3063_v32 = vpack.c.b16 %v3061_v17, %v3060_v45 }
 0x270   :  { %v2652_v14 = vpop.f32.mrf.mxu2 }
 0x271   :  { %v2653_v50 = vadd.f32 %v2652_v14, %v2284_v10  ;;  %v12265_v10 = vor.u32 %v10825_v52, %v9647_v54  ;;  %v1921_v6 = vpop.f32.mrf.mxu0  ;;  %v9665_v14 = vld [vmem:[#allocation2 + $0x350] sm:$0xf]  ;;  %v2286_v54 = vadd.f32 %v2285_v20, %v1916_v47 }
 0x272   :  { %v2291_v37 = vadd.f32 %v2290_v26, %v1921_v6 }
 0x273   :  { %v2937_v3 = vpack.c.bf16 %v2653_v50, %v2653_v50  ;;  %15334 = vst [vmem:[#allocation122_spill] sm:$0xff] %v12265_v10  ;;  %v9657_v50 = vld [vmem:[#allocation2 + $0x348] sm:$0xf] }
 0x274   :  { %2327 = vmatmul.bf16.gmra.mxu1 %v12265_v10  ;;  %v12278_v63 = vor.u32 %v10829_v49, %v9657_v50 }
 0x275   :  { %v3062_v28 = vunpack.c.l.b16 %v2937_v3  ;;  %v12268_v3 = vor.u32 %v10827_v15, %v9653_v48 }
 0x276   :  { %15336 = vst [vmem:[#allocation124_spill] sm:$0xff] %v12278_v63 }
 0x277   :  { %v3064_v44 = vpack.c.b16 %v3062_v28, %v3062_v28  ;;  %15335 = vst [vmem:[#allocation123_spill] sm:$0xff] %v12268_v3  ;;  %v10828_v28 = vld [vmem:[#allocation2 + $0x34c] sm:$0xf] }
 0x278   :  { %v2654_v21 = vpop.f32.mrf.mxu2  ;;  %v12276_v15 = vpop.f32.mrf.mxu1  ;;  %v12280_v45 = vor.u32 %v10828_v28, %v9659_v58  ;;  %1963 = vmatmul.bf16.gmra.mxu0 %v12278_v63  ;;  %v10833_v28 = vld [vmem:[#allocation2 + $0x370] sm:$0xf0] }
 0x279   :  { %v3072_v33 = vsel %vm3070_vm0, %v3064_v44, 0  ;;  %v2289_v44 = vadd.f32 %v2288_v0, %v1919_v36  ;;  %v12274_v48 = vpop.f32.mrf.mxu0  ;;  %v12282_v0 = vor.u32 %v10830_v22, %v9665_v14  ;;  %v2655_v36 = vadd.f32 %v2654_v21, %v2286_v54  ;;  %v9677_v22 = vld [vmem:[#allocation2 + $0x368] sm:$0xf]  ;;  %v11086_v58 = vpop.trf.xlu0  ;;  %v9669_v54 = vld [vmem:[#allocation2 + $0x360] sm:$0xf] }
 0x27a   :  { %3080 = vmatpush.bf16.msrb.mxu3 %v3072_v33  ;;  %15337 = vst [vmem:[#allocation125_spill] sm:$0xff] %v12280_v45 }
 0x27b   :  { %15338 = vst [vmem:[#allocation126_spill] sm:$0xff] %v12282_v0  ;;  %v2938_v50 = vpack.c.bf16 %v2655_v36, %v2655_v36 }
 0x27d   :  { %2696 = vmatmul.bf16.gmra.mxu2 %v12268_v3  ;;  %v3117_v14 = vunpack.c.l.b16 %v2938_v50  ;;  %v12293_v50 = vor.u32 %v10833_v28, %v9677_v22  ;;  %v9683_v22 = vld [vmem:[#allocation2 + $0x384] sm:$0xf0] }
 0x27e   :  { %3081 = vmatpush.bf16.msrb.mxu3 %v3063_v32 }
 0x27f   :  { %15341 = vst [vmem:[#allocation129_spill] sm:$0xff] %v12293_v50 }
 0x280   :  { %v2657_v52 = vpop.f32.mrf.mxu2  ;;  %v2295_v47 = vpop.f32.mrf.mxu1 }
 0x281   :  { %10195 = vmatmul.msk.bf16.vlgmr.msrb.gmra.mxu3 %vm3066_vm1, %v11085_v55  ;;  %v2658_v17 = vadd.f32 %v2657_v52, %v2289_v44  ;;  %v1926_v20 = vpop.f32.mrf.mxu0 }
 0x283   :  { %v2939_v6 = vpack.c.bf16 %v2658_v17, %v2658_v17  ;;  %v10832_v17 = vld [vmem:[#allocation2 + $0x368] sm:$0xf0] }
 0x284   :  { %2332 = vmatmul.bf16.gmra.mxu1 %v12280_v45  ;;  %v12288_v36 = vor.u32 %v10832_v17, %v9669_v54  ;;  %v9681_v54 = vld [vmem:[#allocation2 + $0x378] sm:$0xf]  ;;  %v10835_v17 = vld [vmem:[#allocation2 + $0x380] sm:$0xf0] }
 0x285   :  { %v3118_v52 = vunpack.c.l.b16 %v2939_v6 }
 0x286   :  { %15339 = vst [vmem:[#allocation127_spill] sm:$0xff] %v12288_v36 }
 0x287   :  { %v3120_v21 = vpack.c.b16 %v3118_v52, %v3117_v14  ;;  %v9689_v14 = vld [vmem:[#allocation2 + $0x380] sm:$0xf] }
 0x288   :  { %v2659_v33 = vpop.f32.mrf.mxu2  ;;  %1968 = vmatmul.bf16.gmra.mxu0 %v12288_v36 }
 0x289   :  { %v2660_v32 = vadd.f32 %v2659_v33, %v2291_v37  ;;  %v10831_v33 = vld [vmem:[#allocation2 + $0x364] sm:$0xf] }
 0x28b   :  { %v2940_v55 = vpack.c.bf16 %v2660_v32, %v2660_v32  ;;  %v1929_v32 = vpop.f32.mrf.mxu0 }
 0x28d   :  { %v3119_v26 = vunpack.c.l.b16 %v2940_v55  ;;  %2701 = vmatmul.bf16.gmra.mxu2 %v12282_v0  ;;  %v2298_v55 = vpop.f32.mrf.mxu1  ;;  %v12298_v0 = vor.u32 %v10835_v17, %v9681_v54  ;;  %v2294_v54 = vadd.f32 %v12276_v15, %v12274_v48  ;;  %v2296_v17 = vadd.f32 %v2295_v47, %v1926_v20 }
 0x28f   :  { %v3121_v49 = vpack.c.b16 %v3119_v26, %v3119_v26  ;;  %v9671_v26 = vld [vmem:[#allocation2 + $0x36c] sm:$0xf0]  ;;  %15342 = vst [vmem:[#allocation130_spill] sm:$0xff] %v12298_v0 }
 0x290   :  { %v2662_v44 = vpop.f32.mrf.mxu2  ;;  %v12290_v6 = vor.u32 %v10831_v33, %v9671_v26 }
 0x291   :  { %v3127_v37 = vsel %vm3070_vm0, %v3121_v49, 0 }
 0x292   :  { %3135 = vmatpush.bf16.msra.mxu3 %v3127_v37  ;;  %15340 = vst [vmem:[#allocation128_spill] sm:$0xff] %v12290_v6 }
 0x293   :  { %v1931_v49 = vpop.f32.mrf.mxu0 }
 0x294   :  { %2337 = vmatmul.bf16.gmra.mxu1 %v12290_v6  ;;  %v2299_v6 = vadd.f32 %v2298_v55, %v1929_v32  ;;  %v10839_v32 = vld [vmem:[#allocation2 + $0x3a0] sm:$0xf0]  ;;  %v9693_v55 = vld [vmem:[#allocation2 + $0x390] sm:$0xf] }
 0x295   :  { %v2300_v52 = vpop.f32.mrf.mxu1 }
 0x296   :  { %3136 = vmatpush.bf16.msra.mxu3 %v3120_v21  ;;  %v10836_v21 = vld [vmem:[#allocation2 + $0x388] sm:$0xf0] }
 0x297   :  { %v12302_v36 = vor.u32 %v10836_v21, %v9689_v14  ;;  %v9701_v21 = vld [vmem:[#allocation2 + $0x398] sm:$0xf] }
 0x298   :  { %v2664_v63 = vpop.f32.mrf.mxu2  ;;  %1973 = vmatmul.bf16.gmra.mxu0 %v12298_v0  ;;  %v10838_v0 = vld [vmem:[#allocation2 + $0x398] sm:$0xf0] }
 0x299   :  { %10196 = vmatmul.msk.bf16.vlgmr.msra.gmra.mxu3 %vm3066_vm1, %v11086_v58  ;;  %v12300_v58 = vor.u32 %v10834_v38, %v9683_v22  ;;  %15344 = vst [vmem:[#allocation132_spill] sm:$0xff] %v12302_v36  ;;  %v2663_v38 = vadd.f32 %v2662_v44, %v2294_v54  ;;  %v2665_v22 = vadd.f32 %v2664_v63, %v2296_v17 }
 0x29a   :  { %v12317_v63 = vor.u32 %v10839_v32, %v9701_v21  ;;  %v11089_v21 = vpop.trf.xlu1 }
 0x29b   :  { %v1934_v33 = vpop.f32.mrf.mxu0  ;;  %15343 = vst [vmem:[#allocation131_spill] sm:$0xff] %v12300_v58  ;;  %v2941_v11 = vpack.c.bf16 %v2663_v38, %v2663_v38  ;;  %v2942_v48 = vpack.c.bf16 %v2665_v22, %v2665_v22  ;;  %v2301_v38 = vadd.f32 %v2300_v52, %v1931_v49  ;;  %v9707_v52 = vld [vmem:[#allocation2 + $0x3b4] sm:$0xf0] }
 0x29c   :  { %15347 = vst [vmem:[#allocation135_spill] sm:$0xff] %v12317_v63 }
 0x29d   :  { %2706 = vmatmul.bf16.gmra.mxu2 %v12293_v50  ;;  %v3172_v44 = vunpack.c.l.b16 %v2941_v11 }
 0x2a0   :  { %v2667_v37 = vpop.f32.mrf.mxu2 }
 0x2a1   :  { %v2303_v26 = vpop.f32.mrf.mxu1  ;;  %v2668_v50 = vadd.f32 %v2667_v37, %v2299_v6  ;;  %v12313_v6 = vor.u32 %v10838_v0, %v9693_v55  ;;  %v9695_v37 = vld [vmem:[#allocation2 + $0x39c] sm:$0xf0]  ;;  %v9713_v55 = vld [vmem:[#allocation2 + $0x3b0] sm:$0xf] }
 0x2a2   :  { %v12315_v20 = vor.u32 %v10837_v12, %v9695_v37  ;;  %v10842_v37 = vld [vmem:[#allocation2 + $0x3b8] sm:$0xf0] }
 0x2a3   :  { %v1936_v45 = vpop.f32.mrf.mxu0  ;;  %v2943_v35 = vpack.c.bf16 %v2668_v50, %v2668_v50  ;;  %15345 = vst [vmem:[#allocation133_spill] sm:$0xff] %v12313_v6  ;;  %v3173_v50 = vunpack.c.l.b16 %v2942_v48 }
 0x2a4   :  { %2342 = vmatmul.bf16.gmra.mxu1 %v12300_v58  ;;  %15346 = vst [vmem:[#allocation134_spill] sm:$0xff] %v12315_v20 }
 0x2a5   :  { %v3174_v14 = vunpack.c.l.b16 %v2943_v35 }
 0x2a7   :  { %v3176_v47 = vpack.c.b16 %v3174_v14, %v3174_v14 }
 0x2a8   :  { %v2669_v28 = vpop.f32.mrf.mxu2  ;;  %1978 = vmatmul.bf16.gmra.mxu0 %v12313_v6 }
 0x2a9   :  { %v2305_v3 = vpop.f32.mrf.mxu1  ;;  %v3182_v54 = vsel %vm3070_vm0, %v3176_v47, 0  ;;  %v2670_v11 = vadd.f32 %v2669_v28, %v2301_v38  ;;  %v10841_v47 = vld [vmem:[#allocation2 + $0x3b0] sm:$0xf0]  ;;  %v12334_v28 = vor.u32 %v10842_v37, %v9713_v55  ;;  %v9725_v55 = vld [vmem:[#allocation2 + $0x3c8] sm:$0xf] }
 0x2aa   :  { %v2306_v35 = vadd.f32 %v2305_v3, %v1936_v45  ;;  %3190 = vmatpush.bf16.msrb.mxu3 %v3182_v54  ;;  %v2304_v3 = vadd.f32 %v2303_v26, %v1934_v33  ;;  %v3175_v45 = vpack.c.b16 %v3173_v50, %v3172_v44  ;;  %v10845_v37 = vld [vmem:[#allocation2 + $0x3d0] sm:$0xf0] }
 0x2ab   :  { %v12309_v58 = vpop.f32.mrf.mxu0  ;;  %v2944_v33 = vpack.c.bf16 %v2670_v11, %v2670_v11  ;;  %15350 = vst [vmem:[#allocation138_spill] sm:$0xff] %v12334_v28 }
 0x2ad   :  { %2711 = vmatmul.bf16.gmra.mxu2 %v12302_v36 }
 0x2ae   :  { %3191 = vmatpush.bf16.msrb.mxu3 %v3175_v45 }
 0x2b0   :  { %v2672_v10 = vpop.f32.mrf.mxu2 }
 0x2b1   :  { %v12311_v36 = vpop.f32.mrf.mxu1  ;;  %v2673_v32 = vadd.f32 %v2672_v10, %v2304_v3  ;;  %10197 = vmatmul.msk.bf16.vlgmr.msrb.gmra.mxu3 %vm3066_vm1, %v11089_v21 }
 0x2b3   :  { %v12323_v17 = vpop.f32.mrf.mxu0  ;;  %v2945_v26 = vpack.c.bf16 %v2673_v32, %v2673_v32  ;;  %v11090_v32 = vpop.trf.xlu1 }
 0x2b4   :  { %2347 = vmatmul.bf16.gmra.mxu1 %v12315_v20 }
 0x2b5   :  { %v3228_v38 = vunpack.c.l.b16 %v2945_v26  ;;  %v9719_v26 = vld [vmem:[#allocation2 + $0x3cc] sm:$0xf0] }
 0x2b8   :  { %v2674_v15 = vpop.f32.mrf.mxu2 }
 0x2b9   :  { %v2675_v0 = vadd.f32 %v2674_v15, %v2306_v35  ;;  %v12325_v12 = vpop.f32.mrf.mxu1  ;;  %v9705_v15 = vld [vmem:[#allocation2 + $0x3a8] sm:$0xf]  ;;  %v10840_v35 = vld [vmem:[#allocation2 + $0x3ac] sm:$0xf] }
 0x2ba   :  { %v12330_v49 = vor.u32 %v10841_v47, %v9705_v15  ;;  %v12332_v50 = vor.u32 %v10840_v35, %v9707_v52  ;;  %v10844_v15 = vld [vmem:[#allocation2 + $0x3c8] sm:$0xf0]  ;;  %v10843_v47 = vld [vmem:[#allocation2 + $0x3c4] sm:$0xf] }
 0x2bb   :  { %v2946_v14 = vpack.c.bf16 %v2675_v0, %v2675_v0  ;;  %v1944_v54 = vpop.f32.mrf.mxu0  ;;  %v3227_v0 = vunpack.c.l.b16 %v2944_v33 }
 0x2bc   :  { %15348 = vst [vmem:[#allocation136_spill] sm:$0xff] %v12330_v49  ;;  %1983 = vmatmul.bf16.gmra.mxu0 %v12330_v49  ;;  %v9737_v49 = vld [vmem:[#allocation2 + $0x3e0] sm:$0xf] }
 0x2bd   :  { %2716 = vmatmul.bf16.gmra.mxu2 %v12317_v63  ;;  %v3229_v48 = vunpack.c.l.b16 %v2946_v14  ;;  %15349 = vst [vmem:[#allocation137_spill] sm:$0xff] %v12332_v50  ;;  %v3230_v11 = vpack.c.b16 %v3228_v38, %v3227_v0  ;;  %v12355_v0 = vor.u32 %v10845_v37, %v9725_v55 }
 0x2bf   :  { %v3231_v10 = vpack.c.b16 %v3229_v48, %v3229_v48  ;;  %v9717_v48 = vld [vmem:[#allocation2 + $0x3c0] sm:$0xf]  ;;  %15353 = vst [vmem:[#allocation141_spill] sm:$0xff] %v12355_v0 }
 0x2c0   :  { %v12327_v22 = vpop.f32.mrf.mxu2  ;;  %v12349_v33 = vor.u32 %v10844_v15, %v9717_v48  ;;  %v10848_v48 = vld [vmem:[#allocation2 + $0x3e8] sm:$0xf0]  ;;  %v9729_v15 = vld [vmem:[#allocation2 + $0x3d8] sm:$0xf] }
 0x2c1   :  { %v2313_v6 = vpop.f32.mrf.mxu1  ;;  %v3237_v3 = vsel %vm3070_vm0, %v3231_v10, 0 }
 0x2c2   :  { %3245 = vmatpush.bf16.msra.mxu3 %v3237_v3  ;;  %15351 = vst [vmem:[#allocation139_spill] sm:$0xff] %v12349_v33  ;;  %v12353_v3 = vor.u32 %v10843_v47, %v9719_v26  ;;  %v2314_v63 = vadd.f32 %v2313_v6, %v1944_v54  ;;  %v9731_v26 = vld [vmem:[#allocation2 + $0x3e4] sm:$0xf0]  ;;  %v2309_v6 = vadd.f32 %v12311_v36, %v12309_v58  ;;  %v9741_v36 = vld [vmem:[#allocation2 + $0x3f0] sm:$0xf] }
 0x2c3   :  { %v12340_v45 = vpop.f32.mrf.mxu0  ;;  %v2311_v54 = vadd.f32 %v12325_v12, %v12323_v17  ;;  %v10850_v58 = vld [vmem:[#allocation2 + $0x3f8] sm:$0xf0] }
 0x2c4   :  { %2352 = vmatmul.bf16.gmra.mxu1 %v12332_v50  ;;  %15352 = vst [vmem:[#allocation140_spill] sm:$0xff] %v12353_v3  ;;  %v10846_v50 = vld [vmem:[#allocation2 + $0x3dc] sm:$0xf]  ;;  %v12386_v12 = vor.u32 %v10850_v58, %v9741_v36 }
 0x2c6   :  { %3246 = vmatpush.bf16.msra.mxu3 %v3230_v11  ;;  %15357 = vst [vmem:[#allocation145_spill] sm:$0xff] %v12386_v12 }
 0x2c8   :  { %v2679_v44 = vpop.f32.mrf.mxu2 }
 0x2c9   :  { %v12342_v14 = vpop.f32.mrf.mxu1  ;;  %10198 = vmatmul.msk.bf16.vlgmr.msra.gmra.mxu3 %vm3066_vm1, %v11090_v32 }
 0x2cb   :  { %v12345_v35 = vpop.f32.mrf.mxu0 }
 0x2cc   :  { %1988 = vmatmul.bf16.gmra.mxu0 %v12349_v33 }
 0x2cd   :  { %2721 = vmatmul.bf16.gmra.mxu2 %v12334_v28  ;;  %v10847_v28 = vld [vmem:[#allocation2 + $0x3e0] sm:$0xf0] }
 0x2ce   :  { %v12366_v37 = vor.u32 %v10847_v28, %v9729_v15 }
 0x2d0   :  { %v2682_v21 = vpop.f32.mrf.mxu2  ;;  %15354 = vst [vmem:[#allocation142_spill] sm:$0xff] %v12366_v37 }
 0x2d1   :  { %v12347_v52 = vpop.f32.mrf.mxu1  ;;  %v2683_v20 = vadd.f32 %v2682_v21, %v2314_v63  ;;  %v2680_v63 = vadd.f32 %v2679_v44, %v2311_v54 }
 0x2d3   :  { %v1951_v38 = vpop.f32.mrf.mxu0  ;;  %v2949_v28 = vpack.c.bf16 %v2683_v20, %v2683_v20  ;;  %v2948_v39 = vpack.c.bf16 %v2680_v63, %v2680_v63 }
 0x2d4   :  { %2357 = vmatmul.bf16.gmra.mxu1 %v12353_v3  ;;  %v12368_v3 = vor.u32 %v10846_v50, %v9731_v26 }
 0x2d5   :  { %v3284_v21 = vunpack.c.l.b16 %v2949_v28  ;;  %v12397_v28 = vpop.f32.mrf.mxu3 }
 0x2d6   :  { %15355 = vst [vmem:[#allocation143_spill] sm:$0xff] %v12368_v3 }
 0x2d7   :  { %v3286_v17 = vpack.c.b16 %v3284_v21, %v3284_v21  ;;  %15360 = vst [vmem:[#allocation148_spill] sm:$0xff] %v12397_v28 }
 0x2d8   :  { %v12351_v10 = vpop.f32.mrf.mxu2 }
 0x2d9   :  { %v2320_v11 = vpop.f32.mrf.mxu1  ;;  %v3292_v54 = vsel %vm3070_vm0, %v3286_v17, 0  ;;  %v9761_v17 = vld [vmem:[#allocation2 + $0x410] sm:$0xf] }
 0x2da   :  { %v2321_v26 = vadd.f32 %v2320_v11, %v1951_v38  ;;  %v3283_v11 = vunpack.c.l.b16 %v2948_v39  ;;  %3300 = vmatpush.bf16.msrb.mxu3 %v3292_v54  ;;  %v9753_v54 = vld [vmem:[#allocation2 + $0x408] sm:$0xf] }
 0x2db   :  { %v12362_v47 = vpop.f32.mrf.mxu0 }
 0x2dc   :  { %1993 = vmatmul.bf16.gmra.mxu0 %v12366_v37  ;;  %v9749_v37 = vld [vmem:[#allocation2 + $0x3f8] sm:$0xf] }
 0x2dd   :  { %2726 = vmatmul.bf16.gmra.mxu2 %v12355_v0  ;;  %v12370_v0 = vor.u32 %v10848_v48, %v9737_v49  ;;  %v2678_v48 = vadd.f32 %v12327_v22, %v2309_v6  ;;  %v12390_v22 = vor.u32 %v10849_v51, %v9743_v2  ;;  %v3913_v6 = vlaneseq }
 0x2de   :  { %v2319_v2 = vadd.f32 %v12347_v52, %v12345_v35 }
 0x2df   :  { %15356 = vst [vmem:[#allocation144_spill] sm:$0xff] %v12370_v0  ;;  %v3914_v39 = vshrl.u32 %v3913_v6, 7  ;;  %v3917_v51 = vand.u32 127, %v3913_v6 }
 0x2e0   :  { %v12360_v32 = vpop.f32.mrf.mxu2  ;;  %15358 = vst [vmem:[#allocation146_spill] sm:$0xff] %v12390_v22 }
 0x2e1   :  { %v12364_v55 = vpop.f32.mrf.mxu1  ;;  %vm12410_vm2 = vcmp.ge.s32.totalorder %v3914_v39, %v3917_v51  ;;  %v3915_v6 = vadd.s32 8, %v3914_v39 }
 0x2e3   :  { %v12379_v15 = vpop.f32.mrf.mxu0  ;;  %vm12428_vm4 = vcmp.ge.s32.totalorder %v3915_v6, %v3917_v51 }
 0x2e4   :  { %2362 = vmatmul.bf16.gmra.mxu1 %v12368_v3  ;;  %v2947_v3 = vpack.c.bf16 %v2678_v48, %v2678_v48 }
 0x2e6   :  { %v3282_v38 = vunpack.c.l.b16 %v2947_v3 }
 0x2e8   :  { %v2689_v33 = vpop.f32.mrf.mxu2  ;;  %v3285_v3 = vpack.c.b16 %v3283_v11, %v3282_v38  ;;  %v10854_v38 = vld [vmem:[#allocation2 + $0x418] sm:$0xf0] }
 0x2e9   :  { %v12381_v50 = vpop.f32.mrf.mxu1  ;;  %v2690_v40 = vadd.f32 %v2689_v33, %v2321_v26  ;;  %v2316_v33 = vadd.f32 %v12342_v14, %v12340_v45  ;;  %v2688_v45 = vadd.f32 %v12360_v32, %v2319_v2  ;;  %v15361_v14 = vmov 0 }
 0x2ea   :  { %3301 = vmatpush.bf16.msrb.mxu3 %v3285_v3  ;;  %v15362_v14 = vsel %vm12410_vm2, 4294967295, %v15361_v14  ;;  %v10852_v3 = vld [vmem:[#allocation2 + $0x40c] sm:$0xf]  ;;  %v2326_v51 = vadd.f32 %v12381_v50, %v12379_v15 }
 0x2eb   :  { %v1959_v20 = vpop.f32.mrf.mxu0  ;;  %v2952_v48 = vpack.c.bf16 %v2690_v40, %v2690_v40  ;;  %v11093_v40 = vpop.trf.xlu2  ;;  %v2685_v26 = vadd.f32 %v12351_v10, %v2316_v33  ;;  %15363 = vst [vmem:[#allocation149_spill] sm:$0xff] %v15362_v14  ;;  %v2951_v10 = vpack.c.bf16 %v2688_v45, %v2688_v45  ;;  %v12426_v45 = vor.u32 %v10854_v38, %v9761_v17 }
 0x2ec   :  { %1998 = vmatmul.bf16.gmra.mxu0 %v12386_v12 }
 0x2ed   :  { %2731 = vmatmul.bf16.gmra.mxu2 %v12370_v0  ;;  %v10851_v0 = vld [vmem:[#allocation2 + $0x400] sm:$0xf0]  ;;  %10199 = vmatmul.msk.bf16.vlgmr.msrb.gmra.mxu3 %vm3066_vm1, %v11093_v40  ;;  %v2950_v11 = vpack.c.bf16 %v2685_v26, %v2685_v26  ;;  %15366 = vst [vmem:[#allocation152_spill] sm:$0xff] %v12426_v45  ;;  %v3338_v39 = vunpack.c.l.b16 %v2951_v10 }
 0x2ee   :  { %v12392_v44 = vor.u32 %v10851_v0, %v9749_v37  ;;  %v3339_v37 = vunpack.c.l.b16 %v2952_v48  ;;  %v10853_v48 = vld [vmem:[#allocation2 + $0x410] sm:$0xf0] }
 0x2ef   :  { %v12421_v2 = vor.u32 %v10853_v48, %v9753_v54  ;;  %v3337_v12 = vunpack.c.l.b16 %v2950_v11 }
 0x2f0   :  { %v12383_v49 = vpop.f32.mrf.mxu2  ;;  %15359 = vst [vmem:[#allocation147_spill] sm:$0xff] %v12392_v44  ;;  %v3341_v35 = vpack.c.b16 %v3339_v37, %v3339_v37 }
 0x2f1   :  { %v2328_v57 = vpop.f32.mrf.mxu1  ;;  %15364 = vst [vmem:[#allocation150_spill] sm:$0xff] %v12421_v2  ;;  %v3340_v38 = vpack.c.b16 %v3338_v39, %v3337_v12 }
 0x2f2   :  { %v2329_v36 = vadd.f32 %v2328_v57, %v1959_v20  ;;  %v9755_v57 = vld [vmem:[#allocation2 + $0x414] sm:$0xf0]  ;;  %v3347_v26 = vsel %vm3070_vm0, %v3341_v35, 0 }
 0x2f3   :  { %v12404_v0 = vpop.f32.mrf.mxu0  ;;  %3355 = vmatpush.bf16.msra.mxu3 %v3347_v26  ;;  %v11094_v48 = vpop.trf.xlu2  ;;  %v10857_v26 = vld [vmem:[#allocation2 + $0x430] sm:$0xf0] }
 0x2f4   :  { %2367 = vmatmul.bf16.gmra.mxu1 %v12390_v22 }
 0x2f7   :  { %3356 = vmatpush.bf16.msra.mxu3 %v3340_v38 }
 0x2f8   :  { %v12388_v24 = vpop.f32.mrf.mxu2 }
 0x2f9   :  { %v12406_v21 = vpop.f32.mrf.mxu1 }
 0x2fb   :  { %v1964_v33 = vpop.f32.mrf.mxu0 }
 0x2fc   :  { %2003 = vmatmul.bf16.gmra.mxu0 %v12421_v2  ;;  %v10890_v2 = vld [vmem:[#allocation2 + $0x538] sm:$0xf0] }
 0x2fd   :  { %2736 = vmatmul.bf16.gmra.mxu2 %v12392_v44  ;;  %10200 = vmatmul.msk.bf16.vlgmr.msra.gmra.mxu3 %vm3066_vm1, %v11094_v48 }
 0x300   :  { %v2697_v63 = vpop.f32.mrf.mxu2 }
 0x301   :  { %v2698_v37 = vadd.f32 %v2697_v63, %v2329_v36  ;;  %v2333_v40 = vpop.f32.mrf.mxu1  ;;  %v2324_v36 = vadd.f32 %v12364_v55, %v12362_v47 }
 0x302   :  { %v2334_v48 = vadd.f32 %v2333_v40, %v1964_v33 }
 0x303   :  { %v2955_v63 = vpack.c.bf16 %v2698_v37, %v2698_v37  ;;  %v1966_v11 = vpop.f32.mrf.mxu0  ;;  %v9773_v37 = vld [vmem:[#allocation2 + $0x428] sm:$0xf] }
 0x304   :  { %v3083_v52 = vpop.f32.mrf.mxu3 }
 0x305   :  { %v12417_v58 = vsel %vm12410_vm2, %v3083_v52, -inf  ;;  %v12423_v52 = vor.u32 %v10852_v3, %v9755_v57  ;;  %v3394_v6 = vunpack.c.l.b16 %v2955_v63  ;;  %v2693_v3 = vadd.f32 %v12383_v49, %v2324_v36 }
 0x306   :  { %v3957_v32 = vsel %vm3956_vm3, %v12417_v58, -inf  ;;  %v2695_v57 = vadd.f32 %v12388_v24, %v2326_v51 }
 0x307   :  { %3958 = vmax.xlane.f32.xlu0 %v3957_v32  ;;  %15365 = vst [vmem:[#allocation151_spill] sm:$0xff] %v12423_v52  ;;  %2372 = vmatmul.bf16.gmra.mxu1 %v12423_v52  ;;  %v3396_v47 = vpack.c.b16 %v3394_v6, %v3394_v6  ;;  %v2953_v15 = vpack.c.bf16 %v2693_v3, %v2693_v3 }
 0x308   :  { %v2699_v20 = vpop.f32.mrf.mxu2  ;;  %v2954_v50 = vpack.c.bf16 %v2695_v57, %v2695_v57  ;;  %v2331_v6 = vadd.f32 %v12406_v21, %v12404_v0 }
 0x309   :  { %v2335_v54 = vpop.f32.mrf.mxu1  ;;  %v3402_v63 = vsel %vm3070_vm0, %v3396_v47, 0  ;;  %v3392_v49 = vunpack.c.l.b16 %v2953_v15 }
 0x30a   :  { %v2336_v55 = vadd.f32 %v2335_v54, %v1966_v11  ;;  %3410 = vmatpush.bf16.msrb.mxu3 %v3402_v63  ;;  %v3393_v36 = vunpack.c.l.b16 %v2954_v50  ;;  %v11097_v50 = vpop.trf.xlu0 }
 0x30b   :  { %v1969_v12 = vpop.f32.mrf.mxu0 }
 0x30c   :  { %v3085_v32 = vpop.f32.mrf.mxu3  ;;  %v3395_v3 = vpack.c.b16 %v3393_v36, %v3392_v49  ;;  %v10860_v49 = vld [vmem:[#allocation2 + $0x448] sm:$0xf0] }
 0x30d   :  { %2741 = vmatmul.bf16.gmra.mxu2 %v12426_v45  ;;  %v12437_v35 = vsel %vm12428_vm4, %v3085_v32, -inf }
 0x30e   :  { %v3960_v17 = vsel %vm3956_vm3, %v12437_v35, -inf  ;;  %3411 = vmatpush.bf16.msrb.mxu3 %v3395_v3  ;;  %v10855_v3 = vld [vmem:[#allocation2 + $0x424] sm:$0xf] }
 0x30f   :  { %3961 = vmax.xlane.f32.xlu1 %v3960_v17  ;;  %v12449_v17 = vor.u32 %v10857_v26, %v9773_v37  ;;  %v2700_v37 = vadd.f32 %v2699_v20, %v2331_v6  ;;  %v10856_v6 = vld [vmem:[#allocation2 + $0x428] sm:$0xf0] }
 0x310   :  { %v2702_v10 = vpop.f32.mrf.mxu2 }
 0x311   :  { %v2338_v32 = vpop.f32.mrf.mxu1  ;;  %15369 = vst [vmem:[#allocation153_spill] sm:$0xff] %v12449_v17  ;;  %v2703_v26 = vadd.f32 %v2702_v10, %v2334_v48  ;;  %10201 = vmatmul.msk.bf16.vlgmr.msrb.gmra.mxu3 %vm3066_vm1, %v11097_v50  ;;  %v2956_v21 = vpack.c.bf16 %v2700_v37, %v2700_v37 }
 0x313   :  { %v1971_v57 = vpop.f32.mrf.mxu0  ;;  %v2957_v33 = vpack.c.bf16 %v2703_v26, %v2703_v26  ;;  %v3447_v50 = vunpack.c.l.b16 %v2956_v21  ;;  %v15373_v21 = vpack.c.b16 %v12214_v25, %v12212_v34 }
 0x315   :  { %v3448_v37 = vunpack.c.l.b16 %v2957_v33  ;;  %v15374_v33 = vpack.c.b16 %v12239_v1, %v12237_v5  ;;  %v10863_v5 = vld [vmem:[#allocation2 + $0x460] sm:$0xf0] }
 0x318   :  { %v2704_v39 = vpop.f32.mrf.mxu2 }
 0x319   :  { %v2705_v38 = vadd.f32 %v2704_v39, %v2336_v55  ;;  %v2340_v15 = vpop.f32.mrf.mxu1 }
 0x31b   :  { %v2958_v51 = vpack.c.bf16 %v2705_v38, %v2705_v38  ;;  %v9785_v38 = vld [vmem:[#allocation2 + $0x440] sm:$0xf]  ;;  %v1974_v36 = vpop.f32.mrf.mxu0 }
 0x31c   :  { %v3138_v24 = vpop.f32.mrf.mxu3 }
 0x31d   :  { %v12453_v11 = vsel %vm12410_vm2, %v3138_v24, -inf  ;;  %2746 = vmatmul.bf16.gmra.mxu2 %v12449_v17  ;;  %v3449_v55 = vunpack.c.l.b16 %v2958_v51  ;;  %v9765_v51 = vld [vmem:[#allocation2 + $0x420] sm:$0xf] }
 0x31e   :  { %v3963_v54 = vsel %vm3956_vm3, %v12453_v11, -inf  ;;  %v12470_v48 = vor.u32 %v10856_v6, %v9765_v51 }
 0x31f   :  { %3964 = vmax.xlane.f32.xlu2 %v3963_v54  ;;  %v3451_v63 = vpack.c.b16 %v3449_v55, %v3449_v55  ;;  %v12468_v54 = vor.u32 %v10860_v49, %v9785_v38  ;;  %v9767_v55 = vld [vmem:[#allocation2 + $0x42c] sm:$0xf0]  ;;  %v3450_v38 = vpack.c.b16 %v3448_v37, %v3447_v50 }
 0x320   :  { %v2707_v47 = vpop.f32.mrf.mxu2  ;;  %15371 = vst [vmem:[#allocation155_spill] sm:$0xff] %v12470_v48  ;;  %v12472_v26 = vor.u32 %v10855_v3, %v9767_v55  ;;  %2008 = vmatmul.bf16.gmra.mxu0 %v12470_v48  ;;  %v11098_v55 = vpop.trf.xlu0 }
 0x321   :  { %v2343_v20 = vpop.f32.mrf.mxu1  ;;  %v3457_v10 = vsel %vm3070_vm0, %v3451_v63, 0  ;;  %15370 = vst [vmem:[#allocation154_spill] sm:$0xff] %v12468_v54  ;;  %v2339_v63 = vadd.f32 %v2338_v32, %v1969_v12 }
 0x322   :  { %3465 = vmatpush.bf16.msra.mxu3 %v3457_v10  ;;  %15372 = vst [vmem:[#allocation156_spill] sm:$0xff] %v12472_v26  ;;  %2377 = vmatmul.bf16.gmra.mxu1 %v12472_v26  ;;  %v2276_v10 = vadd.f32 %v12224_v23, %v12222_v18  ;;  %v2931_v18 = vpack.c.bf16 %v12220_v60, %v12220_v60  ;;  %v9779_v60 = vld [vmem:[#allocation2 + $0x444] sm:$0xf0] }
 0x323   :  { %v1976_v49 = vpop.f32.mrf.mxu0  ;;  %v2708_v32 = vadd.f32 %v2707_v47, %v2339_v63  ;;  %v10858_v47 = vld [vmem:[#allocation2 + $0x43c] sm:$0xf] }
 0x324   :  { %v3140_v39 = vpop.f32.mrf.mxu3  ;;  %v2645_v12 = vadd.f32 %v12245_v53, %v2276_v10  ;;  %v10859_v53 = vld [vmem:[#allocation2 + $0x440] sm:$0xf0] }
 0x325   :  { %v12463_v0 = vsel %vm12428_vm4, %v3140_v39, -inf  ;;  %v2344_v39 = vadd.f32 %v2343_v20, %v1974_v36  ;;  %v2959_v25 = vpack.c.bf16 %v2708_v32, %v2708_v32  ;;  %v9797_v36 = vld [vmem:[#allocation2 + $0x458] sm:$0xf] }
 0x326   :  { %v3966_v40 = vsel %vm3956_vm3, %v12463_v0, -inf  ;;  %3466 = vmatpush.bf16.msra.mxu3 %v3450_v38  ;;  %v2934_v34 = vpack.c.bf16 %v2645_v12, %v2645_v12  ;;  %v9777_v38 = vld [vmem:[#allocation2 + $0x438] sm:$0xf]  ;;  %v12489_v63 = vor.u32 %v10863_v5, %v9797_v36  ;;  %v9809_v5 = vld [vmem:[#allocation2 + $0x470] sm:$0xf] }
 0x327   :  { %3967 = vmax.xlane.f32.xlu1 %v3966_v40  ;;  %v2341_v40 = vadd.f32 %v2340_v15, %v1971_v57  ;;  %v12492_v10 = vor.u32 %v10859_v53, %v9777_v38 }
 0x328   :  { %v2709_v24 = vpop.f32.mrf.mxu2  ;;  %15375 = vst [vmem:[#allocation157_spill] sm:$0xff] %v12489_v63 }
 0x329   :  { %v2345_v6 = vpop.f32.mrf.mxu1  ;;  %v2710_v57 = vadd.f32 %v2709_v24, %v2341_v40  ;;  %10202 = vmatmul.msk.bf16.vlgmr.msra.gmra.mxu3 %vm3066_vm1, %v11098_v55  ;;  %v3808_v24 = vunpack.c.l.b16 %v2931_v18  ;;  %15376 = vst [vmem:[#allocation158_spill] sm:$0xff] %v12492_v10 }
 0x32b   :  { %v2960_v1 = vpack.c.bf16 %v2710_v57, %v2710_v57  ;;  %v1979_v50 = vpop.f32.mrf.mxu0  ;;  %v3810_v55 = vpack.c.b16 %v3808_v24, %v3808_v24 }
 0x32d   :  { %2751 = vmatmul.bf16.gmra.mxu2 %v12468_v54  ;;  %v9905_v54 = vld [vmem:[#allocation2 + $0x530] sm:$0xf] }
 0x32e   :  { %v12611_v45 = vor.u32 %v10890_v2, %v9905_v54 }
 0x330   :  { %v2712_v51 = vpop.f32.mrf.mxu2  ;;  %11111 = vxpose.binary.xlu0.c.b16.start [1/4] (short) (narrow) %v15374_v33, %v15373_v21, 16  ;;  %v3502_v21 = vunpack.c.l.b16 %v2959_v25  ;;  %v3503_v33 = vunpack.c.l.b16 %v2960_v1  ;;  %v10866_v1 = vld [vmem:[#allocation2 + $0x478] sm:$0xf0]  ;;  %15390 = vst [vmem:[#allocation172_spill] sm:$0xff] %v12611_v45 }
 0x331   :  { %v2713_v3 = vadd.f32 %v2712_v51, %v2344_v39  ;;  %v2348_v39 = vpop.f32.mrf.mxu1  ;;  %v3863_v51 = vunpack.c.l.b16 %v2934_v34  ;;  %2013 = vmatmul.bf16.gmra.mxu0 %v12492_v10  ;;  %v2346_v34 = vadd.f32 %v2345_v6, %v1976_v49  ;;  %v9791_v6 = vld [vmem:[#allocation2 + $0x45c] sm:$0xf0]  ;;  %v10872_v10 = vld [vmem:[#allocation2 + $0x4a8] sm:$0xf0] }
 0x332   :  { %v3505_v32 = vpack.c.b16 %v3503_v33, %v3502_v21  ;;  %v2349_v25 = vadd.f32 %v2348_v39, %v1979_v50  ;;  %v12500_v21 = vor.u32 %v10866_v1, %v9809_v5 }
 0x333   :  { %v2961_v15 = vpack.c.bf16 %v2713_v3, %v2713_v3  ;;  %v12494_v3 = vor.u32 %v10858_v47, %v9779_v60  ;;  %v3865_v12 = vpack.c.b16 %v3863_v51, %v3863_v51  ;;  %v1981_v57 = vpop.f32.mrf.mxu0  ;;  %v10862_v60 = vld [vmem:[#allocation2 + $0x458] sm:$0xf0]  ;;  %v10861_v51 = vld [vmem:[#allocation2 + $0x454] sm:$0xf] }
 0x334   :  { %15378 = vst [vmem:[#allocation160_spill] sm:$0xff] %v12500_v21 }
 0x335   :  { %v3504_v23 = vunpack.c.l.b16 %v2961_v15  ;;  %15377 = vst [vmem:[#allocation159_spill] sm:$0xff] %v12494_v3  ;;  %2382 = vmatmul.bf16.gmra.mxu1 %v12494_v3 }
 0x337   :  { %v3506_v20 = vpack.c.b16 %v3504_v23, %v3504_v23  ;;  %v11101_v23 = vpop.trf.xlu1 }
 0x338   :  { %v2714_v37 = vpop.f32.mrf.mxu2 }
 0x339   :  { %v3512_v40 = vsel %vm3070_vm0, %v3506_v20, 0  ;;  %v2350_v18 = vpop.f32.mrf.mxu1  ;;  %v2715_v20 = vadd.f32 %v2714_v37, %v2346_v34 }
 0x33a   :  { %3520 = vmatpush.bf16.msrb.mxu3 %v3512_v40  ;;  %v2351_v36 = vadd.f32 %v2350_v18, %v1981_v57  ;;  %v9789_v40 = vld [vmem:[#allocation2 + $0x450] sm:$0xf] }
 0x33b   :  { %v1984_v53 = vpop.f32.mrf.mxu0  ;;  %v12504_v49 = vor.u32 %v10862_v60, %v9789_v40  ;;  %v2962_v50 = vpack.c.bf16 %v2715_v20, %v2715_v20  ;;  %v9821_v20 = vld [vmem:[#allocation2 + $0x488] sm:$0xf] }
 0x33d   :  { %2756 = vmatmul.bf16.gmra.mxu2 %v12489_v63  ;;  %15379 = vst [vmem:[#allocation161_spill] sm:$0xff] %v12504_v49  ;;  %v3557_v57 = vunpack.c.l.b16 %v2962_v50 }
 0x33e   :  { %3521 = vmatpush.bf16.msrb.mxu3 %v3505_v32 }
 0x340   :  { %v2717_v15 = vpop.f32.mrf.mxu2  ;;  %11112 = vxpose.binary.xlu0.c.b16.end [2/4] (short) (narrow) %v3865_v12, %v3810_v55, 16  ;;  %v12502_v55 = vpop.f32.mrf.mxu3  ;;  %v12506_v12 = vor.u32 %v10861_v51, %v9791_v6 }
 0x341   :  { %10203 = vmatmul.msk.bf16.vlgmr.msrb.gmra.mxu3 %vm3066_vm1, %v11101_v23  ;;  %v2718_v38 = vadd.f32 %v2717_v15, %v2349_v25  ;;  %v2353_v24 = vpop.f32.mrf.mxu1  ;;  %2018 = vmatmul.bf16.gmra.mxu0 %v12504_v49 }
 0x342   :  { %15380 = vst [vmem:[#allocation162_spill] sm:$0xff] %v12506_v12  ;;  %v2354_v49 = vadd.f32 %v2353_v24, %v1984_v53 }
 0x343   :  { %v2963_v39 = vpack.c.bf16 %v2718_v38, %v2718_v38  ;;  %v1986_v23 = vpop.f32.mrf.mxu0  ;;  %v10869_v38 = vld [vmem:[#allocation2 + $0x490] sm:$0xf0] }
 0x345   :  { %2387 = vmatmul.bf16.gmra.mxu1 %v12506_v12  ;;  %v3558_v15 = vunpack.c.l.b16 %v2963_v39  ;;  %v9801_v39 = vld [vmem:[#allocation2 + $0x468] sm:$0xf] }
 0x347   :  { %v3560_v1 = vpack.c.b16 %v3558_v15, %v3557_v57  ;;  %v10864_v15 = vld [vmem:[#allocation2 + $0x46c] sm:$0xf] }
 0x348   :  { %v2719_v47 = vpop.f32.mrf.mxu2  ;;  %v12512_v5 = vpop.f32.mrf.mxu3 }
 0x349   :  { %v2720_v33 = vadd.f32 %v2719_v47, %v2351_v36  ;;  %v2355_v25 = vpop.f32.mrf.mxu1  ;;  %v11102_v47 = vpop.trf.xlu1 }
 0x34b   :  { %v2964_v37 = vpack.c.bf16 %v2720_v33, %v2720_v33  ;;  %v1989_v40 = vpop.f32.mrf.mxu0  ;;  %v12514_v33 = vor.u32 %v10869_v38, %v9821_v20 }
 0x34d   :  { %2761 = vmatmul.bf16.gmra.mxu2 %v12500_v21  ;;  %v3559_v32 = vunpack.c.l.b16 %v2964_v37  ;;  %15381 = vst [vmem:[#allocation163_spill] sm:$0xff] %v12514_v33  ;;  %v10865_v37 = vld [vmem:[#allocation2 + $0x470] sm:$0xf0]  ;;  %v2356_v21 = vadd.f32 %v2355_v25, %v1986_v23 }
 0x34e   :  { %v12523_v57 = vor.u32 %v10865_v37, %v9801_v39  ;;  %v9833_v37 = vld [vmem:[#allocation2 + $0x4a0] sm:$0xf] }
 0x34f   :  { %v3561_v18 = vpack.c.b16 %v3559_v32, %v3559_v32 }
 0x350   :  { %v2722_v34 = vpop.f32.mrf.mxu2  ;;  %v3248_v6 = vpop.f32.mrf.mxu3  ;;  %15382 = vst [vmem:[#allocation164_spill] sm:$0xff] %v12523_v57 }
 0x351   :  { %v3567_v36 = vsel %vm3070_vm0, %v3561_v18, 0  ;;  %v2358_v51 = vpop.f32.mrf.mxu1  ;;  %v12519_v50 = vsel %vm12410_vm2, %v3248_v6, -inf  ;;  %v9803_v18 = vld [vmem:[#allocation2 + $0x474] sm:$0xf0]  ;;  %2023 = vmatmul.bf16.gmra.mxu0 %v12523_v57 }
 0x352   :  { %3575 = vmatpush.bf16.msra.mxu3 %v3567_v36  ;;  %v3975_v32 = vsel %vm3956_vm3, %v12519_v50, -inf  ;;  %v12525_v36 = vor.u32 %v10864_v15, %v9803_v18 }
 0x353   :  { %3976 = vmax.xlane.f32.xlu2 %v3975_v32  ;;  %v1991_v20 = vpop.f32.mrf.mxu0  ;;  %v2723_v32 = vadd.f32 %v2722_v34, %v2354_v49 }
 0x354   :  { %15383 = vst [vmem:[#allocation165_spill] sm:$0xff] %v12525_v36 }
 0x355   :  { %2392 = vmatmul.bf16.gmra.mxu1 %v12525_v36  ;;  %v2965_v57 = vpack.c.bf16 %v2723_v32, %v2723_v32 }
 0x356   :  { %3576 = vmatpush.bf16.msra.mxu3 %v3560_v1  ;;  %v2359_v1 = vadd.f32 %v2358_v51, %v1989_v40  ;;  %v11105_v51 = vpop.trf.xlu2 }
 0x357   :  { %v3612_v53 = vunpack.c.l.b16 %v2965_v57 }
 0x358   :  { %v2724_v60 = vpop.f32.mrf.mxu2 }
 0x359   :  { %10204 = vmatmul.msk.bf16.vlgmr.msra.gmra.mxu3 %vm3066_vm1, %v11102_v47  ;;  %v2360_v47 = vpop.f32.mrf.mxu1  ;;  %v2725_v18 = vadd.f32 %v2724_v60, %v2356_v21 }
 0x35a   :  { %v2361_v49 = vadd.f32 %v2360_v47, %v1991_v20 }
 0x35b   :  { %v1994_v63 = vpop.f32.mrf.mxu0  ;;  %v2966_v36 = vpack.c.bf16 %v2725_v18, %v2725_v18 }
 0x35d   :  { %2766 = vmatmul.bf16.gmra.mxu2 %v12514_v33  ;;  %v12530_v33 = vor.u32 %v10872_v10, %v9833_v37  ;;  %v3613_v24 = vunpack.c.l.b16 %v2966_v36 }
 0x35e   :  { %v11106_v21 = vpop.trf.xlu2 }
 0x35f   :  { %15384 = vst [vmem:[#allocation166_spill] sm:$0xff] %v12530_v33  ;;  %v3615_v10 = vpack.c.b16 %v3613_v24, %v3612_v53 }
 0x360   :  { %v2727_v38 = vpop.f32.mrf.mxu2 }
 0x361   :  { %v2728_v6 = vadd.f32 %v2727_v38, %v2359_v1  ;;  %v2363_v48 = vpop.f32.mrf.mxu1 }
 0x362   :  { %v2364_v34 = vadd.f32 %v2363_v48, %v1994_v63 }
 0x363   :  { %v2967_v39 = vpack.c.bf16 %v2728_v6, %v2728_v6  ;;  %v1996_v1 = vpop.f32.mrf.mxu0  ;;  %v9845_v6 = vld [vmem:[#allocation2 + $0x4b8] sm:$0xf] }
 0x365   :  { %v3614_v40 = vunpack.c.l.b16 %v2967_v39  ;;  %v10875_v39 = vld [vmem:[#allocation2 + $0x4c0] sm:$0xf0] }
 0x366   :  { %v12534_v57 = vor.u32 %v10875_v39, %v9845_v6  ;;  %v12539_v24 = vpop.trf.xlu2 }
 0x367   :  { %v3616_v12 = vpack.c.b16 %v3614_v40, %v3614_v40 }
 0x368   :  { %v2729_v15 = vpop.f32.mrf.mxu2  ;;  %15385 = vst [vmem:[#allocation167_spill] sm:$0xff] %v12534_v57 }
 0x369   :  { %v2365_v25 = vpop.f32.mrf.mxu1  ;;  %v3622_v38 = vsel %vm3070_vm0, %v3616_v12, 0  ;;  %v2730_v37 = vadd.f32 %v2729_v15, %v2361_v49 }
 0x36a   :  { %3630 = vmatpush.bf16.msrb.mxu3 %v3622_v38  ;;  %v2366_v60 = vadd.f32 %v2365_v25, %v1996_v1 }
 0x36b   :  { %v1999_v18 = vpop.f32.mrf.mxu0  ;;  %v2968_v20 = vpack.c.bf16 %v2730_v37, %v2730_v37 }
 0x36d   :  { %2771 = vmatmul.bf16.gmra.mxu2 %v12530_v33  ;;  %v3667_v53 = vunpack.c.l.b16 %v2968_v20 }
 0x36e   :  { %3631 = vmatpush.bf16.msrb.mxu3 %v3615_v10 }
 0x370   :  { %v2732_v23 = vpop.f32.mrf.mxu2 }
 0x371   :  { %v2733_v32 = vadd.f32 %v2732_v23, %v2364_v34  ;;  %v2368_v33 = vpop.f32.mrf.mxu1  ;;  %10205 = vmatmul.msk.bf16.vlgmr.msrb.gmra.mxu3 %vm3066_vm1, %v11105_v51 }
 0x373   :  { %v2969_v48 = vpack.c.bf16 %v2733_v32, %v2733_v32  ;;  %v2001_v38 = vpop.f32.mrf.mxu0  ;;  %v9857_v32 = vld [vmem:[#allocation2 + $0x4d0] sm:$0xf] }
 0x375   :  { %v3668_v23 = vunpack.c.l.b16 %v2969_v48  ;;  %v2369_v48 = vadd.f32 %v2368_v33, %v1999_v18  ;;  %v12560_v33 = vsel %vm12410_vm2, %v12502_v55, -inf }
 0x378   :  { %v2734_v40 = vpop.f32.mrf.mxu2 }
 0x379   :  { %v2735_v36 = vadd.f32 %v2734_v40, %v2366_v60  ;;  %v2370_v34 = vpop.f32.mrf.mxu1  ;;  %v3670_v60 = vpack.c.b16 %v3668_v23, %v3667_v53  ;;  %v10878_v40 = vld [vmem:[#allocation2 + $0x4d8] sm:$0xf0] }
 0x37a   :  { %v3959_v12 = vpop.xlane.xlu0 %3958  ;;  %v12549_v20 = vor.u32 %v10878_v40, %v9857_v32  ;;  %v9869_v32 = vld [vmem:[#allocation2 + $0x4e8] sm:$0xf]  ;;  %v10881_v40 = vld [vmem:[#allocation2 + $0x4f0] sm:$0xf0] }
 0x37b   :  { %v4053_v63 = vsub.f32 %v12417_v58, %v3959_v12  ;;  %v2970_v47 = vpack.c.bf16 %v2735_v36, %v2735_v36  ;;  %v12547_v12 = vpop.trf.xlu2 }
 0x37c   :  { %15386 = vst [vmem:[#allocation168_spill] sm:$0xff] %v12549_v20 }
 0x37d   :  { %v4085_v1 = vmul.f32 1.442695, %v4053_v63  ;;  %2776 = vmatmul.bf16.gmra.mxu2 %v12534_v57  ;;  %v3669_v15 = vunpack.c.l.b16 %v2970_v47  ;;  %v2004_v63 = vpop.f32.mrf.mxu0 }
 0x37f   :  { %11231 = vpow2.f32 %v4085_v1  ;;  %v3671_v25 = vpack.c.b16 %v3669_v15, %v3669_v15  ;;  %v3250_v15 = vpop.f32.mrf.mxu3 }
 0x380   :  { %v2737_v49 = vpop.f32.mrf.mxu2 }
 0x381   :  { %v3677_v51 = vsel %vm3070_vm0, %v3671_v25, 0  ;;  %v2738_v25 = vadd.f32 %v2737_v49, %v2369_v48 }
 0x382   :  { %v3962_v10 = vpop.xlane.xlu1 %3961  ;;  %3685 = vmatpush.bf16.msra.mxu3 %v3677_v51 }
 0x383   :  { %v4054_v58 = vsub.f32 %v12437_v35, %v3962_v10  ;;  %v2371_v35 = vadd.f32 %v2370_v34, %v2001_v38  ;;  %v2971_v38 = vpack.c.bf16 %v2738_v25, %v2738_v25 }
 0x384   :  { %v2373_v47 = vpop.f32.mrf.mxu1 }
 0x385   :  { %v12543_v6 = vpop.eup %11231  ;;  %v4087_v39 = vmul.f32 1.442695, %v4054_v58  ;;  %v2374_v53 = vadd.f32 %v2373_v47, %v2004_v63  ;;  %v3969_v58 = vsel %vm3956_vm3, %v12560_v33, -inf  ;;  %v3722_v49 = vunpack.c.l.b16 %v2971_v38 }
 0x386   :  { %v4149_v37 = vsel %vm3956_vm3, %v12543_v6, 0.0  ;;  %3686 = vmatpush.bf16.msra.mxu3 %v3670_v60  ;;  %v12569_v47 = vor.u32 %v10881_v40, %v9869_v32 }
 0x387   :  { %11233 = vpow2.f32 %v4087_v39  ;;  %4150 = vadd.xlane.f32.xlu1 %v4149_v37 }
 0x388   :  { %v2739_v36 = vpop.f32.mrf.mxu2  ;;  %15387 = vst [vmem:[#allocation169_spill] sm:$0xff] %v12569_v47 }
 0x389   :  { %10206 = vmatmul.msk.bf16.vlgmr.msra.gmra.mxu3 %vm3066_vm1, %v11106_v21  ;;  %v2740_v51 = vadd.f32 %v2739_v36, %v2371_v35  ;;  %v12565_v35 = vpop.f32.mrf.mxu3 }
 0x38b   :  { %v2972_v34 = vpack.c.bf16 %v2740_v51, %v2740_v51 }
 0x38d   :  { %v12552_v1 = vpop.eup %11233  ;;  %2781 = vmatmul.bf16.gmra.mxu2 %v12549_v20  ;;  %v3723_v36 = vunpack.c.l.b16 %v2972_v34 }
 0x38e   :  { %v4152_v23 = vsel %vm3956_vm3, %v12552_v1, 0.0 }
 0x38f   :  { %4153 = vadd.xlane.f32.xlu1 %v4152_v23  ;;  %v3725_v25 = vpack.c.b16 %v3723_v36, %v3722_v49 }
 0x390   :  { %v2742_v10 = vpop.f32.mrf.mxu2 }
 0x391   :  { %v2743_v21 = vadd.f32 %v2742_v10, %v2374_v53  ;;  %v12581_v34 = vpop.f32.mrf.mxu3 }
 0x392   :  { %v3965_v18 = vpop.xlane.xlu2 %3964 }
 0x393   :  { %v2973_v60 = vpack.c.bf16 %v2743_v21, %v2743_v21  ;;  %v4055_v39 = vsub.f32 %v12453_v11, %v3965_v18  ;;  %v12575_v11 = vsel %vm12428_vm4, %v12512_v5, -inf  ;;  %v2006_v18 = vpop.f32.mrf.mxu0  ;;  %v2375_v5 = vpop.f32.mrf.mxu1 }
 0x394   :  { %v3972_v10 = vsel %vm3956_vm3, %v12575_v11, -inf }
 0x395   :  { %v3724_v37 = vunpack.c.l.b16 %v2973_v60  ;;  %v4089_v63 = vmul.f32 1.442695, %v4055_v39  ;;  %v10884_v39 = vld [vmem:[#allocation2 + $0x508] sm:$0xf0] }
 0x397   :  { %3970 = vmax.xlane.f32.xlu1 %v3969_v58  ;;  %v3726_v48 = vpack.c.b16 %v3724_v37, %v3724_v37  ;;  %11235 = vpow2.f32 %v4089_v63  ;;  %v9881_v58 = vld [vmem:[#allocation2 + $0x500] sm:$0xf] }
 0x398   :  { %v12567_v55 = vpop.f32.mrf.mxu2  ;;  %v12589_v32 = vor.u32 %v10884_v39, %v9881_v58 }
 0x399   :  { %v3732_v53 = vsel %vm3070_vm0, %v3726_v48, 0  ;;  %v12593_v48 = vpop.f32.mrf.mxu3 }
 0x39a   :  { %v3968_v23 = vpop.xlane.xlu1 %3967  ;;  %3740 = vmatpush.bf16.msrb.mxu3 %v3732_v53  ;;  %15388 = vst [vmem:[#allocation170_spill] sm:$0xff] %v12589_v32 }
 0x39b   :  { %v4056_v51 = vsub.f32 %v12463_v0, %v3968_v23  ;;  %v12600_v23 = vsel %vm12428_vm4, %v3250_v15, -inf }
 0x39d   :  { %2786 = vmatmul.bf16.gmra.mxu2 %v12569_v47  ;;  %v4091_v38 = vmul.f32 1.442695, %v4056_v51  ;;  %v12585_v60 = vpop.eup %11235  ;;  %v2009_v49 = vpop.f32.mrf.mxu0  ;;  %v3978_v51 = vsel %vm3956_vm3, %v12600_v23, -inf }
 0x39e   :  { %3741 = vmatpush.bf16.msrb.mxu3 %v3725_v25  ;;  %v4155_v0 = vsel %vm3956_vm3, %v12585_v60, 0.0 }
 0x39f   :  { %3973 = vmax.xlane.f32.xlu1 %v3972_v10  ;;  %11237 = vpow2.f32 %v4091_v38  ;;  %v2378_v40 = vpop.f32.mrf.mxu1  ;;  %v9893_v38 = vld [vmem:[#allocation2 + $0x518] sm:$0xf] }
 0x3a0   :  { %v2747_v21 = vpop.f32.mrf.mxu2 }
 0x3a1   :  { %10207 = vmatmul.msk.bf16.vlgmr.msrb.gmra.mxu3 %vm3066_vm1, %v12539_v24  ;;  %v12604_v10 = vpop.f32.mrf.mxu3 }
 0x3a5   :  { %v12591_v36 = vpop.eup %11237  ;;  %v2011_v53 = vpop.f32.mrf.mxu0 }
 0x3a6   :  { %v4158_v24 = vsel %vm3956_vm3, %v12591_v36, 0.0 }
 0x3a7   :  { %4156 = vadd.xlane.f32.xlu1 %v4155_v0  ;;  %v2380_v25 = vpop.f32.mrf.mxu1  ;;  %v10887_v0 = vld [vmem:[#allocation2 + $0x520] sm:$0xf0] }
 0x3a8   :  { %v2749_v37 = vpop.f32.mrf.mxu2  ;;  %v2381_v3 = vadd.f32 %v2380_v25, %v2011_v53 }
 0x3a9   :  { %v12609_v47 = vpop.f32.mrf.mxu3 }
 0x3ad   :  { %2791 = vmatmul.bf16.gmra.mxu2 %v12589_v32  ;;  %v12606_v32 = vor.u32 %v10887_v0, %v9893_v38  ;;  %v2750_v38 = vadd.f32 %v2749_v37, %v2381_v3  ;;  %v2376_v0 = vadd.f32 %v2375_v5, %v2006_v18  ;;  %v12619_v18 = vor.u32 %v10893_v7, %v9917_v59 }
 0x3ae   :  { %v2014_v39 = vpop.f32.mrf.mxu0 }
 0x3af   :  { %4159 = vadd.xlane.f32.xlu1 %v4158_v24  ;;  %15389 = vst [vmem:[#allocation171_spill] sm:$0xff] %v12606_v32  ;;  %v2976_v22 = vpack.c.bf16 %v2750_v38, %v2750_v38  ;;  %v2745_v4 = vadd.f32 %v12567_v55, %v2376_v0 }
 0x3b0   :  { %v2752_v63 = vpop.f32.mrf.mxu2  ;;  %15391 = vst [vmem:[#allocation173_spill] sm:$0xff] %v12619_v18 }
 0x3b1   :  { %v12613_v52 = vpop.f32.mrf.mxu3  ;;  %v3779_v53 = vunpack.c.l.b16 %v2976_v22  ;;  %v2974_v54 = vpack.c.bf16 %v2745_v4, %v2745_v4 }
 0x3b2   :  { %v2383_v24 = vpop.f32.mrf.mxu1 }
 0x3b3   :  { %v3781_v3 = vpack.c.b16 %v3779_v53, %v3779_v53  ;;  %v3777_v5 = vunpack.c.l.b16 %v2974_v54  ;;  %v2384_v38 = vadd.f32 %v2383_v24, %v2014_v39 }
 0x3b5   :  { %v3787_v22 = vsel %vm3070_vm0, %v3781_v3, 0 }
 0x3b6   :  { %v2016_v20 = vpop.f32.mrf.mxu0  ;;  %3795 = vmatpush.bf16.msra.mxu3 %v3787_v22 }
 0x3b7   :  { %3979 = vmax.xlane.f32.xlu1 %v3978_v51 }
 0x3b8   :  { %v2754_v58 = vpop.f32.mrf.mxu2 }
 0x3b9   :  { %v12617_v25 = vpop.f32.mrf.mxu3 }
 0x3ba   :  { %v2385_v57 = vpop.f32.mrf.mxu1 }
 0x3bb   :  { %v2386_v46 = vadd.f32 %v2385_v57, %v2016_v20 }
 0x3bd   :  { %2796 = vmatmul.bf16.gmra.mxu2 %v12606_v32  ;;  %v2379_v32 = vadd.f32 %v2378_v40, %v2009_v49 }
 0x3be   :  { %v2019_v26 = vpop.f32.mrf.mxu0 }
 0x3bf   :  { %v2748_v16 = vadd.f32 %v2747_v21, %v2379_v32  ;;  %v2755_v32 = vadd.f32 %v2754_v58, %v2386_v46 }
 0x3c0   :  { %v2757_v15 = vpop.f32.mrf.mxu2 }
 0x3c1   :  { %v2975_v29 = vpack.c.bf16 %v2748_v16, %v2748_v16  ;;  %v12623_v4 = vpop.f32.mrf.mxu3  ;;  %v2978_v20 = vpack.c.bf16 %v2755_v32, %v2755_v32 }
 0x3c2   :  { %v2388_v51 = vpop.f32.mrf.mxu1 }
 0x3c3   :  { %v2389_v2 = vadd.f32 %v2388_v51, %v2019_v26  ;;  %v3778_v49 = vunpack.c.l.b16 %v2975_v29  ;;  %v2753_v26 = vadd.f32 %v2752_v63, %v2384_v38  ;;  %v10896_v63 = vld [vmem:[#allocation2 + $0x568] sm:$0xf0]  ;;  %v3833_v54 = vunpack.c.l.b16 %v2978_v20  ;;  %v9813_v38 = vld [vmem:[#allocation2 + $0x480] sm:$0xf] }
 0x3c5   :  { %v3780_v16 = vpack.c.b16 %v3778_v49, %v3777_v5  ;;  %v2977_v57 = vpack.c.bf16 %v2753_v26, %v2753_v26 }
 0x3c6   :  { %v2021_v27 = vpop.f32.mrf.mxu0 }
 0x3c7   :  { %3796 = vmatpush.bf16.msra.mxu3 %v3780_v16  ;;  %v3832_v58 = vunpack.c.l.b16 %v2977_v57 }
 0x3c8   :  { %v2759_v17 = vpop.f32.mrf.mxu2 }
 0x3c9   :  { %v12629_v3 = vpop.f32.mrf.mxu3  ;;  %v3835_v16 = vpack.c.b16 %v3833_v54, %v3832_v58  ;;  %v10871_v58 = vld [vmem:[#allocation2 + $0x4a0] sm:$0xf0]  ;;  %v10870_v54 = vld [vmem:[#allocation2 + $0x49c] sm:$0xf] }
 0x3ca   :  { %v2390_v43 = vpop.f32.mrf.mxu1  ;;  %10208 = vmatmul.msk.bf16.vlgmr.msra.gmra.mxu3 %vm3066_vm1, %v12547_v12  ;;  %v10868_v12 = vld [vmem:[#allocation2 + $0x488] sm:$0xf0] }
 0x3cb   :  { %v2391_v7 = vadd.f32 %v2390_v43, %v2021_v27 }
 0x3cd   :  { %2801 = vmatmul.bf16.gmra.mxu2 %v12611_v45  ;;  %v2758_v45 = vadd.f32 %v2757_v15, %v2389_v2  ;;  %v2760_v51 = vadd.f32 %v2759_v17, %v2391_v7  ;;  %v9929_v2 = vld [vmem:[#allocation2 + $0x560] sm:$0xf]  ;;  %v10867_v17 = vld [vmem:[#allocation2 + $0x484] sm:$0xf] }
 0x3ce   :  { %v2024_v40 = vpop.f32.mrf.mxu0 }
 0x3cf   :  { %v2979_v21 = vpack.c.bf16 %v2758_v45, %v2758_v45  ;;  %v2980_v27 = vpack.c.bf16 %v2760_v51, %v2760_v51 }
 0x3d0   :  { %v2762_v13 = vpop.f32.mrf.mxu2 }
 0x3d1   :  { %v3834_v59 = vunpack.c.l.b16 %v2979_v21  ;;  %v3887_v26 = vunpack.c.l.b16 %v2980_v27  ;;  %v12646_v57 = vpop.f32.mrf.mxu3 }
 0x3d2   :  { %v2393_v55 = vpop.f32.mrf.mxu1 }
 0x3d3   :  { %v2394_v29 = vadd.f32 %v2393_v55, %v2024_v40  ;;  %v3836_v45 = vpack.c.b16 %v3834_v59, %v3834_v59  ;;  %v12634_v55 = vor.u32 %v10896_v63, %v9929_v2 }
 0x3d5   :  { %v2763_v0 = vadd.f32 %v2762_v13, %v2394_v29  ;;  %v3842_v40 = vsel %vm3070_vm0, %v3836_v45, 0  ;;  %15392 = vst [vmem:[#allocation174_spill] sm:$0xff] %v12634_v55  ;;  %v12636_v13 = vor.u32 %v10868_v12, %v9813_v38  ;;  %v10899_v45 = vld [vmem:[#allocation2 + $0x580] sm:$0xf0] }
 0x3d6   :  { %v2026_v39 = vpop.f32.mrf.mxu0  ;;  %3850 = vmatpush.bf16.msrb.mxu3 %v3842_v40 }
 0x3d7   :  { %v2981_v5 = vpack.c.bf16 %v2763_v0, %v2763_v0  ;;  %15393 = vst [vmem:[#allocation175_spill] sm:$0xff] %v12636_v13  ;;  %2028 = vmatmul.bf16.gmra.mxu0 %v12636_v13  ;;  %v10877_v13 = vld [vmem:[#allocation2 + $0x4d0] sm:$0xf0] }
 0x3d8   :  { %v2764_v37 = vpop.f32.mrf.mxu2 }
 0x3d9   :  { %v3888_v32 = vunpack.c.l.b16 %v2981_v5  ;;  %v9827_v5 = vld [vmem:[#allocation2 + $0x4a4] sm:$0xf0] }
 0x3da   :  { %v2395_v24 = vpop.f32.mrf.mxu1  ;;  %3851 = vmatpush.bf16.msrb.mxu3 %v3835_v16  ;;  %v12660_v40 = vor.u32 %v10870_v54, %v9827_v5 }
 0x3db   :  { %v2396_v53 = vadd.f32 %v2395_v24, %v2026_v39  ;;  %v3890_v39 = vpack.c.b16 %v3888_v32, %v3887_v26  ;;  %v9941_v24 = vld [vmem:[#allocation2 + $0x578] sm:$0xf] }
 0x3dc   :  { %v11113_v20 = vpop.trf.xlu0  ;;  %v12651_v0 = vor.u32 %v10899_v45, %v9941_v24  ;;  %v12653_v2 = vpop.f32.mrf.mxu3  ;;  %15397 = vst [vmem:[#allocation179_spill] sm:$0xff] %v12660_v40 }
 0x3dd   :  { %2806 = vmatmul.bf16.gmra.mxu2 %v12619_v18  ;;  %v2765_v46 = vadd.f32 %v2764_v37, %v2396_v53  ;;  %v9815_v37 = vld [vmem:[#allocation2 + $0x48c] sm:$0xf0]  ;;  %10209 = vmatmul.msk.bf16.vlgmr.msrb.gmra.mxu3 %vm3066_vm1, %v11113_v20  ;;  %v10911_v18 = vld [vmem:[#allocation2 + $0x5e0] sm:$0xf0] }
 0x3de   :  { %v12638_v21 = vor.u32 %v10867_v17, %v9815_v37  ;;  %15395 = vst [vmem:[#allocation177_spill] sm:$0xff] %v12651_v0  ;;  %v9953_v17 = vld [vmem:[#allocation2 + $0x590] sm:$0xf]  ;;  %v10902_v37 = vld [vmem:[#allocation2 + $0x598] sm:$0xf0] }
 0x3df   :  { %v2982_v49 = vpack.c.bf16 %v2765_v46, %v2765_v46  ;;  %v9825_v46 = vld [vmem:[#allocation2 + $0x498] sm:$0xf]  ;;  %v12669_v32 = vor.u32 %v10902_v37, %v9953_v17  ;;  %v10873_v17 = vld [vmem:[#allocation2 + $0x4b4] sm:$0xf] }
 0x3e0   :  { %v12625_v15 = vpop.f32.mrf.mxu2  ;;  %15394 = vst [vmem:[#allocation176_spill] sm:$0xff] %v12638_v21  ;;  %2397 = vmatmul.bf16.gmra.mxu1 %v12638_v21  ;;  %v12658_v27 = vor.u32 %v10871_v58, %v9825_v46 }
 0x3e1   :  { %v3889_v22 = vunpack.c.l.b16 %v2982_v49  ;;  %15398 = vst [vmem:[#allocation180_spill] sm:$0xff] %v12669_v32 }
 0x3e2   :  { %15396 = vst [vmem:[#allocation178_spill] sm:$0xff] %v12658_v27 }
 0x3e3   :  { %v3891_v59 = vpack.c.b16 %v3889_v22, %v3889_v22 }
 0x3e4   :  { %v12664_v12 = vpop.f32.mrf.mxu3  ;;  %v11114_v5 = vpop.trf.xlu0 }
 0x3e5   :  { %v3897_v7 = vsel %vm3070_vm0, %v3891_v59, 0 }
 0x3e6   :  { %3905 = vmatpush.bf16.msra.mxu3 %v3897_v7 }
 0x3e7   :  { %2033 = vmatmul.bf16.gmra.mxu0 %v12658_v27 }
 0x3e8   :  { %v12631_v43 = vpop.f32.mrf.mxu2 }
 0x3ea   :  { %3906 = vmatpush.bf16.msra.mxu3 %v3890_v39 }
 0x3ed   :  { %2811 = vmatmul.bf16.gmra.mxu2 %v12634_v55  ;;  %10210 = vmatmul.msk.bf16.vlgmr.msra.gmra.mxu3 %vm3066_vm1, %v11114_v5 }
 0x3f0   :  { %v12644_v29 = vpop.f32.mrf.mxu2  ;;  %2402 = vmatmul.bf16.gmra.mxu1 %v12660_v40 }
 0x3f4   :  { %v12674_v58 = vpop.f32.mrf.mxu3 }
 0x3f8   :  { %v12649_v51 = vpop.f32.mrf.mxu2 }
 0x3fa   :  { %v4151_v53 = vpop.xlane.xlu1 %4150 }
 0x3fb   :  { %11239 = vrcp.f32 %v4151_v53 }
 0x3fd   :  { %2816 = vmatmul.bf16.gmra.mxu2 %v12651_v0 }
 0x400   :  { %v12656_v63 = vpop.f32.mrf.mxu2 }
 0x401   :  { %v11240_v38 = vpop.eup %11239 }
 0x402   :  { %v4154_v49 = vpop.xlane.xlu1 %4153  ;;  %v4277_v22 = vmul.f32 %v11240_v38, %v12543_v6  ;;  %v10874_v38 = vld [vmem:[#allocation2 + $0x4b8] sm:$0xf0] }
 0x403   :  { %11241 = vrcp.f32 %v4154_v49  ;;  %v9837_v49 = vld [vmem:[#allocation2 + $0x4b0] sm:$0xf] }
 0x404   :  { %v4309_v39 = vpack.c.bf16 %v4277_v22, %v4277_v22  ;;  %v12678_v37 = vor.u32 %v10874_v38, %v9837_v49 }
 0x406   :  { %v4351_v53 = vunpack.c.l.b16 %v4309_v39  ;;  %15399 = vst [vmem:[#allocation181_spill] sm:$0xff] %v12678_v37  ;;  %2038 = vmatmul.bf16.gmra.mxu0 %v12678_v37  ;;  %v10920_v37 = vld [vmem:[#allocation2 + $0x628] sm:$0xf0] }
 0x408   :  { %v12667_v16 = vpop.f32.mrf.mxu2 }
 0x409   :  { %v11242_v26 = vpop.eup %11241 }
 0x40a   :  { %v3971_v59 = vpop.xlane.xlu1 %3970  ;;  %v4278_v7 = vmul.f32 %v11242_v26, %v12552_v1  ;;  %v3977_v1 = vpop.xlane.xlu2 %3976 }
 0x40b   :  { %v4057_v20 = vsub.f32 %v12560_v33, %v3971_v59  ;;  %v9839_v33 = vld [vmem:[#allocation2 + $0x4bc] sm:$0xf0]  ;;  %v4059_v39 = vsub.f32 %v12519_v50, %v3977_v1  ;;  %v12699_v50 = vsel %vm12410_vm2, %v12565_v35, -inf }
 0x40c   :  { %v4310_v24 = vpack.c.bf16 %v4278_v7, %v4278_v7  ;;  %v12682_v59 = vor.u32 %v10873_v17, %v9839_v33  ;;  %v3981_v17 = vsel %vm3956_vm3, %v12699_v50, -inf }
 0x40d   :  { %v4093_v45 = vmul.f32 1.442695, %v4057_v20  ;;  %2821 = vmatmul.bf16.gmra.mxu2 %v12669_v32 }
 0x40e   :  { %v4352_v46 = vunpack.c.l.b16 %v4310_v24  ;;  %15400 = vst [vmem:[#allocation182_spill] sm:$0xff] %v12682_v59  ;;  %2407 = vmatmul.bf16.gmra.mxu1 %v12682_v59 }
 0x40f   :  { %11243 = vpow2.f32 %v4093_v45 }
 0x410   :  { %v12676_v6 = vpop.f32.mrf.mxu2  ;;  %v4353_v54 = vpack.c.b16 %v4352_v46, %v4351_v53  ;;  %v9965_v53 = vld [vmem:[#allocation2 + $0x5a8] sm:$0xf]  ;;  %v10905_v46 = vld [vmem:[#allocation2 + $0x5b0] sm:$0xf0] }
 0x411   :  { %v12701_v49 = vor.u32 %v10905_v46, %v9965_v53  ;;  %v9977_v46 = vld [vmem:[#allocation2 + $0x5c0] sm:$0xf] }
 0x412   :  { %v3974_v22 = vpop.xlane.xlu1 %3973  ;;  %v4361_v26 = vsel %vm3956_vm3, %v4353_v54, 0  ;;  %v4097_v54 = vmul.f32 1.442695, %v4059_v39 }
 0x413   :  { %v4058_v7 = vsub.f32 %v12575_v11, %v3974_v22  ;;  %4370 = vmatpush.bf16.xpose.msrb.mxu3 %v4361_v26  ;;  %v12694_v11 = vpop.f32.mrf.mxu3  ;;  %15401 = vst [vmem:[#allocation183_spill] sm:$0xff] %v12701_v49 }
 0x415   :  { %v12688_v20 = vpop.eup %11243  ;;  %v4095_v24 = vmul.f32 1.442695, %v4058_v7 }
 0x416   :  { %v4161_v45 = vsel %vm3956_vm3, %v12688_v20, 0.0 }
 0x417   :  { %11245 = vpow2.f32 %v4095_v24  ;;  %4162 = vadd.xlane.f32.xlu2 %v4161_v45  ;;  %v12719_v24 = vsel %vm12428_vm4, %v12581_v34, -inf  ;;  %v12731_v34 = vsel %vm12410_vm2, %v12593_v48, -inf }
 0x418   :  { %v12692_v5 = vpop.f32.mrf.mxu2  ;;  %11247 = vpow2.f32 %v4097_v54  ;;  %v3984_v53 = vsel %vm3956_vm3, %v12719_v24, -inf  ;;  %v10908_v54 = vld [vmem:[#allocation2 + $0x5c8] sm:$0xf0]  ;;  %v3987_v48 = vsel %vm3956_vm3, %v12731_v34, -inf }
 0x41a   :  { %v4157_v38 = vpop.xlane.xlu1 %4156 }
 0x41b   :  { %11249 = vrcp.f32 %v4157_v38  ;;  %v12714_v7 = vpop.f32.mrf.mxu3 }
 0x41d   :  { %v12705_v1 = vpop.eup %11245  ;;  %2826 = vmatmul.bf16.gmra.mxu2 %v12701_v49  ;;  %v12738_v49 = vsel %vm12428_vm4, %v12604_v10, -inf }
 0x41e   :  { %v4164_v33 = vsel %vm3956_vm3, %v12705_v1, 0.0  ;;  %v12712_v35 = vpop.eup %11247 }
 0x41f   :  { %3982 = vmax.xlane.f32.xlu2 %v3981_v17  ;;  %4165 = vadd.xlane.f32.xlu1 %v4164_v33  ;;  %v4167_v45 = vsel %vm3956_vm3, %v12712_v35, 0.0 }
 0x420   :  { %v12710_v22 = vpop.f32.mrf.mxu2 }
 0x421   :  { %v11250_v39 = vpop.eup %11249 }
 0x422   :  { %v4160_v26 = vpop.xlane.xlu1 %4159  ;;  %v4279_v38 = vmul.f32 %v11250_v39, %v12585_v60 }
 0x423   :  { %11251 = vrcp.f32 %v4160_v26  ;;  %v12733_v26 = vor.u32 %v10908_v54, %v9977_v46  ;;  %v12746_v46 = vpop.f32.mrf.mxu3 }
 0x424   :  { %v4311_v39 = vpack.c.bf16 %v4279_v38, %v4279_v38 }
 0x425   :  { %15402 = vst [vmem:[#allocation184_spill] sm:$0xff] %v12733_v26 }
 0x426   :  { %v4391_v10 = vunpack.c.l.b16 %v4311_v39 }
 0x427   :  { %4168 = vadd.xlane.f32.xlu2 %v4167_v45  ;;  %3985 = vmax.xlane.f32.xlu1 %v3984_v53  ;;  %v3990_v53 = vsel %vm3956_vm3, %v12738_v49, -inf }
 0x428   :  { %v12726_v17 = vpop.f32.mrf.mxu2 }
 0x429   :  { %v11252_v33 = vpop.eup %11251 }
 0x42a   :  { %v3980_v32 = vpop.xlane.xlu1 %3979  ;;  %v4280_v60 = vmul.f32 %v11252_v33, %v12591_v36 }
 0x42b   :  { %v4060_v45 = vsub.f32 %v12600_v23, %v3980_v32 }
 0x42c   :  { %v4312_v0 = vpack.c.bf16 %v4280_v60, %v4280_v60  ;;  %v3743_v60 = vpop.f32.mrf.mxu3 }
 0x42d   :  { %v4099_v54 = vmul.f32 1.442695, %v4060_v45  ;;  %2831 = vmatmul.bf16.gmra.mxu2 %v12733_v26  ;;  %v9989_v45 = vld [vmem:[#allocation2 + $0x5d8] sm:$0xf] }
 0x42e   :  { %v4392_v55 = vunpack.c.l.b16 %v4312_v0  ;;  %v12760_v0 = vsel %vm12410_vm2, %v3743_v60, -inf  ;;  %v10917_v60 = vld [vmem:[#allocation2 + $0x610] sm:$0xf0] }
 0x42f   :  { %11253 = vpow2.f32 %v4099_v54  ;;  %3991 = vmax.xlane.f32.xlu2 %v3990_v53  ;;  %3988 = vmax.xlane.f32.xlu1 %v3987_v48  ;;  %15403 = vst [vmem:[#allocation185_spill] sm:$0xff] %v12760_v0  ;;  %v12762_v53 = vor.u32 %v10911_v18, %v9989_v45  ;;  %v10001_v54 = vld [vmem:[#allocation2 + $0x5f0] sm:$0xf]  ;;  %v10013_v18 = vld [vmem:[#allocation2 + $0x608] sm:$0xf] }
 0x430   :  { %v12749_v36 = vpop.f32.mrf.mxu2  ;;  %v4393_v23 = vpack.c.b16 %v4392_v55, %v4391_v10  ;;  %v4029_v55 = vsel %vm3956_vm3, %v12760_v0, -inf  ;;  %v10914_v10 = vld [vmem:[#allocation2 + $0x5f8] sm:$0xf0]  ;;  %v12778_v26 = vor.u32 %v10917_v60, %v10013_v18 }
 0x431   :  { %15404 = vst [vmem:[#allocation186_spill] sm:$0xff] %v12762_v53 }
 0x432   :  { %v4401_v32 = vsel %vm3956_vm3, %v4393_v23, 0  ;;  %15406 = vst [vmem:[#allocation188_spill] sm:$0xff] %v12778_v26 }
 0x433   :  { %4410 = vmatpush.bf16.xpose.msra.mxu3 %v4401_v32  ;;  %v12771_v32 = vor.u32 %v10914_v10, %v10001_v54  ;;  %v9849_v10 = vld [vmem:[#allocation2 + $0x4c8] sm:$0xf] }
 0x434   :  { %v12787_v21 = vor.u32 %v10877_v13, %v9849_v10  ;;  %v10037_v10 = vld [vmem:[#allocation2 + $0x638] sm:$0xf] }
 0x435   :  { %v12752_v38 = vpop.eup %11253  ;;  %15405 = vst [vmem:[#allocation187_spill] sm:$0xff] %v12771_v32 }
 0x436   :  { %v4170_v33 = vsel %vm3956_vm3, %v12752_v38, 0.0  ;;  %15408 = vst [vmem:[#allocation190_spill] sm:$0xff] %v12787_v21  ;;  %2043 = vmatmul.bf16.gmra.mxu0 %v12787_v21 }
 0x437   :  { %4171 = vadd.xlane.f32.xlu0 %v4170_v33 }
 0x438   :  { %v12756_v39 = vpop.f32.mrf.mxu2 }
 0x43d   :  { %2836 = vmatmul.bf16.gmra.mxu2 %v12762_v53  ;;  %v10025_v53 = vld [vmem:[#allocation2 + $0x620] sm:$0xf] }
 0x43e   :  { %v12785_v59 = vor.u32 %v10920_v37, %v10025_v53 }
 0x43f   :  { %4030 = vmax.xlane.f32.xlu0 %v4029_v55 }
 0x440   :  { %v12767_v48 = vpop.f32.mrf.mxu2  ;;  %15407 = vst [vmem:[#allocation189_spill] sm:$0xff] %v12785_v59 }
 0x448   :  { %v12769_v23 = vpop.f32.mrf.mxu2 }
 0x44d   :  { %2841 = vmatmul.bf16.gmra.mxu2 %v12771_v32  ;;  %v10876_v32 = vld [vmem:[#allocation2 + $0x4cc] sm:$0xf] }
 0x44e   :  { %v12789_v60 = vor.u32 %v10876_v32, %v9851_v62 }
 0x450   :  { %v12774_v33 = vpop.f32.mrf.mxu2  ;;  %15409 = vst [vmem:[#allocation191_spill] sm:$0xff] %v12789_v60  ;;  %2412 = vmatmul.bf16.gmra.mxu1 %v12789_v60 }
 0x454   :  { %v2029_v54 = vpop.f32.mrf.mxu0 }
 0x458   :  { %v12776_v45 = vpop.f32.mrf.mxu2 }
 0x45c   :  { %v2031_v31 = vpop.f32.mrf.mxu0 }
 0x45d   :  { %2846 = vmatmul.bf16.gmra.mxu2 %v12778_v26  ;;  %v2398_v40 = vpop.f32.mrf.mxu1 }
 0x45e   :  { %v2399_v18 = vadd.f32 %v2398_v40, %v2029_v54  ;;  %v10923_v40 = vld [vmem:[#allocation2 + $0x640] sm:$0xf0] }
 0x45f   :  { %v12800_v60 = vor.u32 %v10923_v40, %v10037_v10 }
 0x460   :  { %v12781_v55 = vpop.f32.mrf.mxu2  ;;  %v2768_v26 = vadd.f32 %v12625_v15, %v2399_v18  ;;  %v9861_v18 = vld [vmem:[#allocation2 + $0x4e0] sm:$0xf] }
 0x461   :  { %15410 = vst [vmem:[#allocation192_spill] sm:$0xff] %v12800_v60 }
 0x462   :  { %v2983_v53 = vpack.c.bf16 %v2768_v26, %v2768_v26 }
 0x464   :  { %v4344_v62 = vunpack.c.l.b16 %v2983_v53  ;;  %v2034_v26 = vpop.f32.mrf.mxu0 }
 0x465   :  { %v2400_v37 = vpop.f32.mrf.mxu1 }
 0x466   :  { %v2401_v28 = vadd.f32 %v2400_v37, %v2031_v31 }
 0x468   :  { %v12783_v27 = vpop.f32.mrf.mxu2  ;;  %v2770_v13 = vadd.f32 %v12631_v43, %v2401_v28  ;;  %v10880_v28 = vld [vmem:[#allocation2 + $0x4e8] sm:$0xf0]  ;;  %v10879_v43 = vld [vmem:[#allocation2 + $0x4e4] sm:$0xf] }
 0x469   :  { %v12806_v53 = vor.u32 %v10880_v28, %v9861_v18 }
 0x46a   :  { %v2984_v32 = vpack.c.bf16 %v2770_v13, %v2770_v13  ;;  %v9863_v13 = vld [vmem:[#allocation2 + $0x4ec] sm:$0xf0] }
 0x46b   :  { %15411 = vst [vmem:[#allocation193_spill] sm:$0xff] %v12806_v53  ;;  %v12808_v19 = vor.u32 %v10879_v43, %v9863_v13  ;;  %2048 = vmatmul.bf16.gmra.mxu0 %v12806_v53  ;;  %v10882_v53 = vld [vmem:[#allocation2 + $0x4fc] sm:$0xf] }
 0x46c   :  { %v4345_v21 = vunpack.c.l.b16 %v2984_v32 }
 0x46d   :  { %2851 = vmatmul.bf16.gmra.mxu2 %v12785_v59  ;;  %v2403_v31 = vpop.f32.mrf.mxu1  ;;  %15412 = vst [vmem:[#allocation194_spill] sm:$0xff] %v12808_v19  ;;  %2417 = vmatmul.bf16.gmra.mxu1 %v12808_v19 }
 0x46e   :  { %v4347_v59 = vpack.c.b16 %v4345_v21, %v4344_v62  ;;  %v2404_v37 = vadd.f32 %v2403_v31, %v2034_v26  ;;  %v10049_v21 = vld [vmem:[#allocation2 + $0x650] sm:$0xf] }
 0x470   :  { %v12795_v30 = vpop.f32.mrf.mxu2  ;;  %10211 = vmatmul.msk.bf16.vlgmr.msrb.gmra.mxu3 %vm3956_vm3, %v4347_v59  ;;  %v2773_v10 = vadd.f32 %v12644_v29, %v2404_v37  ;;  %v10926_v59 = vld [vmem:[#allocation2 + $0x658] sm:$0xf0] }
 0x471   :  { %v12815_v0 = vor.u32 %v10926_v59, %v10049_v21 }
 0x472   :  { %v2985_v40 = vpack.c.bf16 %v2773_v10, %v2773_v10  ;;  %v9873_v10 = vld [vmem:[#allocation2 + $0x4f8] sm:$0xf] }
 0x473   :  { %15414 = vst [vmem:[#allocation196_spill] sm:$0xff] %v12815_v0 }
 0x474   :  { %v4346_v32 = vunpack.c.l.b16 %v2985_v40  ;;  %v10883_v40 = vld [vmem:[#allocation2 + $0x500] sm:$0xf0] }
 0x475   :  { %v2405_v26 = vpop.f32.mrf.mxu1 }
 0x476   :  { %v4348_v18 = vpack.c.b16 %v4346_v32, %v4346_v32  ;;  %v12822_v32 = vor.u32 %v10883_v40, %v9873_v10 }
 0x478   :  { %v12798_v54 = vpop.f32.mrf.mxu2  ;;  %15416 = vst [vmem:[#allocation198_spill] sm:$0xff] %v12822_v32 }
 0x47b   :  { %2053 = vmatmul.bf16.gmra.mxu0 %v12822_v32 }
 0x47d   :  { %2856 = vmatmul.bf16.gmra.mxu2 %v12800_v60  ;;  %v2036_v60 = vpop.f32.mrf.mxu0 }
 0x47e   :  { %v2406_v28 = vadd.f32 %v2405_v26, %v2036_v60  ;;  %v9875_v60 = vld [vmem:[#allocation2 + $0x504] sm:$0xf0] }
 0x480   :  { %v12804_v15 = vpop.f32.mrf.mxu2  ;;  %10212 = vmatmul.msk.bf16.gmra.mxu3 %vm3956_vm3, %v4348_v18  ;;  %v2775_v29 = vadd.f32 %v12649_v51, %v2406_v28  ;;  %v12825_v18 = vor.u32 %v10882_v53, %v9875_v60 }
 0x482   :  { %v2986_v19 = vpack.c.bf16 %v2775_v29, %v2775_v29  ;;  %15417 = vst [vmem:[#allocation199_spill] sm:$0xff] %v12825_v18  ;;  %2422 = vmatmul.bf16.gmra.mxu1 %v12825_v18 }
 0x485   :  { %v2039_v37 = vpop.f32.mrf.mxu0 }
 0x488   :  { %v12813_v62 = vpop.f32.mrf.mxu2 }
 0x489   :  { %15413 = vst [vmem:[#allocation195_spill] sm:$0xff] %v12813_v62 }
 0x48a   :  { %v4163_v31 = vpop.xlane.xlu2 %4162 }
 0x48b   :  { %11255 = vrcp.f32 %v4163_v31  ;;  %v2408_v13 = vpop.f32.mrf.mxu1 }
 0x48c   :  { %v2409_v62 = vadd.f32 %v2408_v13, %v2039_v37  ;;  %v4384_v37 = vunpack.c.l.b16 %v2986_v19 }
 0x48d   :  { %2861 = vmatmul.bf16.gmra.mxu2 %v12815_v0  ;;  %v10061_v0 = vld [vmem:[#allocation2 + $0x668] sm:$0xf] }
 0x48e   :  { %v2778_v51 = vadd.f32 %v12656_v63, %v2409_v62 }
 0x490   :  { %v12820_v43 = vpop.f32.mrf.mxu2  ;;  %v2987_v13 = vpack.c.bf16 %v2778_v51, %v2778_v51 }
 0x491   :  { %15415 = vst [vmem:[#allocation197_spill] sm:$0xff] %v12820_v43  ;;  %v11256_v26 = vpop.eup %11255  ;;  %v10929_v43 = vld [vmem:[#allocation2 + $0x670] sm:$0xf0] }
 0x492   :  { %v3983_v21 = vpop.xlane.xlu2 %3982  ;;  %v4166_v59 = vpop.xlane.xlu1 %4165  ;;  %v4281_v29 = vmul.f32 %v11256_v26, %v12688_v20  ;;  %v12833_v53 = vor.u32 %v10929_v43, %v10061_v0 }
 0x493   :  { %v4061_v31 = vsub.f32 %v12699_v50, %v3983_v21  ;;  %11257 = vrcp.f32 %v4166_v59  ;;  %v4385_v50 = vunpack.c.l.b16 %v2987_v13 }
 0x494   :  { %15418 = vst [vmem:[#allocation200_spill] sm:$0xff] %v12833_v53  ;;  %v4313_v59 = vpack.c.bf16 %v4281_v29, %v4281_v29 }
 0x495   :  { %v4101_v28 = vmul.f32 1.442695, %v4061_v31  ;;  %v4387_v60 = vpack.c.b16 %v4385_v50, %v4384_v37  ;;  %v12849_v37 = vsel %vm12410_vm2, %v12609_v47, -inf }
 0x496   :  { %v4431_v43 = vunpack.c.l.b16 %v4313_v59  ;;  %v10073_v59 = vld [vmem:[#allocation2 + $0x680] sm:$0xf] }
 0x497   :  { %11259 = vpow2.f32 %v4101_v28  ;;  %10213 = vmatmul.msk.bf16.vlgmr.msra.gmra.mxu3 %vm3956_vm3, %v4387_v60  ;;  %v10932_v60 = vld [vmem:[#allocation2 + $0x688] sm:$0xf0] }
 0x498   :  { %v12831_v10 = vpop.f32.mrf.mxu2 }
 0x499   :  { %v11258_v40 = vpop.eup %11257 }
 0x49a   :  { %v4169_v21 = vpop.xlane.xlu2 %4168  ;;  %v3986_v63 = vpop.xlane.xlu1 %3985  ;;  %v4282_v62 = vmul.f32 %v11258_v40, %v12705_v1 }
 0x49b   :  { %v4062_v31 = vsub.f32 %v12719_v24, %v3986_v63  ;;  %v3993_v63 = vsel %vm3956_vm3, %v12849_v37, -inf }
 0x49c   :  { %v4314_v32 = vpack.c.bf16 %v4282_v62, %v4282_v62 }
 0x49d   :  { %v12838_v19 = vpop.eup %11259  ;;  %v4103_v20 = vmul.f32 1.442695, %v4062_v31  ;;  %2866 = vmatmul.bf16.gmra.mxu2 %v12833_v53  ;;  %v12861_v31 = vor.u32 %v10932_v60, %v10073_v59  ;;  %v10085_v59 = vld [vmem:[#allocation2 + $0x698] sm:$0xf]  ;;  %v10935_v60 = vld [vmem:[#allocation2 + $0x6a0] sm:$0xf0] }
 0x49e   :  { %v4173_v0 = vsel %vm3956_vm3, %v12838_v19, 0.0  ;;  %v4432_v26 = vunpack.c.l.b16 %v4314_v32 }
 0x49f   :  { %11261 = vpow2.f32 %v4103_v20  ;;  %4174 = vadd.xlane.f32.xlu1 %v4173_v0  ;;  %15419 = vst [vmem:[#allocation201_spill] sm:$0xff] %v12861_v31 }
 0x4a0   :  { %v12843_v1 = vpop.f32.mrf.mxu2  ;;  %v4433_v51 = vpack.c.b16 %v4432_v26, %v4431_v43  ;;  %11263 = vrcp.f32 %v4169_v21 }
 0x4a2   :  { %v3992_v28 = vpop.xlane.xlu2 %3991  ;;  %v3989_v24 = vpop.xlane.xlu1 %3988  ;;  %v4441_v29 = vsel %vm3956_vm3, %v4433_v51, 0 }
 0x4a3   :  { %v4063_v13 = vsub.f32 %v12731_v34, %v3989_v24  ;;  %4450 = vmatpush.bf16.xpose.msrb.mxu3 %v4441_v29  ;;  %v4064_v32 = vsub.f32 %v12738_v49, %v3992_v28  ;;  %v12866_v49 = vsel %vm12428_vm4, %v12613_v52, -inf }
 0x4a4   :  { %v3996_v43 = vsel %vm3956_vm3, %v12866_v49, -inf }
 0x4a5   :  { %v12852_v50 = vpop.eup %11261  ;;  %v4105_v40 = vmul.f32 1.442695, %v4063_v13  ;;  %v4107_v34 = vmul.f32 1.442695, %v4064_v32  ;;  %v12884_v32 = vsel %vm12410_vm2, %v12617_v25, -inf }
 0x4a6   :  { %v4176_v62 = vsel %vm3956_vm3, %v12852_v50, 0.0  ;;  %v11264_v20 = vpop.eup %11263 }
 0x4a7   :  { %3994 = vmax.xlane.f32.xlu1 %v3993_v63  ;;  %4177 = vadd.xlane.f32.xlu2 %v4176_v62  ;;  %11265 = vpow2.f32 %v4105_v40  ;;  %v4283_v26 = vmul.f32 %v11264_v20, %v12712_v35  ;;  %v12892_v20 = vor.u32 %v10935_v60, %v10085_v59 }
 0x4a8   :  { %v12859_v47 = vpop.f32.mrf.mxu2 }
 0x4a9   :  { %v4315_v29 = vpack.c.bf16 %v4283_v26, %v4283_v26  ;;  %15420 = vst [vmem:[#allocation202_spill] sm:$0xff] %v12892_v20 }
 0x4aa   :  { %v4172_v21 = vpop.xlane.xlu0 %4171 }
 0x4ab   :  { %11267 = vrcp.f32 %v4172_v21  ;;  %v4471_v63 = vunpack.c.l.b16 %v4315_v29 }
 0x4ac   :  { %11269 = vpow2.f32 %v4107_v34 }
 0x4ad   :  { %2871 = vmatmul.bf16.gmra.mxu2 %v12861_v31  ;;  %v12869_v0 = vpop.eup %11265 }
 0x4ae   :  { %v4179_v51 = vsel %vm3956_vm3, %v12869_v0, 0.0 }
 0x4af   :  { %3997 = vmax.xlane.f32.xlu2 %v3996_v43  ;;  %4180 = vadd.xlane.f32.xlu1 %v4179_v51  ;;  %v12898_v43 = vsel %vm12428_vm4, %v12623_v4, -inf }
 0x4b0   :  { %v12876_v28 = vpop.f32.mrf.mxu2  ;;  %v4002_v26 = vsel %vm3956_vm3, %v12898_v43, -inf }
 0x4b1   :  { %v11268_v24 = vpop.eup %11267 }
 0x4b2   :  { %v4284_v52 = vmul.f32 %v11268_v24, %v12752_v38  ;;  %v12879_v13 = vpop.eup %11269  ;;  %v3999_v38 = vsel %vm3956_vm3, %v12884_v32, -inf  ;;  %v10097_v24 = vld [vmem:[#allocation2 + $0x6b0] sm:$0xf] }
 0x4b3   :  { %v4182_v35 = vsel %vm3956_vm3, %v12879_v13, 0.0 }
 0x4b4   :  { %v4316_v40 = vpack.c.bf16 %v4284_v52, %v4284_v52  ;;  %v10938_v52 = vld [vmem:[#allocation2 + $0x6b8] sm:$0xf0] }
 0x4b6   :  { %v4472_v62 = vunpack.c.l.b16 %v4316_v40  ;;  %v12907_v40 = vor.u32 %v10938_v52, %v10097_v24 }
 0x4b7   :  { %4183 = vadd.xlane.f32.xlu2 %v4182_v35  ;;  %4000 = vmax.xlane.f32.xlu1 %v3999_v38 }
 0x4b8   :  { %v12890_v34 = vpop.f32.mrf.mxu2  ;;  %v4473_v21 = vpack.c.b16 %v4472_v62, %v4471_v63  ;;  %15421 = vst [vmem:[#allocation203_spill] sm:$0xff] %v12907_v40  ;;  %v2041_v63 = vpop.f32.mrf.mxu0 }
 0x4b9   :  { %v2410_v62 = vpop.f32.mrf.mxu1 }
 0x4ba   :  { %v4481_v25 = vsel %vm3956_vm3, %v4473_v21, 0  ;;  %v2411_v59 = vadd.f32 %v2410_v62, %v2041_v63  ;;  %v9885_v62 = vld [vmem:[#allocation2 + $0x510] sm:$0xf] }
 0x4bb   :  { %4490 = vmatpush.bf16.xpose.msra.mxu3 %v4481_v25 }
 0x4bc   :  { %v2780_v60 = vadd.f32 %v12667_v16, %v2411_v59  ;;  %v10886_v16 = vld [vmem:[#allocation2 + $0x518] sm:$0xf0]  ;;  %v10885_v59 = vld [vmem:[#allocation2 + $0x514] sm:$0xf] }
 0x4bd   :  { %2876 = vmatmul.bf16.gmra.mxu2 %v12892_v20 }
 0x4be   :  { %v2988_v38 = vpack.c.bf16 %v2780_v60, %v2780_v60 }
 0x4bf   :  { %4003 = vmax.xlane.f32.xlu2 %v4002_v26 }
 0x4c0   :  { %v12903_v51 = vpop.f32.mrf.mxu2  ;;  %v4386_v25 = vunpack.c.l.b16 %v2988_v38  ;;  %v2044_v52 = vpop.f32.mrf.mxu0  ;;  %v12923_v38 = vor.u32 %v10886_v16, %v9885_v62 }
 0x4c2   :  { %v4388_v26 = vpack.c.b16 %v4386_v25, %v4386_v25  ;;  %15425 = vst [vmem:[#allocation207_spill] sm:$0xff] %v12923_v38  ;;  %v9887_v25 = vld [vmem:[#allocation2 + $0x51c] sm:$0xf0]  ;;  %2058 = vmatmul.bf16.gmra.mxu0 %v12923_v38  ;;  %v10888_v38 = vld [vmem:[#allocation2 + $0x52c] sm:$0xf] }
 0x4c4   :  { %10214 = vmatmul.msk.bf16.gmra.mxu3 %vm3956_vm3, %v4388_v26  ;;  %v12925_v26 = vor.u32 %v10885_v59, %v9887_v25 }
 0x4c6   :  { %15426 = vst [vmem:[#allocation208_spill] sm:$0xff] %v12925_v26  ;;  %2427 = vmatmul.bf16.gmra.mxu1 %v12925_v26 }
 0x4c8   :  { %v12905_v29 = vpop.f32.mrf.mxu2  ;;  %v2046_v18 = vpop.f32.mrf.mxu0 }
 0x4cd   :  { %2881 = vmatmul.bf16.gmra.mxu2 %v12907_v40  ;;  %v2413_v40 = vpop.f32.mrf.mxu1 }
 0x4ce   :  { %v2414_v20 = vadd.f32 %v2413_v40, %v2044_v52 }
 0x4d0   :  { %v12910_v35 = vpop.f32.mrf.mxu2  ;;  %v2783_v31 = vadd.f32 %v12676_v6, %v2414_v20 }
 0x4d2   :  { %v2989_v60 = vpack.c.bf16 %v2783_v31, %v2783_v31 }
 0x4d4   :  { %v4424_v6 = vunpack.c.l.b16 %v2989_v60  ;;  %v9897_v60 = vld [vmem:[#allocation2 + $0x528] sm:$0xf] }
 0x4d5   :  { %v2415_v63 = vpop.f32.mrf.mxu1 }
 0x4d8   :  { %v12912_v4 = vpop.f32.mrf.mxu2 }
 0x4e0   :  { %v12915_v21 = vpop.f32.mrf.mxu2 }
 0x4e1   :  { %15422 = vst [vmem:[#allocation204_spill] sm:$0xff] %v12915_v21  ;;  %v2416_v21 = vadd.f32 %v2415_v63, %v2046_v18 }
 0x4e8   :  { %v12918_v24 = vpop.f32.mrf.mxu2  ;;  %v2049_v31 = vpop.f32.mrf.mxu0 }
 0x4e9   :  { %15423 = vst [vmem:[#allocation205_spill] sm:$0xff] %v12918_v24  ;;  %v2785_v24 = vadd.f32 %v12692_v5, %v2416_v21 }
 0x4ea   :  { %v2418_v63 = vpop.f32.mrf.mxu1 }
 0x4eb   :  { %v2990_v20 = vpack.c.bf16 %v2785_v24, %v2785_v24  ;;  %v2419_v62 = vadd.f32 %v2418_v63, %v2049_v31  ;;  %v10889_v24 = vld [vmem:[#allocation2 + $0x530] sm:$0xf0] }
 0x4ed   :  { %v4425_v52 = vunpack.c.l.b16 %v2990_v20  ;;  %v2788_v16 = vadd.f32 %v12710_v22, %v2419_v62  ;;  %v12938_v20 = vor.u32 %v10889_v24, %v9897_v60 }
 0x4ef   :  { %v2991_v5 = vpack.c.bf16 %v2788_v16, %v2788_v16  ;;  %15429 = vst [vmem:[#allocation211_spill] sm:$0xff] %v12938_v20  ;;  %2063 = vmatmul.bf16.gmra.mxu0 %v12938_v20  ;;  %v10892_v20 = vld [vmem:[#allocation2 + $0x548] sm:$0xf0] }
 0x4f0   :  { %v12921_v53 = vpop.f32.mrf.mxu2  ;;  %v2051_v25 = vpop.f32.mrf.mxu0 }
 0x4f1   :  { %15424 = vst [vmem:[#allocation206_spill] sm:$0xff] %v12921_v53  ;;  %v4427_v53 = vpack.c.b16 %v4425_v52, %v4424_v6  ;;  %v4426_v59 = vunpack.c.l.b16 %v2991_v5  ;;  %v9899_v6 = vld [vmem:[#allocation2 + $0x534] sm:$0xf0] }
 0x4f2   :  { %v2420_v26 = vpop.f32.mrf.mxu1 }
 0x4f3   :  { %10215 = vmatmul.msk.bf16.vlgmr.msrb.gmra.mxu3 %vm3956_vm3, %v4427_v53  ;;  %v4428_v53 = vpack.c.b16 %v4426_v59, %v4426_v59  ;;  %v2421_v52 = vadd.f32 %v2420_v26, %v2051_v25 }
 0x4f5   :  { %v2790_v22 = vadd.f32 %v12726_v17, %v2421_v52 }
 0x4f7   :  { %v2992_v5 = vpack.c.bf16 %v2790_v22, %v2790_v22 }
 0x4f8   :  { %v12930_v40 = vpop.f32.mrf.mxu2  ;;  %v2054_v63 = vpop.f32.mrf.mxu0 }
 0x4ff   :  { %v2423_v16 = vpop.f32.mrf.mxu1 }
 0x500   :  { %v12933_v18 = vpop.f32.mrf.mxu2  ;;  %v2424_v60 = vadd.f32 %v2423_v16, %v2054_v63 }
 0x501   :  { %15427 = vst [vmem:[#allocation209_spill] sm:$0xff] %v12933_v18  ;;  %v12940_v18 = vor.u32 %v10888_v38, %v9899_v6  ;;  %v4464_v38 = vunpack.c.l.b16 %v2992_v5  ;;  %v9909_v6 = vld [vmem:[#allocation2 + $0x540] sm:$0xf] }
 0x502   :  { %v2793_v26 = vadd.f32 %v12749_v36, %v2424_v60  ;;  %v12951_v52 = vor.u32 %v10892_v20, %v9909_v6 }
 0x503   :  { %15430 = vst [vmem:[#allocation212_spill] sm:$0xff] %v12940_v18  ;;  %2432 = vmatmul.bf16.gmra.mxu1 %v12940_v18  ;;  %10216 = vmatmul.msk.bf16.gmra.mxu3 %vm3956_vm3, %v4428_v53  ;;  %v10891_v53 = vld [vmem:[#allocation2 + $0x544] sm:$0xf] }
 0x504   :  { %v2993_v59 = vpack.c.bf16 %v2793_v26, %v2793_v26  ;;  %15432 = vst [vmem:[#allocation214_spill] sm:$0xff] %v12951_v52  ;;  %2068 = vmatmul.bf16.gmra.mxu0 %v12951_v52  ;;  %v10903_v52 = vld [vmem:[#allocation2 + $0x5a4] sm:$0xf] }
 0x506   :  { %v4465_v24 = vunpack.c.l.b16 %v2993_v59 }
 0x508   :  { %v12936_v21 = vpop.f32.mrf.mxu2  ;;  %v4467_v63 = vpack.c.b16 %v4465_v24, %v4464_v38 }
 0x509   :  { %15428 = vst [vmem:[#allocation210_spill] sm:$0xff] %v12936_v21 }
 0x510   :  { %v12946_v31 = vpop.f32.mrf.mxu2 }
 0x511   :  { %15431 = vst [vmem:[#allocation213_spill] sm:$0xff] %v12946_v31  ;;  %v9911_v31 = vld [vmem:[#allocation2 + $0x54c] sm:$0xf0] }
 0x512   :  { %v4175_v62 = vpop.xlane.xlu1 %4174 }
 0x513   :  { %11271 = vrcp.f32 %v4175_v62  ;;  %v12954_v62 = vor.u32 %v10891_v53, %v9911_v31  ;;  %10217 = vmatmul.msk.bf16.vlgmr.msra.gmra.mxu3 %vm3956_vm3, %v4467_v63  ;;  %v12974_v63 = vsel %vm12410_vm2, %v12629_v3, -inf }
 0x515   :  { %15433 = vst [vmem:[#allocation215_spill] sm:$0xff] %v12954_v62  ;;  %2437 = vmatmul.bf16.gmra.mxu1 %v12954_v62 }
 0x518   :  { %v12949_v25 = vpop.f32.mrf.mxu2 }
 0x519   :  { %v11272_v21 = vpop.eup %11271 }
 0x51a   :  { %v4178_v18 = vpop.xlane.xlu2 %4177  ;;  %v3995_v17 = vpop.xlane.xlu1 %3994  ;;  %v4285_v16 = vmul.f32 %v11272_v21, %v12838_v19 }
 0x51b   :  { %11273 = vrcp.f32 %v4178_v18  ;;  %v4065_v22 = vsub.f32 %v12849_v37, %v3995_v17 }
 0x51c   :  { %v4317_v37 = vpack.c.bf16 %v4285_v16, %v4285_v16 }
 0x51d   :  { %v4109_v36 = vmul.f32 1.442695, %v4065_v22 }
 0x51e   :  { %v4511_v19 = vunpack.c.l.b16 %v4317_v37  ;;  %v4005_v37 = vsel %vm3956_vm3, %v12974_v63, -inf }
 0x51f   :  { %11275 = vpow2.f32 %v4109_v36 }
 0x520   :  { %v12960_v20 = vpop.f32.mrf.mxu2 }
 0x521   :  { %v11274_v5 = vpop.eup %11273 }
 0x522   :  { %v3998_v60 = vpop.xlane.xlu2 %3997  ;;  %v4286_v18 = vmul.f32 %v11274_v5, %v12852_v50  ;;  %v4181_v26 = vpop.xlane.xlu1 %4180 }
 0x523   :  { %v4066_v31 = vsub.f32 %v12866_v49, %v3998_v60  ;;  %11277 = vrcp.f32 %v4181_v26 }
 0x524   :  { %v4318_v38 = vpack.c.bf16 %v4286_v18, %v4286_v18 }
 0x525   :  { %v12964_v59 = vpop.eup %11275  ;;  %v4111_v24 = vmul.f32 1.442695, %v4066_v31 }
 0x526   :  { %v4185_v6 = vsel %vm3956_vm3, %v12964_v59, 0.0  ;;  %v4512_v21 = vunpack.c.l.b16 %v4318_v38 }
 0x527   :  { %11279 = vpow2.f32 %v4111_v24  ;;  %4186 = vadd.xlane.f32.xlu1 %v4185_v6 }
 0x528   :  { %v12968_v53 = vpop.f32.mrf.mxu2  ;;  %v4513_v17 = vpack.c.b16 %v4512_v21, %v4511_v19  ;;  %v12989_v19 = vsel %vm12428_vm4, %v12646_v57, -inf }
 0x529   :  { %v11278_v49 = vpop.eup %11277 }
 0x52a   :  { %v4184_v50 = vpop.xlane.xlu2 %4183  ;;  %v4521_v22 = vsel %vm3956_vm3, %v4513_v17, 0  ;;  %v4001_v36 = vpop.xlane.xlu1 %4000  ;;  %v4287_v31 = vmul.f32 %v11278_v49, %v12869_v0 }
 0x52b   :  { %11281 = vrcp.f32 %v4184_v50  ;;  %4530 = vmatpush.bf16.xpose.msrb.mxu3 %v4521_v22  ;;  %v4067_v16 = vsub.f32 %v12884_v32, %v4001_v36  ;;  %v4008_v22 = vsel %vm3956_vm3, %v12989_v19, -inf }
 0x52c   :  { %v4319_v32 = vpack.c.bf16 %v4287_v31, %v4287_v31 }
 0x52d   :  { %v12977_v5 = vpop.eup %11279  ;;  %v4113_v60 = vmul.f32 1.442695, %v4067_v16 }
 0x52e   :  { %v4188_v18 = vsel %vm3956_vm3, %v12977_v5, 0.0  ;;  %v4551_v49 = vunpack.c.l.b16 %v4319_v32  ;;  %v10895_v32 = vld [vmem:[#allocation2 + $0x560] sm:$0xf0] }
 0x52f   :  { %4189 = vadd.xlane.f32.xlu2 %v4188_v18  ;;  %4006 = vmax.xlane.f32.xlu1 %v4005_v37  ;;  %11283 = vpow2.f32 %v4113_v60  ;;  %v13004_v37 = vsel %vm12410_vm2, %v12653_v2, -inf  ;;  %v9921_v2 = vld [vmem:[#allocation2 + $0x558] sm:$0xf] }
 0x530   :  { %v2872_v3 = vpop.f32.mrf.mxu2 }
 0x531   :  { %v11282_v26 = vpop.eup %11281  ;;  %v2873_v17 = vadd.f32 %v2872_v3, %v11759_v56 }
 0x532   :  { %v4004_v38 = vpop.xlane.xlu2 %4003  ;;  %v4288_v24 = vmul.f32 %v11282_v26, %v12879_v13  ;;  %v2506_v13 = vadd.f32 %v11769_v9, %v11767_v8 }
 0x533   :  { %v4068_v6 = vsub.f32 %v12898_v43, %v4004_v38  ;;  %v3025_v56 = vpack.c.bf16 %v2873_v17, %v2873_v17  ;;  %v4011_v38 = vsel %vm3956_vm3, %v13004_v37, -inf  ;;  %v2425_v17 = vpop.f32.mrf.mxu1 }
 0x534   :  { %v4320_v21 = vpack.c.bf16 %v4288_v24, %v4288_v24 }
 0x535   :  { %v4115_v0 = vmul.f32 1.442695, %v4068_v6  ;;  %v12992_v50 = vpop.eup %11283  ;;  %v13008_v9 = vunpack.c.l.b16 %v3025_v56  ;;  %v10894_v6 = vld [vmem:[#allocation2 + $0x55c] sm:$0xf] }
 0x536   :  { %v4552_v36 = vunpack.c.l.b16 %v4320_v21  ;;  %v4191_v57 = vsel %vm3956_vm3, %v12992_v50, 0.0  ;;  %v2056_v21 = vpop.f32.mrf.mxu0 }
 0x537   :  { %11285 = vpow2.f32 %v4115_v0  ;;  %4009 = vmax.xlane.f32.xlu2 %v4008_v22  ;;  %4192 = vadd.xlane.f32.xlu1 %v4191_v57  ;;  %v13020_v22 = vor.u32 %v10895_v32, %v9921_v2  ;;  %v10897_v2 = vld [vmem:[#allocation2 + $0x574] sm:$0xf] }
 0x538   :  { %v2874_v43 = vpop.f32.mrf.mxu2  ;;  %v4553_v16 = vpack.c.b16 %v4552_v36, %v4551_v49  ;;  %v9923_v49 = vld [vmem:[#allocation2 + $0x564] sm:$0xf0]  ;;  %v2426_v36 = vadd.f32 %v2425_v17, %v2056_v21 }
 0x539   :  { %v2875_v60 = vadd.f32 %v2874_v43, %v2506_v13  ;;  %15435 = vst [vmem:[#allocation217_spill] sm:$0xff] %v13020_v22  ;;  %v13022_v13 = vor.u32 %v10894_v6, %v9923_v49  ;;  %2073 = vmatmul.bf16.gmra.mxu0 %v13020_v22  ;;  %v13029_v43 = vsel %vm12428_vm4, %v12664_v12, -inf  ;;  %v9935_v12 = vld [vmem:[#allocation2 + $0x57c] sm:$0xf0] }
 0x53a   :  { %v4561_v18 = vsel %vm3956_vm3, %v4553_v16, 0  ;;  %v2795_v57 = vadd.f32 %v12756_v39, %v2426_v36  ;;  %v4014_v56 = vsel %vm3956_vm3, %v13029_v43, -inf  ;;  %v2511_v39 = vadd.f32 %v11792_v42, %v11790_v41 }
 0x53b   :  { %v3026_v31 = vpack.c.bf16 %v2875_v60, %v2875_v60  ;;  %4570 = vmatpush.bf16.xpose.msra.mxu3 %v4561_v18  ;;  %15436 = vst [vmem:[#allocation218_spill] sm:$0xff] %v13022_v13  ;;  %2442 = vmatmul.bf16.gmra.mxu1 %v13022_v13  ;;  %v13039_v21 = vor.u32 %v10897_v2, %v9935_v12 }
 0x53c   :  { %v2994_v16 = vpack.c.bf16 %v2795_v57, %v2795_v57 }
 0x53d   :  { %v13006_v8 = vpop.eup %11285  ;;  %v13010_v3 = vunpack.c.l.b16 %v3026_v31  ;;  %15438 = vst [vmem:[#allocation220_spill] sm:$0xff] %v13039_v21 }
 0x53e   :  { %v4194_v26 = vsel %vm3956_vm3, %v13006_v8, 0.0  ;;  %v4466_v60 = vunpack.c.l.b16 %v2994_v16 }
 0x53f   :  { %4195 = vadd.xlane.f32.xlu2 %v4194_v26  ;;  %4012 = vmax.xlane.f32.xlu1 %v4011_v38  ;;  %v9933_v26 = vld [vmem:[#allocation2 + $0x570] sm:$0xf]  ;;  %v10898_v38 = vld [vmem:[#allocation2 + $0x578] sm:$0xf0]  ;;  %v2059_v2 = vpop.f32.mrf.mxu0 }
 0x540   :  { %v13018_v0 = vpop.f32.mrf.mxu2  ;;  %v4468_v31 = vpack.c.b16 %v4466_v60, %v4466_v60  ;;  %v13037_v6 = vor.u32 %v10898_v38, %v9933_v26  ;;  %v10901_v60 = vld [vmem:[#allocation2 + $0x590] sm:$0xf0] }
 0x541   :  { %15434 = vst [vmem:[#allocation216_spill] sm:$0xff] %v13018_v0 }
 0x542   :  { %10218 = vmatmul.msk.bf16.gmra.mxu3 %vm3956_vm3, %v4468_v31  ;;  %15437 = vst [vmem:[#allocation219_spill] sm:$0xff] %v13037_v6  ;;  %v9947_v31 = vld [vmem:[#allocation2 + $0x594] sm:$0xf0] }
 0x543   :  { %v2428_v12 = vpop.f32.mrf.mxu1 }
 0x547   :  { %4015 = vmax.xlane.f32.xlu2 %v4014_v56  ;;  %v9945_v56 = vld [vmem:[#allocation2 + $0x588] sm:$0xf] }
 0x548   :  { %v2879_v18 = vpop.f32.mrf.mxu2 }
 0x549   :  { %v2880_v32 = vadd.f32 %v2879_v18, %v2511_v39  ;;  %2078 = vmatmul.bf16.gmra.mxu0 %v13037_v6  ;;  %v10900_v18 = vld [vmem:[#allocation2 + $0x58c] sm:$0xf]  ;;  %v13050_v39 = vor.u32 %v10901_v60, %v9945_v56 }
 0x54a   :  { %v13052_v26 = vor.u32 %v10900_v18, %v9947_v31 }
 0x54b   :  { %v3028_v49 = vpack.c.bf16 %v2880_v32, %v2880_v32  ;;  %2447 = vmatmul.bf16.gmra.mxu1 %v13039_v21  ;;  %15441 = vst [vmem:[#allocation223_spill] sm:$0xff] %v13050_v39  ;;  %v2429_v32 = vadd.f32 %v2428_v12, %v2059_v2 }
 0x54c   :  { %15442 = vst [vmem:[#allocation224_spill] sm:$0xff] %v13052_v26 }
 0x54d   :  { %v13044_v16 = vunpack.c.l.b16 %v3028_v49  ;;  %v2798_v49 = vadd.f32 %v12767_v48, %v2429_v32 }
 0x54f   :  { %15439 = vst [vmem:[#allocation221_spill] sm:$0xff] %v13044_v16  ;;  %v2995_v56 = vpack.c.bf16 %v2798_v49, %v2798_v49 }
 0x550   :  { %v2882_v17 = vpop.f32.mrf.mxu2 }
 0x551   :  { %v2883_v36 = vadd.f32 %v2882_v17, %v11801_v61  ;;  %v13054_v61 = vpop.f32.mrf.mxu3  ;;  %v4504_v42 = vunpack.c.l.b16 %v2995_v56 }
 0x553   :  { %v3029_v57 = vpack.c.bf16 %v2883_v36, %v2883_v36  ;;  %v2061_v36 = vpop.f32.mrf.mxu0 }
 0x555   :  { %v13046_v41 = vunpack.c.l.b16 %v3029_v57  ;;  %v2430_v57 = vpop.f32.mrf.mxu1 }
 0x556   :  { %v2431_v60 = vadd.f32 %v2430_v57, %v2061_v36  ;;  %v9957_v36 = vld [vmem:[#allocation2 + $0x5a0] sm:$0xf]  ;;  %v10904_v57 = vld [vmem:[#allocation2 + $0x5a8] sm:$0xf0] }
 0x557   :  { %15440 = vst [vmem:[#allocation222_spill] sm:$0xff] %v13046_v41 }
 0x558   :  { %v2800_v31 = vadd.f32 %v12769_v23, %v2431_v60  ;;  %v13072_v60 = vor.u32 %v10904_v57, %v9957_v36 }
 0x559   :  { %2083 = vmatmul.bf16.gmra.mxu0 %v13050_v39  ;;  %v13058_v38 = vpop.f32.mrf.mxu3 }
 0x55a   :  { %v2996_v24 = vpack.c.bf16 %v2800_v31, %v2800_v31  ;;  %15443 = vst [vmem:[#allocation225_spill] sm:$0xff] %v13072_v60 }
 0x55b   :  { %2452 = vmatmul.bf16.gmra.mxu1 %v13052_v26 }
 0x55c   :  { %v4505_v39 = vunpack.c.l.b16 %v2996_v24  ;;  %v9959_v24 = vld [vmem:[#allocation2 + $0x5ac] sm:$0xf0] }
 0x55e   :  { %v4507_v6 = vpack.c.b16 %v4505_v39, %v4504_v42 }
 0x560   :  { %10219 = vmatmul.msk.bf16.vlgmr.msrb.gmra.mxu3 %vm3956_vm3, %v4507_v6  ;;  %v13074_v6 = vor.u32 %v10903_v52, %v9959_v24 }
 0x561   :  { %v13060_v17 = vpop.f32.mrf.mxu3 }
 0x562   :  { %15444 = vst [vmem:[#allocation226_spill] sm:$0xff] %v13074_v6 }
 0x569   :  { %v13063_v18 = vpop.f32.mrf.mxu3  ;;  %2088 = vmatmul.bf16.gmra.mxu0 %v13072_v60 }
 0x56b   :  { %2457 = vmatmul.bf16.gmra.mxu1 %v13074_v6 }
 0x56c   :  { %v2064_v2 = vpop.f32.mrf.mxu0 }
 0x571   :  { %v13067_v22 = vpop.f32.mrf.mxu3 }
 0x574   :  { %v2066_v56 = vpop.f32.mrf.mxu0 }
 0x579   :  { %v13070_v32 = vpop.f32.mrf.mxu3 }
 0x580   :  { %v2433_v12 = vpop.f32.mrf.mxu1 }
 0x581   :  { %v2434_v26 = vadd.f32 %v2433_v12, %v2064_v2  ;;  %v2069_v2 = vpop.f32.mrf.mxu0 }
 0x583   :  { %v2803_v48 = vadd.f32 %v12774_v33, %v2434_v26  ;;  %v13079_v33 = vpop.f32.mrf.mxu3 }
 0x585   :  { %v2997_v49 = vpack.c.bf16 %v2803_v48, %v2803_v48 }
 0x587   :  { %v4506_v23 = vunpack.c.l.b16 %v2997_v49 }
 0x588   :  { %v2435_v42 = vpop.f32.mrf.mxu1 }
 0x589   :  { %v4508_v39 = vpack.c.b16 %v4506_v23, %v4506_v23  ;;  %v2436_v31 = vadd.f32 %v2435_v42, %v2066_v56 }
 0x58b   :  { %10220 = vmatmul.msk.bf16.gmra.mxu3 %vm3956_vm3, %v4508_v39  ;;  %v2805_v26 = vadd.f32 %v12776_v45, %v2436_v31  ;;  %v13083_v57 = vpop.f32.mrf.mxu3 }
 0x58d   :  { %v2998_v49 = vpack.c.bf16 %v2805_v26, %v2805_v26 }
 0x58f   :  { %v4544_v23 = vunpack.c.l.b16 %v2998_v49 }
 0x592   :  { %v2438_v48 = vpop.f32.mrf.mxu1 }
 0x593   :  { %v2439_v36 = vadd.f32 %v2438_v48, %v2069_v2  ;;  %v13088_v2 = vpop.f32.mrf.mxu3  ;;  %v10906_v48 = vld [vmem:[#allocation2 + $0x5bc] sm:$0xf] }
 0x595   :  { %v2808_v52 = vadd.f32 %v12781_v55, %v2439_v36  ;;  %v9969_v55 = vld [vmem:[#allocation2 + $0x5b8] sm:$0xf] }
 0x597   :  { %v2999_v56 = vpack.c.bf16 %v2808_v52, %v2808_v52  ;;  %v9971_v52 = vld [vmem:[#allocation2 + $0x5c4] sm:$0xf0] }
 0x599   :  { %v4545_v24 = vunpack.c.l.b16 %v2999_v56 }
 0x59a   :  { %v4187_v12 = vpop.xlane.xlu1 %4186 }
 0x59b   :  { %11287 = vrcp.f32 %v4187_v12  ;;  %v4547_v45 = vpack.c.b16 %v4545_v24, %v4544_v23  ;;  %v10907_v12 = vld [vmem:[#allocation2 + $0x5c0] sm:$0xf0] }
 0x59c   :  { %v13090_v36 = vor.u32 %v10907_v12, %v9969_v55  ;;  %v2440_v55 = vpop.f32.mrf.mxu1 }
 0x59d   :  { %10221 = vmatmul.msk.bf16.vlgmr.msra.gmra.mxu3 %vm3956_vm3, %v4547_v45 }
 0x59e   :  { %15445 = vst [vmem:[#allocation227_spill] sm:$0xff] %v13090_v36  ;;  %2093 = vmatmul.bf16.gmra.mxu0 %v13090_v36 }
 0x5a1   :  { %v11288_v39 = vpop.eup %11287 }
 0x5a2   :  { %v4190_v42 = vpop.xlane.xlu2 %4189  ;;  %v4007_v6 = vpop.xlane.xlu1 %4006  ;;  %v4289_v26 = vmul.f32 %v11288_v39, %v12964_v59 }
 0x5a3   :  { %11289 = vrcp.f32 %v4190_v42  ;;  %v4069_v60 = vsub.f32 %v12974_v63, %v4007_v6  ;;  %v13093_v6 = vor.u32 %v10906_v48, %v9971_v52 }
 0x5a4   :  { %v4321_v63 = vpack.c.bf16 %v4289_v26, %v4289_v26  ;;  %v13102_v26 = vpop.f32.mrf.mxu3 }
 0x5a5   :  { %v4117_v31 = vmul.f32 1.442695, %v4069_v60  ;;  %15446 = vst [vmem:[#allocation228_spill] sm:$0xff] %v13093_v6  ;;  %2462 = vmatmul.bf16.gmra.mxu1 %v13093_v6 }
 0x5a7   :  { %11291 = vpow2.f32 %v4117_v31  ;;  %v4591_v31 = vunpack.c.l.b16 %v4321_v63 }
 0x5a9   :  { %v11290_v49 = vpop.eup %11289 }
 0x5aa   :  { %v4010_v56 = vpop.xlane.xlu2 %4009  ;;  %v4290_v42 = vmul.f32 %v11290_v49, %v12977_v5  ;;  %v4193_v23 = vpop.xlane.xlu1 %4192  ;;  %v13107_v49 = vsel %vm12410_vm2, %v12674_v58, -inf }
 0x5ab   :  { %v4070_v60 = vsub.f32 %v12989_v19, %v4010_v56  ;;  %11293 = vrcp.f32 %v4193_v23  ;;  %v2071_v19 = vpop.f32.mrf.mxu0  ;;  %v4017_v58 = vsel %vm3956_vm3, %v13107_v49, -inf }
 0x5ac   :  { %v4322_v59 = vpack.c.bf16 %v4290_v42, %v4290_v42  ;;  %v2441_v48 = vadd.f32 %v2440_v55, %v2071_v19  ;;  %v9983_v19 = vld [vmem:[#allocation2 + $0x5dc] sm:$0xf0] }
 0x5ad   :  { %v13098_v24 = vpop.eup %11291  ;;  %v4119_v39 = vmul.f32 1.442695, %v4070_v60 }
 0x5ae   :  { %v4197_v45 = vsel %vm3956_vm3, %v13098_v24, 0.0  ;;  %v4592_v5 = vunpack.c.l.b16 %v4322_v59  ;;  %v2810_v42 = vadd.f32 %v12783_v27, %v2441_v48  ;;  %v9981_v59 = vld [vmem:[#allocation2 + $0x5d0] sm:$0xf]  ;;  %v4379_v48 = vpop.f32.mrf.mxu3 }
 0x5af   :  { %11295 = vpow2.f32 %v4119_v39  ;;  %4198 = vadd.xlane.f32.xlu1 %v4197_v45  ;;  %v10910_v39 = vld [vmem:[#allocation2 + $0x5d8] sm:$0xf0] }
 0x5b0   :  { %v4593_v12 = vpack.c.b16 %v4592_v5, %v4591_v31  ;;  %v3000_v45 = vpack.c.bf16 %v2810_v42, %v2810_v42  ;;  %v10909_v5 = vld [vmem:[#allocation2 + $0x5d4] sm:$0xf] }
 0x5b1   :  { %v11294_v63 = vpop.eup %11293 }
 0x5b2   :  { %v4196_v52 = vpop.xlane.xlu2 %4195  ;;  %v4601_v56 = vsel %vm3956_vm3, %v4593_v12, 0  ;;  %v4013_v60 = vpop.xlane.xlu1 %4012  ;;  %v4291_v55 = vmul.f32 %v11294_v63, %v12992_v50  ;;  %v13129_v63 = vsel %vm12428_vm4, %v12694_v11, -inf }
 0x5b3   :  { %11297 = vrcp.f32 %v4196_v52  ;;  %4610 = vmatpush.bf16.xpose.msrb.mxu3 %v4601_v56  ;;  %v4071_v23 = vsub.f32 %v13004_v37, %v4013_v60  ;;  %v4546_v52 = vunpack.c.l.b16 %v3000_v45  ;;  %v13119_v37 = vor.u32 %v10910_v39, %v9981_v59 }
 0x5b4   :  { %v13121_v56 = vor.u32 %v10909_v5, %v9983_v19  ;;  %v4323_v21 = vpack.c.bf16 %v4291_v55, %v4291_v55 }
 0x5b5   :  { %v13112_v31 = vpop.eup %11295  ;;  %v4121_v12 = vmul.f32 1.442695, %v4071_v23  ;;  %15447 = vst [vmem:[#allocation229_spill] sm:$0xff] %v13119_v37  ;;  %v4548_v42 = vpack.c.b16 %v4546_v52, %v4546_v52  ;;  %2098 = vmatmul.bf16.gmra.mxu0 %v13119_v37 }
 0x5b6   :  { %v4200_v27 = vsel %vm3956_vm3, %v13112_v31, 0.0  ;;  %15448 = vst [vmem:[#allocation230_spill] sm:$0xff] %v13121_v56  ;;  %2467 = vmatmul.bf16.gmra.mxu1 %v13121_v56  ;;  %v4631_v45 = vunpack.c.l.b16 %v4323_v21  ;;  %v13137_v5 = vpop.f32.mrf.mxu3  ;;  %v13145_v21 = vsel %vm12410_vm2, %v12714_v7, -inf  ;;  %v13159_v7 = vsel %vm12428_vm4, %v12746_v46, -inf  ;;  %v15449_v56 = vld [vmem:[#allocation195_spill] sm:$0xff] }
 0x5b7   :  { %4201 = vadd.xlane.f32.xlu2 %v4200_v27  ;;  %4018 = vmax.xlane.f32.xlu1 %v4017_v58  ;;  %11299 = vpow2.f32 %v4121_v12 }
 0x5b8   :  { %10222 = vmatmul.msk.bf16.gmra.mxu3 %vm3956_vm3, %v4548_v42  ;;  %v4023_v42 = vsel %vm3956_vm3, %v13145_v21, -inf }
 0x5b9   :  { %v11298_v60 = vpop.eup %11297 }
 0x5ba   :  { %v4292_v6 = vmul.f32 %v11298_v60, %v13006_v8  ;;  %v4016_v36 = vpop.xlane.xlu2 %4015  ;;  %v4020_v8 = vsel %vm3956_vm3, %v13129_v63, -inf }
 0x5bb   :  { %v4072_v50 = vsub.f32 %v13029_v43, %v4016_v36  ;;  %v2074_v43 = vpop.f32.mrf.mxu0 }
 0x5bc   :  { %v4324_v23 = vpack.c.bf16 %v4292_v6, %v4292_v6  ;;  %v2443_v6 = vpop.f32.mrf.mxu1 }
 0x5bd   :  { %v4123_v59 = vmul.f32 1.442695, %v4072_v50  ;;  %v13133_v39 = vpop.eup %11299  ;;  %v2444_v19 = vadd.f32 %v2443_v6, %v2074_v43 }
 0x5be   :  { %v4632_v58 = vunpack.c.l.b16 %v4324_v23  ;;  %v4203_v11 = vsel %vm3956_vm3, %v13133_v39, 0.0  ;;  %v13152_v52 = vpop.f32.mrf.mxu3 }
 0x5bf   :  { %11301 = vpow2.f32 %v4123_v59  ;;  %4021 = vmax.xlane.f32.xlu2 %v4020_v8  ;;  %4204 = vadd.xlane.f32.xlu1 %v4203_v11  ;;  %v2813_v27 = vadd.f32 %v12795_v30, %v2444_v19 }
 0x5c0   :  { %v4633_v36 = vpack.c.b16 %v4632_v58, %v4631_v45  ;;  %v4026_v58 = vsel %vm3956_vm3, %v13159_v7, -inf }
 0x5c1   :  { %v3001_v23 = vpack.c.bf16 %v2813_v27, %v2813_v27 }
 0x5c2   :  { %v4641_v55 = vsel %vm3956_vm3, %v4633_v36, 0 }
 0x5c3   :  { %4650 = vmatpush.bf16.xpose.msra.mxu3 %v4641_v55  ;;  %v2076_v60 = vpop.f32.mrf.mxu0  ;;  %v4584_v8 = vunpack.c.l.b16 %v3001_v23 }
 0x5c4   :  { %v2445_v50 = vpop.f32.mrf.mxu1 }
 0x5c5   :  { %v13147_v12 = vpop.eup %11301  ;;  %v2446_v59 = vadd.f32 %v2445_v50, %v2076_v60 }
 0x5c6   :  { %v4206_v48 = vsel %vm3956_vm3, %v13147_v12, 0.0  ;;  %v13164_v11 = vpop.f32.mrf.mxu3 }
 0x5c7   :  { %4207 = vadd.xlane.f32.xlu2 %v4206_v48  ;;  %4024 = vmax.xlane.f32.xlu1 %v4023_v42  ;;  %v2815_v30 = vadd.f32 %v12798_v54, %v2446_v59 }
 0x5c9   :  { %v3002_v45 = vpack.c.bf16 %v2815_v30, %v2815_v30 }
 0x5cb   :  { %v4585_v43 = vunpack.c.l.b16 %v3002_v45  ;;  %v2079_v36 = vpop.f32.mrf.mxu0 }
 0x5cc   :  { %v2448_v6 = vpop.f32.mrf.mxu1 }
 0x5cd   :  { %v4587_v19 = vpack.c.b16 %v4585_v43, %v4584_v8  ;;  %v2449_v55 = vadd.f32 %v2448_v6, %v2079_v36  ;;  %v15450_v8 = vld [vmem:[#allocation197_spill] sm:$0xff] }
 0x5ce   :  { %v4419_v27 = vpop.f32.mrf.mxu3 }
 0x5cf   :  { %4027 = vmax.xlane.f32.xlu2 %v4026_v58  ;;  %10223 = vmatmul.msk.bf16.vlgmr.msrb.gmra.mxu3 %vm3956_vm3, %v4587_v19  ;;  %v2818_v46 = vadd.f32 %v12804_v15, %v2449_v55 }
 0x5d1   :  { %v3003_v48 = vpack.c.bf16 %v2818_v46, %v2818_v46 }
 0x5d3   :  { %v2081_v54 = vpop.f32.mrf.mxu0  ;;  %v4586_v60 = vunpack.c.l.b16 %v3003_v48 }
 0x5d4   :  { %v2450_v42 = vpop.f32.mrf.mxu1 }
 0x5d5   :  { %v4588_v23 = vpack.c.b16 %v4586_v60, %v4586_v60  ;;  %v2451_v59 = vadd.f32 %v2450_v42, %v2081_v54 }
 0x5d6   :  { %v13168_v50 = vpop.f32.mrf.mxu3 }
 0x5d7   :  { %v2820_v37 = vadd.f32 %v15449_v56, %v2451_v59 }
 0x5d9   :  { %v3004_v15 = vpack.c.bf16 %v2820_v37, %v2820_v37 }
 0x5db   :  { %v2084_v30 = vpop.f32.mrf.mxu0  ;;  %v4624_v19 = vunpack.c.l.b16 %v3004_v15  ;;  %v10913_v15 = vld [vmem:[#allocation2 + $0x5f0] sm:$0xf0] }
 0x5dc   :  { %v2453_v58 = vpop.f32.mrf.mxu1 }
 0x5dd   :  { %v2454_v45 = vadd.f32 %v2453_v58, %v2084_v30 }
 0x5de   :  { %v13173_v36 = vpop.f32.mrf.mxu3 }
 0x5df   :  { %10224 = vmatmul.msk.bf16.gmra.mxu3 %vm3956_vm3, %v4588_v23  ;;  %v2823_v43 = vadd.f32 %v15450_v8, %v2454_v45 }
 0x5e1   :  { %v3005_v6 = vpack.c.bf16 %v2823_v43, %v2823_v43  ;;  %v9993_v43 = vld [vmem:[#allocation2 + $0x5e8] sm:$0xf] }
 0x5e3   :  { %v4625_v55 = vunpack.c.l.b16 %v3005_v6  ;;  %v2086_v56 = vpop.f32.mrf.mxu0  ;;  %v10912_v6 = vld [vmem:[#allocation2 + $0x5ec] sm:$0xf] }
 0x5e4   :  { %v2455_v60 = vpop.f32.mrf.mxu1 }
 0x5e5   :  { %v4627_v27 = vpack.c.b16 %v4625_v55, %v4624_v19  ;;  %v2456_v23 = vadd.f32 %v2455_v60, %v2086_v56  ;;  %v13186_v19 = vor.u32 %v10913_v15, %v9993_v43  ;;  %v9995_v55 = vld [vmem:[#allocation2 + $0x5f4] sm:$0xf0] }
 0x5e6   :  { %v13175_v46 = vpop.f32.mrf.mxu3 }
 0x5e7   :  { %v2825_v59 = vadd.f32 %v12831_v10, %v2456_v23  ;;  %15451 = vst [vmem:[#allocation195_spill] sm:$0xff] %v13186_v19  ;;  %2103 = vmatmul.bf16.gmra.mxu0 %v13186_v19 }
 0x5e9   :  { %v3006_v30 = vpack.c.bf16 %v2825_v59, %v2825_v59 }
 0x5eb   :  { %v4626_v58 = vunpack.c.l.b16 %v3006_v30 }
 0x5ec   :  { %v2458_v56 = vpop.f32.mrf.mxu1 }
 0x5ed   :  { %v4628_v45 = vpack.c.b16 %v4626_v58, %v4626_v58 }
 0x5ee   :  { %v4459_v48 = vpop.f32.mrf.mxu3 }
 0x5ef   :  { %10225 = vmatmul.msk.bf16.vlgmr.msra.gmra.mxu3 %vm3956_vm3, %v4627_v27  ;;  %v13188_v27 = vor.u32 %v10912_v6, %v9995_v55  ;;  %v2089_v48 = vpop.f32.mrf.mxu0 }
 0x5f0   :  { %v2459_v6 = vadd.f32 %v2458_v56, %v2089_v48 }
 0x5f1   :  { %15452 = vst [vmem:[#allocation197_spill] sm:$0xff] %v13188_v27  ;;  %2472 = vmatmul.bf16.gmra.mxu1 %v13188_v27 }
 0x5f4   :  { %v2460_v30 = vpop.f32.mrf.mxu1 }
 0x5f6   :  { %v13178_v54 = vpop.f32.mrf.mxu3 }
 0x5f7   :  { %v2091_v59 = vpop.f32.mrf.mxu0 }
 0x5f8   :  { %v2461_v55 = vadd.f32 %v2460_v30, %v2091_v59 }
 0x5fa   :  { %v2830_v62 = vadd.f32 %v12859_v47, %v2461_v55 }
 0x5fc   :  { %v3008_v59 = vpack.c.bf16 %v2830_v62, %v2830_v62  ;;  %v13212_v62 = vsel %vm12428_vm4, %v13054_v61, -inf }
 0x5fe   :  { %v13180_v42 = vpop.f32.mrf.mxu3 }
 0x5ff   :  { %10226 = vmatmul.msk.bf16.gmra.mxu3 %vm3956_vm3, %v4628_v45 }
 0x606   :  { %v13183_v37 = vpop.f32.mrf.mxu3 }
 0x60e   :  { %v4499_v8 = vpop.f32.mrf.mxu3 }
 0x616   :  { %v13192_v10 = vpop.f32.mrf.mxu3 }
 0x61e   :  { %v13194_v23 = vpop.f32.mrf.mxu3 }
 0x622   :  { %v4199_v60 = vpop.xlane.xlu1 %4198 }
 0x623   :  { %11303 = vrcp.f32 %v4199_v60  ;;  %v2828_v60 = vadd.f32 %v12843_v1, %v2459_v6 }
 0x625   :  { %v3007_v56 = vpack.c.bf16 %v2828_v60, %v2828_v60 }
 0x626   :  { %v13198_v19 = vpop.f32.mrf.mxu3 }
 0x629   :  { %v11304_v8 = vpop.eup %11303 }
 0x62a   :  { %v4202_v58 = vpop.xlane.xlu2 %4201  ;;  %v4019_v45 = vpop.xlane.xlu1 %4018  ;;  %v4293_v27 = vmul.f32 %v11304_v8, %v13098_v24 }
 0x62b   :  { %11305 = vrcp.f32 %v4202_v58  ;;  %v4073_v43 = vsub.f32 %v13107_v49, %v4019_v45 }
 0x62c   :  { %v4325_v0 = vpack.c.bf16 %v4293_v27, %v4293_v27 }
 0x62d   :  { %v4125_v15 = vmul.f32 1.442695, %v4073_v43 }
 0x62e   :  { %v4671_v1 = vunpack.c.l.b16 %v4325_v0  ;;  %v4539_v47 = vpop.f32.mrf.mxu3 }
 0x62f   :  { %11307 = vpow2.f32 %v4125_v15 }
 0x631   :  { %v11306_v13 = vpop.eup %11305 }
 0x632   :  { %v4294_v16 = vmul.f32 %v11306_v13, %v13112_v31  ;;  %v4022_v41 = vpop.xlane.xlu2 %4021  ;;  %v4205_v49 = vpop.xlane.xlu1 %4204 }
 0x633   :  { %v4074_v58 = vsub.f32 %v13129_v63, %v4022_v41  ;;  %11309 = vrcp.f32 %v4205_v49  ;;  %v2094_v13 = vpop.f32.mrf.mxu0  ;;  %v2463_v31 = vpop.f32.mrf.mxu1  ;;  %v4664_v41 = vunpack.c.l.b16 %v3007_v56  ;;  %v4665_v63 = vunpack.c.l.b16 %v3008_v59 }
 0x634   :  { %v4326_v45 = vpack.c.bf16 %v4294_v16, %v4294_v16  ;;  %v2464_v61 = vadd.f32 %v2463_v31, %v2094_v13  ;;  %v13230_v13 = vsel %vm12410_vm2, %v13058_v38, -inf }
 0x635   :  { %v13204_v48 = vpop.eup %11307  ;;  %v4127_v24 = vmul.f32 1.442695, %v4074_v58  ;;  %v4667_v60 = vpack.c.b16 %v4665_v63, %v4664_v41  ;;  %v4032_v58 = vsel %vm3956_vm3, %v13212_v62, -inf  ;;  %v15453_v63 = vld [vmem:[#allocation185_spill] sm:$0xff] }
 0x636   :  { %v4209_v30 = vsel %vm3956_vm3, %v13204_v48, 0.0  ;;  %v4672_v8 = vunpack.c.l.b16 %v4326_v45 }
 0x637   :  { %11311 = vpow2.f32 %v4127_v24  ;;  %4210 = vadd.xlane.f32.xlu1 %v4209_v30  ;;  %v13222_v24 = vpop.f32.mrf.mxu3 }
 0x638   :  { %v4673_v27 = vpack.c.b16 %v4672_v8, %v4671_v1  ;;  %v4031_v1 = vpop.xlane.xlu0 %4030 }
 0x639   :  { %v11310_v15 = vpop.eup %11309 }
 0x63a   :  { %v4208_v16 = vpop.xlane.xlu2 %4207  ;;  %v4681_v43 = vsel %vm3956_vm3, %v4673_v27, 0  ;;  %v4025_v0 = vpop.xlane.xlu1 %4024  ;;  %v4295_v49 = vmul.f32 %v11310_v15, %v13133_v39  ;;  %v2833_v39 = vadd.f32 %v12876_v28, %v2464_v61 }
 0x63b   :  { %11313 = vrcp.f32 %v4208_v16  ;;  %4690 = vmatpush.bf16.xpose.msrb.mxu3 %v4681_v43  ;;  %v4075_v6 = vsub.f32 %v13145_v21, %v4025_v0  ;;  %v2096_v21 = vpop.f32.mrf.mxu0  ;;  %v2465_v30 = vpop.f32.mrf.mxu1  ;;  %v4077_v16 = vsub.f32 %v15453_v63, %v4031_v1  ;;  %v4035_v0 = vsel %vm3956_vm3, %v13230_v13, -inf }
 0x63c   :  { %v4327_v27 = vpack.c.bf16 %v4295_v49, %v4295_v49 }
 0x63d   :  { %v13215_v55 = vpop.eup %11311  ;;  %v4129_v45 = vmul.f32 1.442695, %v4075_v6 }
 0x63e   :  { %v4212_v56 = vsel %vm3956_vm3, %v13215_v55, 0.0  ;;  %v4711_v6 = vunpack.c.l.b16 %v4327_v27 }
 0x63f   :  { %4213 = vadd.xlane.f32.xlu2 %v4212_v56  ;;  %4033 = vmax.xlane.f32.xlu1 %v4032_v58  ;;  %11315 = vpow2.f32 %v4129_v45  ;;  %v4133_v58 = vmul.f32 1.442695, %v4077_v16  ;;  %v10916_v16 = vld [vmem:[#allocation2 + $0x608] sm:$0xf0] }
 0x641   :  { %v11314_v59 = vpop.eup %11313 }
 0x642   :  { %v4296_v8 = vmul.f32 %v11314_v59, %v13147_v12  ;;  %v4028_v47 = vpop.xlane.xlu2 %4027  ;;  %10227 = vmatmul.msk.bf16.vlgmr.msrb.gmra.mxu3 %vm3956_vm3, %v4667_v60  ;;  %v3009_v12 = vpack.c.bf16 %v2833_v39, %v2833_v39  ;;  %v13238_v60 = vpop.f32.mrf.mxu3  ;;  %v13246_v59 = vsel %vm12428_vm4, %v13060_v17, -inf  ;;  %v13259_v17 = vsel %vm12410_vm2, %v13063_v18, -inf }
 0x643   :  { %v4076_v31 = vsub.f32 %v13159_v7, %v4028_v47  ;;  %v2099_v56 = vpop.f32.mrf.mxu0  ;;  %v2468_v61 = vpop.f32.mrf.mxu1  ;;  %v2466_v47 = vadd.f32 %v2465_v30, %v2096_v21  ;;  %v10005_v30 = vld [vmem:[#allocation2 + $0x600] sm:$0xf]  ;;  %v4041_v18 = vsel %vm3956_vm3, %v13259_v17, -inf }
 0x644   :  { %v4328_v41 = vpack.c.bf16 %v4296_v8, %v4296_v8  ;;  %v4666_v49 = vunpack.c.l.b16 %v3009_v12  ;;  %v2469_v27 = vadd.f32 %v2468_v61, %v2099_v56 }
 0x645   :  { %v4131_v43 = vmul.f32 1.442695, %v4076_v31  ;;  %v13234_v15 = vpop.eup %11315  ;;  %v2835_v63 = vadd.f32 %v12890_v34, %v2466_v47 }
 0x646   :  { %v4712_v28 = vunpack.c.l.b16 %v4328_v41  ;;  %v4215_v38 = vsel %vm3956_vm3, %v13234_v15, 0.0  ;;  %v4668_v8 = vpack.c.b16 %v4666_v49, %v4666_v49  ;;  %v4038_v41 = vsel %vm3956_vm3, %v13246_v59, -inf }
 0x647   :  { %11317 = vpow2.f32 %v4131_v43  ;;  %4036 = vmax.xlane.f32.xlu1 %v4035_v0  ;;  %4216 = vadd.xlane.f32.xlu2 %v4215_v38  ;;  %v2838_v21 = vadd.f32 %v12903_v51, %v2469_v27  ;;  %v10915_v43 = vld [vmem:[#allocation2 + $0x604] sm:$0xf]  ;;  %v13266_v0 = vor.u32 %v10916_v16, %v10005_v30  ;;  %v3010_v34 = vpack.c.bf16 %v2835_v63, %v2835_v63  ;;  %v10019_v30 = vld [vmem:[#allocation2 + $0x624] sm:$0xf0] }
 0x648   :  { %v4713_v7 = vpack.c.b16 %v4712_v28, %v4711_v6  ;;  %11319 = vpow2.f32 %v4133_v58  ;;  %v10007_v6 = vld [vmem:[#allocation2 + $0x60c] sm:$0xf0]  ;;  %v13279_v58 = vsel %vm12428_vm4, %v13067_v22, -inf  ;;  %v10919_v63 = vld [vmem:[#allocation2 + $0x620] sm:$0xf0]  ;;  %v13288_v22 = vsel %vm12410_vm2, %v13070_v32, -inf }
 0x649   :  { %15454 = vst [vmem:[#allocation185_spill] sm:$0xff] %v13266_v0  ;;  %v13268_v28 = vor.u32 %v10915_v43, %v10007_v6  ;;  %2108 = vmatmul.bf16.gmra.mxu0 %v13266_v0  ;;  %v3011_v38 = vpack.c.bf16 %v2838_v21, %v2838_v21  ;;  %v4704_v49 = vunpack.c.l.b16 %v3010_v34  ;;  %v10918_v21 = vld [vmem:[#allocation2 + $0x61c] sm:$0xf] }
 0x64a   :  { %v4721_v45 = vsel %vm3956_vm3, %v4713_v7, 0  ;;  %v13252_v31 = vpop.f32.mrf.mxu3  ;;  %v13294_v6 = vor.u32 %v10918_v21, %v10019_v30 }
 0x64b   :  { %4730 = vmatpush.bf16.xpose.msra.mxu3 %v4721_v45  ;;  %15455 = vst [vmem:[#allocation231_spill] sm:$0xff] %v13268_v28  ;;  %2477 = vmatmul.bf16.gmra.mxu1 %v13268_v28  ;;  %v4705_v45 = vunpack.c.l.b16 %v3011_v38  ;;  %v2101_v56 = vpop.f32.mrf.mxu0  ;;  %v2470_v61 = vpop.f32.mrf.mxu1 }
 0x64c   :  { %15457 = vst [vmem:[#allocation233_spill] sm:$0xff] %v13294_v6 }
 0x64d   :  { %v13248_v1 = vpop.eup %11317  ;;  %v4707_v47 = vpack.c.b16 %v4705_v45, %v4704_v49 }
 0x64e   :  { %v4218_v39 = vsel %vm3956_vm3, %v13248_v1, 0.0  ;;  %v13264_v12 = vpop.eup %11319 }
 0x64f   :  { %4219 = vadd.xlane.f32.xlu0 %v4218_v39  ;;  %4039 = vmax.xlane.f32.xlu2 %v4038_v41  ;;  %v4221_v51 = vsel %vm3956_vm3, %v13264_v12, 0.0  ;;  %v2471_v39 = vadd.f32 %v2470_v61, %v2101_v56  ;;  %v10017_v41 = vld [vmem:[#allocation2 + $0x618] sm:$0xf]  ;;  %v10029_v61 = vld [vmem:[#allocation2 + $0x630] sm:$0xf] }
 0x650   :  { %v13290_v16 = vor.u32 %v10919_v63, %v10017_v41  ;;  %v10031_v41 = vld [vmem:[#allocation2 + $0x63c] sm:$0xf0] }
 0x651   :  { %v2840_v43 = vadd.f32 %v12905_v29, %v2471_v39 }
 0x652   :  { %10228 = vmatmul.msk.bf16.gmra.mxu3 %vm3956_vm3, %v4668_v8  ;;  %v4579_v7 = vpop.f32.mrf.mxu3  ;;  %v4044_v8 = vsel %vm3956_vm3, %v13279_v58, -inf  ;;  %15456 = vst [vmem:[#allocation232_spill] sm:$0xff] %v13290_v16 }
 0x653   :  { %v3012_v34 = vpack.c.bf16 %v2840_v43, %v2840_v43 }
 0x655   :  { %v4706_v32 = vunpack.c.l.b16 %v3012_v34  ;;  %v10041_v34 = vld [vmem:[#allocation2 + $0x648] sm:$0xf] }
 0x657   :  { %4222 = vadd.xlane.f32.xlu0 %v4221_v51  ;;  %4042 = vmax.xlane.f32.xlu2 %v4041_v18  ;;  %v4047_v18 = vsel %vm3956_vm3, %v13288_v22, -inf  ;;  %v4708_v51 = vpack.c.b16 %v4706_v32, %v4706_v32  ;;  %v10925_v32 = vld [vmem:[#allocation2 + $0x650] sm:$0xf0] }
 0x659   :  { %2113 = vmatmul.bf16.gmra.mxu0 %v13290_v16 }
 0x65a   :  { %v13283_v27 = vpop.f32.mrf.mxu3 }
 0x65b   :  { %2482 = vmatmul.bf16.gmra.mxu1 %v13294_v6  ;;  %v10043_v6 = vld [vmem:[#allocation2 + $0x654] sm:$0xf0] }
 0x65f   :  { %4045 = vmax.xlane.f32.xlu0 %v4044_v8  ;;  %v10922_v8 = vld [vmem:[#allocation2 + $0x638] sm:$0xf0] }
 0x660   :  { %v13311_v39 = vor.u32 %v10922_v8, %v10029_v61 }
 0x662   :  { %10229 = vmatmul.msk.bf16.vlgmr.msra.gmra.mxu3 %vm3956_vm3, %v4707_v47  ;;  %v13299_v38 = vpop.f32.mrf.mxu3  ;;  %v10921_v47 = vld [vmem:[#allocation2 + $0x634] sm:$0xf]  ;;  %15458 = vst [vmem:[#allocation234_spill] sm:$0xff] %v13311_v39 }
 0x663   :  { %v13313_v63 = vor.u32 %v10921_v47, %v10031_v41 }
 0x664   :  { %v2104_v30 = vpop.f32.mrf.mxu0 }
 0x665   :  { %15459 = vst [vmem:[#allocation235_spill] sm:$0xff] %v13313_v63 }
 0x667   :  { %4048 = vmax.xlane.f32.xlu0 %v4047_v18 }
 0x669   :  { %2118 = vmatmul.bf16.gmra.mxu0 %v13311_v39 }
 0x66a   :  { %v13302_v7 = vpop.f32.mrf.mxu3 }
 0x66b   :  { %2487 = vmatmul.bf16.gmra.mxu1 %v13313_v63 }
 0x66c   :  { %v2106_v63 = vpop.f32.mrf.mxu0 }
 0x66e   :  { %v2473_v43 = vpop.f32.mrf.mxu1 }
 0x66f   :  { %v2474_v39 = vadd.f32 %v2473_v43, %v2104_v30 }
 0x672   :  { %10230 = vmatmul.msk.bf16.gmra.mxu3 %vm3956_vm3, %v4708_v51  ;;  %v4619_v29 = vpop.f32.mrf.mxu3  ;;  %v10924_v51 = vld [vmem:[#allocation2 + $0x64c] sm:$0xf] }
 0x673   :  { %v13317_v29 = vor.u32 %v10925_v32, %v10041_v34  ;;  %v13319_v16 = vor.u32 %v10924_v51, %v10043_v6  ;;  %v2843_v6 = vadd.f32 %v12910_v35, %v2474_v39 }
 0x675   :  { %15460 = vst [vmem:[#allocation236_spill] sm:$0xff] %v13317_v29  ;;  %v3013_v30 = vpack.c.bf16 %v2843_v6, %v2843_v6 }
 0x676   :  { %15461 = vst [vmem:[#allocation237_spill] sm:$0xff] %v13319_v16 }
 0x679   :  { %2123 = vmatmul.bf16.gmra.mxu0 %v13317_v29 }
 0x67a   :  { %v13305_v49 = vpop.f32.mrf.mxu3 }
 0x67b   :  { %2492 = vmatmul.bf16.gmra.mxu1 %v13319_v16 }
 0x682   :  { %v13307_v45 = vpop.f32.mrf.mxu3 }
 0x68a   :  { %v13309_v56 = vpop.f32.mrf.mxu3 }
 0x692   :  { %v4659_v21 = vpop.f32.mrf.mxu3 }
 0x693   :  { %v2475_v21 = vpop.f32.mrf.mxu1 }
 0x694   :  { %v2476_v32 = vadd.f32 %v2475_v21, %v2106_v63 }
 0x6aa   :  { %v4211_v18 = vpop.xlane.xlu1 %4210 }
 0x6ab   :  { %11321 = vrcp.f32 %v4211_v18 }
 0x6b1   :  { %v11322_v47 = vpop.eup %11321 }
 0x6b2   :  { %v4214_v61 = vpop.xlane.xlu2 %4213  ;;  %v4034_v8 = vpop.xlane.xlu1 %4033  ;;  %v4297_v34 = vmul.f32 %v11322_v47, %v13204_v48 }
 0x6b3   :  { %11323 = vrcp.f32 %v4214_v61  ;;  %v4078_v41 = vsub.f32 %v13212_v62, %v4034_v8  ;;  %v2845_v62 = vadd.f32 %v12912_v4, %v2476_v32  ;;  %v10928_v4 = vld [vmem:[#allocation2 + $0x668] sm:$0xf0] }
 0x6b4   :  { %v4329_v8 = vpack.c.bf16 %v4297_v34, %v4297_v34 }
 0x6b5   :  { %v4135_v18 = vmul.f32 1.442695, %v4078_v41  ;;  %v3014_v63 = vpack.c.bf16 %v2845_v62, %v2845_v62 }
 0x6b6   :  { %v4751_v35 = vunpack.c.l.b16 %v4329_v8 }
 0x6b7   :  { %11325 = vpow2.f32 %v4135_v18  ;;  %v4744_v18 = vunpack.c.l.b16 %v3013_v30 }
 0x6b9   :  { %v11324_v28 = vpop.eup %11323 }
 0x6ba   :  { %v4298_v51 = vmul.f32 %v11324_v28, %v13215_v55  ;;  %v4037_v61 = vpop.xlane.xlu1 %4036  ;;  %v4217_v0 = vpop.xlane.xlu2 %4216  ;;  %v10053_v55 = vld [vmem:[#allocation2 + $0x660] sm:$0xf]  ;;  %v10927_v28 = vld [vmem:[#allocation2 + $0x664] sm:$0xf] }
 0x6bb   :  { %v4079_v29 = vsub.f32 %v13230_v13, %v4037_v61  ;;  %11327 = vrcp.f32 %v4217_v0  ;;  %v13333_v41 = vor.u32 %v10928_v4, %v10053_v55  ;;  %v10055_v13 = vld [vmem:[#allocation2 + $0x66c] sm:$0xf0]  ;;  %v4745_v0 = vunpack.c.l.b16 %v3014_v63 }
 0x6bc   :  { %v4330_v14 = vpack.c.bf16 %v4298_v51, %v4298_v51  ;;  %v13335_v21 = vor.u32 %v10927_v28, %v10055_v13 }
 0x6bd   :  { %v13329_v16 = vpop.eup %11325  ;;  %v4137_v48 = vmul.f32 1.442695, %v4079_v29  ;;  %15462 = vst [vmem:[#allocation238_spill] sm:$0xff] %v13333_v41  ;;  %2128 = vmatmul.bf16.gmra.mxu0 %v13333_v41  ;;  %v4747_v8 = vpack.c.b16 %v4745_v0, %v4744_v18 }
 0x6be   :  { %v4224_v43 = vsel %vm3956_vm3, %v13329_v16, 0.0  ;;  %v4752_v39 = vunpack.c.l.b16 %v4330_v14  ;;  %15463 = vst [vmem:[#allocation239_spill] sm:$0xff] %v13335_v21  ;;  %2497 = vmatmul.bf16.gmra.mxu1 %v13335_v21 }
 0x6bf   :  { %11329 = vpow2.f32 %v4137_v48  ;;  %4225 = vadd.xlane.f32.xlu1 %v4224_v43 }
 0x6c0   :  { %v4753_v47 = vpack.c.b16 %v4752_v39, %v4751_v35 }
 0x6c1   :  { %v11328_v32 = vpop.eup %11327 }
 0x6c2   :  { %v4220_v29 = vpop.xlane.xlu0 %4219  ;;  %v4761_v34 = vsel %vm3956_vm3, %v4753_v47, 0  ;;  %v4040_v6 = vpop.xlane.xlu2 %4039  ;;  %v4299_v62 = vmul.f32 %v11328_v32, %v13234_v15  ;;  %v13355_v15 = vsel %vm12428_vm4, %v13079_v33, -inf }
 0x6c3   :  { %11331 = vrcp.f32 %v4220_v29  ;;  %4770 = vmatpush.bf16.xpose.msrb.mxu3 %v4761_v34  ;;  %v4080_v14 = vsub.f32 %v13246_v59, %v4040_v6 }
 0x6c4   :  { %v4331_v35 = vpack.c.bf16 %v4299_v62, %v4299_v62 }
 0x6c5   :  { %v13341_v51 = vpop.eup %11329  ;;  %v13343_v61 = vpop.f32.mrf.mxu3  ;;  %v4139_v30 = vmul.f32 1.442695, %v4080_v14 }
 0x6c6   :  { %v4227_v48 = vsel %vm3956_vm3, %v13341_v51, 0.0  ;;  %v4791_v18 = vunpack.c.l.b16 %v4331_v35 }
 0x6c7   :  { %4228 = vadd.xlane.f32.xlu1 %v4227_v48  ;;  %11333 = vpow2.f32 %v4139_v30 }
 0x6c9   :  { %v11332_v63 = vpop.eup %11331 }
 0x6ca   :  { %v4300_v43 = vmul.f32 %v11332_v63, %v13248_v1  ;;  %10231 = vmatmul.msk.bf16.vlgmr.msrb.gmra.mxu3 %vm3956_vm3, %v4747_v8  ;;  %v13350_v59 = vpop.xlane.xlu0 %4222  ;;  %v4043_v39 = vpop.xlane.xlu2 %4042  ;;  %v4050_v1 = vsel %vm3956_vm3, %v13355_v15, -inf }
 0x6cb   :  { %v4081_v55 = vsub.f32 %v13259_v17, %v4043_v39 }
 0x6cc   :  { %v4332_v4 = vpack.c.bf16 %v4300_v43, %v4300_v43 }
 0x6cd   :  { %v13358_v28 = vpop.f32.mrf.mxu3  ;;  %v13360_v47 = vpop.eup %11333  ;;  %v4141_v13 = vmul.f32 1.442695, %v4081_v55 }
 0x6ce   :  { %v4792_v0 = vunpack.c.l.b16 %v4332_v4  ;;  %v4230_v29 = vsel %vm3956_vm3, %v13360_v47, 0.0 }
 0x6cf   :  { %4051 = vmax.xlane.f32.xlu1 %v4050_v1  ;;  %11335 = vpow2.f32 %v4141_v13  ;;  %4231 = vadd.xlane.f32.xlu2 %v4230_v29  ;;  %v2109_v13 = vpop.f32.mrf.mxu0  ;;  %v2478_v1 = vpop.f32.mrf.mxu1 }
 0x6d0   :  { %v4793_v33 = vpack.c.b16 %v4792_v0, %v4791_v18  ;;  %v15464_v18 = vld [vmem:[#allocation204_spill] sm:$0xff] }
 0x6d2   :  { %v4046_v34 = vpop.xlane.xlu0 %4045  ;;  %v4801_v17 = vsel %vm3956_vm3, %v4793_v33, 0 }
 0x6d3   :  { %v4082_v32 = vsub.f32 %v13279_v58, %v4046_v34  ;;  %4810 = vmatpush.bf16.xpose.msra.mxu3 %v4801_v17 }
 0x6d5   :  { %v4143_v6 = vmul.f32 1.442695, %v4082_v32  ;;  %v13368_v14 = vpop.f32.mrf.mxu3  ;;  %v13370_v62 = vpop.eup %11335 }
 0x6d6   :  { %v4233_v8 = vsel %vm3956_vm3, %v13370_v62, 0.0 }
 0x6d7   :  { %11337 = vpow2.f32 %v4143_v6  ;;  %4234 = vadd.xlane.f32.xlu2 %v4233_v8  ;;  %v2111_v17 = vpop.f32.mrf.mxu0  ;;  %v2480_v32 = vpop.f32.mrf.mxu1 }
 0x6d8   :  { %v2481_v8 = vadd.f32 %v2480_v32, %v2111_v17 }
 0x6da   :  { %v4049_v30 = vpop.xlane.xlu0 %4048 }
 0x6db   :  { %v4083_v48 = vsub.f32 %v13288_v22, %v4049_v30  ;;  %v2479_v22 = vadd.f32 %v2478_v1, %v2109_v13  ;;  %v15466_v1 = vld [vmem:[#allocation206_spill] sm:$0xff] }
 0x6dd   :  { %v13375_v63 = vpop.eup %11337  ;;  %v4145_v43 = vmul.f32 1.442695, %v4083_v48  ;;  %v4699_v35 = vpop.f32.mrf.mxu3  ;;  %v2848_v0 = vadd.f32 %v15464_v18, %v2479_v22  ;;  %v15465_v48 = vld [vmem:[#allocation205_spill] sm:$0xff] }
 0x6de   :  { %v4236_v58 = vsel %vm3956_vm3, %v13375_v63, 0.0 }
 0x6df   :  { %11339 = vpow2.f32 %v4145_v43  ;;  %4237 = vadd.xlane.f32.xlu0 %v4236_v58  ;;  %v3015_v33 = vpack.c.bf16 %v2848_v0, %v2848_v0  ;;  %v2850_v43 = vadd.f32 %v15465_v48, %v2481_v8  ;;  %v2114_v35 = vpop.f32.mrf.mxu0  ;;  %v2483_v58 = vpop.f32.mrf.mxu1 }
 0x6e0   :  { %v2484_v13 = vadd.f32 %v2483_v58, %v2114_v35  ;;  %11341 = vrcp.f32 %v13350_v59 }
 0x6e1   :  { %v4746_v34 = vunpack.c.l.b16 %v3015_v33 }
 0x6e2   :  { %v2853_v22 = vadd.f32 %v15466_v1, %v2484_v13 }
 0x6e3   :  { %v4748_v6 = vpack.c.b16 %v4746_v34, %v4746_v34  ;;  %v11115_v34 = vpack.i.bf16 %v13238_v60, %v13083_v57  ;;  %v11121_v57 = vpack.i.bf16 %v13299_v38, %v13137_v5  ;;  %v11127_v38 = vpack.i.bf16 %v13307_v45, %v13168_v50 }
 0x6e4   :  { %v3017_v21 = vpack.c.bf16 %v2853_v22, %v2853_v22  ;;  %v15467_v22 = vld [vmem:[#allocation209_spill] sm:$0xff] }
 0x6e5   :  { %v13379_v39 = vpop.eup %11339  ;;  %v13381_v55 = vpop.f32.mrf.mxu3  ;;  %10232 = vmatmul.msk.bf16.gmra.mxu3 %vm3956_vm3, %v4748_v6 }
 0x6e6   :  { %v4239_v4 = vsel %vm3956_vm3, %v13379_v39, 0.0  ;;  %v4785_v33 = vunpack.c.l.b16 %v3017_v21 }
 0x6e7   :  { %4240 = vadd.xlane.f32.xlu1 %v4239_v4  ;;  %v3016_v4 = vpack.c.bf16 %v2850_v43, %v2850_v43  ;;  %v2116_v17 = vpop.f32.mrf.mxu0  ;;  %v2485_v32 = vpop.f32.mrf.mxu1  ;;  %v11117_v43 = vpack.i.bf16 %v13252_v31, %v13088_v2  ;;  %v11125_v2 = vpack.i.bf16 %v13305_v49, %v13164_v11 }
 0x6e8   :  { %v2486_v6 = vadd.f32 %v2485_v32, %v2116_v17  ;;  %v11342_v31 = vpop.eup %11341 }
 0x6e9   :  { %v4784_v18 = vunpack.c.l.b16 %v3016_v4  ;;  %v4301_v5 = vmul.f32 %v11342_v31, %v13264_v12 }
 0x6ea   :  { %v2855_v8 = vadd.f32 %v12930_v40, %v2486_v6  ;;  %v11123_v40 = vpack.i.bf16 %v13302_v7, %v13152_v52 }
 0x6eb   :  { %v4787_v41 = vpack.c.b16 %v4785_v33, %v4784_v18  ;;  %v4333_v1 = vpack.c.bf16 %v4301_v5, %v4301_v5  ;;  %v15468_v18 = vld [vmem:[#allocation210_spill] sm:$0xff] }
 0x6ec   :  { %v3018_v48 = vpack.c.bf16 %v2855_v8, %v2855_v8 }
 0x6ed   :  { %v13386_v29 = vpop.f32.mrf.mxu3  ;;  %v4831_v12 = vunpack.c.l.b16 %v4333_v1 }
 0x6ee   :  { %v4786_v35 = vunpack.c.l.b16 %v3018_v48 }
 0x6ef   :  { %v2119_v60 = vpop.f32.mrf.mxu0  ;;  %v2488_v21 = vpop.f32.mrf.mxu1 }
 0x6f0   :  { %v4788_v58 = vpack.c.b16 %v4786_v35, %v4786_v35  ;;  %v2489_v52 = vadd.f32 %v2488_v21, %v2119_v60 }
 0x6f2   :  { %v2858_v11 = vadd.f32 %v15467_v22, %v2489_v52 }
 0x6f4   :  { %v3019_v17 = vpack.c.bf16 %v2858_v11, %v2858_v11 }
 0x6f5   :  { %v13389_v30 = vpop.f32.mrf.mxu3  ;;  %10233 = vmatmul.msk.bf16.vlgmr.msra.gmra.mxu3 %vm3956_vm3, %v4787_v41  ;;  %v11119_v41 = vpack.i.bf16 %v13283_v27, %v13102_v26 }
 0x6f6   :  { %v4824_v48 = vunpack.c.l.b16 %v3019_v17 }
 0x6f7   :  { %v2121_v26 = vpop.f32.mrf.mxu0  ;;  %v2490_v27 = vpop.f32.mrf.mxu1 }
 0x6f8   :  { %v2491_v7 = vadd.f32 %v2490_v27, %v2121_v26  ;;  %v15469_v26 = vld [vmem:[#allocation213_spill] sm:$0xff] }
 0x6fd   :  { %v4739_v0 = vpop.f32.mrf.mxu3 }
 0x6fe   :  { %v2860_v0 = vadd.f32 %v15468_v18, %v2491_v7 }
 0x6ff   :  { %v2124_v32 = vpop.f32.mrf.mxu0  ;;  %v2493_v6 = vpop.f32.mrf.mxu1 }
 0x700   :  { %v3020_v50 = vpack.c.bf16 %v2860_v0, %v2860_v0  ;;  %v2494_v60 = vadd.f32 %v2493_v6, %v2124_v32 }
 0x705   :  { %10234 = vmatmul.msk.bf16.gmra.mxu3 %vm3956_vm3, %v4788_v58 }
 0x707   :  { %v2495_v31 = vpop.f32.mrf.mxu1 }
 0x708   :  { %11116 = vxpose.xlu0.b32.start [1/16] (narrow) %v11115_v34, 16  ;;  %v11129_v34 = vpack.i.bf16 %v13309_v56, %v13173_v36  ;;  %v11131_v56 = vpack.i.bf16 %v13343_v61, %v13175_v46 }
 0x710   :  { %11118 = vxpose.xlu0.b32.cont [2/16] (narrow) %v11117_v43, 16 }
 0x718   :  { %11120 = vxpose.xlu0.b32.cont [3/16] (narrow) %v11119_v41, 16 }
 0x720   :  { %11122 = vxpose.xlu0.b32.cont [4/16] (narrow) %v11121_v57, 16 }
 0x728   :  { %11124 = vxpose.xlu0.b32.cont [5/16] (narrow) %v11123_v40, 16 }
 0x730   :  { %11126 = vxpose.xlu0.b32.cont [6/16] (narrow) %v11125_v2, 16  ;;  %v2126_v2 = vpop.f32.mrf.mxu0 }
 0x732   :  { %v4226_v4 = vpop.xlane.xlu1 %4225 }
 0x733   :  { %11343 = vrcp.f32 %v4226_v4 }
 0x738   :  { %11128 = vxpose.xlu0.b32.cont [7/16] (narrow) %v11127_v38, 16 }
 0x739   :  { %v11344_v13 = vpop.eup %11343 }
 0x73a   :  { %v4302_v59 = vmul.f32 %v11344_v13, %v13329_v16  ;;  %v4229_v49 = vpop.xlane.xlu1 %4228  ;;  %v4825_v16 = vunpack.c.l.b16 %v3020_v50  ;;  %v2129_v18 = vpop.f32.mrf.mxu0 }
 0x73b   :  { %11345 = vrcp.f32 %v4229_v49  ;;  %v2498_v0 = vpop.f32.mrf.mxu1 }
 0x73c   :  { %v4334_v33 = vpack.c.bf16 %v4302_v59, %v4302_v59  ;;  %v4827_v40 = vpack.c.b16 %v4825_v16, %v4824_v48 }
 0x73e   :  { %v4832_v45 = vunpack.c.l.b16 %v4334_v33 }
 0x740   :  { %11130 = vxpose.xlu0.b32.cont [8/16] (narrow) %v11129_v34, 16  ;;  %v4833_v8 = vpack.c.b16 %v4832_v45, %v4831_v12  ;;  %v2496_v34 = vadd.f32 %v2495_v31, %v2126_v2  ;;  %v2499_v12 = vadd.f32 %v2498_v0, %v2129_v18 }
 0x741   :  { %v11346_v57 = vpop.eup %11345 }
 0x742   :  { %v4052_v43 = vpop.xlane.xlu1 %4051  ;;  %v4841_v35 = vsel %vm3956_vm3, %v4833_v8, 0  ;;  %v4232_v58 = vpop.xlane.xlu2 %4231  ;;  %v4303_v21 = vmul.f32 %v11346_v57, %v13341_v51  ;;  %v11133_v51 = vpack.i.bf16 %v13358_v28, %v13178_v54  ;;  %v11135_v54 = vpack.i.bf16 %v13368_v14, %v13180_v42 }
 0x743   :  { %v4084_v41 = vsub.f32 %v13355_v15, %v4052_v43  ;;  %4850 = vmatpush.bf16.xpose.msrb.mxu3 %v4841_v35  ;;  %11347 = vrcp.f32 %v4232_v58  ;;  %v2863_v15 = vadd.f32 %v15469_v26, %v2494_v60  ;;  %v2865_v45 = vadd.f32 %v12949_v25, %v2496_v34  ;;  %v2131_v25 = vpop.f32.mrf.mxu0  ;;  %v15472_v26 = vld [vmem:[#allocation216_spill] sm:$0xff] }
 0x744   :  { %v4335_v38 = vpack.c.bf16 %v4303_v21, %v4303_v21  ;;  %v2868_v32 = vadd.f32 %v12960_v20, %v2499_v12  ;;  %v11137_v42 = vpack.i.bf16 %v13381_v55, %v13183_v37  ;;  %v11139_v20 = vpack.i.bf16 %v13386_v29, %v13192_v10  ;;  %v15476_v12 = vld [vmem:[#allocation221_spill] sm:$0xff] }
 0x745   :  { %v4147_v36 = vmul.f32 1.442695, %v4084_v41  ;;  %v3021_v61 = vpack.c.bf16 %v2863_v15, %v2863_v15  ;;  %v3022_v14 = vpack.c.bf16 %v2865_v45, %v2865_v45  ;;  %v2500_v41 = vpop.f32.mrf.mxu1  ;;  %v11141_v55 = vpack.i.bf16 %v13389_v30, %v13194_v23  ;;  %v15471_v30 = vld [vmem:[#allocation42_spill] sm:$0xff] }
 0x746   :  { %v4871_v13 = vunpack.c.l.b16 %v4335_v38 }
 0x747   :  { %11349 = vpow2.f32 %v4147_v36  ;;  %v4826_v22 = vunpack.c.l.b16 %v3021_v61  ;;  %v4864_v35 = vunpack.c.l.b16 %v3022_v14  ;;  %v2501_v36 = vadd.f32 %v2500_v41, %v2131_v25  ;;  %v10305_v41 = vld [vmem:[#allocation5 + $0x78] sm:$0xf] }
 0x748   :  { %11132 = vxpose.xlu0.b32.cont [9/16] (narrow) %v11131_v56, 16 }
 0x749   :  { %v11348_v4 = vpop.eup %11347  ;;  %v4828_v33 = vpack.c.b16 %v4826_v22, %v4826_v22  ;;  %v2870_v37 = vadd.f32 %v12968_v53, %v2501_v36  ;;  %v15470_v53 = vpack.c.b16 %v13010_v3, %v13008_v9 }
 0x74a   :  { %10235 = vmatmul.msk.bf16.vlgmr.msrb.gmra.mxu3 %vm3956_vm3, %v4827_v40  ;;  %v4304_v27 = vmul.f32 %v11348_v4, %v13360_v47  ;;  %v4235_v5 = vpop.xlane.xlu2 %4234 }
 0x74b   :  { %11351 = vrcp.f32 %v4235_v5  ;;  %v3024_v40 = vpack.c.bf16 %v2870_v37, %v2870_v37  ;;  %v10952_v37 = vld [vmem:[#allocation5 + $0x68] sm:$0xf0] }
 0x74c   :  { %v4336_v46 = vpack.c.bf16 %v4304_v27, %v4304_v27 }
 0x74d   :  { %v13425_v52 = vpop.eup %11349  ;;  %v4772_v56 = vpop.f32.mrf.mxu3  ;;  %v4866_v21 = vunpack.c.l.b16 %v3024_v40  ;;  %v10281_v40 = vld [vmem:[#allocation5 + $0x48] sm:$0xf] }
 0x74e   :  { %v4242_v7 = vsel %vm3956_vm3, %v13425_v52, 0.0  ;;  %v4872_v1 = vunpack.c.l.b16 %v4336_v46  ;;  %v11143_v2 = vpack.i.bf16 %v4772_v56, %v13198_v19  ;;  %v2878_v19 = vadd.f32 %v15472_v26, %v15471_v30 }
 0x74f   :  { %4243 = vadd.xlane.f32.xlu2 %v4242_v7  ;;  %v4868_v31 = vpack.c.b16 %v4866_v21, %v4866_v21 }
 0x750   :  { %11134 = vxpose.xlu0.b32.cont [10/16] (narrow) %v11133_v51, 16  ;;  %v4873_v59 = vpack.c.b16 %v4872_v1, %v4871_v13  ;;  %v3027_v15 = vpack.c.bf16 %v2878_v19, %v2878_v19  ;;  %v10245_v19 = vld [vmem:[#allocation5] sm:$0xf] }
 0x751   :  { %v11352_v11 = vpop.eup %11351 }
 0x752   :  { %v4238_v47 = vpop.xlane.xlu0 %4237  ;;  %v4881_v49 = vsel %vm3956_vm3, %v4873_v59, 0  ;;  %v4305_v28 = vmul.f32 %v11352_v11, %v13370_v62  ;;  %v3023_v62 = vpack.c.bf16 %v2868_v32, %v2868_v32  ;;  %v4906_v5 = vunpack.c.l.b16 %v3027_v15  ;;  %v10940_v15 = vld [vmem:[#allocation5 + $0x8] sm:$0xf0] }
 0x753   :  { %11353 = vrcp.f32 %v4238_v47  ;;  %4890 = vmatpush.bf16.xpose.msra.mxu3 %v4881_v49 }
 0x754   :  { %v4337_v6 = vpack.c.bf16 %v4305_v28, %v4305_v28  ;;  %v4865_v58 = vunpack.c.l.b16 %v3023_v62  ;;  %v4908_v38 = vpack.c.b16 %v4906_v5, %v4906_v5  ;;  %v15473_v28 = vld [vmem:[#allocation148_spill] sm:$0xff]  ;;  %v10985_v5 = vld [vmem:[#allocation5 + $0x170] sm:$0xf0] }
 0x755   :  { %v4774_v60 = vpop.f32.mrf.mxu3 }
 0x756   :  { %v4911_v48 = vunpack.c.l.b16 %v4337_v6  ;;  %v4867_v57 = vpack.c.b16 %v4865_v58, %v4864_v35  ;;  %v11145_v29 = vpack.i.bf16 %v4774_v60, %v13222_v24  ;;  %v10317_v35 = vld [vmem:[#allocation5 + $0x90] sm:$0xf]  ;;  %v10958_v58 = vld [vmem:[#allocation5 + $0x98] sm:$0xf0]  ;;  %v10949_v60 = vld [vmem:[#allocation5 + $0x50] sm:$0xf0] }
 0x757   :  { %v13482_v21 = vor.u32 %v10949_v60, %v10281_v40  ;;  %v10997_v60 = vld [vmem:[#allocation5 + $0x1d0] sm:$0xf0] }
 0x758   :  { %11136 = vxpose.xlu0.b32.cont [11/16] (narrow) %v11135_v54, 16  ;;  %v2884_v54 = vpop.f32.mrf.mxu2 }
 0x759   :  { %v11354_v17 = vpop.eup %11353 }
 0x75a   :  { %v4306_v50 = vmul.f32 %v11354_v17, %v13375_v63  ;;  %10236 = vmatmul.msk.bf16.gmra.mxu3 %vm3956_vm3, %v4828_v33  ;;  %v4241_v51 = vpop.xlane.xlu1 %4240  ;;  %v15474_v33 = vld [vmem:[#allocation47_spill] sm:$0xff] }
 0x75b   :  { %11355 = vrcp.f32 %v4241_v51  ;;  %v2516_v34 = vadd.f32 %v15474_v33, %v15473_v28  ;;  %v10365_v33 = vld [vmem:[#allocation5 + $0xf0] sm:$0xf] }
 0x75c   :  { %v4338_v8 = vpack.c.bf16 %v4306_v50, %v4306_v50 }
 0x75e   :  { %v4912_v16 = vunpack.c.l.b16 %v4338_v8 }
 0x760   :  { %11138 = vxpose.xlu0.b32.cont [12/16] (narrow) %v11137_v42, 16  ;;  %v4913_v43 = vpack.c.b16 %v4912_v16, %v4911_v48  ;;  %v10329_v48 = vld [vmem:[#allocation5 + $0xa8] sm:$0xf]  ;;  %v10961_v16 = vld [vmem:[#allocation5 + $0xb0] sm:$0xf0] }
 0x761   :  { %v11356_v3 = vpop.eup %11355 }
 0x762   :  { %v4921_v63 = vsel %vm3956_vm3, %v4913_v43, 0  ;;  %v4307_v61 = vmul.f32 %v11356_v3, %v13379_v39  ;;  %v15475_v39 = vld [vmem:[#allocation222_spill] sm:$0xff]  ;;  %v13468_v43 = vor.u32 %v10961_v16, %v10329_v48  ;;  %v10509_v16 = vld [vmem:[#allocation5 + $0x210] sm:$0xf] }
 0x763   :  { %4930 = vmatpush.bf16.xpose.msrb.mxu3 %v4921_v63  ;;  %v15477_v17 = vpack.c.b16 %v15475_v39, %v15476_v12  ;;  %v13471_v63 = vor.u32 %v10958_v58, %v10317_v35  ;;  %v10982_v3 = vld [vmem:[#allocation5 + $0x158] sm:$0xf0]  ;;  %v10353_v12 = vld [vmem:[#allocation5 + $0xd8] sm:$0xf] }
 0x764   :  { %v4339_v1 = vpack.c.bf16 %v4307_v61, %v4307_v61  ;;  %v11006_v35 = vld [vmem:[#allocation5 + $0x218] sm:$0xf0] }
 0x765   :  { %v13529_v58 = vor.u32 %v11006_v35, %v10509_v16  ;;  %v10259_v16 = vld [vmem:[#allocation5 + $0x24] sm:$0xf0] }
 0x766   :  { %v4951_v47 = vunpack.c.l.b16 %v4339_v1  ;;  %v10401_v1 = vld [vmem:[#allocation5 + $0x138] sm:$0xf] }
 0x767   :  { %15489 = vst [vmem:[#allocation221_spill] sm:$0xff] %v13529_v58 }
 0x768   :  { %11140 = vxpose.xlu0.b32.cont [13/16] (narrow) %v11139_v20, 16  ;;  %v4777_v10 = vpop.f32.mrf.mxu3  ;;  %v10955_v20 = vld [vmem:[#allocation5 + $0x80] sm:$0xf0] }
 0x769   :  { %5045 = vxpose.xlu1.b32.start [1/16] (narrow) %v4777_v10, 16  ;;  %v13476_v56 = vor.u32 %v10955_v20, %v10305_v41  ;;  %v10946_v10 = vld [vmem:[#allocation5 + $0x38] sm:$0xf0]  ;;  %v11003_v41 = vld [vmem:[#allocation5 + $0x200] sm:$0xf0] }
 0x76a   :  { %10237 = vmatmul.msk.bf16.vlgmr.msra.gmra.mxu3 %vm3956_vm3, %v4867_v57  ;;  %v10293_v57 = vld [vmem:[#allocation5 + $0x60] sm:$0xf] }
 0x770   :  { %11142 = vxpose.xlu0.b32.cont [14/16] (narrow) %v11141_v55, 16  ;;  %v4779_v4 = vpop.f32.mrf.mxu3  ;;  %v13479_v55 = vor.u32 %v10952_v37, %v10293_v57  ;;  %v10485_v57 = vld [vmem:[#allocation5 + $0x1e0] sm:$0xf]  ;;  %v10473_v37 = vld [vmem:[#allocation5 + $0x1c8] sm:$0xf] }
 0x778   :  { %11144 = vxpose.xlu0.b32.cont [15/16] (narrow) %v11143_v2, 16  ;;  %v4812_v23 = vpop.f32.mrf.mxu3 }
 0x779   :  { %5046 = vxpose.xlu1.b32.cont [2/16] (narrow) %v4812_v23, 16  ;;  %v10943_v23 = vld [vmem:[#allocation5 + $0x20] sm:$0xf0] }
 0x77a   :  { %10238 = vmatmul.msk.bf16.gmra.mxu3 %vm3956_vm3, %v4868_v31  ;;  %v10269_v31 = vld [vmem:[#allocation5 + $0x30] sm:$0xf] }
 0x77b   :  { %v13485_v4 = vor.u32 %v10946_v10, %v10269_v31  ;;  %v10461_v31 = vld [vmem:[#allocation5 + $0x1b0] sm:$0xf]  ;;  %v10994_v10 = vld [vmem:[#allocation5 + $0x1b8] sm:$0xf0] }
 0x780   :  { %11146 = vxpose.xlu0.b32.end [16/16] (narrow) %v11145_v29, 16  ;;  %v4814_v27 = vpop.f32.mrf.mxu3 }
 0x781   :  { %5047 = vxpose.xlu1.b32.cont [3/16] (narrow) %v4814_v27, 16  ;;  %v10425_v27 = vld [vmem:[#allocation5 + $0x168] sm:$0xf] }
 0x782   :  { %v13494_v51 = vor.u32 %v10985_v5, %v10425_v27  ;;  %v10988_v27 = vld [vmem:[#allocation5 + $0x188] sm:$0xf0] }
 0x783   :  { %v10960_v5 = vld [vmem:[#allocation5 + $0xac] sm:$0xf] }
 0x784   :  { %15480 = vst [vmem:[#allocation206_spill] sm:$0xff] %v13494_v51 }
 0x788   :  { %v4817_v24 = vpop.f32.mrf.mxu3 }
 0x789   :  { %5048 = vxpose.xlu1.b32.cont [4/16] (narrow) %v4817_v24, 16 }
 0x78a   :  { %10239 = vmatmul.msk.bf16.vlgmr.msrb.gmra.mxu3 %vm3956_vm3, %v15470_v53  ;;  %v10257_v53 = vld [vmem:[#allocation5 + $0x18] sm:$0xf] }
 0x78b   :  { %v13488_v30 = vor.u32 %v10943_v23, %v10257_v53  ;;  %v10449_v23 = vld [vmem:[#allocation5 + $0x198] sm:$0xf] }
 0x78d   :  { %15478 = vst [vmem:[#allocation204_spill] sm:$0xff] %v13488_v30 }
 0x790   :  { %v4819_v46 = vpop.f32.mrf.mxu3 }
 0x791   :  { %v13492_v46 = vor.u32 %v10940_v15, %v10245_v19  ;;  %v10437_v15 = vld [vmem:[#allocation5 + $0x180] sm:$0xf] }
 0x793   :  { %15479 = vst [vmem:[#allocation205_spill] sm:$0xff] %v13492_v46 }
 0x79a   :  { %10240 = vmatmul.msk.bf16.gmra.mxu3 %vm3956_vm3, %v4908_v38 }
 0x7ac   :  { %v13474_v36 = vpop.trf.xlu0 }
 0x7ad   :  { %v11148_v38 = vunpack.i.l.bf16 %v13474_v36 }
 0x7b4   :  { %v11152_v29 = vpop.trf.xlu0 }
 0x7b5   :  { %v11153_v24 = vunpack.i.l.bf16 %v11152_v29 }
 0x7b7   :  { %v13496_v61 = vpack.c.bf16 %v11153_v24, %v11148_v38  ;;  %v10331_v38 = vld [vmem:[#allocation5 + $0xb4] sm:$0xf0]  ;;  %v13547_v24 = vor.u32 %v10988_v27, %v10437_v15  ;;  %v10978_v27 = vld [vmem:[#allocation5 + $0x13c] sm:$0xf] }
 0x7b9   :  { %15495 = vst [vmem:[#allocation245_spill] sm:$0xff] %v13547_v24 }
 0x7c2   :  { %v4244_v9 = vpop.xlane.xlu2 %4243 }
 0x7c3   :  { %11357 = vrcp.f32 %v4244_v9  ;;  %v10413_v9 = vld [vmem:[#allocation5 + $0x150] sm:$0xf] }
 0x7c9   :  { %v11358_v7 = vpop.eup %11357 }
 0x7ca   :  { %v4308_v13 = vmul.f32 %v11358_v7, %v13425_v52  ;;  %v2885_v52 = vadd.f32 %v2884_v54, %v2516_v34  ;;  %v10973_v54 = vld [vmem:[#allocation5 + $0x110] sm:$0xf0]  ;;  %v10970_v34 = vld [vmem:[#allocation5 + $0xf8] sm:$0xf0] }
 0x7cb   :  { %v13513_v39 = vor.u32 %v10970_v34, %v10365_v33  ;;  %v10295_v33 = vld [vmem:[#allocation5 + $0x6c] sm:$0xf0] }
 0x7cc   :  { %v4340_v59 = vpack.c.bf16 %v4308_v13, %v4308_v13  ;;  %v3030_v45 = vpack.c.bf16 %v2885_v52, %v2885_v52  ;;  %v13500_v13 = vor.u32 %v10982_v3, %v10413_v9  ;;  %v13549_v3 = vor.u32 %v10960_v5, %v10331_v38  ;;  %v10403_v5 = vld [vmem:[#allocation5 + $0x144] sm:$0xf0] }
 0x7cd   :  { %v4852_v22 = vpop.f32.mrf.mxu3  ;;  %15485 = vst [vmem:[#allocation216_spill] sm:$0xff] %v13513_v39  ;;  %v13583_v38 = vor.u32 %v10978_v27, %v10403_v5  ;;  %v10999_v5 = vld [vmem:[#allocation5 + $0x1e4] sm:$0xf] }
 0x7ce   :  { %v4952_v11 = vunpack.c.l.b16 %v4340_v59  ;;  %5049 = vxpose.xlu1.b32.cont [5/16] (narrow) %v4852_v22, 16  ;;  %v4946_v32 = vunpack.c.l.b16 %v3030_v45  ;;  %15481 = vst [vmem:[#allocation209_spill] sm:$0xff] %v13500_v13  ;;  %v10979_v59 = vld [vmem:[#allocation5 + $0x140] sm:$0xf0]  ;;  %v10964_v45 = vld [vmem:[#allocation5 + $0xc8] sm:$0xf0] }
 0x7cf   :  { %v13504_v22 = vor.u32 %v10979_v59, %v10401_v1  ;;  %15496 = vst [vmem:[#allocation246_spill] sm:$0xff] %v13549_v3  ;;  %v10319_v1 = vld [vmem:[#allocation5 + $0x9c] sm:$0xf0] }
 0x7d0   :  { %v4953_v49 = vpack.c.b16 %v4952_v11, %v4951_v47  ;;  %v4948_v8 = vpack.c.b16 %v4946_v32, %v4946_v32  ;;  %v10389_v47 = vld [vmem:[#allocation5 + $0x120] sm:$0xf]  ;;  %v10976_v11 = vld [vmem:[#allocation5 + $0x128] sm:$0xf0]  ;;  %v11151_v32 = vunpack.i.h.bf16 %v13474_v36  ;;  %15506 = vst [vmem:[#allocation256_spill] sm:$0xff] %v13583_v38 }
 0x7d1   :  { %15482 = vst [vmem:[#allocation210_spill] sm:$0xff] %v13504_v22  ;;  %v11000_v36 = vld [vmem:[#allocation5 + $0x1e8] sm:$0xf0] }
 0x7d2   :  { %v4961_v18 = vsel %vm3956_vm3, %v4953_v49, 0  ;;  %v13535_v40 = vor.u32 %v11000_v36, %v10485_v57 }
 0x7d3   :  { %4970 = vmatpush.bf16.xpose.msra.mxu3 %v4961_v18  ;;  %v13507_v18 = vor.u32 %v10976_v11, %v10389_v47  ;;  %v10954_v47 = vld [vmem:[#allocation5 + $0x7c] sm:$0xf]  ;;  %v10307_v11 = vld [vmem:[#allocation5 + $0x84] sm:$0xf0] }
 0x7d4   :  { %15491 = vst [vmem:[#allocation241_spill] sm:$0xff] %v13535_v40 }
 0x7d5   :  { %v4854_v0 = vpop.f32.mrf.mxu3  ;;  %15483 = vst [vmem:[#allocation213_spill] sm:$0xff] %v13507_v18 }
 0x7d6   :  { %5050 = vxpose.xlu1.b32.cont [6/16] (narrow) %v4854_v0, 16  ;;  %v10377_v0 = vld [vmem:[#allocation5 + $0x108] sm:$0xf] }
 0x7d7   :  { %v13510_v28 = vor.u32 %v10973_v54, %v10377_v0  ;;  %v13556_v0 = vor.u32 %v10954_v47, %v10307_v11  ;;  %v10951_v54 = vld [vmem:[#allocation5 + $0x64] sm:$0xf]  ;;  %v10972_v47 = vld [vmem:[#allocation5 + $0x10c] sm:$0xf]  ;;  %v10379_v11 = vld [vmem:[#allocation5 + $0x114] sm:$0xf0] }
 0x7d8   :  { %v13559_v34 = vor.u32 %v10951_v54, %v10295_v33  ;;  %v10969_v54 = vld [vmem:[#allocation5 + $0xf4] sm:$0xf]  ;;  %v10367_v33 = vld [vmem:[#allocation5 + $0xfc] sm:$0xf0] }
 0x7d9   :  { %15484 = vst [vmem:[#allocation42_spill] sm:$0xff] %v13510_v28 }
 0x7da   :  { %10241 = vmatmul.msk.bf16.vlgmr.msra.gmra.mxu3 %vm3956_vm3, %v15477_v17  ;;  %v10967_v17 = vld [vmem:[#allocation5 + $0xe0] sm:$0xf0]  ;;  %15498 = vst [vmem:[#allocation248_spill] sm:$0xff] %v13556_v0 }
 0x7db   :  { %5471 = vmatpush.bf16.msrb.mxu3 %v13468_v43  ;;  %v13516_v52 = vor.u32 %v10967_v17, %v10353_v12  ;;  %15499 = vst [vmem:[#allocation249_spill] sm:$0xff] %v13559_v34  ;;  %v10948_v12 = vld [vmem:[#allocation5 + $0x4c] sm:$0xf]  ;;  %v10283_v17 = vld [vmem:[#allocation5 + $0x54] sm:$0xf0] }
 0x7dd   :  { %v4857_v50 = vpop.f32.mrf.mxu3  ;;  %15486 = vst [vmem:[#allocation148_spill] sm:$0xff] %v13516_v52 }
 0x7de   :  { %5051 = vxpose.xlu1.b32.cont [7/16] (narrow) %v4857_v50, 16  ;;  %v10341_v50 = vld [vmem:[#allocation5 + $0xc0] sm:$0xf] }
 0x7df   :  { %5472 = vmatpush.bf16.msrb.mxu3 %v13471_v63 }
 0x7e3   :  { %5473 = vmatpush.bf16.msrb.mxu3 %v13476_v56 }
 0x7e5   :  { %v4859_v6 = vpop.f32.mrf.mxu3 }
 0x7e6   :  { %v11156_v6 = vunpack.i.h.bf16 %v11152_v29  ;;  %v13541_v29 = vor.u32 %v10994_v10, %v10461_v31 }
 0x7e7   :  { %5474 = vmatpush.bf16.msrb.mxu3 %v13479_v55 }
 0x7e8   :  { %15493 = vst [vmem:[#allocation243_spill] sm:$0xff] %v13541_v29 }
 0x7ea   :  { %10242 = vmatmul.msk.bf16.gmra.mxu3 %vm3956_vm3, %v4948_v8  ;;  %v13520_v8 = vor.u32 %v10964_v45, %v10341_v50  ;;  %v13562_v45 = vor.u32 %v10948_v12, %v10283_v17  ;;  %v13593_v12 = vor.u32 %v10969_v54, %v10367_v33  ;;  %v10966_v17 = vld [vmem:[#allocation5 + $0xdc] sm:$0xf]  ;;  %v10993_v33 = vld [vmem:[#allocation5 + $0x1b4] sm:$0xf] }
 0x7eb   :  { %5475 = vmatpush.bf16.msrb.mxu3 %v13482_v21 }
 0x7ec   :  { %15487 = vst [vmem:[#allocation47_spill] sm:$0xff] %v13520_v8 }
 0x7ed   :  { %v4892_v42 = vpop.f32.mrf.mxu3  ;;  %15500 = vst [vmem:[#allocation250_spill] sm:$0xff] %v13562_v45 }
 0x7ee   :  { %5052 = vxpose.xlu1.b32.cont [8/16] (narrow) %v4892_v42, 16  ;;  %v13522_v42 = vpack.c.bf16 %v11156_v6, %v11151_v32  ;;  %v10945_v32 = vld [vmem:[#allocation5 + $0x34] sm:$0xf]  ;;  %v10271_v6 = vld [vmem:[#allocation5 + $0x3c] sm:$0xf0]  ;;  %15509 = vst [vmem:[#allocation259_spill] sm:$0xff] %v13593_v12 }
 0x7ef   :  { %5476 = vmatpush.bf16.msrb.mxu3 %v13485_v4 }
 0x7f3   :  { %5477 = vmatpush.bf16.msrb.mxu3 %v13488_v30 }
 0x7f5   :  { %v4894_v14 = vpop.f32.mrf.mxu3 }
 0x7f6   :  { %5053 = vxpose.xlu1.b32.cont [9/16] (narrow) %v4894_v14, 16  ;;  %v10521_v14 = vld [vmem:[#allocation5 + $0x228] sm:$0xf] }
 0x7f7   :  { %5478 = vmatpush.bf16.msrb.mxu3 %v13492_v46 }
 0x7fa   :  { %5479 = vmatmul.bf16.vlgmr.msrb.gmra.mxu3 %v13496_v61 }
 0x7fb   :  { %5485 = vmatpush.bf16.msra.mxu3 %v13494_v51 }
 0x7fd   :  { %v4897_v62 = vpop.f32.mrf.mxu3 }
 0x7fe   :  { %5054 = vxpose.xlu1.b32.cont [10/16] (narrow) %v4897_v62, 16  ;;  %v11009_v62 = vld [vmem:[#allocation5 + $0x230] sm:$0xf0] }
 0x7ff   :  { %5486 = vmatpush.bf16.msra.mxu3 %v13500_v13  ;;  %v13526_v48 = vor.u32 %v11009_v62, %v10521_v14  ;;  %v10942_v14 = vld [vmem:[#allocation5 + $0x1c] sm:$0xf]  ;;  %v13565_v62 = vor.u32 %v10945_v32, %v10271_v6  ;;  %v10963_v6 = vld [vmem:[#allocation5 + $0xc4] sm:$0xf] }
 0x800   :  { %v13568_v35 = vor.u32 %v10942_v14, %v10259_v16  ;;  %v10343_v14 = vld [vmem:[#allocation5 + $0xcc] sm:$0xf0]  ;;  %v11008_v16 = vld [vmem:[#allocation5 + $0x22c] sm:$0xf] }
 0x801   :  { %15488 = vst [vmem:[#allocation222_spill] sm:$0xff] %v13526_v48 }
 0x802   :  { %15501 = vst [vmem:[#allocation251_spill] sm:$0xff] %v13565_v62 }
 0x803   :  { %5487 = vmatpush.bf16.msra.mxu3 %v13504_v22  ;;  %15502 = vst [vmem:[#allocation252_spill] sm:$0xff] %v13568_v35 }
 0x805   :  { %v4899_v25 = vpop.f32.mrf.mxu3 }
 0x806   :  { %v10497_v25 = vld [vmem:[#allocation5 + $0x1f8] sm:$0xf] }
 0x807   :  { %5488 = vmatpush.bf16.msra.mxu3 %v13507_v18  ;;  %v13532_v20 = vor.u32 %v11003_v41, %v10497_v25  ;;  %v10939_v25 = vld [vmem:[#allocation5 + $0x4] sm:$0xf]  ;;  %v10247_v41 = vld [vmem:[#allocation5 + $0xc] sm:$0xf0] }
 0x808   :  { %v13571_v57 = vor.u32 %v10939_v25, %v10247_v41  ;;  %v10523_v25 = vld [vmem:[#allocation5 + $0x234] sm:$0xf0]  ;;  %v13599_v41 = vor.u32 %v10963_v6, %v10343_v14  ;;  %v10990_v6 = vld [vmem:[#allocation5 + $0x19c] sm:$0xf]  ;;  %v10451_v14 = vld [vmem:[#allocation5 + $0x1a4] sm:$0xf0] }
 0x809   :  { %15490 = vst [vmem:[#allocation240_spill] sm:$0xff] %v13532_v20 }
 0x80a   :  { %15503 = vst [vmem:[#allocation253_spill] sm:$0xff] %v13571_v57 }
 0x80b   :  { %5489 = vmatpush.bf16.msra.mxu3 %v13510_v28  ;;  %15511 = vst [vmem:[#allocation261_spill] sm:$0xff] %v13599_v41 }
 0x80d   :  { %v4932_v2 = vpop.f32.mrf.mxu3 }
 0x80e   :  { %5055 = vxpose.xlu1.b32.cont [11/16] (narrow) %v4932_v2, 16  ;;  %v13538_v2 = vor.u32 %v10997_v60, %v10473_v37  ;;  %v10984_v37 = vld [vmem:[#allocation5 + $0x16c] sm:$0xf]  ;;  %v10427_v60 = vld [vmem:[#allocation5 + $0x174] sm:$0xf0] }
 0x80f   :  { %5490 = vmatpush.bf16.msra.mxu3 %v13513_v39  ;;  %v13574_v10 = vor.u32 %v10984_v37, %v10427_v60  ;;  %v11005_v37 = vld [vmem:[#allocation5 + $0x214] sm:$0xf]  ;;  %v10511_v60 = vld [vmem:[#allocation5 + $0x21c] sm:$0xf0] }
 0x810   :  { %15492 = vst [vmem:[#allocation242_spill] sm:$0xff] %v13538_v2 }
 0x811   :  { %15504 = vst [vmem:[#allocation254_spill] sm:$0xff] %v13574_v10 }
 0x813   :  { %5491 = vmatpush.bf16.msra.mxu3 %v13516_v52 }
 0x815   :  { %v4934_v26 = vpop.f32.mrf.mxu3 }
 0x816   :  { %5056 = vxpose.xlu1.b32.cont [12/16] (narrow) %v4934_v26, 16  ;;  %v10991_v26 = vld [vmem:[#allocation5 + $0x1a0] sm:$0xf0] }
 0x817   :  { %5492 = vmatpush.bf16.msra.mxu3 %v13520_v8  ;;  %v13544_v19 = vor.u32 %v10991_v26, %v10449_v23  ;;  %v10981_v23 = vld [vmem:[#allocation5 + $0x154] sm:$0xf]  ;;  %v10415_v26 = vld [vmem:[#allocation5 + $0x15c] sm:$0xf0] }
 0x818   :  { %v13580_v15 = vor.u32 %v10981_v23, %v10415_v26  ;;  %v11002_v23 = vld [vmem:[#allocation5 + $0x1fc] sm:$0xf]  ;;  %v10499_v26 = vld [vmem:[#allocation5 + $0x204] sm:$0xf0] }
 0x819   :  { %15494 = vst [vmem:[#allocation244_spill] sm:$0xff] %v13544_v19  ;;  %v13609_v27 = vor.u32 %v11002_v23, %v10499_v26  ;;  %v10962_v23 = vld [vmem:[#allocation5 + $0xb8] sm:$0xf0] }
 0x81a   :  { %5493 = vmatmul.bf16.vlgmr.msra.gmra.mxu3 %v13522_v42  ;;  %15505 = vst [vmem:[#allocation255_spill] sm:$0xff] %v13580_v15 }
 0x81b   :  { %5499 = vmatpush.bf16.msrb.mxu3 %v13526_v48  ;;  %15514 = vst [vmem:[#allocation264_spill] sm:$0xff] %v13609_v27  ;;  %v15763_v48 = vld [vmem:[#allocation19_spill] sm:$0xff] }
 0x81d   :  { %v4937_v7 = vpop.f32.mrf.mxu3 }
 0x81e   :  { %5057 = vxpose.xlu1.b32.cont [13/16] (narrow) %v4937_v7, 16  ;;  %v10957_v7 = vld [vmem:[#allocation5 + $0x94] sm:$0xf] }
 0x81f   :  { %5500 = vmatpush.bf16.msrb.mxu3 %v13529_v58  ;;  %v13553_v59 = vor.u32 %v10957_v7, %v10319_v1  ;;  %v10391_v7 = vld [vmem:[#allocation5 + $0x12c] sm:$0xf0] }
 0x821   :  { %15497 = vst [vmem:[#allocation247_spill] sm:$0xff] %v13553_v59 }
 0x823   :  { %5501 = vmatpush.bf16.msrb.mxu3 %v13532_v20 }
 0x825   :  { %v4939_v49 = vpop.f32.mrf.mxu3 }
 0x827   :  { %5502 = vmatpush.bf16.msrb.mxu3 %v13535_v40 }
 0x82b   :  { %5503 = vmatpush.bf16.msrb.mxu3 %v13538_v2 }
 0x82f   :  { %5504 = vmatpush.bf16.msrb.mxu3 %v13541_v29  ;;  %v15665_v29 = vld [vmem:[#allocation140_spill] sm:$0xff] }
 0x833   :  { %5505 = vmatpush.bf16.msrb.mxu3 %v13544_v19 }
 0x837   :  { %5506 = vmatpush.bf16.msrb.mxu3 %v13547_v24 }
 0x83b   :  { %5513 = vmatpush.bf16.msra.mxu3 %v13549_v3 }
 0x83f   :  { %5514 = vmatpush.bf16.msra.mxu3 %v13553_v59 }
 0x843   :  { %5515 = vmatpush.bf16.msra.mxu3 %v13556_v0 }
 0x847   :  { %5516 = vmatpush.bf16.msra.mxu3 %v13559_v34 }
 0x84b   :  { %5517 = vmatpush.bf16.msra.mxu3 %v13562_v45 }
 0x84f   :  { %5518 = vmatpush.bf16.msra.mxu3 %v13565_v62 }
 0x853   :  { %5519 = vmatpush.bf16.msra.mxu3 %v13568_v35 }
 0x857   :  { %5520 = vmatpush.bf16.msra.mxu3 %v13571_v57 }
 0x85d   :  { %v4972_v53 = vpop.f32.mrf.mxu3 }
 0x85e   :  { %5058 = vxpose.xlu1.b32.cont [14/16] (narrow) %v4972_v53, 16 }
 0x865   :  { %v4974_v9 = vpop.f32.mrf.mxu3 }
 0x866   :  { %5059 = vxpose.xlu1.b32.cont [15/16] (narrow) %v4974_v9, 16  ;;  %v10975_v9 = vld [vmem:[#allocation5 + $0x124] sm:$0xf] }
 0x867   :  { %v13586_v1 = vor.u32 %v10975_v9, %v10391_v7  ;;  %v10487_v9 = vld [vmem:[#allocation5 + $0x1ec] sm:$0xf0] }
 0x868   :  { %v13612_v7 = vor.u32 %v10999_v5, %v10487_v9  ;;  %v10325_v9 = vld [vmem:[#allocation5 + $0x98] sm:$0xf] }
 0x869   :  { %15507 = vst [vmem:[#allocation257_spill] sm:$0xff] %v13586_v1 }
 0x86a   :  { %15515 = vst [vmem:[#allocation265_spill] sm:$0xff] %v13612_v7 }
 0x86d   :  { %v4977_v49 = vpop.f32.mrf.mxu3 }
 0x86e   :  { %5060 = vxpose.xlu1.b32.end [16/16] (narrow) %v4977_v49, 16  ;;  %v13589_v49 = vor.u32 %v10972_v47, %v10379_v11  ;;  %v10996_v47 = vld [vmem:[#allocation5 + $0x1cc] sm:$0xf]  ;;  %v10475_v11 = vld [vmem:[#allocation5 + $0x1d4] sm:$0xf0] }
 0x86f   :  { %v13615_v54 = vor.u32 %v10996_v47, %v10475_v11  ;;  %v10959_v47 = vld [vmem:[#allocation5 + $0xa0] sm:$0xf0] }
 0x870   :  { %15508 = vst [vmem:[#allocation258_spill] sm:$0xff] %v13589_v49  ;;  %v13630_v11 = vor.u32 %v10959_v47, %v10325_v9  ;;  %v10277_v47 = vld [vmem:[#allocation5 + $0x38] sm:$0xf] }
 0x871   :  { %15516 = vst [vmem:[#allocation266_spill] sm:$0xff] %v13615_v54 }
 0x872   :  { %15521 = vst [vmem:[#allocation271_spill] sm:$0xff] %v13630_v11 }
 0x875   :  { %v4979_v50 = vpop.f32.mrf.mxu3 }
 0x876   :  { %v10355_v50 = vld [vmem:[#allocation5 + $0xe4] sm:$0xf0] }
 0x877   :  { %v13596_v32 = vor.u32 %v10966_v17, %v10355_v50  ;;  %v10463_v17 = vld [vmem:[#allocation5 + $0x1bc] sm:$0xf0] }
 0x878   :  { %v13618_v50 = vor.u32 %v10993_v33, %v10463_v17  ;;  %v10313_v33 = vld [vmem:[#allocation5 + $0x80] sm:$0xf]  ;;  %v10956_v17 = vld [vmem:[#allocation5 + $0x88] sm:$0xf0] }
 0x879   :  { %15510 = vst [vmem:[#allocation260_spill] sm:$0xff] %v13596_v32 }
 0x87a   :  { %15517 = vst [vmem:[#allocation267_spill] sm:$0xff] %v13618_v50 }
 0x89a   :  { %v5061_v36 = vpop.trf.xlu1 }
 0x8a2   :  { %v5062_v31 = vpop.trf.xlu1 }
 0x8a3   :  { %v13576_v53 = vpack.c.bf16 %v5062_v31, %v5061_v36  ;;  %v13601_v36 = vor.u32 %v11008_v16, %v10523_v25  ;;  %v13605_v31 = vor.u32 %v11005_v37, %v10511_v60  ;;  %v13621_v16 = vor.u32 %v10990_v6, %v10451_v14  ;;  %v10987_v25 = vld [vmem:[#allocation5 + $0x184] sm:$0xf]  ;;  %v10439_v37 = vld [vmem:[#allocation5 + $0x18c] sm:$0xf0]  ;;  %v10301_v14 = vld [vmem:[#allocation5 + $0x68] sm:$0xf] }
 0x8a4   :  { %v10337_v60 = vld [vmem:[#allocation5 + $0xb0] sm:$0xf]  ;;  %v13624_v26 = vor.u32 %v10987_v25, %v10439_v37  ;;  %v13634_v6 = vor.u32 %v10956_v17, %v10313_v33  ;;  %v10953_v25 = vld [vmem:[#allocation5 + $0x70] sm:$0xf0]  ;;  %v10265_v33 = vld [vmem:[#allocation5 + $0x20] sm:$0xf] }
 0x8a5   :  { %5507 = vmatmul.bf16.vlgmr.msrb.gmra.mxu3 %v13576_v53  ;;  %15512 = vst [vmem:[#allocation262_spill] sm:$0xff] %v13601_v36  ;;  %v13626_v5 = vor.u32 %v10962_v23, %v10337_v60  ;;  %v13637_v37 = vor.u32 %v10953_v25, %v10301_v14  ;;  %v10289_v60 = vld [vmem:[#allocation5 + $0x50] sm:$0xf]  ;;  %v10950_v23 = vld [vmem:[#allocation5 + $0x58] sm:$0xf0] }
 0x8a6   :  { %5527 = vmatpush.bf16.msrb.mxu3 %v13574_v10  ;;  %15513 = vst [vmem:[#allocation263_spill] sm:$0xff] %v13605_v31  ;;  %v13640_v9 = vor.u32 %v10950_v23, %v10289_v60  ;;  %v10944_v17 = vld [vmem:[#allocation5 + $0x28] sm:$0xf0]  ;;  %v10253_v14 = vld [vmem:[#allocation5 + $0x8] sm:$0xf] }
 0x8a7   :  { %15518 = vst [vmem:[#allocation268_spill] sm:$0xff] %v13621_v16  ;;  %v10941_v25 = vld [vmem:[#allocation5 + $0x10] sm:$0xf0] }
 0x8a8   :  { %15519 = vst [vmem:[#allocation269_spill] sm:$0xff] %v13624_v26  ;;  %v13649_v60 = vor.u32 %v10941_v25, %v10253_v14  ;;  %v5480_v14 = vpop.f32.mrf.mxu3  ;;  %v10397_v25 = vld [vmem:[#allocation5 + $0x128] sm:$0xf] }
 0x8a9   :  { %15520 = vst [vmem:[#allocation270_spill] sm:$0xff] %v13626_v5 }
 0x8aa   :  { %5528 = vmatpush.bf16.msrb.mxu3 %v13580_v15  ;;  %15522 = vst [vmem:[#allocation272_spill] sm:$0xff] %v13634_v6 }
 0x8ab   :  { %15523 = vst [vmem:[#allocation273_spill] sm:$0xff] %v13637_v37 }
 0x8ac   :  { %15524 = vst [vmem:[#allocation274_spill] sm:$0xff] %v13640_v9 }
 0x8ad   :  { %15527 = vst [vmem:[#allocation277_spill] sm:$0xff] %v13649_v60 }
 0x8ae   :  { %5529 = vmatpush.bf16.msrb.mxu3 %v13583_v38  ;;  %v15581_v38 = vld [vmem:[#allocation54_spill] sm:$0xff] }
 0x8b2   :  { %5530 = vmatpush.bf16.msrb.mxu3 %v13586_v1 }
 0x8b5   :  { %5521 = vmatmul.bf16.vlgmr.msra.gmra.mxu3 %v13496_v61 }
 0x8b6   :  { %5531 = vmatpush.bf16.msrb.mxu3 %v13589_v49 }
 0x8ba   :  { %5532 = vmatpush.bf16.msrb.mxu3 %v13593_v12 }
 0x8be   :  { %5533 = vmatpush.bf16.msrb.mxu3 %v13596_v32 }
 0x8c2   :  { %5534 = vmatpush.bf16.msrb.mxu3 %v13599_v41 }
 0x8c5   :  { %5535 = vmatmul.bf16.vlgmr.msrb.gmra.mxu3 %v13522_v42 }
 0x8c6   :  { %5541 = vmatpush.bf16.msra.mxu3 %v13601_v36 }
 0x8ca   :  { %5542 = vmatpush.bf16.msra.mxu3 %v13605_v31 }
 0x8ce   :  { %5543 = vmatpush.bf16.msra.mxu3 %v13609_v27 }
 0x8d2   :  { %5544 = vmatpush.bf16.msra.mxu3 %v13612_v7 }
 0x8d6   :  { %5545 = vmatpush.bf16.msra.mxu3 %v13615_v54 }
 0x8da   :  { %5546 = vmatpush.bf16.msra.mxu3 %v13618_v50 }
 0x8de   :  { %5547 = vmatpush.bf16.msra.mxu3 %v13621_v16  ;;  %v10986_v16 = vld [vmem:[#allocation5 + $0x178] sm:$0xf0] }
 0x8e2   :  { %5548 = vmatpush.bf16.msra.mxu3 %v13624_v26 }
 0x8e5   :  { %5549 = vmatmul.bf16.vlgmr.msra.gmra.mxu3 %v13576_v53 }
 0x8e6   :  { %5555 = vmatpush.bf16.msrb.mxu3 %v13626_v5  ;;  %v10947_v5 = vld [vmem:[#allocation5 + $0x40] sm:$0xf0] }
 0x8e7   :  { %v13643_v26 = vor.u32 %v10947_v5, %v10277_v47  ;;  %v10409_v47 = vld [vmem:[#allocation5 + $0x140] sm:$0xf] }
 0x8e9   :  { %15525 = vst [vmem:[#allocation275_spill] sm:$0xff] %v13643_v26 }
 0x8ea   :  { %5556 = vmatpush.bf16.msrb.mxu3 %v13630_v11  ;;  %v13646_v11 = vor.u32 %v10944_v17, %v10265_v33  ;;  %v10980_v33 = vld [vmem:[#allocation5 + $0x148] sm:$0xf0] }
 0x8eb   :  { %v13659_v17 = vor.u32 %v10980_v33, %v10409_v47  ;;  %v10361_v33 = vld [vmem:[#allocation5 + $0xe0] sm:$0xf] }
 0x8ec   :  { %15526 = vst [vmem:[#allocation276_spill] sm:$0xff] %v13646_v11 }
 0x8ed   :  { %15530 = vst [vmem:[#allocation280_spill] sm:$0xff] %v13659_v17 }
 0x8ee   :  { %5557 = vmatpush.bf16.msrb.mxu3 %v13634_v6  ;;  %v10433_v6 = vld [vmem:[#allocation5 + $0x170] sm:$0xf] }
 0x8ef   :  { %v13651_v23 = vor.u32 %v10986_v16, %v10433_v6  ;;  %v10977_v16 = vld [vmem:[#allocation5 + $0x130] sm:$0xf0] }
 0x8f0   :  { %v13662_v6 = vor.u32 %v10977_v16, %v10397_v25  ;;  %v10349_v16 = vld [vmem:[#allocation5 + $0xc8] sm:$0xf] }
 0x8f1   :  { %15528 = vst [vmem:[#allocation278_spill] sm:$0xff] %v13651_v23 }
 0x8f2   :  { %5558 = vmatpush.bf16.msrb.mxu3 %v13637_v37  ;;  %v10421_v37 = vld [vmem:[#allocation5 + $0x158] sm:$0xf]  ;;  %15531 = vst [vmem:[#allocation281_spill] sm:$0xff] %v13662_v6 }
 0x8f6   :  { %5559 = vmatpush.bf16.msrb.mxu3 %v13640_v9  ;;  %v10983_v9 = vld [vmem:[#allocation5 + $0x160] sm:$0xf0] }
 0x8f7   :  { %v13655_v5 = vor.u32 %v10983_v9, %v10421_v37  ;;  %v10373_v9 = vld [vmem:[#allocation5 + $0xf8] sm:$0xf] }
 0x8f9   :  { %15529 = vst [vmem:[#allocation279_spill] sm:$0xff] %v13655_v5 }
 0x8fa   :  { %5560 = vmatpush.bf16.msrb.mxu3 %v13643_v26  ;;  %v10529_v26 = vld [vmem:[#allocation5 + $0x230] sm:$0xf] }
 0x8fe   :  { %5561 = vmatpush.bf16.msrb.mxu3 %v13646_v11  ;;  %v10974_v11 = vld [vmem:[#allocation5 + $0x118] sm:$0xf0] }
 0x902   :  { %5562 = vmatpush.bf16.msrb.mxu3 %v13649_v60  ;;  %v10385_v60 = vld [vmem:[#allocation5 + $0x110] sm:$0xf] }
 0x903   :  { %v13665_v37 = vor.u32 %v10974_v11, %v10385_v60  ;;  %v11050_v11 = vld [vmem:[%s14925_s0 + $0x138] sm:$0xff] }
 0x904   :  { %6165 = vmatpush.bf16.msrb.mxu0 %v11050_v11  ;;  %v11048_v11 = vld [vmem:[%s14925_s0 + $0x128] sm:$0xff] }
 0x905   :  { %5563 = vmatmul.bf16.vlgmr.msrb.gmra.mxu3 %v13496_v61  ;;  %15532 = vst [vmem:[#allocation282_spill] sm:$0xff] %v13665_v37  ;;  %v13667_v61 = vpop.f32.mrf.mxu3 }
 0x906   :  { %5569 = vmatpush.bf16.msra.mxu3 %v13651_v23  ;;  %v10971_v23 = vld [vmem:[#allocation5 + $0x100] sm:$0xf0] }
 0x907   :  { %v13670_v47 = vor.u32 %v10971_v23, %v10373_v9  ;;  %v11058_v23 = vld [vmem:[%s14925_s0 + $0x178] sm:$0xff] }
 0x908   :  { %6534 = vmatpush.bf16.msrb.mxu1 %v11058_v23  ;;  %v13702_v23 = vld [vmem:[%s14928_s3] sm:$0x7] }
 0x909   :  { %15533 = vst [vmem:[#allocation283_spill] sm:$0xff] %v13670_v47 }
 0x90a   :  { %5570 = vmatpush.bf16.msra.mxu3 %v13655_v5  ;;  %v10968_v5 = vld [vmem:[#allocation5 + $0xe8] sm:$0xf0] }
 0x90b   :  { %v13673_v25 = vor.u32 %v10968_v5, %v10361_v33  ;;  %v10517_v33 = vld [vmem:[#allocation5 + $0x218] sm:$0xf] }
 0x90d   :  { %15534 = vst [vmem:[#allocation284_spill] sm:$0xff] %v13673_v25  ;;  %v5494_v9 = vpop.f32.mrf.mxu3 }
 0x90e   :  { %5571 = vmatpush.bf16.msra.mxu3 %v13659_v17  ;;  %v10965_v17 = vld [vmem:[#allocation5 + $0xd0] sm:$0xf0] }
 0x90f   :  { %v13679_v60 = vor.u32 %v10965_v17, %v10349_v16  ;;  %v11057_v17 = vld [vmem:[%s14925_s0 + $0x170] sm:$0xff] }
 0x910   :  { %6535 = vmatpush.bf16.msrb.mxu1 %v11057_v17  ;;  %v10493_v17 = vld [vmem:[#allocation5 + $0x1e8] sm:$0xf] }
 0x911   :  { %15535 = vst [vmem:[#allocation285_spill] sm:$0xff] %v13679_v60 }
 0x912   :  { %5572 = vmatpush.bf16.msra.mxu3 %v13662_v6  ;;  %v11010_v6 = vld [vmem:[#allocation5 + $0x238] sm:$0xf0] }
 0x913   :  { %v13684_v5 = vor.u32 %v11010_v6, %v10529_v26  ;;  %v10505_v26 = vld [vmem:[#allocation5 + $0x200] sm:$0xf]  ;;  %v11004_v6 = vld [vmem:[#allocation5 + $0x208] sm:$0xf0] }
 0x915   :  { %15536 = vst [vmem:[#allocation286_spill] sm:$0xff] %v13684_v5 }
 0x916   :  { %5573 = vmatpush.bf16.msra.mxu3 %v13665_v37  ;;  %v11049_v37 = vld [vmem:[%s14925_s0 + $0x130] sm:$0xff] }
 0x917   :  { %6166 = vmatpush.bf16.msrb.mxu0 %v11049_v37  ;;  %v11056_v37 = vld [vmem:[%s14925_s0 + $0x168] sm:$0xff] }
 0x918   :  { %6536 = vmatpush.bf16.msrb.mxu1 %v11056_v37  ;;  %v11046_v37 = vld [vmem:[%s14925_s0 + $0x118] sm:$0xff] }
 0x91a   :  { %5574 = vmatpush.bf16.msra.mxu3 %v13670_v47  ;;  %v11007_v47 = vld [vmem:[#allocation5 + $0x220] sm:$0xf0] }
 0x91b   :  { %v13694_v16 = vor.u32 %v11007_v47, %v10517_v33  ;;  %6167 = vmatpush.bf16.msrb.mxu0 %v11048_v11  ;;  %v13709_v47 = vor.u32 %v11004_v6, %v10505_v26  ;;  %v13712_v33 = vperm.slane %v13702_v23, 0  ;;  %v11055_v11 = vld [vmem:[%s14925_s0 + $0x160] sm:$0xff] }
 0x91c   :  { %6537 = vmatpush.bf16.msrb.mxu1 %v11055_v11 }
 0x91d   :  { %15537 = vst [vmem:[#allocation287_spill] sm:$0xff] %v13694_v16  ;;  %v5481_v6 = vadd.f32 %v5480_v14, %v13712_v33  ;;  %v11045_v14 = vld [vmem:[%s14925_s0 + $0x110] sm:$0xff] }
 0x91e   :  { %5575 = vmatpush.bf16.msra.mxu3 %v13673_v25  ;;  %15538 = vst [vmem:[#allocation288_spill] sm:$0xff] %v13709_v47  ;;  %v10998_v25 = vld [vmem:[#allocation5 + $0x1d8] sm:$0xf0] }
 0x91f   :  { %15539 = vst [vmem:[#allocation289_spill] sm:$0xff] %v13712_v33 }
 0x922   :  { %5576 = vmatpush.bf16.msra.mxu3 %v13679_v60  ;;  %v11047_v60 = vld [vmem:[%s14925_s0 + $0x120] sm:$0xff] }
 0x923   :  { %6168 = vmatpush.bf16.msrb.mxu0 %v11047_v60  ;;  %v11054_v60 = vld [vmem:[%s14925_s0 + $0x158] sm:$0xff] }
 0x924   :  { %6538 = vmatpush.bf16.msrb.mxu1 %v11054_v60  ;;  %v11052_v60 = vld [vmem:[%s14925_s0 + $0x148] sm:$0xff] }
 0x925   :  { %5577 = vmatmul.bf16.vlgmr.msra.gmra.mxu3 %v13522_v42  ;;  %v5496_v42 = vpop.f32.mrf.mxu3 }
 0x926   :  { %5583 = vmatpush.bf16.msrb.mxu3 %v13684_v5  ;;  %v11001_v5 = vld [vmem:[#allocation5 + $0x1f0] sm:$0xf0] }
 0x927   :  { %v13721_v26 = vor.u32 %v11001_v5, %v10493_v17  ;;  %6169 = vmatpush.bf16.msrb.mxu0 %v11046_v37  ;;  %v5495_v5 = vadd.f32 %v5494_v9, %v5481_v6  ;;  %v10469_v17 = vld [vmem:[#allocation5 + $0x1b8] sm:$0xf]  ;;  %v11053_v37 = vld [vmem:[%s14925_s0 + $0x150] sm:$0xff]  ;;  %v10457_v9 = vld [vmem:[#allocation5 + $0x1a0] sm:$0xf] }
 0x928   :  { %6539 = vmatpush.bf16.msrb.mxu1 %v11053_v37  ;;  %v11044_v6 = vld [vmem:[%s14925_s0 + $0x108] sm:$0xff]  ;;  %v11051_v37 = vld [vmem:[%s14925_s0 + $0x140] sm:$0xff] }
 0x929   :  { %15540 = vst [vmem:[#allocation290_spill] sm:$0xff] %v13721_v26 }
 0x92a   :  { %5584 = vmatpush.bf16.msrb.mxu3 %v13694_v16  ;;  %v10481_v16 = vld [vmem:[#allocation5 + $0x1d0] sm:$0xf] }
 0x92b   :  { %v13731_v50 = vor.u32 %v10998_v25, %v10481_v16  ;;  %6170 = vmatpush.bf16.msrb.mxu0 %v11045_v14  ;;  %v5483_v25 = vadd.f32 %v13667_v61, %v13712_v33  ;;  %v10992_v16 = vld [vmem:[#allocation5 + $0x1a8] sm:$0xf0]  ;;  %v10989_v61 = vld [vmem:[#allocation5 + $0x190] sm:$0xf0] }
 0x92c   :  { %6540 = vmatpush.bf16.msrb.mxu1 %v11052_v60  ;;  %v11040_v60 = vld [vmem:[%s14925_s0 + $0xe8] sm:$0xff]  ;;  %v15557_v33 = vld [vmem:[#allocation21_spill] sm:$0xff] }
 0x92d   :  { %15541 = vst [vmem:[#allocation291_spill] sm:$0xff] %v13731_v50  ;;  %v5508_v11 = vpop.f32.mrf.mxu3 }
 0x92e   :  { %5585 = vmatpush.bf16.msrb.mxu3 %v13709_v47  ;;  %v10995_v47 = vld [vmem:[#allocation5 + $0x1c0] sm:$0xf0]  ;;  %v5509_v54 = vadd.f32 %v5508_v11, %v5495_v5  ;;  %v5497_v5 = vadd.f32 %v5496_v42, %v5483_v25  ;;  %v11042_v42 = vld [vmem:[%s14925_s0 + $0xf8] sm:$0xff] }
 0x92f   :  { %6171 = vmatpush.bf16.msrb.mxu0 %v11044_v6  ;;  %v15545_v25 = vld [vmem:[#allocation14_spill] sm:$0xff] }
 0x930   :  { %5597 = vst [vmem:[#allocation7] sm:$0xff] %v5509_v54  ;;  %v11043_v54 = vld [vmem:[%s14925_s0 + $0x100] sm:$0xff]  ;;  %6541 = vmatpush.bf16.msrb.mxu1 %v11051_v37  ;;  %v11036_v37 = vld [vmem:[%s14925_s0 + $0xc8] sm:$0xff] }
 0x932   :  { %5586 = vmatpush.bf16.msrb.mxu3 %v13721_v26  ;;  %v13740_v26 = vor.u32 %v10995_v47, %v10469_v17  ;;  %v13751_v47 = vor.u32 %v10992_v16, %v10457_v9  ;;  %v10445_v17 = vld [vmem:[#allocation5 + $0x188] sm:$0xf]  ;;  %v15546_v9 = vld [vmem:[#allocation23_spill] sm:$0xff]  ;;  %v11041_v16 = vld [vmem:[%s14925_s0 + $0xf0] sm:$0xff] }
 0x933   :  { %6172 = vmatpush.bf16.msrb.mxu0 %v11043_v54  ;;  %v13760_v6 = vor.u32 %v10989_v61, %v10445_v17  ;;  %6542 = vmatmul.bf16.vlgmr.msrb.gmra.mxu1 %v15546_v9  ;;  %v11039_v17 = vld [vmem:[%s14925_s0 + $0xe0] sm:$0xff]  ;;  %v11038_v61 = vld [vmem:[%s14925_s0 + $0xd8] sm:$0xff] }
 0x934   :  { %15542 = vst [vmem:[#allocation292_spill] sm:$0xff] %v13740_v26  ;;  %v15547_v54 = vld [vmem:[#allocation18_spill] sm:$0xff] }
 0x935   :  { %15543 = vst [vmem:[#allocation293_spill] sm:$0xff] %v13751_v47  ;;  %v5510_v14 = vpop.f32.mrf.mxu3  ;;  %v15549_v9 = vld [vmem:[#allocation22_spill] sm:$0xff] }
 0x936   :  { %5587 = vmatpush.bf16.msrb.mxu3 %v13731_v50  ;;  %v5511_v11 = vadd.f32 %v5510_v14, %v5497_v5  ;;  %15544 = vst [vmem:[#allocation294_spill] sm:$0xff] %v13760_v6  ;;  %6173 = vmatmul.bf16.vlgmr.msrb.gmra.mxu0 %v15545_v25  ;;  %v15548_v14 = vld [vmem:[#allocation26_spill] sm:$0xff]  ;;  %v15556_v50 = vld [vmem:[#allocation28_spill] sm:$0xff] }
 0x938   :  { %5600 = vst [vmem:[#allocation7 + $0x18] sm:$0xff] %v5511_v11 }
 0x93a   :  { %5588 = vmatpush.bf16.msrb.mxu3 %v13740_v26 }
 0x93d   :  { %v5522_v5 = vpop.f32.mrf.mxu3 }
 0x93e   :  { %5589 = vmatpush.bf16.msrb.mxu3 %v13751_v47  ;;  %v15554_v47 = vld [vmem:[#allocation17_spill] sm:$0xff] }
 0x942   :  { %5590 = vmatpush.bf16.msrb.mxu3 %v13760_v6 }
 0x943   :  { %6547 = vmatmul.bf16.gmra.mxu1 %v15548_v14 }
 0x945   :  { %5591 = vmatmul.bf16.vlgmr.msrb.gmra.mxu3 %v13576_v53  ;;  %v11037_v53 = vld [vmem:[%s14925_s0 + $0xd0] sm:$0xff]  ;;  %v5524_v11 = vpop.f32.mrf.mxu3 }
 0x946   :  { %5796 = vmatpush.bf16.msra.mxu3 %v11042_v42  ;;  %6178 = vmatmul.bf16.gmra.mxu0 %v15547_v54  ;;  %v11035_v42 = vld [vmem:[%s14925_s0 + $0xc0] sm:$0xff]  ;;  %s11569_s0 = smov [#allocation7]  }
 0x947   :  { %s9219_s11 = sshll.u32 %s11569_s0, 4  ;;  %s9220_s11 = int_to_ptr.vmem [resolvable:$true] %s9219_s11 }
 0x94a   :  { %5797 = vmatpush.bf16.msra.mxu3 %v11041_v16  ;;  %v15550_v16 = vld [vmem:[#allocation13_spill] sm:$0xff] }
 0x94d   :  { %v5536_v25 = vpop.f32.mrf.mxu3 }
 0x94e   :  { %5798 = vmatpush.bf16.msra.mxu3 %v11040_v60  ;;  %v15551_v60 = vld [vmem:[#allocation29_spill] sm:$0xff] }
 0x952   :  { %5799 = vmatpush.bf16.msra.mxu3 %v11039_v17 }
 0x953   :  { %6552 = vmatmul.bf16.gmra.mxu1 %v15551_v60 }
 0x955   :  { %v5538_v17 = vpop.f32.mrf.mxu3 }
 0x956   :  { %5800 = vmatpush.bf16.msra.mxu3 %v11038_v61  ;;  %6183 = vmatmul.bf16.gmra.mxu0 %v15549_v9  ;;  %v13796_v61 = vperm.slane %v13702_v23, 1 }
 0x958   :  { %15552 = vst [vmem:[#allocation14_spill] sm:$0xff] %v13796_v61  ;;  %v5523_v54 = vadd.f32 %v5522_v5, %v13796_v61  ;;  %v5525_v9 = vadd.f32 %v5524_v11, %v13796_v61  ;;  %v15558_v5 = vld [vmem:[#allocation35_spill] sm:$0xff]  ;;  %v15564_v11 = vld [vmem:[#allocation41_spill] sm:$0xff] }
 0x95a   :  { %5801 = vmatpush.bf16.msra.mxu3 %v11037_v53  ;;  %v5537_v14 = vadd.f32 %v5536_v25, %v5523_v54  ;;  %v15553_v53 = vld [vmem:[#allocation25_spill] sm:$0xff]  ;;  %v15559_v25 = vld [vmem:[#allocation31_spill] sm:$0xff]  ;;  %v15560_v54 = vld [vmem:[#allocation24_spill] sm:$0xff] }
 0x95e   :  { %5802 = vmatpush.bf16.msra.mxu3 %v11036_v37 }
 0x962   :  { %5803 = vmatpush.bf16.msra.mxu3 %v11035_v42  ;;  %v15555_v42 = vld [vmem:[#allocation32_spill] sm:$0xff] }
 0x963   :  { %6557 = vmatmul.bf16.gmra.mxu1 %v15555_v42 }
 0x965   :  { %5804 = vmatmul.bf16.vlgmr.msra.gmra.mxu3 %v15550_v16  ;;  %v5539_v16 = vadd.f32 %v5538_v17, %v5525_v9 }
 0x966   :  { %6188 = vmatmul.bf16.gmra.mxu0 %v15553_v53  ;;  %v15565_v53 = vld [vmem:[#allocation37_spill] sm:$0xff] }
 0x968   :  { %v5550_v37 = vpop.f32.mrf.mxu3 }
 0x969   :  { %v5551_v6 = vadd.f32 %v5550_v37, %v5537_v14  ;;  %v15562_v14 = vld [vmem:[#allocation34_spill] sm:$0xff] }
 0x96b   :  { %5598 = vst [vmem:[#allocation7 + $0x8] sm:$0xff] %v5551_v6  ;;  %v15563_v6 = vld [vmem:[#allocation27_spill] sm:$0xff] }
 0x970   :  { %v5552_v60 = vpop.f32.mrf.mxu3 }
 0x971   :  { %v5553_v26 = vadd.f32 %v5552_v60, %v5539_v16  ;;  %v15568_v60 = vld [vmem:[#allocation40_spill] sm:$0xff] }
 0x973   :  { %5601 = vst [vmem:[#allocation7 + $0x20] sm:$0xff] %v5553_v26  ;;  %6562 = vmatmul.bf16.gmra.mxu1 %v15558_v5  ;;  %v13817_v5 = vperm.slane %v13702_v23, 2  ;;  %v15572_v23 = vld [vmem:[#allocation44_spill] sm:$0xff] }
 0x975   :  { %5809 = vmatmul.bf16.gmra.mxu3 %v15554_v47  ;;  %v15561_v47 = vld [vmem:[#allocation38_spill] sm:$0xff]  ;;  %15569 = vst [vmem:[#allocation23_spill] sm:$0xff] %v13817_v5 }
 0x976   :  { %6193 = vmatmul.bf16.gmra.mxu0 %v15556_v50  ;;  %v15566_v50 = vld [vmem:[#allocation30_spill] sm:$0xff] }
 0x983   :  { %6567 = vmatmul.bf16.gmra.mxu1 %v15561_v47 }
 0x985   :  { %5814 = vmatmul.bf16.gmra.mxu3 %v15557_v33  ;;  %v15567_v33 = vld [vmem:[#allocation45_spill] sm:$0xff] }
 0x986   :  { %6198 = vmatmul.bf16.gmra.mxu0 %v15559_v25  ;;  %v15570_v25 = vld [vmem:[#allocation33_spill] sm:$0xff] }
 0x988   :  { %v5564_v17 = vpop.f32.mrf.mxu3 }
 0x989   :  { %v5565_v47 = vadd.f32 %v5564_v17, %v13817_v5 }
 0x990   :  { %v5566_v26 = vpop.f32.mrf.mxu3 }
 0x993   :  { %6572 = vmatmul.bf16.gmra.mxu1 %v15564_v11 }
 0x995   :  { %5819 = vmatmul.bf16.gmra.mxu3 %v15560_v54  ;;  %v15571_v54 = vld [vmem:[#allocation49_spill] sm:$0xff] }
 0x996   :  { %6203 = vmatmul.bf16.gmra.mxu0 %v15562_v14 }
 0x9a3   :  { %6577 = vmatmul.bf16.gmra.mxu1 %v15567_v33  ;;  %v5567_v33 = vadd.f32 %v5566_v26, %v13817_v5  ;;  %v15577_v26 = vld [vmem:[#allocation55_spill] sm:$0xff] }
 0x9a5   :  { %5824 = vmatmul.bf16.gmra.mxu3 %v15563_v6 }
 0x9a6   :  { %6208 = vmatmul.bf16.gmra.mxu0 %v15565_v53 }
 0x9a8   :  { %v5578_v37 = vpop.f32.mrf.mxu3 }
 0x9a9   :  { %v5579_v6 = vadd.f32 %v5578_v37, %v5565_v47 }
 0x9b0   :  { %v6543_v9 = vpop.f32.mrf.mxu1  ;;  %v5580_v16 = vpop.f32.mrf.mxu3 }
 0x9b1   :  { %v5581_v7 = vadd.f32 %v5580_v16, %v5567_v33 }
 0x9b3   :  { %v6174_v42 = vpop.f32.mrf.mxu0  ;;  %6582 = vmatmul.bf16.gmra.mxu1 %v15571_v54  ;;  %v15574_v54 = vld [vmem:[#allocation52_spill] sm:$0xff] }
 0x9b5   :  { %5829 = vmatmul.bf16.gmra.mxu3 %v15566_v50 }
 0x9b6   :  { %6213 = vmatmul.bf16.gmra.mxu0 %v15568_v60 }
 0x9b8   :  { %v6545_v11 = vpop.f32.mrf.mxu1 }
 0x9bb   :  { %v6176_v14 = vpop.f32.mrf.mxu0 }
 0x9c0   :  { %v6548_v60 = vpop.f32.mrf.mxu1 }
 0x9c3   :  { %v6179_v61 = vpop.f32.mrf.mxu0  ;;  %6587 = vmatmul.bf16.gmra.mxu1 %v15574_v54  ;;  %v15580_v54 = vld [vmem:[#allocation58_spill] sm:$0xff] }
 0x9c5   :  { %5834 = vmatmul.bf16.gmra.mxu3 %v15570_v25  ;;  %v15573_v25 = vld [vmem:[#allocation36_spill] sm:$0xff] }
 0x9c6   :  { %6218 = vmatmul.bf16.gmra.mxu0 %v15572_v23 }
 0x9c8   :  { %v5592_v53 = vpop.f32.mrf.mxu3  ;;  %v6550_v37 = vpop.f32.mrf.mxu1 }
 0x9c9   :  { %v5593_v50 = vadd.f32 %v5592_v53, %v5579_v6  ;;  %v15575_v6 = vld [vmem:[#allocation48_spill] sm:$0xff]  ;;  %v15576_v53 = vld [vmem:[#allocation39_spill] sm:$0xff] }
 0x9cb   :  { %5599 = vst [vmem:[#allocation7 + $0x10] sm:$0xff] %v5593_v50  ;;  %v6181_v17 = vpop.f32.mrf.mxu0 }
 0x9d0   :  { %v5594_v27 = vpop.f32.mrf.mxu3  ;;  %v6553_v36 = vpop.f32.mrf.mxu1 }
 0x9d1   :  { %v5595_v31 = vadd.f32 %v5594_v27, %v5581_v7 }
 0x9d3   :  { %5602 = vst [vmem:[#allocation7 + $0x28] sm:$0xff] %v5595_v31  ;;  %v6184_v47 = vpop.f32.mrf.mxu0  ;;  %6592 = vmatmul.bf16.gmra.mxu1 %v15577_v26  ;;  %v15579_v31 = vld [vmem:[#allocation43_spill] sm:$0xff] }
 0x9d5   :  { %5839 = vmatmul.bf16.gmra.mxu3 %v15573_v25  ;;  %v15578_v25 = vld [vmem:[#allocation51_spill] sm:$0xff] }
 0x9d6   :  { %6223 = vmatmul.bf16.gmra.mxu0 %v15575_v6 }
 0x9d8   :  { %v6555_v33 = vpop.f32.mrf.mxu1 }
 0x9db   :  { %v6186_v50 = vpop.f32.mrf.mxu0 }
 0x9e0   :  { %v13831_v7 = vpop.f32.mrf.mxu1 }
 0x9e3   :  { %v13829_v27 = vpop.f32.mrf.mxu0  ;;  %6597 = vmatmul.bf16.gmra.mxu1 %v15580_v54 }
 0x9e5   :  { %5844 = vmatmul.bf16.gmra.mxu3 %v15576_v53 }
 0x9e6   :  { %6228 = vmatmul.bf16.gmra.mxu0 %v15578_v25  ;;  %v15582_v25 = vld [vmem:[#allocation46_spill] sm:$0xff] }
 0x9e8   :  { %v5805_v16 = vpop.f32.mrf.mxu3  ;;  %v13836_v41 = vpop.f32.mrf.mxu1 }
 0x9e9   :  { %v6175_v49 = vadd.f32 %v6174_v42, %v5805_v16 }
 0x9eb   :  { %v6191_v6 = vpop.f32.mrf.mxu0  ;;  %v6544_v54 = vadd.f32 %v6543_v9, %v6175_v49  ;;  %v15584_v9 = vld [vmem:[#allocation57_spill] sm:$0xff] }
 0x9ed   :  { %v6903_v0 = vpack.c.bf16 %v6544_v54, %v6544_v54 }
 0x9f0   :  { %v5807_v23 = vpop.f32.mrf.mxu3  ;;  %v13840_v12 = vpop.f32.mrf.mxu1 }
 0x9f1   :  { %v6177_v32 = vadd.f32 %v6176_v14, %v5807_v23 }
 0x9f3   :  { %v13838_v26 = vpop.f32.mrf.mxu0  ;;  %v6546_v15 = vadd.f32 %v6545_v11, %v6177_v32 }
 0x9f5   :  { %5849 = vmatmul.bf16.gmra.mxu3 %v15579_v31  ;;  %v15583_v31 = vld [vmem:[#allocation61_spill] sm:$0xff]  ;;  %v6904_v62 = vpack.c.bf16 %v6546_v15, %v6546_v15 }
 0x9f6   :  { %6233 = vmatmul.bf16.gmra.mxu0 %v15581_v38  ;;  %6602 = vmatmul.bf16.gmra.mxu1 %v15583_v31 }
 0x9f7   :  { %v7051_v59 = vunpack.c.l.b16 %v6904_v62 }
 0x9f8   :  { %v5810_v5 = vpop.f32.mrf.mxu3  ;;  %v6565_v34 = vpop.f32.mrf.mxu1 }
 0x9fb   :  { %v6196_v35 = vpop.f32.mrf.mxu0 }
 0xa00   :  { %v5812_v53 = vpop.f32.mrf.mxu3 }
 0xa01   :  { %v6182_v1 = vadd.f32 %v6181_v17, %v5812_v53  ;;  %v7050_v17 = vunpack.c.l.b16 %v6903_v0 }
 0xa03   :  { %v6551_v10 = vadd.f32 %v6550_v37, %v6182_v1  ;;  %v6199_v11 = vpop.f32.mrf.mxu0  ;;  %v7053_v53 = vpack.c.b16 %v7051_v59, %v7050_v17  ;;  %v6568_v1 = vpop.f32.mrf.mxu1  ;;  %v15585_v37 = vld [vmem:[#allocation50_spill] sm:$0xff] }
 0xa05   :  { %5854 = vmatmul.bf16.gmra.mxu3 %v15582_v25  ;;  %v6906_v14 = vpack.c.bf16 %v6551_v10, %v6551_v10  ;;  %v6180_v25 = vadd.f32 %v6179_v61, %v5810_v5 }
 0xa06   :  { %6238 = vmatmul.bf16.gmra.mxu0 %v15584_v9 }
 0xa07   :  { %v7105_v16 = vunpack.c.l.b16 %v6906_v14 }
 0xa08   :  { %v5815_v57 = vpop.f32.mrf.mxu3 }
 0xa09   :  { %v6185_v45 = vadd.f32 %v6184_v47, %v5815_v57  ;;  %v6549_v57 = vadd.f32 %v6548_v60, %v6180_v25  ;;  %v15587_v60 = vld [vmem:[#allocation60_spill] sm:$0xff] }
 0xa0b   :  { %v6554_v23 = vadd.f32 %v6553_v36, %v6185_v45  ;;  %v15586_v45 = vld [vmem:[#allocation64_spill] sm:$0xff]  ;;  %v6201_v0 = vpop.f32.mrf.mxu0  ;;  %v6905_v10 = vpack.c.bf16 %v6549_v57, %v6549_v57  ;;  %v6570_v47 = vpop.f32.mrf.mxu1  ;;  %v15590_v57 = vld [vmem:[#allocation63_spill] sm:$0xff] }
 0xa0c   :  { %6607 = vmatmul.bf16.gmra.mxu1 %v15586_v45  ;;  %v15592_v45 = vld [vmem:[#allocation70_spill] sm:$0xff] }
 0xa0d   :  { %v6907_v42 = vpack.c.bf16 %v6554_v23, %v6554_v23  ;;  %v7052_v54 = vunpack.c.l.b16 %v6905_v10 }
 0xa0f   :  { %v7106_v38 = vunpack.c.l.b16 %v6907_v42  ;;  %v15589_v42 = vld [vmem:[#allocation67_spill] sm:$0xff] }
 0xa10   :  { %v5817_v32 = vpop.f32.mrf.mxu3 }
 0xa11   :  { %v7108_v31 = vpack.c.b16 %v7106_v38, %v7105_v16  ;;  %v6187_v49 = vadd.f32 %v6186_v50, %v5817_v32  ;;  %v7054_v50 = vpack.c.b16 %v7052_v54, %v7052_v54 }
 0xa13   :  { %11157 = vxpose.binary.xlu2.c.b16.start [1/4] (short) (narrow) %v7108_v31, %v7053_v53, 16  ;;  %v6556_v15 = vadd.f32 %v6555_v33, %v6187_v49  ;;  %v13848_v5 = vpop.f32.mrf.mxu0  ;;  %v13850_v23 = vpop.f32.mrf.mxu1  ;;  %v15588_v33 = vld [vmem:[#allocation53_spill] sm:$0xff] }
 0xa15   :  { %5859 = vmatmul.bf16.gmra.mxu3 %v15585_v37  ;;  %v6908_v36 = vpack.c.bf16 %v6556_v15, %v6556_v15  ;;  %v15591_v37 = vld [vmem:[#allocation56_spill] sm:$0xff] }
 0xa16   :  { %6243 = vmatmul.bf16.gmra.mxu0 %v15587_v60 }
 0xa17   :  { %v7107_v59 = vunpack.c.l.b16 %v6908_v36 }
 0xa18   :  { %v5820_v62 = vpop.f32.mrf.mxu3 }
 0xa19   :  { %v7109_v14 = vpack.c.b16 %v7107_v59, %v7107_v59  ;;  %v6190_v49 = vadd.f32 %v13829_v27, %v5820_v62 }
 0xa1b   :  { %v6206_v16 = vpop.f32.mrf.mxu0  ;;  %v13855_v38 = vpop.f32.mrf.mxu1  ;;  %v6559_v10 = vadd.f32 %v13831_v7, %v6190_v49 }
 0xa1c   :  { %6612 = vmatmul.bf16.gmra.mxu1 %v15589_v42 }
 0xa20   :  { %v5822_v61 = vpop.f32.mrf.mxu3 }
 0xa21   :  { %v6192_v25 = vadd.f32 %v6191_v6, %v5822_v61 }
 0xa23   :  { %11158 = vxpose.binary.xlu2.c.b16.end [2/4] (short) (narrow) %v7109_v14, %v7054_v50, 16  ;;  %v13857_v53 = vpop.f32.mrf.mxu0  ;;  %v13859_v31 = vpop.f32.mrf.mxu1  ;;  %v6561_v15 = vadd.f32 %v13836_v41, %v6192_v25  ;;  %v6909_v14 = vpack.c.bf16 %v6559_v10, %v6559_v10 }
 0xa25   :  { %5864 = vmatmul.bf16.gmra.mxu3 %v15588_v33  ;;  %v6910_v50 = vpack.c.bf16 %v6561_v15, %v6561_v15  ;;  %v7160_v33 = vunpack.c.l.b16 %v6909_v14 }
 0xa26   :  { %6248 = vmatmul.bf16.gmra.mxu0 %v15590_v57 }
 0xa28   :  { %v5825_v17 = vpop.f32.mrf.mxu3 }
 0xa29   :  { %v6195_v57 = vadd.f32 %v13838_v26, %v5825_v17 }
 0xa2b   :  { %v6211_v59 = vpop.f32.mrf.mxu0  ;;  %v6580_v61 = vpop.f32.mrf.mxu1 }
 0xa2c   :  { %6617 = vmatmul.bf16.gmra.mxu1 %v15592_v45  ;;  %v15595_v45 = vld [vmem:[#allocation73_spill] sm:$0xff] }
 0xa30   :  { %v5827_v32 = vpop.f32.mrf.mxu3 }
 0xa31   :  { %v6197_v9 = vadd.f32 %v6196_v35, %v5827_v32  ;;  %v7161_v35 = vunpack.c.l.b16 %v6910_v50 }
 0xa33   :  { %v6566_v36 = vadd.f32 %v6565_v34, %v6197_v9  ;;  %v6214_v25 = vpop.f32.mrf.mxu0  ;;  %v7163_v7 = vpack.c.b16 %v7161_v35, %v7160_v33  ;;  %v6583_v49 = vpop.f32.mrf.mxu1  ;;  %v15593_v9 = vld [vmem:[#allocation66_spill] sm:$0xff] }
 0xa35   :  { %5869 = vmatmul.bf16.gmra.mxu3 %v15591_v37  ;;  %v6912_v60 = vpack.c.bf16 %v6566_v36, %v6566_v36 }
 0xa36   :  { %6253 = vmatmul.bf16.gmra.mxu0 %v15593_v9 }
 0xa37   :  { %v7215_v42 = vunpack.c.l.b16 %v6912_v60 }
 0xa38   :  { %v5830_v54 = vpop.f32.mrf.mxu3 }
 0xa39   :  { %v6200_v6 = vadd.f32 %v6199_v11, %v5830_v54  ;;  %v6564_v11 = vadd.f32 %v13840_v12, %v6195_v57  ;;  %v15596_v12 = vld [vmem:[#allocation69_spill] sm:$0xff] }
 0xa3b   :  { %v6569_v27 = vadd.f32 %v6568_v1, %v6200_v6  ;;  %v15594_v1 = vld [vmem:[#allocation59_spill] sm:$0xff]  ;;  %v6216_v36 = vpop.f32.mrf.mxu0  ;;  %v6911_v54 = vpack.c.bf16 %v6564_v11, %v6564_v11  ;;  %v6585_v6 = vpop.f32.mrf.mxu1  ;;  %v15599_v11 = vld [vmem:[#allocation72_spill] sm:$0xff] }
 0xa3c   :  { %6622 = vmatmul.bf16.gmra.mxu1 %v15595_v45  ;;  %v15601_v45 = vld [vmem:[#allocation79_spill] sm:$0xff] }
 0xa3d   :  { %v6913_v62 = vpack.c.bf16 %v6569_v27, %v6569_v27  ;;  %v7162_v26 = vunpack.c.l.b16 %v6911_v54 }
 0xa3f   :  { %v7216_v41 = vunpack.c.l.b16 %v6913_v62  ;;  %v7164_v60 = vpack.c.b16 %v7162_v26, %v7162_v26  ;;  %v15598_v62 = vld [vmem:[#allocation76_spill] sm:$0xff] }
 0xa40   :  { %v5832_v32 = vpop.f32.mrf.mxu3 }
 0xa41   :  { %v6202_v37 = vadd.f32 %v6201_v0, %v5832_v32  ;;  %v7218_v34 = vpack.c.b16 %v7216_v41, %v7215_v42 }
 0xa43   :  { %11161 = vxpose.binary.xlu2.c.b16.start [1/4] (short) (narrow) %v7218_v34, %v7163_v7, 16  ;;  %v6571_v15 = vadd.f32 %v6570_v47, %v6202_v37  ;;  %v13872_v14 = vpop.f32.mrf.mxu0  ;;  %v13874_v35 = vpop.f32.mrf.mxu1  ;;  %v15597_v47 = vld [vmem:[#allocation62_spill] sm:$0xff] }
 0xa45   :  { %5874 = vmatmul.bf16.gmra.mxu3 %v15594_v1  ;;  %v6914_v50 = vpack.c.bf16 %v6571_v15, %v6571_v15  ;;  %v15600_v1 = vld [vmem:[#allocation65_spill] sm:$0xff] }
 0xa46   :  { %6258 = vmatmul.bf16.gmra.mxu0 %v15596_v12 }
 0xa47   :  { %v7217_v0 = vunpack.c.l.b16 %v6914_v50 }
 0xa48   :  { %v5835_v10 = vpop.f32.mrf.mxu3 }
 0xa49   :  { %v7219_v27 = vpack.c.b16 %v7217_v0, %v7217_v0  ;;  %v6205_v34 = vadd.f32 %v13848_v5, %v5835_v10 }
 0xa4b   :  { %v6221_v42 = vpop.f32.mrf.mxu0  ;;  %v13879_v41 = vpop.f32.mrf.mxu1  ;;  %v6574_v54 = vadd.f32 %v13850_v23, %v6205_v34 }
 0xa4c   :  { %6627 = vmatmul.bf16.gmra.mxu1 %v15598_v62 }
 0xa50   :  { %v5837_v17 = vpop.f32.mrf.mxu3 }
 0xa51   :  { %v6207_v37 = vadd.f32 %v6206_v16, %v5837_v17 }
 0xa53   :  { %11162 = vxpose.binary.xlu2.c.b16.end [2/4] (short) (narrow) %v7219_v27, %v7164_v60, 16  ;;  %v13881_v57 = vpop.f32.mrf.mxu0  ;;  %v13883_v7 = vpop.f32.mrf.mxu1  ;;  %v6576_v15 = vadd.f32 %v13855_v38, %v6207_v37  ;;  %v6915_v27 = vpack.c.bf16 %v6574_v54, %v6574_v54 }
 0xa55   :  { %5879 = vmatmul.bf16.gmra.mxu3 %v15597_v47  ;;  %v6916_v60 = vpack.c.bf16 %v6576_v15, %v6576_v15  ;;  %v7270_v47 = vunpack.c.l.b16 %v6915_v27 }
 0xa56   :  { %6263 = vmatmul.bf16.gmra.mxu0 %v15599_v11 }
 0xa58   :  { %v5840_v33 = vpop.f32.mrf.mxu3 }
 0xa59   :  { %v6210_v11 = vadd.f32 %v13857_v53, %v5840_v33 }
 0xa5b   :  { %v6226_v0 = vpop.f32.mrf.mxu0  ;;  %v6595_v17 = vpop.f32.mrf.mxu1 }
 0xa5c   :  { %6632 = vmatmul.bf16.gmra.mxu1 %v15601_v45  ;;  %v15604_v45 = vld [vmem:[#allocation82_spill] sm:$0xff] }
 0xa60   :  { %v5842_v32 = vpop.f32.mrf.mxu3 }
 0xa61   :  { %v6212_v9 = vadd.f32 %v6211_v59, %v5842_v32  ;;  %v7271_v59 = vunpack.c.l.b16 %v6916_v60 }
 0xa63   :  { %v6581_v50 = vadd.f32 %v6580_v61, %v6212_v9  ;;  %v6229_v37 = vpop.f32.mrf.mxu0  ;;  %v7273_v23 = vpack.c.b16 %v7271_v59, %v7270_v47  ;;  %v6598_v34 = vpop.f32.mrf.mxu1  ;;  %v15602_v9 = vld [vmem:[#allocation75_spill] sm:$0xff] }
 0xa65   :  { %5884 = vmatmul.bf16.gmra.mxu3 %v15600_v1  ;;  %v6918_v12 = vpack.c.bf16 %v6581_v50, %v6581_v50 }
 0xa66   :  { %6268 = vmatmul.bf16.gmra.mxu0 %v15602_v9 }
 0xa67   :  { %v7325_v62 = vunpack.c.l.b16 %v6918_v12 }
 0xa68   :  { %v5845_v26 = vpop.f32.mrf.mxu3 }
 0xa69   :  { %v6215_v16 = vadd.f32 %v6214_v25, %v5845_v26  ;;  %v6579_v25 = vadd.f32 %v13859_v31, %v6210_v11  ;;  %v15605_v31 = vld [vmem:[#allocation78_spill] sm:$0xff] }
 0xa6b   :  { %v6584_v5 = vadd.f32 %v6583_v49, %v6215_v16  ;;  %v15603_v49 = vld [vmem:[#allocation68_spill] sm:$0xff]  ;;  %v6231_v50 = vpop.f32.mrf.mxu0  ;;  %v6917_v26 = vpack.c.bf16 %v6579_v25, %v6579_v25  ;;  %v6600_v16 = vpop.f32.mrf.mxu1  ;;  %v15608_v25 = vld [vmem:[#allocation81_spill] sm:$0xff] }
 0xa6c   :  { %6637 = vmatmul.bf16.gmra.mxu1 %v15604_v45  ;;  %v15610_v45 = vld [vmem:[#allocation88_spill] sm:$0xff] }
 0xa6d   :  { %v6919_v10 = vpack.c.bf16 %v6584_v5, %v6584_v5  ;;  %v7272_v53 = vunpack.c.l.b16 %v6917_v26 }
 0xa6f   :  { %v7326_v38 = vunpack.c.l.b16 %v6919_v10  ;;  %v7274_v12 = vpack.c.b16 %v7272_v53, %v7272_v53  ;;  %v15607_v10 = vld [vmem:[#allocation85_spill] sm:$0xff] }
 0xa70   :  { %v5847_v32 = vpop.f32.mrf.mxu3 }
 0xa71   :  { %v6217_v1 = vadd.f32 %v6216_v36, %v5847_v32  ;;  %v7328_v61 = vpack.c.b16 %v7326_v38, %v7325_v62 }
 0xa73   :  { %11165 = vxpose.binary.xlu2.c.b16.start [1/4] (short) (narrow) %v7328_v61, %v7273_v23, 16  ;;  %v6586_v15 = vadd.f32 %v6585_v6, %v6217_v1  ;;  %v13896_v27 = vpop.f32.mrf.mxu0  ;;  %v13898_v59 = vpop.f32.mrf.mxu1  ;;  %v15606_v6 = vld [vmem:[#allocation71_spill] sm:$0xff] }
 0xa75   :  { %5889 = vmatmul.bf16.gmra.mxu3 %v15603_v49  ;;  %v6920_v60 = vpack.c.bf16 %v6586_v15, %v6586_v15  ;;  %v15609_v49 = vld [vmem:[#allocation74_spill] sm:$0xff] }
 0xa76   :  { %6273 = vmatmul.bf16.gmra.mxu0 %v15605_v31 }
 0xa77   :  { %v7327_v36 = vunpack.c.l.b16 %v6920_v60 }
 0xa78   :  { %v5850_v54 = vpop.f32.mrf.mxu3 }
 0xa79   :  { %v7329_v5 = vpack.c.b16 %v7327_v36, %v7327_v36  ;;  %v6220_v61 = vadd.f32 %v13872_v14, %v5850_v54 }
 0xa7b   :  { %v6236_v62 = vpop.f32.mrf.mxu0  ;;  %v13903_v38 = vpop.f32.mrf.mxu1  ;;  %v6589_v26 = vadd.f32 %v13874_v35, %v6220_v61 }
 0xa7c   :  { %6642 = vmatmul.bf16.gmra.mxu1 %v15607_v10 }
 0xa80   :  { %v5852_v33 = vpop.f32.mrf.mxu3 }
 0xa81   :  { %v6222_v11 = vadd.f32 %v6221_v42, %v5852_v33 }
 0xa83   :  { %11166 = vxpose.binary.xlu2.c.b16.end [2/4] (short) (narrow) %v7329_v5, %v7274_v12, 16  ;;  %v13905_v1 = vpop.f32.mrf.mxu0  ;;  %v6591_v15 = vadd.f32 %v13879_v41, %v6222_v11  ;;  %v6921_v5 = vpack.c.bf16 %v6589_v26, %v6589_v26 }
 0xa85   :  { %5894 = vmatmul.bf16.gmra.mxu3 %v15606_v6  ;;  %v6922_v42 = vpack.c.bf16 %v6591_v15, %v6591_v15  ;;  %v7380_v6 = vunpack.c.l.b16 %v6921_v5 }
 0xa86   :  { %6278 = vmatmul.bf16.gmra.mxu0 %v15608_v25 }
 0xa88   :  { %v5855_v47 = vpop.f32.mrf.mxu3 }
 0xa89   :  { %v13907_v23 = vpop.f32.mrf.mxu1  ;;  %v6225_v11 = vadd.f32 %v13881_v57, %v5855_v47 }
 0xa8b   :  { %v6241_v33 = vpop.f32.mrf.mxu0 }
 0xa8c   :  { %6647 = vmatmul.bf16.gmra.mxu1 %v15610_v45  ;;  %v15613_v45 = vld [vmem:[#allocation91_spill] sm:$0xff] }
 0xa90   :  { %v5857_v32 = vpop.f32.mrf.mxu3 }
 0xa91   :  { %v6227_v9 = vadd.f32 %v6226_v0, %v5857_v32  ;;  %v6610_v12 = vpop.f32.mrf.mxu1  ;;  %v7381_v0 = vunpack.c.l.b16 %v6922_v42 }
 0xa93   :  { %v6596_v60 = vadd.f32 %v6595_v17, %v6227_v9  ;;  %v6244_v17 = vpop.f32.mrf.mxu0  ;;  %v6594_v9 = vadd.f32 %v13883_v7, %v6225_v11  ;;  %v15614_v7 = vld [vmem:[#allocation87_spill] sm:$0xff] }
 0xa95   :  { %5899 = vmatmul.bf16.gmra.mxu3 %v15609_v49  ;;  %v6924_v31 = vpack.c.bf16 %v6596_v60, %v6596_v60  ;;  %v7383_v49 = vpack.c.b16 %v7381_v0, %v7380_v6  ;;  %v6923_v60 = vpack.c.bf16 %v6594_v9, %v6594_v9  ;;  %v15617_v9 = vld [vmem:[#allocation90_spill] sm:$0xff] }
 0xa97   :  { %v7435_v10 = vunpack.c.l.b16 %v6924_v31 }
 0xa98   :  { %v5860_v53 = vpop.f32.mrf.mxu3 }
 0xa99   :  { %v6230_v36 = vadd.f32 %v6229_v37, %v5860_v53  ;;  %v6613_v61 = vpop.f32.mrf.mxu1  ;;  %v15611_v37 = vld [vmem:[#allocation84_spill] sm:$0xff] }
 0xa9a   :  { %6283 = vmatmul.bf16.gmra.mxu0 %v15611_v37 }
 0xa9b   :  { %v6599_v14 = vadd.f32 %v6598_v34, %v6230_v36  ;;  %v15612_v34 = vld [vmem:[#allocation77_spill] sm:$0xff]  ;;  %v6246_v42 = vpop.f32.mrf.mxu0 }
 0xa9c   :  { %6652 = vmatmul.bf16.gmra.mxu1 %v15613_v45  ;;  %v15619_v45 = vld [vmem:[#allocation95_spill] sm:$0xff] }
 0xa9d   :  { %v6925_v54 = vpack.c.bf16 %v6599_v14, %v6599_v14 }
 0xa9f   :  { %v7436_v41 = vunpack.c.l.b16 %v6925_v54  ;;  %v15616_v54 = vld [vmem:[#allocation94_spill] sm:$0xff] }
 0xaa0   :  { %v5862_v32 = vpop.f32.mrf.mxu3 }
 0xaa1   :  { %v6232_v25 = vadd.f32 %v6231_v50, %v5862_v32  ;;  %v7438_v35 = vpack.c.b16 %v7436_v41, %v7435_v10  ;;  %v6615_v57 = vpop.f32.mrf.mxu1  ;;  %v7382_v50 = vunpack.c.l.b16 %v6923_v60 }
 0xaa3   :  { %11169 = vxpose.binary.xlu2.c.b16.start [1/4] (short) (narrow) %v7438_v35, %v7383_v49, 16  ;;  %v6601_v15 = vadd.f32 %v6600_v16, %v6232_v25  ;;  %v7384_v5 = vpack.c.b16 %v7382_v50, %v7382_v50  ;;  %v13920_v14 = vpop.f32.mrf.mxu0  ;;  %v15615_v16 = vld [vmem:[#allocation80_spill] sm:$0xff] }
 0xaa5   :  { %5904 = vmatmul.bf16.gmra.mxu3 %v15612_v34  ;;  %v6926_v53 = vpack.c.bf16 %v6601_v15, %v6601_v15  ;;  %v15618_v34 = vld [vmem:[#allocation83_spill] sm:$0xff] }
 0xaa7   :  { %v7437_v47 = vunpack.c.l.b16 %v6926_v53 }
 0xaa8   :  { %v5865_v26 = vpop.f32.mrf.mxu3 }
 0xaa9   :  { %v7439_v31 = vpack.c.b16 %v7437_v47, %v7437_v47  ;;  %v13922_v0 = vpop.f32.mrf.mxu1  ;;  %v6235_v35 = vadd.f32 %v13896_v27, %v5865_v26 }
 0xaaa   :  { %6288 = vmatmul.bf16.gmra.mxu0 %v15614_v7 }
 0xaab   :  { %v6251_v10 = vpop.f32.mrf.mxu0  ;;  %v6604_v60 = vadd.f32 %v13898_v59, %v6235_v35 }
 0xaac   :  { %6657 = vmatmul.bf16.gmra.mxu1 %v15616_v54 }
 0xab0   :  { %v5867_v36 = vpop.f32.mrf.mxu3 }
 0xab1   :  { %v13927_v41 = vpop.f32.mrf.mxu1  ;;  %v6237_v11 = vadd.f32 %v6236_v62, %v5867_v36 }
 0xab3   :  { %11170 = vxpose.binary.xlu2.c.b16.end [2/4] (short) (narrow) %v7439_v31, %v7384_v5, 16  ;;  %v13929_v25 = vpop.f32.mrf.mxu0  ;;  %v6606_v15 = vadd.f32 %v13903_v38, %v6237_v11  ;;  %v6927_v31 = vpack.c.bf16 %v6604_v60, %v6604_v60 }
 0xab5   :  { %5909 = vmatmul.bf16.gmra.mxu3 %v15615_v16  ;;  %v6928_v62 = vpack.c.bf16 %v6606_v15, %v6606_v15  ;;  %v7490_v16 = vunpack.c.l.b16 %v6927_v31 }
 0xab8   :  { %v5870_v6 = vpop.f32.mrf.mxu3 }
 0xab9   :  { %v13931_v49 = vpop.f32.mrf.mxu1  ;;  %v6240_v11 = vadd.f32 %v13905_v1, %v5870_v6 }
 0xaba   :  { %6293 = vmatmul.bf16.gmra.mxu0 %v15617_v9 }
 0xabb   :  { %v6256_v36 = vpop.f32.mrf.mxu0 }
 0xabc   :  { %6662 = vmatmul.bf16.gmra.mxu1 %v15619_v45  ;;  %v15622_v45 = vld [vmem:[#allocation98_spill] sm:$0xff] }
 0xac0   :  { %v5872_v32 = vpop.f32.mrf.mxu3 }
 0xac1   :  { %v6242_v37 = vadd.f32 %v6241_v33, %v5872_v32  ;;  %v6625_v5 = vpop.f32.mrf.mxu1  ;;  %v7491_v33 = vunpack.c.l.b16 %v6928_v62 }
 0xac3   :  { %v6611_v53 = vadd.f32 %v6610_v12, %v6242_v37  ;;  %v6259_v12 = vpop.f32.mrf.mxu0  ;;  %v6609_v37 = vadd.f32 %v13907_v23, %v6240_v11  ;;  %v15623_v23 = vld [vmem:[#allocation97_spill] sm:$0xff] }
 0xac5   :  { %5914 = vmatmul.bf16.gmra.mxu3 %v15618_v34  ;;  %v6930_v7 = vpack.c.bf16 %v6611_v53, %v6611_v53  ;;  %v7493_v34 = vpack.c.b16 %v7491_v33, %v7490_v16  ;;  %v6929_v53 = vpack.c.bf16 %v6609_v37, %v6609_v37  ;;  %v15626_v37 = vld [vmem:[#allocation101_spill] sm:$0xff] }
 0xac7   :  { %v7545_v54 = vunpack.c.l.b16 %v6930_v7 }
 0xac8   :  { %v5875_v50 = vpop.f32.mrf.mxu3 }
 0xac9   :  { %v6245_v47 = vadd.f32 %v6244_v17, %v5875_v50  ;;  %v6628_v35 = vpop.f32.mrf.mxu1  ;;  %v15620_v17 = vld [vmem:[#allocation93_spill] sm:$0xff] }
 0xaca   :  { %6298 = vmatmul.bf16.gmra.mxu0 %v15620_v17 }
 0xacb   :  { %v6614_v27 = vadd.f32 %v6613_v61, %v6245_v47  ;;  %v15621_v61 = vld [vmem:[#allocation86_spill] sm:$0xff]  ;;  %v6261_v62 = vpop.f32.mrf.mxu0 }
 0xacc   :  { %6667 = vmatmul.bf16.gmra.mxu1 %v15622_v45  ;;  %v15628_v45 = vld [vmem:[#allocation102_spill] sm:$0xff] }
 0xacd   :  { %v6931_v26 = vpack.c.bf16 %v6614_v27, %v6614_v27 }
 0xacf   :  { %v7546_v38 = vunpack.c.l.b16 %v6931_v26  ;;  %v15625_v26 = vld [vmem:[#allocation99_spill] sm:$0xff] }
 0xad0   :  { %v5877_v32 = vpop.f32.mrf.mxu3 }
 0xad1   :  { %v6247_v9 = vadd.f32 %v6246_v42, %v5877_v32  ;;  %v7548_v59 = vpack.c.b16 %v7546_v38, %v7545_v54  ;;  %v6630_v1 = vpop.f32.mrf.mxu1  ;;  %v7492_v42 = vunpack.c.l.b16 %v6929_v53 }
 0xad3   :  { %11173 = vxpose.binary.xlu2.c.b16.start [1/4] (short) (narrow) %v7548_v59, %v7493_v34, 16  ;;  %v6616_v15 = vadd.f32 %v6615_v57, %v6247_v9  ;;  %v7494_v31 = vpack.c.b16 %v7492_v42, %v7492_v42  ;;  %v13944_v27 = vpop.f32.mrf.mxu0  ;;  %v15624_v57 = vld [vmem:[#allocation89_spill] sm:$0xff] }
 0xad5   :  { %5919 = vmatmul.bf16.gmra.mxu3 %v15621_v61  ;;  %v6932_v50 = vpack.c.bf16 %v6616_v15, %v6616_v15  ;;  %v15627_v61 = vld [vmem:[#allocation92_spill] sm:$0xff] }
 0xad7   :  { %v7547_v6 = vunpack.c.l.b16 %v6932_v50 }
 0xad8   :  { %v5880_v60 = vpop.f32.mrf.mxu3 }
 0xad9   :  { %v7549_v7 = vpack.c.b16 %v7547_v6, %v7547_v6  ;;  %v13946_v33 = vpop.f32.mrf.mxu1  ;;  %v6250_v59 = vadd.f32 %v13920_v14, %v5880_v60 }
 0xada   :  { %6303 = vmatmul.bf16.gmra.mxu0 %v15623_v23 }
 0xadb   :  { %v6266_v54 = vpop.f32.mrf.mxu0  ;;  %v6619_v53 = vadd.f32 %v13922_v0, %v6250_v59 }
 0xadc   :  { %6672 = vmatmul.bf16.gmra.mxu1 %v15625_v26 }
 0xae0   :  { %v5882_v47 = vpop.f32.mrf.mxu3 }
 0xae1   :  { %v13951_v38 = vpop.f32.mrf.mxu1  ;;  %v6252_v11 = vadd.f32 %v6251_v10, %v5882_v47 }
 0xae3   :  { %11174 = vxpose.binary.xlu2.c.b16.end [2/4] (short) (narrow) %v7549_v7, %v7494_v31, 16  ;;  %v13953_v9 = vpop.f32.mrf.mxu0  ;;  %v6621_v15 = vadd.f32 %v13927_v41, %v6252_v11  ;;  %v6933_v7 = vpack.c.bf16 %v6619_v53, %v6619_v53 }
 0xae5   :  { %5924 = vmatmul.bf16.gmra.mxu3 %v15624_v57  ;;  %v6934_v10 = vpack.c.bf16 %v6621_v15, %v6621_v15  ;;  %v7600_v57 = vunpack.c.l.b16 %v6933_v7 }
 0xae8   :  { %v5885_v16 = vpop.f32.mrf.mxu3 }
 0xae9   :  { %v13955_v34 = vpop.f32.mrf.mxu1  ;;  %v6255_v11 = vadd.f32 %v13929_v25, %v5885_v16 }
 0xaea   :  { %6308 = vmatmul.bf16.gmra.mxu0 %v15626_v37 }
 0xaeb   :  { %v6271_v47 = vpop.f32.mrf.mxu0 }
 0xaec   :  { %6677 = vmatmul.bf16.gmra.mxu1 %v15628_v45  ;;  %v15631_v45 = vld [vmem:[#allocation105_spill] sm:$0xff] }
 0xaf0   :  { %v5887_v32 = vpop.f32.mrf.mxu3 }
 0xaf1   :  { %v6257_v17 = vadd.f32 %v6256_v36, %v5887_v32  ;;  %v6640_v31 = vpop.f32.mrf.mxu1  ;;  %v7601_v36 = vunpack.c.l.b16 %v6934_v10 }
 0xaf3   :  { %v6626_v50 = vadd.f32 %v6625_v5, %v6257_v17  ;;  %v6274_v5 = vpop.f32.mrf.mxu0  ;;  %v6624_v17 = vadd.f32 %v13931_v49, %v6255_v11  ;;  %v15633_v49 = vld [vmem:[#allocation100_spill] sm:$0xff] }
 0xaf5   :  { %5929 = vmatmul.bf16.gmra.mxu3 %v15627_v61  ;;  %v6936_v23 = vpack.c.bf16 %v6626_v50, %v6626_v50  ;;  %v7603_v61 = vpack.c.b16 %v7601_v36, %v7600_v57  ;;  %v6935_v50 = vpack.c.bf16 %v6624_v17, %v6624_v17  ;;  %v15635_v17 = vld [vmem:[#allocation110_spill] sm:$0xff] }
 0xaf7   :  { %v7655_v26 = vunpack.c.l.b16 %v6936_v23 }
 0xaf8   :  { %v5890_v42 = vpop.f32.mrf.mxu3 }
 0xaf9   :  { %v6260_v6 = vadd.f32 %v6259_v12, %v5890_v42  ;;  %v6643_v59 = vpop.f32.mrf.mxu1  ;;  %v15629_v12 = vld [vmem:[#allocation104_spill] sm:$0xff] }
 0xafa   :  { %6313 = vmatmul.bf16.gmra.mxu0 %v15629_v12 }
 0xafb   :  { %v6629_v14 = vadd.f32 %v6628_v35, %v6260_v6  ;;  %v15630_v35 = vld [vmem:[#allocation96_spill] sm:$0xff]  ;;  %v6276_v10 = vpop.f32.mrf.mxu0 }
 0xafc   :  { %6682 = vmatmul.bf16.gmra.mxu1 %v15631_v45  ;;  %v15637_v45 = vld [vmem:[#allocation111_spill] sm:$0xff] }
 0xafd   :  { %v6937_v60 = vpack.c.bf16 %v6629_v14, %v6629_v14 }
 0xaff   :  { %v7656_v41 = vunpack.c.l.b16 %v6937_v60  ;;  %v15632_v60 = vld [vmem:[#allocation107_spill] sm:$0xff] }
 0xb00   :  { %v5892_v32 = vpop.f32.mrf.mxu3 }
 0xb01   :  { %v6262_v37 = vadd.f32 %v6261_v62, %v5892_v32  ;;  %v7658_v0 = vpack.c.b16 %v7656_v41, %v7655_v26  ;;  %v6645_v25 = vpop.f32.mrf.mxu1  ;;  %v7602_v62 = vunpack.c.l.b16 %v6935_v50 }
 0xb03   :  { %11177 = vxpose.binary.xlu0.c.b16.start [1/4] (short) (narrow) %v7658_v0, %v7603_v61, 16  ;;  %v6631_v15 = vadd.f32 %v6630_v1, %v6262_v37  ;;  %v7604_v7 = vpack.c.b16 %v7602_v62, %v7602_v62  ;;  %v6279_v14 = vpop.f32.mrf.mxu0  ;;  %v15634_v1 = vld [vmem:[#allocation108_spill] sm:$0xff] }
 0xb05   :  { %5934 = vmatmul.bf16.gmra.mxu3 %v15630_v35  ;;  %v6938_v42 = vpack.c.bf16 %v6631_v15, %v6631_v15  ;;  %v15636_v35 = vld [vmem:[#allocation103_spill] sm:$0xff] }
 0xb07   :  { %v7657_v16 = vunpack.c.l.b16 %v6938_v42 }
 0xb08   :  { %v5895_v53 = vpop.f32.mrf.mxu3 }
 0xb09   :  { %v7659_v23 = vpack.c.b16 %v7657_v16, %v7657_v16  ;;  %v6648_v36 = vpop.f32.mrf.mxu1  ;;  %v6265_v0 = vadd.f32 %v13944_v27, %v5895_v53 }
 0xb0a   :  { %6318 = vmatmul.bf16.gmra.mxu0 %v15632_v60 }
 0xb0b   :  { %v6281_v26 = vpop.f32.mrf.mxu0  ;;  %v6634_v50 = vadd.f32 %v13946_v33, %v6265_v0 }
 0xb0c   :  { %6687 = vmatmul.bf16.gmra.mxu1 %v15634_v1 }
 0xb10   :  { %v5897_v6 = vpop.f32.mrf.mxu3 }
 0xb11   :  { %v6650_v41 = vpop.f32.mrf.mxu1  ;;  %v6267_v11 = vadd.f32 %v6266_v54, %v5897_v6 }
 0xb13   :  { %11178 = vxpose.binary.xlu0.c.b16.end [2/4] (short) (narrow) %v7659_v23, %v7604_v7, 16  ;;  %v6636_v15 = vadd.f32 %v13951_v38, %v6267_v11  ;;  %v6939_v23 = vpack.c.bf16 %v6634_v50, %v6634_v50 }
 0xb15   :  { %5939 = vmatmul.bf16.gmra.mxu3 %v15633_v49  ;;  %v6940_v16 = vpack.c.bf16 %v6636_v15, %v6636_v15  ;;  %v7710_v49 = vunpack.c.l.b16 %v6939_v23 }
 0xb17   :  { %v6284_v37 = vpop.f32.mrf.mxu0 }
 0xb18   :  { %v5900_v57 = vpop.f32.mrf.mxu3 }
 0xb19   :  { %v6653_v61 = vpop.f32.mrf.mxu1  ;;  %v6270_v11 = vadd.f32 %v13953_v9, %v5900_v57 }
 0xb1a   :  { %6323 = vmatmul.bf16.gmra.mxu0 %v15635_v17 }
 0xb1c   :  { %6692 = vmatmul.bf16.gmra.mxu1 %v15637_v45  ;;  %v15640_v45 = vld [vmem:[#allocation114_spill] sm:$0xff] }
 0xb1f   :  { %v6286_v54 = vpop.f32.mrf.mxu0 }
 0xb20   :  { %v5902_v32 = vpop.f32.mrf.mxu3 }
 0xb21   :  { %v6272_v12 = vadd.f32 %v6271_v47, %v5902_v32  ;;  %v6655_v6 = vpop.f32.mrf.mxu1  ;;  %v7711_v47 = vunpack.c.l.b16 %v6940_v16 }
 0xb23   :  { %v6641_v42 = vadd.f32 %v6640_v31, %v6272_v12  ;;  %v6639_v12 = vadd.f32 %v13955_v34, %v6270_v11  ;;  %v15642_v11 = vld [vmem:[#allocation109_spill] sm:$0xff] }
 0xb25   :  { %5944 = vmatmul.bf16.gmra.mxu3 %v15636_v35  ;;  %v6942_v60 = vpack.c.bf16 %v6641_v42, %v6641_v42  ;;  %v7713_v35 = vpack.c.b16 %v7711_v47, %v7710_v49  ;;  %v6941_v42 = vpack.c.bf16 %v6639_v12, %v6639_v12 }
 0xb27   :  { %v7765_v1 = vunpack.c.l.b16 %v6942_v60  ;;  %v6289_v31 = vpop.f32.mrf.mxu0 }
 0xb28   :  { %v5905_v62 = vpop.f32.mrf.mxu3 }
 0xb29   :  { %v6275_v7 = vadd.f32 %v6274_v5, %v5905_v62  ;;  %v6658_v0 = vpop.f32.mrf.mxu1  ;;  %v15638_v5 = vld [vmem:[#allocation113_spill] sm:$0xff] }
 0xb2a   :  { %6328 = vmatmul.bf16.gmra.mxu0 %v15638_v5 }
 0xb2b   :  { %v6644_v27 = vadd.f32 %v6643_v59, %v6275_v7  ;;  %v15639_v59 = vld [vmem:[#allocation106_spill] sm:$0xff]  ;;  %v7712_v7 = vunpack.c.l.b16 %v6941_v42  ;;  %v15645_v42 = vld [vmem:[#allocation112_spill] sm:$0xff] }
 0xb2c   :  { %6697 = vmatmul.bf16.gmra.mxu1 %v15640_v45 }
 0xb2d   :  { %v6943_v53 = vpack.c.bf16 %v6644_v27, %v6644_v27  ;;  %v7714_v27 = vpack.c.b16 %v7712_v7, %v7712_v7 }
 0xb2f   :  { %v7766_v38 = vunpack.c.l.b16 %v6943_v53  ;;  %v6291_v9 = vpop.f32.mrf.mxu0 }
 0xb30   :  { %v5907_v32 = vpop.f32.mrf.mxu3 }
 0xb31   :  { %v6277_v17 = vadd.f32 %v6276_v10, %v5907_v32  ;;  %v7768_v33 = vpack.c.b16 %v7766_v38, %v7765_v1  ;;  %v6660_v10 = vpop.f32.mrf.mxu1  ;;  %v15641_v38 = vld [vmem:[#allocation116_spill] sm:$0xff] }
 0xb33   :  { %11181 = vxpose.binary.xlu2.c.b16.start [1/4] (short) (narrow) %v7768_v33, %v7713_v35, 16  ;;  %v6646_v15 = vadd.f32 %v6645_v25, %v6277_v17 }
 0xb35   :  { %5949 = vmatmul.bf16.gmra.mxu3 %v15639_v59  ;;  %v6944_v62 = vpack.c.bf16 %v6646_v15, %v6646_v15 }
 0xb37   :  { %v7767_v23 = vunpack.c.l.b16 %v6944_v62  ;;  %v6294_v49 = vpop.f32.mrf.mxu0  ;;  %v15646_v62 = vld [vmem:[#allocation120_spill] sm:$0xff] }
 0xb38   :  { %v5910_v50 = vpop.f32.mrf.mxu3 }
 0xb39   :  { %v6280_v16 = vadd.f32 %v6279_v14, %v5910_v50  ;;  %v7769_v47 = vpack.c.b16 %v7767_v23, %v7767_v23  ;;  %v6663_v1 = vpop.f32.mrf.mxu1  ;;  %v15643_v14 = vld [vmem:[#allocation117_spill] sm:$0xff]  ;;  %v15644_v50 = vld [vmem:[#allocation119_spill] sm:$0xff] }
 0xb3a   :  { %6333 = vmatmul.bf16.gmra.mxu0 %v15641_v38 }
 0xb3b   :  { %v6649_v57 = vadd.f32 %v6648_v36, %v6280_v16 }
 0xb3c   :  { %6702 = vmatmul.bf16.gmra.mxu1 %v15643_v14 }
 0xb3d   :  { %v6945_v34 = vpack.c.bf16 %v6649_v57, %v6649_v57 }
 0xb3f   :  { %v13985_v17 = vunpack.c.l.b16 %v6945_v34 }
 0xb40   :  { %v5912_v60 = vpop.f32.mrf.mxu3 }
 0xb41   :  { %v6282_v53 = vadd.f32 %v6281_v26, %v5912_v60  ;;  %v6665_v12 = vpop.f32.mrf.mxu1 }
 0xb43   :  { %v6651_v25 = vadd.f32 %v6650_v41, %v6282_v53  ;;  %11182 = vxpose.binary.xlu2.c.b16.end [2/4] (short) (narrow) %v7769_v47, %v7714_v27, 16  ;;  %v6296_v41 = vpop.f32.mrf.mxu0 }
 0xb45   :  { %v6946_v32 = vpack.c.bf16 %v6651_v25, %v6651_v25  ;;  %5954 = vmatmul.bf16.gmra.mxu3 %v15642_v11  ;;  %v15648_v11 = vld [vmem:[#allocation115_spill] sm:$0xff] }
 0xb47   :  { %v13987_v36 = vunpack.c.l.b16 %v6946_v32  ;;  %v15647_v32 = vld [vmem:[#allocation122_spill] sm:$0xff] }
 0xb48   :  { %v5915_v35 = vpop.f32.mrf.mxu3 }
 0xb49   :  { %v6285_v33 = vadd.f32 %v6284_v37, %v5915_v35  ;;  %v6668_v57 = vpop.f32.mrf.mxu1 }
 0xb4a   :  { %6338 = vmatmul.bf16.gmra.mxu0 %v15644_v50  ;;  %v15651_v50 = vld [vmem:[#allocation118_spill] sm:$0xff] }
 0xb4b   :  { %v13991_v5 = vadd.f32 %v6653_v61, %v6285_v33  ;;  %v6299_v16 = vpop.f32.mrf.mxu0 }
 0xb4c   :  { %6707 = vmatmul.bf16.gmra.mxu1 %v15646_v62 }
 0xb50   :  { %v5917_v15 = vpop.f32.mrf.mxu3 }
 0xb51   :  { %v6287_v59 = vadd.f32 %v6286_v54, %v5917_v15  ;;  %v6670_v25 = vpop.f32.mrf.mxu1 }
 0xb53   :  { %v6656_v45 = vadd.f32 %v6655_v6, %v6287_v59  ;;  %v6301_v54 = vpop.f32.mrf.mxu0 }
 0xb55   :  { %5959 = vmatmul.bf16.gmra.mxu3 %v15645_v42  ;;  %v6948_v60 = vpack.c.bf16 %v6656_v45, %v6656_v45  ;;  %v15650_v45 = vld [vmem:[#allocation125_spill] sm:$0xff] }
 0xb57   :  { %v13996_v61 = vunpack.c.l.b16 %v6948_v60 }
 0xb58   :  { %v5920_v7 = vpop.f32.mrf.mxu3 }
 0xb59   :  { %v6290_v23 = vadd.f32 %v6289_v31, %v5920_v7  ;;  %v15649_v31 = vld [vmem:[#allocation123_spill] sm:$0xff]  ;;  %v6673_v35 = vpop.f32.mrf.mxu1 }
 0xb5a   :  { %6343 = vmatmul.bf16.gmra.mxu0 %v15647_v32 }
 0xb5b   :  { %v6659_v27 = vadd.f32 %v6658_v0, %v6290_v23  ;;  %v6304_v14 = vpop.f32.mrf.mxu0 }
 0xb5c   :  { %6712 = vmatmul.bf16.gmra.mxu1 %v15649_v31 }
 0xb5d   :  { %v6949_v37 = vpack.c.bf16 %v6659_v27, %v6659_v27 }
 0xb5f   :  { %v13998_v47 = vunpack.c.l.b16 %v6949_v37 }
 0xb60   :  { %v5922_v53 = vpop.f32.mrf.mxu3 }
 0xb61   :  { %v6292_v34 = vadd.f32 %v6291_v9, %v5922_v53  ;;  %v6675_v59 = vpop.f32.mrf.mxu1  ;;  %v15652_v9 = vld [vmem:[#allocation126_spill] sm:$0xff] }
 0xb63   :  { %v14002_v38 = vadd.f32 %v6660_v10, %v6292_v34  ;;  %v6306_v15 = vpop.f32.mrf.mxu0 }
 0xb65   :  { %5964 = vmatmul.bf16.gmra.mxu3 %v15648_v11 }
 0xb68   :  { %v5925_v0 = vpop.f32.mrf.mxu3 }
 0xb69   :  { %v6295_v42 = vadd.f32 %v6294_v49, %v5925_v0  ;;  %v14012_v27 = vpop.f32.mrf.mxu1 }
 0xb6a   :  { %6348 = vmatmul.bf16.gmra.mxu0 %v15650_v45 }
 0xb6b   :  { %v14010_v7 = vpop.f32.mrf.mxu0  ;;  %v6664_v53 = vadd.f32 %v6663_v1, %v6295_v42  ;;  %v15655_v1 = vld [vmem:[#allocation129_spill] sm:$0xff] }
 0xb6c   :  { %6717 = vmatmul.bf16.gmra.mxu1 %v15652_v9 }
 0xb6d   :  { %v6951_v31 = vpack.c.bf16 %v6664_v53, %v6664_v53 }
 0xb6f   :  { %v7076_v0 = vunpack.c.l.b16 %v6951_v31 }
 0xb70   :  { %v5927_v33 = vpop.f32.mrf.mxu3 }
 0xb71   :  { %v6297_v10 = vadd.f32 %v6296_v41, %v5927_v33  ;;  %v14016_v41 = vpop.f32.mrf.mxu1  ;;  %v11159_v33 = vpop.trf.xlu2 }
 0xb73   :  { %v6666_v60 = vadd.f32 %v6665_v12, %v6297_v10  ;;  %v14014_v6 = vpop.f32.mrf.mxu0  ;;  %v15653_v12 = vld [vmem:[#allocation128_spill] sm:$0xff] }
 0xb75   :  { %5969 = vmatmul.bf16.gmra.mxu3 %v15651_v50  ;;  %v6952_v32 = vpack.c.bf16 %v6666_v60, %v6666_v60 }
 0xb77   :  { %v7077_v9 = vunpack.c.l.b16 %v6952_v32 }
 0xb78   :  { %v5930_v62 = vpop.f32.mrf.mxu3 }
 0xb79   :  { %v6300_v23 = vadd.f32 %v6299_v16, %v5930_v62  ;;  %v15654_v16 = vld [vmem:[#allocation121_spill] sm:$0xff]  ;;  %v6683_v62 = vpop.f32.mrf.mxu1 }
 0xb7a   :  { %6353 = vmatmul.bf16.gmra.mxu0 %v15653_v12  ;;  %v15658_v12 = vld [vmem:[#allocation132_spill] sm:$0xff] }
 0xb7b   :  { %v6669_v37 = vadd.f32 %v6668_v57, %v6300_v23  ;;  %v7079_v57 = vpack.c.b16 %v7077_v9, %v7076_v0  ;;  %v6314_v42 = vpop.f32.mrf.mxu0  ;;  %v15657_v0 = vld [vmem:[#allocation124_spill] sm:$0xff] }
 0xb7c   :  { %6722 = vmatmul.bf16.gmra.mxu1 %v15655_v1 }
 0xb7d   :  { %v6953_v34 = vpack.c.bf16 %v6669_v37, %v6669_v37 }
 0xb7f   :  { %v7078_v11 = vunpack.c.l.b16 %v6953_v34 }
 0xb80   :  { %v5932_v45 = vpop.f32.mrf.mxu3 }
 0xb81   :  { %v7080_v50 = vpack.c.b16 %v7078_v11, %v7078_v11  ;;  %v6302_v60 = vadd.f32 %v6301_v54, %v5932_v45  ;;  %v14025_v11 = vpop.f32.mrf.mxu1 }
 0xb83   :  { %v7086_v49 = vsel %vm3070_vm0, %v7080_v50, 0  ;;  %v14023_v53 = vpop.f32.mrf.mxu0  ;;  %v6671_v50 = vadd.f32 %v6670_v25, %v6302_v60 }
 0xb84   :  { %7094 = vmatpush.bf16.msra.mxu2 %v7086_v49  ;;  %v15656_v49 = vld [vmem:[#allocation131_spill] sm:$0xff] }
 0xb85   :  { %5974 = vmatmul.bf16.gmra.mxu3 %v15654_v16 }
 0xb88   :  { %v5935_v10 = vpop.f32.mrf.mxu3  ;;  %7095 = vmatpush.bf16.msra.mxu2 %v7079_v57 }
 0xb89   :  { %v6305_v23 = vadd.f32 %v6304_v14, %v5935_v10  ;;  %v6954_v14 = vpack.c.bf16 %v6671_v50, %v6671_v50  ;;  %v11160_v10 = vpop.trf.xlu2 }
 0xb8a   :  { %6358 = vmatmul.bf16.gmra.mxu0 %v15656_v49 }
 0xb8b   :  { %10675 = vmatmul.msk.bf16.vlgmr.msra.gmra.mxu2 %vm3066_vm1, %v11159_v33  ;;  %v6674_v32 = vadd.f32 %v6673_v35, %v6305_v23  ;;  %v14030_v45 = vpop.f32.mrf.mxu0  ;;  %v14032_v35 = vpop.f32.mrf.mxu1  ;;  %v7131_v25 = vunpack.c.l.b16 %v6954_v14  ;;  %v15663_v14 = vld [vmem:[#allocation130_spill] sm:$0xff] }
 0xb8c   :  { %6727 = vmatmul.bf16.gmra.mxu1 %v15658_v12 }
 0xb8d   :  { %v6955_v16 = vpack.c.bf16 %v6674_v32, %v6674_v32  ;;  %v15660_v32 = vld [vmem:[#allocation127_spill] sm:$0xff] }
 0xb90   :  { %v5937_v37 = vpop.f32.mrf.mxu3 }
 0xb91   :  { %v6307_v34 = vadd.f32 %v6306_v15, %v5937_v37  ;;  %v7132_v15 = vunpack.c.l.b16 %v6955_v16 }
 0xb93   :  { %v6676_v31 = vadd.f32 %v6675_v59, %v6307_v34  ;;  %v7134_v33 = vpack.c.b16 %v7132_v15, %v7131_v25  ;;  %v6321_v60 = vpop.f32.mrf.mxu0  ;;  %v6690_v37 = vpop.f32.mrf.mxu1  ;;  %v15659_v34 = vld [vmem:[#allocation134_spill] sm:$0xff] }
 0xb95   :  { %v6956_v9 = vpack.c.bf16 %v6676_v31, %v6676_v31  ;;  %5979 = vmatmul.bf16.gmra.mxu3 %v15657_v0  ;;  %v15661_v31 = vld [vmem:[#allocation135_spill] sm:$0xff] }
 0xb97   :  { %v7133_v1 = vunpack.c.l.b16 %v6956_v9 }
 0xb98   :  { %v5940_v54 = vpop.f32.mrf.mxu3 }
 0xb99   :  { %v7135_v57 = vpack.c.b16 %v7133_v1, %v7133_v1  ;;  %v15662_v1 = vld [vmem:[#allocation137_spill] sm:$0xff]  ;;  %v6310_v26 = vadd.f32 %v14010_v7, %v5940_v54 }
 0xb9a   :  { %6363 = vmatmul.bf16.gmra.mxu0 %v15659_v34 }
 0xb9b   :  { %v7141_v59 = vsel %vm3070_vm0, %v7135_v57, 0  ;;  %v14039_v49 = vpop.f32.mrf.mxu0  ;;  %v14041_v9 = vpop.f32.mrf.mxu1  ;;  %v15664_v57 = vld [vmem:[#allocation138_spill] sm:$0xff] }
 0xb9c   :  { %7149 = vmatpush.bf16.msrb.mxu2 %v7141_v59  ;;  %6732 = vmatmul.bf16.gmra.mxu1 %v15661_v31 }
 0xba0   :  { %7150 = vmatpush.bf16.msrb.mxu2 %v7134_v33  ;;  %v5942_v23 = vpop.f32.mrf.mxu3 }
 0xba1   :  { %v6312_v3 = vadd.f32 %v14014_v6, %v5942_v23 }
 0xba3   :  { %10676 = vmatmul.msk.bf16.vlgmr.msrb.gmra.mxu2 %vm3066_vm1, %v11160_v10  ;;  %v14043_v12 = vpop.f32.mrf.mxu0  ;;  %v14045_v16 = vpop.f32.mrf.mxu1 }
 0xba5   :  { %5984 = vmatmul.bf16.gmra.mxu3 %v15660_v32 }
 0xba8   :  { %v5945_v50 = vpop.f32.mrf.mxu3 }
 0xba9   :  { %v6315_v33 = vadd.f32 %v6314_v42, %v5945_v50  ;;  %v15666_v50 = vld [vmem:[#allocation133_spill] sm:$0xff] }
 0xbaa   :  { %6368 = vmatmul.bf16.gmra.mxu0 %v15662_v1 }
 0xbab   :  { %v14050_v59 = vpop.f32.mrf.mxu0  ;;  %v14052_v25 = vpop.f32.mrf.mxu1  ;;  %v6684_v10 = vadd.f32 %v6683_v62, %v6315_v33  ;;  %v15667_v33 = vld [vmem:[#allocation141_spill] sm:$0xff] }
 0xbac   :  { %6737 = vmatmul.bf16.gmra.mxu1 %v15664_v57  ;;  %v6681_v57 = vadd.f32 %v14016_v41, %v6312_v3 }
 0xbad   :  { %v6959_v34 = vpack.c.bf16 %v6684_v10, %v6684_v10 }
 0xbae   :  { %v6958_v62 = vpack.c.bf16 %v6681_v57, %v6681_v57 }
 0xbaf   :  { %v7188_v1 = vunpack.c.l.b16 %v6959_v34 }
 0xbb0   :  { %v5947_v0 = vpop.f32.mrf.mxu3  ;;  %v7187_v6 = vunpack.c.l.b16 %v6958_v62 }
 0xbb1   :  { %v7190_v19 = vpack.c.b16 %v7188_v1, %v7188_v1 }
 0xbb3   :  { %v14054_v31 = vpop.f32.mrf.mxu0  ;;  %v14058_v24 = vpop.f32.mrf.mxu1  ;;  %v7196_v7 = vsel %vm3070_vm0, %v7190_v19, 0  ;;  %v6317_v19 = vadd.f32 %v14023_v53, %v5947_v0 }
 0xbb4   :  { %7204 = vmatpush.bf16.msra.mxu2 %v7196_v7 }
 0xbb5   :  { %5989 = vmatmul.bf16.gmra.mxu3 %v15663_v14  ;;  %v6679_v14 = vadd.f32 %v14012_v27, %v6310_v26 }
 0xbb7   :  { %v6957_v42 = vpack.c.bf16 %v6679_v14, %v6679_v14 }
 0xbb8   :  { %v5950_v15 = vpop.f32.mrf.mxu3 }
 0xbb9   :  { %v7186_v54 = vunpack.c.l.b16 %v6957_v42  ;;  %v6320_v57 = vadd.f32 %v14030_v45, %v5950_v15 }
 0xbba   :  { %6373 = vmatmul.bf16.gmra.mxu0 %v15665_v29  ;;  %v11163_v29 = vpop.trf.xlu2 }
 0xbbb   :  { %v14066_v10 = vpop.f32.mrf.mxu0  ;;  %v7189_v26 = vpack.c.b16 %v7187_v6, %v7186_v54  ;;  %v14068_v27 = vpop.f32.mrf.mxu1  ;;  %v15668_v54 = vld [vmem:[#allocation143_spill] sm:$0xff]  ;;  %v15669_v6 = vld [vmem:[#allocation136_spill] sm:$0xff] }
 0xbbc   :  { %6742 = vmatmul.bf16.gmra.mxu1 %v15667_v33  ;;  %v6689_v33 = vadd.f32 %v14032_v35, %v6320_v57  ;;  %v15672_v57 = vld [vmem:[#allocation139_spill] sm:$0xff] }
 0xbbd   :  { %7205 = vmatpush.bf16.msra.mxu2 %v7189_v26 }
 0xbc0   :  { %v5952_v32 = vpop.f32.mrf.mxu3  ;;  %10677 = vmatmul.msk.bf16.vlgmr.msra.gmra.mxu2 %vm3066_vm1, %v11163_v29 }
 0xbc1   :  { %v6322_v3 = vadd.f32 %v6321_v60, %v5952_v32  ;;  %v6961_v32 = vpack.c.bf16 %v6689_v33, %v6689_v33 }
 0xbc2   :  { %v11164_v35 = vpop.trf.xlu2 }
 0xbc3   :  { %v6691_v41 = vadd.f32 %v6690_v37, %v6322_v3  ;;  %v6336_v14 = vpop.f32.mrf.mxu0  ;;  %v6705_v62 = vpop.f32.mrf.mxu1  ;;  %v15670_v37 = vld [vmem:[#allocation144_spill] sm:$0xff]  ;;  %v7242_v0 = vunpack.c.l.b16 %v6961_v32 }
 0xbc5   :  { %5994 = vmatmul.bf16.gmra.mxu3 %v15666_v50  ;;  %v6962_v34 = vpack.c.bf16 %v6691_v41, %v6691_v41  ;;  %v6686_v50 = vadd.f32 %v14025_v11, %v6317_v19  ;;  %v15671_v19 = vld [vmem:[#allocation146_spill] sm:$0xff] }
 0xbc7   :  { %v7243_v42 = vunpack.c.l.b16 %v6962_v34  ;;  %v6960_v60 = vpack.c.bf16 %v6686_v50, %v6686_v50 }
 0xbc8   :  { %v5955_v23 = vpop.f32.mrf.mxu3 }
 0xbc9   :  { %v7245_v7 = vpack.c.b16 %v7243_v42, %v7243_v42  ;;  %v7241_v53 = vunpack.c.l.b16 %v6960_v60  ;;  %v15673_v42 = vld [vmem:[#allocation147_spill] sm:$0xff] }
 0xbca   :  { %6378 = vmatmul.bf16.gmra.mxu0 %v15668_v54 }
 0xbcb   :  { %v7251_v26 = vsel %vm3070_vm0, %v7245_v7, 0  ;;  %v14079_v15 = vpop.f32.mrf.mxu0  ;;  %v7244_v11 = vpack.c.b16 %v7242_v0, %v7241_v53  ;;  %v14081_v3 = vpop.f32.mrf.mxu1 }
 0xbcc   :  { %6747 = vmatmul.bf16.gmra.mxu1 %v15670_v37  ;;  %7259 = vmatpush.bf16.msrb.mxu2 %v7251_v26 }
 0xbd0   :  { %v5957_v1 = vpop.f32.mrf.mxu3  ;;  %7260 = vmatpush.bf16.msrb.mxu2 %v7244_v11 }
 0xbd1   :  { %v6327_v37 = vadd.f32 %v14043_v12, %v5957_v1  ;;  %v15675_v12 = vld [vmem:[#allocation142_spill] sm:$0xff] }
 0xbd3   :  { %10678 = vmatmul.msk.bf16.vlgmr.msrb.gmra.mxu2 %vm3066_vm1, %v11164_v35  ;;  %v14084_v41 = vpop.f32.mrf.mxu0  ;;  %v14086_v34 = vpop.f32.mrf.mxu1  ;;  %v6696_v0 = vadd.f32 %v14045_v16, %v6327_v37 }
 0xbd5   :  { %5999 = vmatmul.bf16.gmra.mxu3 %v15669_v6  ;;  %v6325_v6 = vadd.f32 %v14039_v49, %v5955_v23  ;;  %v15674_v49 = vld [vmem:[#allocation151_spill] sm:$0xff] }
 0xbd7   :  { %v6694_v53 = vadd.f32 %v14041_v9, %v6325_v6  ;;  %v15676_v9 = vld [vmem:[#allocation152_spill] sm:$0xff] }
 0xbd8   :  { %v5960_v45 = vpop.f32.mrf.mxu3 }
 0xbd9   :  { %v6330_v7 = vadd.f32 %v14050_v59, %v5960_v45 }
 0xbda   :  { %6383 = vmatmul.bf16.gmra.mxu0 %v15671_v19 }
 0xbdb   :  { %v6344_v33 = vpop.f32.mrf.mxu0  ;;  %v6713_v54 = vpop.f32.mrf.mxu1  ;;  %v6699_v60 = vadd.f32 %v14052_v25, %v6330_v7 }
 0xbdc   :  { %6752 = vmatmul.bf16.gmra.mxu1 %v15673_v42  ;;  %v6964_v42 = vpack.c.bf16 %v6696_v0, %v6696_v0 }
 0xbdd   :  { %v6965_v32 = vpack.c.bf16 %v6699_v60, %v6699_v60  ;;  %v11167_v60 = vpop.trf.xlu2 }
 0xbde   :  { %v7297_v7 = vunpack.c.l.b16 %v6964_v42 }
 0xbdf   :  { %v7298_v26 = vunpack.c.l.b16 %v6965_v32 }
 0xbe0   :  { %v5962_v29 = vpop.f32.mrf.mxu3 }
 0xbe1   :  { %v7300_v35 = vpack.c.b16 %v7298_v26, %v7298_v26 }
 0xbe3   :  { %v14097_v19 = vpop.f32.mrf.mxu0  ;;  %v7306_v59 = vsel %vm3070_vm0, %v7300_v35, 0  ;;  %v14100_v45 = vpop.f32.mrf.mxu1 }
 0xbe4   :  { %7314 = vmatpush.bf16.msra.mxu2 %v7306_v59 }
 0xbe5   :  { %6004 = vmatmul.bf16.gmra.mxu3 %v15672_v57  ;;  %v6963_v57 = vpack.c.bf16 %v6694_v53, %v6694_v53  ;;  %v6332_v53 = vadd.f32 %v14054_v31, %v5962_v29  ;;  %v15678_v31 = vld [vmem:[#allocation145_spill] sm:$0xff] }
 0xbe7   :  { %v7296_v25 = vunpack.c.l.b16 %v6963_v57  ;;  %v6701_v57 = vadd.f32 %v14058_v24, %v6332_v53 }
 0xbe8   :  { %v5965_v50 = vpop.f32.mrf.mxu3 }
 0xbe9   :  { %v7299_v16 = vpack.c.b16 %v7297_v7, %v7296_v25  ;;  %v6335_v0 = vadd.f32 %v14066_v10, %v5965_v50  ;;  %v15679_v10 = vld [vmem:[#allocation153_spill] sm:$0xff] }
 0xbea   :  { %6388 = vmatmul.bf16.gmra.mxu0 %v15674_v49 }
 0xbeb   :  { %7315 = vmatpush.bf16.msra.mxu2 %v7299_v16  ;;  %v14106_v6 = vpop.f32.mrf.mxu0  ;;  %v14108_v26 = vpop.f32.mrf.mxu1  ;;  %v6704_v42 = vadd.f32 %v14068_v27, %v6335_v0 }
 0xbec   :  { %6757 = vmatmul.bf16.gmra.mxu1 %v15676_v9  ;;  %v11168_v16 = vpop.trf.xlu2 }
 0xbee   :  { %10679 = vmatmul.msk.bf16.vlgmr.msra.gmra.mxu2 %vm3066_vm1, %v11167_v60 }
 0xbf0   :  { %v5967_v11 = vpop.f32.mrf.mxu3 }
 0xbf1   :  { %v6337_v1 = vadd.f32 %v6336_v14, %v5967_v11  ;;  %v6966_v11 = vpack.c.bf16 %v6701_v57, %v6701_v57 }
 0xbf3   :  { %v6706_v32 = vadd.f32 %v6705_v62, %v6337_v1  ;;  %v6967_v62 = vpack.c.bf16 %v6704_v42, %v6704_v42  ;;  %v7351_v7 = vunpack.c.l.b16 %v6966_v11  ;;  %v6351_v9 = vpop.f32.mrf.mxu0  ;;  %v6720_v24 = vpop.f32.mrf.mxu1 }
 0xbf5   :  { %6009 = vmatmul.bf16.gmra.mxu3 %v15675_v12  ;;  %v6968_v37 = vpack.c.bf16 %v6706_v32, %v6706_v32  ;;  %v7352_v49 = vunpack.c.l.b16 %v6967_v62  ;;  %v15677_v12 = vld [vmem:[#allocation156_spill] sm:$0xff] }
 0xbf7   :  { %v7353_v35 = vunpack.c.l.b16 %v6968_v37  ;;  %v7354_v29 = vpack.c.b16 %v7352_v49, %v7351_v7  ;;  %v15681_v49 = vld [vmem:[#allocation159_spill] sm:$0xff] }
 0xbf8   :  { %v5970_v23 = vpop.f32.mrf.mxu3 }
 0xbf9   :  { %v7355_v14 = vpack.c.b16 %v7353_v35, %v7353_v35  ;;  %v6340_v37 = vadd.f32 %v14079_v15, %v5970_v23 }
 0xbfa   :  { %6393 = vmatmul.bf16.gmra.mxu0 %v15677_v12  ;;  %v15682_v12 = vld [vmem:[#allocation150_spill] sm:$0xff] }
 0xbfb   :  { %v7361_v25 = vsel %vm3070_vm0, %v7355_v14, 0  ;;  %v14125_v42 = vpop.f32.mrf.mxu0  ;;  %v6709_v14 = vadd.f32 %v14081_v3, %v6340_v37  ;;  %v14131_v15 = vpop.f32.mrf.mxu1 }
 0xbfc   :  { %7369 = vmatpush.bf16.msrb.mxu2 %v7361_v25  ;;  %6762 = vmatmul.bf16.gmra.mxu1 %v15679_v10 }
 0xc00   :  { %v5972_v59 = vpop.f32.mrf.mxu3  ;;  %7370 = vmatpush.bf16.msrb.mxu2 %v7354_v29 }
 0xc01   :  { %v6342_v53 = vadd.f32 %v14084_v41, %v5972_v59  ;;  %v6969_v41 = vpack.c.bf16 %v6709_v14, %v6709_v14 }
 0xc03   :  { %10680 = vmatmul.msk.bf16.vlgmr.msrb.gmra.mxu2 %vm3066_vm1, %v11168_v16  ;;  %v7406_v25 = vunpack.c.l.b16 %v6969_v41  ;;  %v11171_v16 = vpop.trf.xlu2 }
 0xc05   :  { %6014 = vmatmul.bf16.gmra.mxu3 %v15678_v31  ;;  %v15683_v31 = vld [vmem:[#allocation154_spill] sm:$0xff] }
 0xc08   :  { %v5975_v27 = vpop.f32.mrf.mxu3 }
 0xc09   :  { %v6345_v50 = vadd.f32 %v6344_v33, %v5975_v27 }
 0xc0a   :  { %6398 = vmatmul.bf16.gmra.mxu0 %v15681_v49  ;;  %v15686_v49 = vld [vmem:[#allocation157_spill] sm:$0xff] }
 0xc0b   :  { %v6714_v1 = vadd.f32 %v6713_v54, %v6345_v50  ;;  %v6711_v54 = vadd.f32 %v14086_v34, %v6342_v53  ;;  %v6356_v50 = vpop.f32.mrf.mxu0 }
 0xc0c   :  { %6767 = vmatmul.bf16.gmra.mxu1 %v15683_v31 }
 0xc0d   :  { %v6971_v60 = vpack.c.bf16 %v6714_v1, %v6714_v1  ;;  %v6970_v23 = vpack.c.bf16 %v6711_v54, %v6711_v54  ;;  %v6725_v1 = vpop.f32.mrf.mxu1 }
 0xc0e   :  { %v7097_v32 = vpop.f32.mrf.mxu2 }
 0xc0f   :  { %v14123_v35 = vsel %vm12410_vm2, %v7097_v32, -inf  ;;  %v7408_v57 = vunpack.c.l.b16 %v6971_v60  ;;  %v7407_v7 = vunpack.c.l.b16 %v6970_v23  ;;  %v15684_v23 = vld [vmem:[#allocation162_spill] sm:$0xff] }
 0xc10   :  { %v7959_v33 = vsel %vm3956_vm3, %v14123_v35, -inf  ;;  %v5977_v11 = vpop.f32.mrf.mxu3 }
 0xc11   :  { %7960 = vmax.xlane.f32.xlu1 %v7959_v33  ;;  %v7410_v62 = vpack.c.b16 %v7408_v57, %v7408_v57  ;;  %v7409_v34 = vpack.c.b16 %v7407_v7, %v7406_v25  ;;  %v6347_v60 = vadd.f32 %v14097_v19, %v5977_v11  ;;  %v15685_v7 = vld [vmem:[#allocation155_spill] sm:$0xff] }
 0xc13   :  { %v7416_v59 = vsel %vm3070_vm0, %v7410_v62, 0  ;;  %v6716_v37 = vadd.f32 %v14100_v45, %v6347_v60  ;;  %v6359_v54 = vpop.f32.mrf.mxu0 }
 0xc14   :  { %7424 = vmatpush.bf16.msra.mxu2 %v7416_v59 }
 0xc15   :  { %6019 = vmatmul.bf16.gmra.mxu3 %v15682_v12  ;;  %v6972_v62 = vpack.c.bf16 %v6716_v37, %v6716_v37  ;;  %v6728_v25 = vpop.f32.mrf.mxu1 }
 0xc16   :  { %v7099_v3 = vpop.f32.mrf.mxu2 }
 0xc17   :  { %v14139_v10 = vsel %vm12428_vm4, %v7099_v3, -inf }
 0xc18   :  { %v7962_v29 = vsel %vm3956_vm3, %v14139_v10, -inf  ;;  %v5980_v27 = vpop.f32.mrf.mxu3  ;;  %7425 = vmatpush.bf16.msra.mxu2 %v7409_v34 }
 0xc19   :  { %7963 = vmax.xlane.f32.xlu0 %v7962_v29  ;;  %v6350_v32 = vadd.f32 %v14106_v6, %v5980_v27 }
 0xc1a   :  { %6403 = vmatmul.bf16.gmra.mxu0 %v15684_v23 }
 0xc1b   :  { %10681 = vmatmul.msk.bf16.vlgmr.msra.gmra.mxu2 %vm3066_vm1, %v11171_v16  ;;  %v6719_v53 = vadd.f32 %v14108_v26, %v6350_v32  ;;  %v6361_v34 = vpop.f32.mrf.mxu0  ;;  %v11172_v32 = vpop.trf.xlu2 }
 0xc1c   :  { %6772 = vmatmul.bf16.gmra.mxu1 %v15686_v49 }
 0xc1d   :  { %v6973_v41 = vpack.c.bf16 %v6719_v53, %v6719_v53  ;;  %v6730_v16 = vpop.f32.mrf.mxu1 }
 0xc20   :  { %v5982_v57 = vpop.f32.mrf.mxu3 }
 0xc21   :  { %v6352_v33 = vadd.f32 %v6351_v9, %v5982_v57  ;;  %v7461_v9 = vunpack.c.l.b16 %v6972_v62  ;;  %v15689_v62 = vld [vmem:[#allocation160_spill] sm:$0xff] }
 0xc23   :  { %v6721_v14 = vadd.f32 %v6720_v24, %v6352_v33  ;;  %v7462_v24 = vunpack.c.l.b16 %v6973_v41  ;;  %v15687_v33 = vld [vmem:[#allocation165_spill] sm:$0xff]  ;;  %v6364_v41 = vpop.f32.mrf.mxu0 }
 0xc25   :  { %v6974_v59 = vpack.c.bf16 %v6721_v14, %v6721_v14  ;;  %6024 = vmatmul.bf16.gmra.mxu3 %v15685_v7  ;;  %v7464_v3 = vpack.c.b16 %v7462_v24, %v7461_v9  ;;  %v15688_v14 = vld [vmem:[#allocation158_spill] sm:$0xff] }
 0xc26   :  { %v7152_v19 = vpop.f32.mrf.mxu2 }
 0xc27   :  { %v14153_v45 = vsel %vm12410_vm2, %v7152_v19, -inf  ;;  %v7463_v6 = vunpack.c.l.b16 %v6974_v59  ;;  %v6733_v19 = vpop.f32.mrf.mxu1 }
 0xc28   :  { %v7965_v26 = vsel %vm3956_vm3, %v14153_v45, -inf  ;;  %v5985_v11 = vpop.f32.mrf.mxu3 }
 0xc29   :  { %7966 = vmax.xlane.f32.xlu2 %v7965_v26  ;;  %v7465_v12 = vpack.c.b16 %v7463_v6, %v7463_v6  ;;  %v6355_v53 = vadd.f32 %v14125_v42, %v5985_v11 }
 0xc2a   :  { %6408 = vmatmul.bf16.gmra.mxu0 %v15687_v33 }
 0xc2b   :  { %v7471_v31 = vsel %vm3070_vm0, %v7465_v12, 0  ;;  %v6724_v23 = vadd.f32 %v14131_v15, %v6355_v53  ;;  %v15691_v15 = vpack.c.b16 %v13998_v47, %v13996_v61  ;;  %v6947_v53 = vpack.c.bf16 %v13991_v5, %v13991_v5 }
 0xc2c   :  { %7479 = vmatpush.bf16.msrb.mxu2 %v7471_v31  ;;  %6777 = vmatmul.bf16.gmra.mxu1 %v15689_v62 }
 0xc2d   :  { %v6975_v26 = vpack.c.bf16 %v6724_v23, %v6724_v23 }
 0xc2e   :  { %v7154_v29 = vpop.f32.mrf.mxu2 }
 0xc2f   :  { %v14160_v27 = vsel %vm12428_vm4, %v7154_v29, -inf  ;;  %v7516_v42 = vunpack.c.l.b16 %v6975_v26  ;;  %v15690_v29 = vpack.c.b16 %v13987_v36, %v13985_v17  ;;  %v6950_v17 = vpack.c.bf16 %v14002_v38, %v14002_v38  ;;  %v11175_v36 = vpop.trf.xlu2 }
 0xc30   :  { %v7968_v60 = vsel %vm3956_vm3, %v14160_v27, -inf  ;;  %7480 = vmatpush.bf16.msrb.mxu2 %v7464_v3  ;;  %v5987_v37 = vpop.f32.mrf.mxu3  ;;  %v6366_v3 = vpop.f32.mrf.mxu0 }
 0xc31   :  { %7969 = vmax.xlane.f32.xlu1 %v7968_v60  ;;  %v6357_v57 = vadd.f32 %v6356_v50, %v5987_v37  ;;  %v15692_v60 = vld [vmem:[#allocation176_spill] sm:$0xff]  ;;  %v15694_v37 = vld [vmem:[#allocation163_spill] sm:$0xff]  ;;  %v7877_v33 = vunpack.c.l.b16 %v6950_v17 }
 0xc33   :  { %10682 = vmatmul.msk.bf16.vlgmr.msrb.gmra.mxu2 %vm3066_vm1, %v11172_v32  ;;  %v6726_v59 = vadd.f32 %v6725_v1, %v6357_v57  ;;  %v15693_v32 = vld [vmem:[#allocation161_spill] sm:$0xff]  ;;  %v7822_v57 = vunpack.c.l.b16 %v6947_v53 }
 0xc35   :  { %6029 = vmatmul.bf16.gmra.mxu3 %v15688_v14  ;;  %v6976_v9 = vpack.c.bf16 %v6726_v59, %v6726_v59  ;;  %v7824_v59 = vpack.c.b16 %v7822_v57, %v7822_v57  ;;  %v15698_v57 = vld [vmem:[#allocation182_spill] sm:$0xff] }
 0xc37   :  { %v7517_v50 = vunpack.c.l.b16 %v6976_v9 }
 0xc38   :  { %v5990_v7 = vpop.f32.mrf.mxu3  ;;  %v6369_v47 = vpop.f32.mrf.mxu0 }
 0xc39   :  { %v6360_v49 = vadd.f32 %v6359_v54, %v5990_v7  ;;  %v7519_v54 = vpack.c.b16 %v7517_v50, %v7516_v42  ;;  %v7879_v7 = vpack.c.b16 %v7877_v33, %v7877_v33  ;;  %v15695_v42 = vld [vmem:[#allocation179_spill] sm:$0xff] }
 0xc3a   :  { %6413 = vmatmul.bf16.gmra.mxu0 %v15692_v60  ;;  %v15699_v33 = vld [vmem:[#allocation175_spill] sm:$0xff] }
 0xc3b   :  { %v6729_v6 = vadd.f32 %v6728_v25, %v6360_v49  ;;  %v6735_v25 = vpop.f32.mrf.mxu1 }
 0xc3c   :  { %6782 = vmatmul.bf16.gmra.mxu1 %v15694_v37 }
 0xc3d   :  { %v6977_v24 = vpack.c.bf16 %v6729_v6, %v6729_v6 }
 0xc3f   :  { %v7518_v12 = vunpack.c.l.b16 %v6977_v24 }
 0xc40   :  { %v5992_v11 = vpop.f32.mrf.mxu3 }
 0xc41   :  { %v7520_v31 = vpack.c.b16 %v7518_v12, %v7518_v12  ;;  %v6362_v14 = vadd.f32 %v6361_v34, %v5992_v11  ;;  %v15697_v34 = vld [vmem:[#allocation166_spill] sm:$0xff] }
 0xc42   :  { %11185 = vxpose.binary.xlu0.c.b16.start [1/4] (short) (narrow) %v15691_v15, %v15690_v29, 16  ;;  %v15696_v29 = vld [vmem:[#allocation164_spill] sm:$0xff] }
 0xc43   :  { %v7526_v1 = vsel %vm3070_vm0, %v7520_v31, 0  ;;  %v6738_v23 = vpop.f32.mrf.mxu1  ;;  %v6731_v49 = vadd.f32 %v6730_v16, %v6362_v14  ;;  %v14185_v5 = vpop.f32.mrf.mxu2  ;;  %v15700_v14 = vld [vmem:[#allocation167_spill] sm:$0xff] }
 0xc44   :  { %7534 = vmatpush.bf16.msra.mxu2 %v7526_v1  ;;  %v6371_v31 = vpop.f32.mrf.mxu0 }
 0xc45   :  { %6034 = vmatmul.bf16.gmra.mxu3 %v15693_v32  ;;  %v6978_v24 = vpack.c.bf16 %v6731_v49, %v6731_v49  ;;  %v11176_v32 = vpop.trf.xlu2 }
 0xc47   :  { %v7571_v11 = vunpack.c.l.b16 %v6978_v24 }
 0xc48   :  { %v5995_v61 = vpop.f32.mrf.mxu3  ;;  %7535 = vmatpush.bf16.msra.mxu2 %v7519_v54 }
 0xc49   :  { %v6365_v62 = vadd.f32 %v6364_v41, %v5995_v61 }
 0xc4a   :  { %6418 = vmatmul.bf16.gmra.mxu0 %v15695_v42 }
 0xc4b   :  { %10683 = vmatmul.msk.bf16.vlgmr.msra.gmra.mxu2 %vm3066_vm1, %v11175_v36  ;;  %v6734_v6 = vadd.f32 %v6733_v19, %v6365_v62  ;;  %v6740_v15 = vpop.f32.mrf.mxu1  ;;  %v14190_v1 = vpop.f32.mrf.mxu2 }
 0xc4c   :  { %6787 = vmatmul.bf16.gmra.mxu1 %v15697_v34  ;;  %v6374_v60 = vpop.f32.mrf.mxu0 }
 0xc4d   :  { %v6979_v12 = vpack.c.bf16 %v6734_v6, %v6734_v6 }
 0xc4f   :  { %v7572_v16 = vunpack.c.l.b16 %v6979_v12 }
 0xc50   :  { %v5997_v26 = vpop.f32.mrf.mxu3 }
 0xc51   :  { %v6367_v9 = vadd.f32 %v6366_v3, %v5997_v26 }
 0xc52   :  { %11186 = vxpose.binary.xlu0.c.b16.end [2/4] (short) (narrow) %v7879_v7, %v7824_v59, 16 }
 0xc53   :  { %v6736_v38 = vadd.f32 %v6735_v25, %v6367_v9  ;;  %v7574_v25 = vpack.c.b16 %v7572_v16, %v7571_v11  ;;  %v6743_v17 = vpop.f32.mrf.mxu1 }
 0xc54   :  { %v6376_v9 = vpop.f32.mrf.mxu0 }
 0xc55   :  { %v6980_v50 = vpack.c.bf16 %v6736_v38, %v6736_v38  ;;  %6039 = vmatmul.bf16.gmra.mxu3 %v15696_v29 }
 0xc56   :  { %v14193_v53 = vpop.f32.mrf.mxu2 }
 0xc57   :  { %v7573_v41 = vunpack.c.l.b16 %v6980_v50 }
 0xc58   :  { %v6000_v19 = vpop.f32.mrf.mxu3 }
 0xc59   :  { %v7575_v3 = vpack.c.b16 %v7573_v41, %v7573_v41  ;;  %v6370_v36 = vadd.f32 %v6369_v47, %v6000_v19 }
 0xc5a   :  { %6423 = vmatmul.bf16.gmra.mxu0 %v15698_v57 }
 0xc5b   :  { %v7581_v54 = vsel %vm3070_vm0, %v7575_v3, 0  ;;  %v6739_v62 = vadd.f32 %v6738_v23, %v6370_v36  ;;  %v6745_v42 = vpop.f32.mrf.mxu1  ;;  %v15702_v3 = vld [vmem:[#allocation178_spill] sm:$0xff] }
 0xc5c   :  { %7589 = vmatpush.bf16.msrb.mxu2 %v7581_v54  ;;  %6792 = vmatmul.bf16.gmra.mxu1 %v15700_v14  ;;  %v6379_v16 = vpop.f32.mrf.mxu0  ;;  %v15703_v54 = vld [vmem:[#allocation168_spill] sm:$0xff] }
 0xc5d   :  { %v6981_v24 = vpack.c.bf16 %v6739_v62, %v6739_v62 }
 0xc5e   :  { %v7264_v49 = vpop.f32.mrf.mxu2 }
 0xc5f   :  { %v14201_v26 = vsel %vm12428_vm4, %v7264_v49, -inf  ;;  %v7626_v23 = vunpack.c.l.b16 %v6981_v24 }
 0xc60   :  { %7590 = vmatpush.bf16.msrb.mxu2 %v7574_v25  ;;  %v6002_v37 = vpop.f32.mrf.mxu3  ;;  %v7980_v47 = vsel %vm3956_vm3, %v14201_v26, -inf }
 0xc61   :  { %v6372_v61 = vadd.f32 %v6371_v31, %v6002_v37  ;;  %7981 = vmax.xlane.f32.xlu2 %v7980_v47 }
 0xc63   :  { %10684 = vmatmul.msk.bf16.vlgmr.msrb.gmra.mxu2 %vm3066_vm1, %v11176_v32  ;;  %v6741_v59 = vadd.f32 %v6740_v15, %v6372_v61  ;;  %v15701_v15 = vld [vmem:[#allocation191_spill] sm:$0xff]  ;;  %v6748_v25 = vpop.f32.mrf.mxu1 }
 0xc64   :  { %v6381_v36 = vpop.f32.mrf.mxu0 }
 0xc65   :  { %6044 = vmatmul.bf16.gmra.mxu3 %v15699_v33  ;;  %v6982_v12 = vpack.c.bf16 %v6741_v59, %v6741_v59 }
 0xc67   :  { %v7627_v29 = vunpack.c.l.b16 %v6982_v12 }
 0xc68   :  { %v6005_v7 = vpop.f32.mrf.mxu3 }
 0xc69   :  { %v6375_v6 = vadd.f32 %v6374_v60, %v6005_v7  ;;  %v7629_v19 = vpack.c.b16 %v7627_v29, %v7626_v23  ;;  %v11179_v60 = vpop.trf.xlu0  ;;  %v14214_v23 = vpop.trf.xlu2 }
 0xc6a   :  { %6428 = vmatmul.bf16.gmra.mxu0 %v15701_v15 }
 0xc6b   :  { %v6744_v38 = vadd.f32 %v6743_v17, %v6375_v6  ;;  %v6750_v14 = vpop.f32.mrf.mxu1 }
 0xc6c   :  { %6797 = vmatmul.bf16.gmra.mxu1 %v15703_v54 }
 0xc6d   :  { %v6983_v50 = vpack.c.bf16 %v6744_v38, %v6744_v38  ;;  %v15704_v38 = vld [vmem:[#allocation194_spill] sm:$0xff] }
 0xc6f   :  { %v7628_v31 = vunpack.c.l.b16 %v6983_v50  ;;  %v15705_v50 = vld [vmem:[#allocation181_spill] sm:$0xff] }
 0xc70   :  { %v6007_v34 = vpop.f32.mrf.mxu3 }
 0xc71   :  { %v7630_v41 = vpack.c.b16 %v7628_v31, %v7628_v31  ;;  %v6377_v37 = vadd.f32 %v6376_v9, %v6007_v34  ;;  %v11180_v59 = vpop.trf.xlu0  ;;  %v15706_v9 = vld [vmem:[#allocation169_spill] sm:$0xff] }
 0xc73   :  { %v7636_v11 = vsel %vm3070_vm0, %v7630_v41, 0  ;;  %v6746_v61 = vadd.f32 %v6745_v42, %v6377_v37  ;;  %v15707_v37 = vld [vmem:[#allocation199_spill] sm:$0xff] }
 0xc74   :  { %7644 = vmatpush.bf16.msra.mxu2 %v7636_v11 }
 0xc75   :  { %6049 = vmatmul.bf16.gmra.mxu3 %v15702_v3  ;;  %v6984_v6 = vpack.c.bf16 %v6746_v61, %v6746_v61 }
 0xc77   :  { %v7681_v29 = vunpack.c.l.b16 %v6984_v6 }
 0xc78   :  { %v6010_v32 = vpop.f32.mrf.mxu3  ;;  %7645 = vmatpush.bf16.msra.mxu2 %v7629_v19 }
 0xc79   :  { %v6380_v17 = vadd.f32 %v6379_v16, %v6010_v32  ;;  %v6384_v32 = vpop.f32.mrf.mxu0 }
 0xc7a   :  { %6433 = vmatmul.bf16.gmra.mxu0 %v15704_v38 }
 0xc7b   :  { %10685 = vmatmul.msk.bf16.vlgmr.msra.gmra.mxu2 %vm3066_vm1, %v11179_v60  ;;  %v6749_v57 = vadd.f32 %v6748_v25, %v6380_v17  ;;  %v14222_v25 = vpop.trf.xlu2  ;;  %v6753_v17 = vpop.f32.mrf.mxu1 }
 0xc7c   :  { %6802 = vmatmul.bf16.gmra.mxu1 %v15706_v9 }
 0xc7d   :  { %v6985_v47 = vpack.c.bf16 %v6749_v57, %v6749_v57 }
 0xc7f   :  { %v7682_v34 = vunpack.c.l.b16 %v6985_v47 }
 0xc80   :  { %v6012_v33 = vpop.f32.mrf.mxu3 }
 0xc81   :  { %v6382_v62 = vadd.f32 %v6381_v36, %v6012_v33  ;;  %v7684_v19 = vpack.c.b16 %v7682_v34, %v7681_v29  ;;  %v15708_v36 = vld [vmem:[#allocation190_spill] sm:$0xff]  ;;  %v14235_v33 = vsel %vm12410_vm2, %v14185_v5, -inf  ;;  %v14244_v5 = vsel %vm12428_vm4, %v14190_v1, -inf }
 0xc82   :  { %v7974_v29 = vsel %vm3956_vm3, %v14244_v5, -inf }
 0xc83   :  { %v6751_v7 = vadd.f32 %v6750_v14, %v6382_v62  ;;  %v6386_v62 = vpop.f32.mrf.mxu0 }
 0xc84   :  { %v7961_v49 = vpop.xlane.xlu1 %7960 }
 0xc85   :  { %v8055_v24 = vsub.f32 %v14123_v35, %v7961_v49  ;;  %v6986_v12 = vpack.c.bf16 %v6751_v7, %v6751_v7  ;;  %6054 = vmatmul.bf16.gmra.mxu3 %v15705_v50  ;;  %v6755_v7 = vpop.f32.mrf.mxu1  ;;  %v7971_v49 = vsel %vm3956_vm3, %v14235_v33, -inf  ;;  %v15710_v50 = vld [vmem:[#allocation208_spill] sm:$0xff] }
 0xc87   :  { %v8087_v31 = vmul.f32 1.442695, %v8055_v24  ;;  %v7683_v42 = vunpack.c.l.b16 %v6986_v12 }
 0xc88   :  { %v6015_v60 = vpop.f32.mrf.mxu3 }
 0xc89   :  { %11359 = vpow2.f32 %v8087_v31  ;;  %v7685_v41 = vpack.c.b16 %v7683_v42, %v7683_v42  ;;  %v15711_v31 = vld [vmem:[#allocation193_spill] sm:$0xff]  ;;  %v15712_v42 = vld [vmem:[#allocation171_spill] sm:$0xff] }
 0xc8a   :  { %6438 = vmatmul.bf16.gmra.mxu0 %v15707_v37  ;;  %v6385_v37 = vadd.f32 %v6384_v32, %v6015_v60 }
 0xc8b   :  { %v7691_v11 = vsel %vm3070_vm0, %v7685_v41, 0  ;;  %v6389_v24 = vpop.f32.mrf.mxu0 }
 0xc8c   :  { %v7964_v16 = vpop.xlane.xlu0 %7963  ;;  %7699 = vmatpush.bf16.msrb.mxu2 %v7691_v11 }
 0xc8d   :  { %v8056_v35 = vsub.f32 %v14139_v10, %v7964_v16  ;;  %v15709_v10 = vld [vmem:[#allocation170_spill] sm:$0xff]  ;;  %v6758_v9 = vpop.f32.mrf.mxu1 }
 0xc8e   :  { %6807 = vmatmul.bf16.gmra.mxu1 %v15709_v10  ;;  %v6754_v10 = vadd.f32 %v6753_v17, %v6385_v37 }
 0xc8f   :  { %v14218_v15 = vpop.eup %11359  ;;  %v8089_v3 = vmul.f32 1.442695, %v8056_v35 }
 0xc90   :  { %v8151_v54 = vsel %vm3956_vm3, %v14218_v15, 0.0  ;;  %7700 = vmatpush.bf16.msrb.mxu2 %v7684_v19  ;;  %v6017_v14 = vpop.f32.mrf.mxu3 }
 0xc91   :  { %11361 = vpow2.f32 %v8089_v3  ;;  %8152 = vadd.xlane.f32.xlu1 %v8151_v54 }
 0xc93   :  { %10686 = vmatmul.msk.bf16.vlgmr.msrb.gmra.mxu2 %vm3066_vm1, %v11180_v59  ;;  %v6391_v11 = vpop.f32.mrf.mxu0 }
 0xc95   :  { %6059 = vmatmul.bf16.gmra.mxu3 %v15708_v36  ;;  %v6760_v1 = vpop.f32.mrf.mxu1 }
 0xc97   :  { %v14228_v61 = vpop.eup %11361 }
 0xc98   :  { %v8154_v57 = vsel %vm3956_vm3, %v14228_v61, 0.0  ;;  %v6020_v38 = vpop.f32.mrf.mxu3 }
 0xc99   :  { %8155 = vadd.xlane.f32.xlu1 %v8154_v57  ;;  %v6390_v16 = vadd.f32 %v6389_v24, %v6020_v38  ;;  %v6987_v24 = vpack.c.bf16 %v6754_v10, %v6754_v10 }
 0xc9a   :  { %6443 = vmatmul.bf16.gmra.mxu0 %v15710_v50 }
 0xc9b   :  { %v6759_v35 = vadd.f32 %v6758_v9, %v6390_v16  ;;  %v15714_v9 = vld [vmem:[#allocation198_spill] sm:$0xff]  ;;  %v7736_v32 = vunpack.c.l.b16 %v6987_v24 }
 0xc9c   :  { %v7967_v59 = vpop.xlane.xlu2 %7966 }
 0xc9d   :  { %v8057_v6 = vsub.f32 %v14153_v45, %v7967_v59  ;;  %v6989_v54 = vpack.c.bf16 %v6759_v35, %v6759_v35  ;;  %v6763_v50 = vpop.f32.mrf.mxu1 }
 0xc9e   :  { %6812 = vmatmul.bf16.gmra.mxu1 %v15712_v42 }
 0xc9f   :  { %v8091_v47 = vmul.f32 1.442695, %v8057_v6  ;;  %v7738_v36 = vunpack.c.l.b16 %v6989_v54 }
 0xca0   :  { %v6022_v41 = vpop.f32.mrf.mxu3 }
 0xca1   :  { %7972 = vmax.xlane.f32.xlu1 %v7971_v49  ;;  %11363 = vpow2.f32 %v8091_v47  ;;  %v6394_v49 = vpop.f32.mrf.mxu0  ;;  %v7740_v6 = vpack.c.b16 %v7738_v36, %v7738_v36  ;;  %v15713_v47 = vld [vmem:[#allocation212_spill] sm:$0xff]  ;;  %v6392_v54 = vadd.f32 %v6391_v11, %v6022_v41 }
 0xca3   :  { %v7746_v60 = vsel %vm3070_vm0, %v7740_v6, 0  ;;  %v6761_v36 = vadd.f32 %v6760_v1, %v6392_v54 }
 0xca4   :  { %v7970_v12 = vpop.xlane.xlu1 %7969  ;;  %7754 = vmatpush.bf16.msra.mxu2 %v7746_v60 }
 0xca5   :  { %6064 = vmatmul.bf16.gmra.mxu3 %v15711_v31  ;;  %v8058_v45 = vsub.f32 %v14160_v27, %v7970_v12  ;;  %v6387_v27 = vadd.f32 %v6386_v62, %v6017_v14  ;;  %v15715_v31 = vld [vmem:[#allocation172_spill] sm:$0xff]  ;;  %v6990_v6 = vpack.c.bf16 %v6761_v36, %v6761_v36 }
 0xca7   :  { %v8093_v34 = vmul.f32 1.442695, %v8058_v45  ;;  %v14251_v19 = vpop.eup %11363  ;;  %v6756_v57 = vadd.f32 %v6755_v7, %v6387_v27  ;;  %v14266_v7 = vsel %vm12410_vm2, %v14193_v53, -inf  ;;  %v7791_v60 = vunpack.c.l.b16 %v6990_v6 }
 0xca8   :  { %v8157_v3 = vsel %vm3956_vm3, %v14251_v19, 0.0  ;;  %v6025_v59 = vpop.f32.mrf.mxu3  ;;  %v7977_v16 = vsel %vm3956_vm3, %v14266_v7, -inf }
 0xca9   :  { %7975 = vmax.xlane.f32.xlu1 %v7974_v29  ;;  %11365 = vpow2.f32 %v8093_v34  ;;  %v6988_v12 = vpack.c.bf16 %v6756_v57, %v6756_v57  ;;  %v6396_v45 = vpop.f32.mrf.mxu0  ;;  %v6765_v34 = vpop.f32.mrf.mxu1  ;;  %v6395_v37 = vadd.f32 %v6394_v49, %v6025_v59  ;;  %v15716_v57 = vld [vmem:[#allocation215_spill] sm:$0xff] }
 0xcaa   :  { %6448 = vmatmul.bf16.gmra.mxu0 %v15713_v47 }
 0xcab   :  { %v7737_v14 = vunpack.c.l.b16 %v6988_v12  ;;  %v6764_v53 = vadd.f32 %v6763_v50, %v6395_v37  ;;  %v15719_v50 = vld [vmem:[#allocation218_spill] sm:$0xff] }
 0xcac   :  { %v15723_v37 = vld [vmem:[#allocation214_spill] sm:$0xff] }
 0xcad   :  { %v7739_v62 = vpack.c.b16 %v7737_v14, %v7736_v32  ;;  %v6991_v47 = vpack.c.bf16 %v6764_v53, %v6764_v53 }
 0xcae   :  { %6817 = vmatmul.bf16.gmra.mxu1 %v15715_v31  ;;  %v15718_v31 = vld [vmem:[#allocation173_spill] sm:$0xff] }
 0xcaf   :  { %v14256_v38 = vpop.eup %11365  ;;  %7755 = vmatpush.bf16.msra.mxu2 %v7739_v62  ;;  %v7792_v32 = vunpack.c.l.b16 %v6991_v47  ;;  %v15720_v62 = vld [vmem:[#allocation211_spill] sm:$0xff] }
 0xcb0   :  { %v8160_v17 = vsel %vm3956_vm3, %v14256_v38, 0.0  ;;  %v6027_v42 = vpop.f32.mrf.mxu3 }
 0xcb1   :  { %8158 = vadd.xlane.f32.xlu1 %v8157_v3  ;;  %v6397_v29 = vadd.f32 %v6396_v45, %v6027_v42  ;;  %v6399_v12 = vpop.f32.mrf.mxu0  ;;  %v6768_v41 = vpop.f32.mrf.mxu1  ;;  %v7794_v11 = vpack.c.b16 %v7792_v32, %v7791_v60  ;;  %v15721_v42 = vld [vmem:[#allocation174_spill] sm:$0xff] }
 0xcb2   :  { %10687 = vmatmul.msk.bf16.vlgmr.msra.gmra.mxu2 %vm3066_vm1, %v14214_v23 }
 0xcb3   :  { %v6766_v35 = vadd.f32 %v6765_v34, %v6397_v29 }
 0xcb5   :  { %6069 = vmatmul.bf16.gmra.mxu3 %v15714_v9  ;;  %v6992_v3 = vpack.c.bf16 %v6766_v35, %v6766_v35  ;;  %v15717_v9 = vld [vmem:[#allocation207_spill] sm:$0xff]  ;;  %v15722_v35 = vld [vmem:[#allocation220_spill] sm:$0xff] }
 0xcb7   :  { %v7793_v27 = vunpack.c.l.b16 %v6992_v3 }
 0xcb8   :  { %v6030_v24 = vpop.f32.mrf.mxu3 }
 0xcb9   :  { %8161 = vadd.xlane.f32.xlu1 %v8160_v17  ;;  %v7795_v10 = vpack.c.b16 %v7793_v27, %v7793_v27  ;;  %v6401_v59 = vpop.f32.mrf.mxu0  ;;  %v6770_v49 = vpop.f32.mrf.mxu1  ;;  %v6400_v47 = vadd.f32 %v6399_v12, %v6030_v24  ;;  %v15725_v24 = vld [vmem:[#allocation224_spill] sm:$0xff] }
 0xcba   :  { %6453 = vmatmul.bf16.gmra.mxu0 %v15716_v57 }
 0xcbb   :  { %v7801_v23 = vsel %vm3070_vm0, %v7795_v10, 0  ;;  %v6769_v32 = vadd.f32 %v6768_v41, %v6400_v47  ;;  %v15727_v41 = vld [vmem:[#allocation180_spill] sm:$0xff] }
 0xcbc   :  { %7809 = vmatpush.bf16.msrb.mxu2 %v7801_v23 }
 0xcbe   :  { %6822 = vmatmul.bf16.gmra.mxu1 %v15718_v31 }
 0xcc0   :  { %7810 = vmatpush.bf16.msrb.mxu2 %v7794_v11  ;;  %v6032_v1 = vpop.f32.mrf.mxu3 }
 0xcc1   :  { %7978 = vmax.xlane.f32.xlu1 %v7977_v16  ;;  %v6404_v17 = vpop.f32.mrf.mxu0  ;;  %v6773_v45 = vpop.f32.mrf.mxu1 }
 0xcc3   :  { %10688 = vmatmul.msk.bf16.vlgmr.msrb.gmra.mxu2 %vm3066_vm1, %v14222_v25  ;;  %v15724_v25 = vld [vmem:[#allocation177_spill] sm:$0xff] }
 0xcc5   :  { %6074 = vmatmul.bf16.gmra.mxu3 %v15717_v9  ;;  %v6402_v9 = vadd.f32 %v6401_v59, %v6032_v1  ;;  %v15726_v59 = vld [vmem:[#allocation217_spill] sm:$0xff] }
 0xcc7   :  { %v6771_v11 = vadd.f32 %v6770_v49, %v6402_v9 }
 0xcc8   :  { %v6035_v14 = vpop.f32.mrf.mxu3 }
 0xcc9   :  { %v6406_v34 = vpop.f32.mrf.mxu0  ;;  %v6775_v16 = vpop.f32.mrf.mxu1  ;;  %v6405_v36 = vadd.f32 %v6404_v17, %v6035_v14 }
 0xcca   :  { %6458 = vmatmul.bf16.gmra.mxu0 %v15719_v50 }
 0xccb   :  { %v6774_v53 = vadd.f32 %v6773_v45, %v6405_v36 }
 0xccd   :  { %v6995_v10 = vpack.c.bf16 %v6774_v53, %v6774_v53 }
 0xcce   :  { %6827 = vmatmul.bf16.gmra.mxu1 %v15721_v42  ;;  %v6993_v42 = vpack.c.bf16 %v6769_v32, %v6769_v32  ;;  %v7317_v32 = vpop.f32.mrf.mxu2 }
 0xccf   :  { %v7848_v23 = vunpack.c.l.b16 %v6995_v10 }
 0xcd0   :  { %v6037_v29 = vpop.f32.mrf.mxu3  ;;  %v7846_v17 = vunpack.c.l.b16 %v6993_v42 }
 0xcd1   :  { %v6409_v3 = vpop.f32.mrf.mxu0  ;;  %v6778_v27 = vpop.f32.mrf.mxu1  ;;  %v6407_v2 = vadd.f32 %v6406_v34, %v6037_v29 }
 0xcd3   :  { %v6776_v12 = vadd.f32 %v6775_v16, %v6407_v2  ;;  %v15728_v16 = vld [vmem:[#allocation219_spill] sm:$0xff] }
 0xcd5   :  { %6079 = vmatmul.bf16.gmra.mxu3 %v15720_v62  ;;  %v7850_v62 = vpack.c.b16 %v7848_v23, %v7848_v23  ;;  %v6996_v10 = vpack.c.bf16 %v6776_v12, %v6776_v12 }
 0xcd7   :  { %v7856_v14 = vsel %vm3070_vm0, %v7850_v62, 0  ;;  %v7901_v34 = vunpack.c.l.b16 %v6996_v10  ;;  %v15729_v62 = vld [vmem:[#allocation223_spill] sm:$0xff] }
 0xcd8   :  { %v6040_v54 = vpop.f32.mrf.mxu3  ;;  %7864 = vmatpush.bf16.msra.mxu2 %v7856_v14 }
 0xcd9   :  { %v6411_v6 = vpop.f32.mrf.mxu0  ;;  %v6780_v60 = vpop.f32.mrf.mxu1 }
 0xcda   :  { %6463 = vmatmul.bf16.gmra.mxu0 %v15722_v35  ;;  %v6994_v35 = vpack.c.bf16 %v6771_v11, %v6771_v11 }
 0xcdc   :  { %v7847_v45 = vunpack.c.l.b16 %v6994_v35 }
 0xcde   :  { %6832 = vmatmul.bf16.gmra.mxu1 %v15724_v25  ;;  %v6410_v25 = vadd.f32 %v6409_v3, %v6040_v54  ;;  %v7849_v49 = vpack.c.b16 %v7847_v45, %v7846_v17  ;;  %v7982_v17 = vpop.xlane.xlu2 %7981 }
 0xcdf   :  { %v8062_v12 = vsub.f32 %v14201_v26, %v7982_v17 }
 0xce0   :  { %v6042_v57 = vpop.f32.mrf.mxu3  ;;  %v6779_v1 = vadd.f32 %v6778_v27, %v6410_v25  ;;  %7865 = vmatpush.bf16.msra.mxu2 %v7849_v49  ;;  %v14305_v49 = vsel %vm12410_vm2, %v7317_v32, -inf }
 0xce1   :  { %v6412_v31 = vadd.f32 %v6411_v6, %v6042_v57 }
 0xce2   :  { %v6997_v57 = vpack.c.bf16 %v6779_v1, %v6779_v1 }
 0xce3   :  { %v6781_v50 = vadd.f32 %v6780_v60, %v6412_v31 }
 0xce4   :  { %v7902_v3 = vunpack.c.l.b16 %v6997_v57 }
 0xce5   :  { %6084 = vmatmul.bf16.gmra.mxu3 %v15723_v37  ;;  %v6998_v37 = vpack.c.bf16 %v6781_v50, %v6781_v50 }
 0xce6   :  { %v7904_v54 = vpack.c.b16 %v7902_v3, %v7901_v34 }
 0xce7   :  { %v7903_v36 = vunpack.c.l.b16 %v6998_v37 }
 0xce8   :  { %v6045_v17 = vpop.f32.mrf.mxu3 }
 0xce9   :  { %v7905_v53 = vpack.c.b16 %v7903_v36, %v7903_v36 }
 0xcea   :  { %6468 = vmatmul.bf16.gmra.mxu0 %v15725_v24  ;;  %v7319_v24 = vpop.f32.mrf.mxu2 }
 0xceb   :  { %v7911_v29 = vsel %vm3070_vm0, %v7905_v53, 0  ;;  %v7983_v53 = vsel %vm3956_vm3, %v14305_v49, -inf }
 0xcec   :  { %7919 = vmatpush.bf16.msrb.mxu2 %v7911_v29 }
 0xcee   :  { %6837 = vmatmul.bf16.gmra.mxu1 %v15727_v41  ;;  %v11187_v6 = vpop.trf.xlu0  ;;  %v8101_v41 = vmul.f32 1.442695, %v8062_v12  ;;  %v15731_v12 = vld [vmem:[#allocation226_spill] sm:$0xff] }
 0xcef   :  { %10689 = vmatmul.msk.bf16.vlgmr.msra.gmra.mxu2 %vm3066_vm1, %v11187_v6 }
 0xcf0   :  { %7920 = vmatpush.bf16.msrb.mxu2 %v7904_v54  ;;  %v14317_v54 = vsel %vm12428_vm4, %v7319_v24, -inf  ;;  %v15730_v24 = vld [vmem:[#allocation225_spill] sm:$0xff] }
 0xcf1   :  { %v7986_v6 = vsel %vm3956_vm3, %v14317_v54, -inf }
 0xcf2   :  { %v7372_v57 = vpop.f32.mrf.mxu2 }
 0xcf5   :  { %6089 = vmatmul.bf16.gmra.mxu3 %v15726_v59 }
 0xd04   :  { %v8153_v2 = vpop.xlane.xlu1 %8152 }
 0xd05   :  { %6094 = vmatmul.bf16.gmra.mxu3 %v15728_v16  ;;  %11367 = vrcp.f32 %v8153_v2 }
 0xd0b   :  { %v11368_v47 = vpop.eup %11367 }
 0xd0c   :  { %v8156_v27 = vpop.xlane.xlu1 %8155  ;;  %v8279_v9 = vmul.f32 %v11368_v47, %v14218_v15 }
 0xd0d   :  { %11369 = vrcp.f32 %v8156_v27  ;;  %v7374_v27 = vpop.f32.mrf.mxu2 }
 0xd0e   :  { %v8311_v11 = vpack.c.bf16 %v8279_v9, %v8279_v9  ;;  %v14326_v9 = vsel %vm12410_vm2, %v7372_v57, -inf }
 0xd10   :  { %v8353_v37 = vunpack.c.l.b16 %v8311_v11 }
 0xd13   :  { %v11370_v31 = vpop.eup %11369 }
 0xd14   :  { %v8280_v23 = vmul.f32 %v11370_v31, %v14228_v61  ;;  %v7973_v60 = vpop.xlane.xlu1 %7972  ;;  %v11188_v61 = vpop.trf.xlu0  ;;  %v14330_v31 = vsel %vm12428_vm4, %v7374_v27, -inf }
 0xd15   :  { %v8059_v50 = vsub.f32 %v14235_v33, %v7973_v60  ;;  %6099 = vmatmul.bf16.gmra.mxu3 %v15729_v62  ;;  %10690 = vmatmul.msk.bf16.vlgmr.msrb.gmra.mxu2 %vm3066_vm1, %v11188_v61 }
 0xd16   :  { %v8312_v42 = vpack.c.bf16 %v8280_v23, %v8280_v23 }
 0xd17   :  { %v8095_v35 = vmul.f32 1.442695, %v8059_v50  ;;  %v7992_v50 = vsel %vm3956_vm3, %v14330_v31, -inf }
 0xd18   :  { %v8354_v25 = vunpack.c.l.b16 %v8312_v42 }
 0xd19   :  { %11371 = vpow2.f32 %v8095_v35 }
 0xd1a   :  { %v8355_v14 = vpack.c.b16 %v8354_v25, %v8353_v37 }
 0xd1c   :  { %v7976_v45 = vpop.xlane.xlu1 %7975  ;;  %v8363_v15 = vsel %vm3956_vm3, %v8355_v14, 0 }
 0xd1d   :  { %v8060_v36 = vsub.f32 %v14244_v5, %v7976_v45  ;;  %8372 = vmatpush.bf16.xpose.msra.mxu2 %v8363_v15  ;;  %v6414_v45 = vpop.f32.mrf.mxu0  ;;  %v6783_v15 = vpop.f32.mrf.mxu1 }
 0xd1f   :  { %v14299_v33 = vpop.eup %11371  ;;  %v8097_v1 = vmul.f32 1.442695, %v8060_v36  ;;  %v6047_v36 = vpop.f32.mrf.mxu3 }
 0xd20   :  { %v8163_v59 = vsel %vm3956_vm3, %v14299_v33, 0.0 }
 0xd21   :  { %11373 = vpow2.f32 %v8097_v1  ;;  %8164 = vadd.xlane.f32.xlu1 %v8163_v59  ;;  %v6415_v1 = vadd.f32 %v6414_v45, %v6045_v17 }
 0xd22   :  { %11375 = vpow2.f32 %v8101_v41 }
 0xd24   :  { %v8159_v5 = vpop.xlane.xlu1 %8158 }
 0xd25   :  { %11377 = vrcp.f32 %v8159_v5  ;;  %v6416_v61 = vpop.f32.mrf.mxu0  ;;  %6104 = vmatmul.bf16.gmra.mxu3 %v15730_v24  ;;  %6473 = vmatmul.bf16.gmra.mxu0 %v15731_v12  ;;  %v6785_v41 = vpop.f32.mrf.mxu1  ;;  %v15732_v5 = vld [vmem:[#allocation183_spill] sm:$0xff] }
 0xd26   :  { %v6417_v59 = vadd.f32 %v6416_v61, %v6047_v36  ;;  %6842 = vmatmul.bf16.gmra.mxu1 %v15732_v5 }
 0xd27   :  { %v14309_v26 = vpop.eup %11373 }
 0xd28   :  { %v8166_v10 = vsel %vm3956_vm3, %v14309_v26, 0.0  ;;  %v14313_v29 = vpop.eup %11375 }
 0xd29   :  { %8167 = vadd.xlane.f32.xlu2 %v8166_v10  ;;  %7984 = vmax.xlane.f32.xlu1 %v7983_v53  ;;  %v8172_v2 = vsel %vm3956_vm3, %v14313_v29, 0.0  ;;  %v6784_v53 = vadd.f32 %v6783_v15, %v6415_v1  ;;  %v6786_v10 = vadd.f32 %v6785_v41, %v6417_v59 }
 0xd2b   :  { %v11378_v3 = vpop.eup %11377  ;;  %v6999_v57 = vpack.c.bf16 %v6784_v53, %v6784_v53 }
 0xd2c   :  { %v8162_v34 = vpop.xlane.xlu1 %8161  ;;  %v8281_v16 = vmul.f32 %v11378_v3, %v14251_v19  ;;  %v7989_v19 = vsel %vm3956_vm3, %v14326_v9, -inf }
 0xd2d   :  { %11379 = vrcp.f32 %v8162_v34  ;;  %v7000_v34 = vpack.c.bf16 %v6786_v10, %v6786_v10  ;;  %v8346_v3 = vunpack.c.l.b16 %v6999_v57  ;;  %v6419_v27 = vpop.f32.mrf.mxu0 }
 0xd2e   :  { %v8313_v32 = vpack.c.bf16 %v8281_v16, %v8281_v16  ;;  %v6050_v16 = vpop.f32.mrf.mxu3 }
 0xd30   :  { %v8393_v35 = vunpack.c.l.b16 %v8313_v32 }
 0xd31   :  { %7987 = vmax.xlane.f32.xlu2 %v7986_v6  ;;  %8173 = vadd.xlane.f32.xlu1 %v8172_v2  ;;  %v8347_v6 = vunpack.c.l.b16 %v7000_v34 }
 0xd33   :  { %v11380_v47 = vpop.eup %11379  ;;  %v8349_v2 = vpack.c.b16 %v8347_v6, %v8346_v3 }
 0xd34   :  { %v8282_v23 = vmul.f32 %v11380_v47, %v14256_v38  ;;  %v7979_v60 = vpop.xlane.xlu1 %7978  ;;  %v6420_v47 = vadd.f32 %v6419_v27, %v6050_v16 }
 0xd35   :  { %v8061_v11 = vsub.f32 %v14266_v7, %v7979_v60  ;;  %10691 = vmatmul.msk.bf16.vlgmr.msra.gmra.mxu2 %vm3956_vm3, %v8349_v2 }
 0xd36   :  { %v8314_v62 = vpack.c.bf16 %v8282_v23, %v8282_v23  ;;  %v6788_v23 = vpop.f32.mrf.mxu1 }
 0xd37   :  { %v8099_v42 = vmul.f32 1.442695, %v8061_v11  ;;  %v6789_v60 = vadd.f32 %v6788_v23, %v6420_v47 }
 0xd38   :  { %v8394_v37 = vunpack.c.l.b16 %v8314_v62  ;;  %v15733_v62 = vld [vmem:[#allocation227_spill] sm:$0xff] }
 0xd39   :  { %7990 = vmax.xlane.f32.xlu2 %v7989_v19  ;;  %7993 = vmax.xlane.f32.xlu1 %v7992_v50  ;;  %11381 = vpow2.f32 %v8099_v42  ;;  %v7001_v32 = vpack.c.bf16 %v6789_v60, %v6789_v60  ;;  %v6052_v19 = vpop.f32.mrf.mxu3  ;;  %v6421_v50 = vpop.f32.mrf.mxu0  ;;  %v15734_v42 = vld [vmem:[#allocation228_spill] sm:$0xff] }
 0xd3a   :  { %v8395_v25 = vpack.c.b16 %v8394_v37, %v8393_v35  ;;  %6109 = vmatmul.bf16.gmra.mxu3 %v15733_v62  ;;  %6478 = vmatmul.bf16.gmra.mxu0 %v15734_v42  ;;  %v6422_v61 = vadd.f32 %v6421_v50, %v6052_v19 }
 0xd3b   :  { %v8348_v11 = vunpack.c.l.b16 %v7001_v32 }
 0xd3c   :  { %v8403_v38 = vsel %vm3956_vm3, %v8395_v25, 0 }
 0xd3d   :  { %8412 = vmatpush.bf16.xpose.msrb.mxu2 %v8403_v38  ;;  %v8350_v37 = vpack.c.b16 %v8348_v11, %v8348_v11  ;;  %v15735_v38 = vld [vmem:[#allocation184_spill] sm:$0xff] }
 0xd3e   :  { %v6790_v25 = vpop.f32.mrf.mxu1  ;;  %6847 = vmatmul.bf16.gmra.mxu1 %v15735_v38 }
 0xd3f   :  { %v14339_v14 = vpop.eup %11381  ;;  %v6791_v41 = vadd.f32 %v6790_v25, %v6422_v61 }
 0xd40   :  { %v8169_v7 = vsel %vm3956_vm3, %v14339_v14, 0.0 }
 0xd41   :  { %8170 = vadd.xlane.f32.xlu0 %v8169_v7  ;;  %v7427_v7 = vpop.f32.mrf.mxu2  ;;  %v6055_v17 = vpop.f32.mrf.mxu3  ;;  %v7002_v57 = vpack.c.bf16 %v6791_v41, %v6791_v41 }
 0xd42   :  { %v6424_v45 = vpop.f32.mrf.mxu0  ;;  %v14364_v38 = vsel %vm12410_vm2, %v7427_v7, -inf }
 0xd43   :  { %v6425_v24 = vadd.f32 %v6424_v45, %v6055_v17  ;;  %v8386_v3 = vunpack.c.l.b16 %v7002_v57 }
 0xd45   :  { %10692 = vmatmul.msk.bf16.gmra.mxu2 %vm3956_vm3, %v8350_v37 }
 0xd46   :  { %v6793_v59 = vpop.f32.mrf.mxu1 }
 0xd47   :  { %v6794_v5 = vadd.f32 %v6793_v59, %v6425_v24 }
 0xd49   :  { %v7003_v34 = vpack.c.bf16 %v6794_v5, %v6794_v5  ;;  %v7429_v32 = vpop.f32.mrf.mxu2 }
 0xd4b   :  { %v8387_v6 = vunpack.c.l.b16 %v7003_v34 }
 0xd4d   :  { %v8389_v23 = vpack.c.b16 %v8387_v6, %v8386_v3 }
 0xd51   :  { %v7482_v5 = vpop.f32.mrf.mxu2 }
 0xd52   :  { %v14389_v3 = vsel %vm12410_vm2, %v7482_v5, -inf }
 0xd55   :  { %10693 = vmatmul.msk.bf16.vlgmr.msrb.gmra.mxu2 %vm3956_vm3, %v8389_v23 }
 0xd94   :  { %v8165_v35 = vpop.xlane.xlu1 %8164 }
 0xd95   :  { %11383 = vrcp.f32 %v8165_v35 }
 0xd9b   :  { %v11384_v12 = vpop.eup %11383 }
 0xd9c   :  { %v8168_v15 = vpop.xlane.xlu2 %8167  ;;  %v7985_v36 = vpop.xlane.xlu1 %7984  ;;  %v8283_v10 = vmul.f32 %v11384_v12, %v14299_v33  ;;  %v14375_v12 = vsel %vm12428_vm4, %v7429_v32, -inf }
 0xd9d   :  { %11385 = vrcp.f32 %v8168_v15  ;;  %v8063_v1 = vsub.f32 %v14305_v49, %v7985_v36  ;;  %v7995_v36 = vsel %vm3956_vm3, %v14364_v38, -inf  ;;  %v7998_v59 = vsel %vm3956_vm3, %v14375_v12, -inf  ;;  %v6057_v32 = vpop.f32.mrf.mxu3 }
 0xd9e   :  { %v8315_v60 = vpack.c.bf16 %v8283_v10, %v8283_v10 }
 0xd9f   :  { %v8103_v53 = vmul.f32 1.442695, %v8063_v1 }
 0xda0   :  { %v8433_v62 = vunpack.c.l.b16 %v8315_v60 }
 0xda1   :  { %11387 = vpow2.f32 %v8103_v53 }
 0xda3   :  { %v11386_v2 = vpop.eup %11385 }
 0xda4   :  { %v8284_v16 = vmul.f32 %v11386_v2, %v14309_v26  ;;  %v7988_v27 = vpop.xlane.xlu2 %7987  ;;  %v8174_v47 = vpop.xlane.xlu1 %8173  ;;  %v8001_v2 = vsel %vm3956_vm3, %v14389_v3, -inf }
 0xda5   :  { %v8064_v49 = vsub.f32 %v14317_v54, %v7988_v27 }
 0xda6   :  { %v8316_v11 = vpack.c.bf16 %v8284_v16, %v8284_v16 }
 0xda7   :  { %v14356_v19 = vpop.eup %11387  ;;  %v8105_v33 = vmul.f32 1.442695, %v8064_v49 }
 0xda8   :  { %v8175_v50 = vsel %vm3956_vm3, %v14356_v19, 0.0  ;;  %v8434_v42 = vunpack.c.l.b16 %v8316_v11  ;;  %v6426_v11 = vpop.f32.mrf.mxu0 }
 0xda9   :  { %11389 = vpow2.f32 %v8105_v33  ;;  %8176 = vadd.xlane.f32.xlu2 %v8175_v50  ;;  %v15736_v33 = vld [vmem:[#allocation229_spill] sm:$0xff]  ;;  %v15737_v50 = vld [vmem:[#allocation230_spill] sm:$0xff] }
 0xdaa   :  { %v8435_v26 = vpack.c.b16 %v8434_v42, %v8433_v62  ;;  %11391 = vrcp.f32 %v8174_v47  ;;  %6114 = vmatmul.bf16.gmra.mxu3 %v15736_v33  ;;  %6483 = vmatmul.bf16.gmra.mxu0 %v15737_v50  ;;  %v6427_v62 = vadd.f32 %v6426_v11, %v6057_v32  ;;  %v6795_v42 = vpop.f32.mrf.mxu1 }
 0xdac   :  { %v7991_v35 = vpop.xlane.xlu2 %7990  ;;  %v7994_v37 = vpop.xlane.xlu1 %7993  ;;  %v8443_v25 = vsel %vm3956_vm3, %v8435_v26, 0  ;;  %v15738_v26 = vld [vmem:[#allocation186_spill] sm:$0xff] }
 0xdad   :  { %v8065_v54 = vsub.f32 %v14326_v9, %v7991_v35  ;;  %8452 = vmatpush.bf16.xpose.msra.mxu2 %v8443_v25  ;;  %v8066_v15 = vsub.f32 %v14330_v31, %v7994_v37  ;;  %6852 = vmatmul.bf16.gmra.mxu1 %v15738_v26  ;;  %v6796_v35 = vadd.f32 %v6795_v42, %v6427_v62 }
 0xdaf   :  { %v14366_v17 = vpop.eup %11389  ;;  %v8107_v45 = vmul.f32 1.442695, %v8065_v54  ;;  %v8109_v9 = vmul.f32 1.442695, %v8066_v15  ;;  %v7004_v37 = vpack.c.bf16 %v6796_v35, %v6796_v35  ;;  %v6060_v54 = vpop.f32.mrf.mxu3 }
 0xdb0   :  { %v8178_v61 = vsel %vm3956_vm3, %v14366_v17, 0.0  ;;  %v11392_v7 = vpop.eup %11391 }
 0xdb1   :  { %11393 = vpow2.f32 %v8107_v45  ;;  %8179 = vadd.xlane.f32.xlu1 %v8178_v61  ;;  %7996 = vmax.xlane.f32.xlu2 %v7995_v36  ;;  %v8286_v41 = vmul.f32 %v11392_v7, %v14313_v29  ;;  %v8388_v25 = vunpack.c.l.b16 %v7004_v37  ;;  %v6429_v45 = vpop.f32.mrf.mxu0  ;;  %v15739_v7 = vld [vmem:[#allocation195_spill] sm:$0xff]  ;;  %v15742_v37 = vld [vmem:[#allocation185_spill] sm:$0xff] }
 0xdb2   :  { %v6798_v61 = vpop.f32.mrf.mxu1 }
 0xdb3   :  { %v8318_v57 = vpack.c.bf16 %v8286_v41, %v8286_v41  ;;  %v8390_v36 = vpack.c.b16 %v8388_v25, %v8388_v25  ;;  %v15743_v25 = vld [vmem:[#allocation231_spill] sm:$0xff] }
 0xdb4   :  { %v8171_v24 = vpop.xlane.xlu0 %8170 }
 0xdb5   :  { %11395 = vrcp.f32 %v8171_v24  ;;  %v8474_v27 = vunpack.c.l.b16 %v8318_v57 }
 0xdb6   :  { %11397 = vpow2.f32 %v8109_v9 }
 0xdb7   :  { %v14377_v1 = vpop.eup %11393  ;;  %v6062_v9 = vpop.f32.mrf.mxu3 }
 0xdb8   :  { %v8181_v31 = vsel %vm3956_vm3, %v14377_v1, 0.0 }
 0xdb9   :  { %8182 = vadd.xlane.f32.xlu2 %v8181_v31  ;;  %7999 = vmax.xlane.f32.xlu1 %v7998_v59  ;;  %v6431_v24 = vpop.f32.mrf.mxu0  ;;  %v15740_v31 = vld [vmem:[#allocation197_spill] sm:$0xff]  ;;  %v6430_v59 = vadd.f32 %v6429_v45, %v6060_v54 }
 0xdba   :  { %6119 = vmatmul.bf16.gmra.mxu3 %v15739_v7  ;;  %6488 = vmatmul.bf16.gmra.mxu0 %v15740_v31  ;;  %v6432_v41 = vadd.f32 %v6431_v24, %v6062_v9  ;;  %v6800_v5 = vpop.f32.mrf.mxu1 }
 0xdbb   :  { %v11396_v53 = vpop.eup %11395  ;;  %v6799_v57 = vadd.f32 %v6798_v61, %v6430_v59 }
 0xdbc   :  { %v8285_v10 = vmul.f32 %v11396_v53, %v14339_v14  ;;  %v14385_v34 = vpop.eup %11397  ;;  %v7484_v14 = vpop.f32.mrf.mxu2  ;;  %10694 = vmatmul.msk.bf16.gmra.mxu2 %vm3956_vm3, %v8390_v36  ;;  %v15741_v53 = vld [vmem:[#allocation187_spill] sm:$0xff]  ;;  %v15744_v36 = vld [vmem:[#allocation188_spill] sm:$0xff] }
 0xdbd   :  { %v8184_v29 = vsel %vm3956_vm3, %v14385_v34, 0.0  ;;  %v14398_v60 = vsel %vm12428_vm4, %v7484_v14, -inf  ;;  %6857 = vmatmul.bf16.gmra.mxu1 %v15741_v53 }
 0xdbe   :  { %v8317_v6 = vpack.c.bf16 %v8285_v10, %v8285_v10  ;;  %v8004_v49 = vsel %vm3956_vm3, %v14398_v60, -inf }
 0xdc0   :  { %v8473_v16 = vunpack.c.l.b16 %v8317_v6  ;;  %v6801_v6 = vadd.f32 %v6800_v5, %v6432_v41 }
 0xdc1   :  { %8002 = vmax.xlane.f32.xlu2 %v8001_v2  ;;  %8185 = vadd.xlane.f32.xlu1 %v8184_v29  ;;  %v7005_v2 = vpack.c.bf16 %v6799_v57, %v6799_v57 }
 0xdc2   :  { %v8475_v47 = vpack.c.b16 %v8474_v27, %v8473_v16  ;;  %v7006_v29 = vpack.c.bf16 %v6801_v6, %v6801_v6  ;;  %v6803_v11 = vpop.f32.mrf.mxu1 }
 0xdc3   :  { %v8426_v16 = vunpack.c.l.b16 %v7005_v2 }
 0xdc4   :  { %v8483_v23 = vsel %vm3956_vm3, %v8475_v47, 0  ;;  %v14405_v15 = vpop.f32.mrf.mxu2  ;;  %v8427_v27 = vunpack.c.l.b16 %v7006_v29 }
 0xdc5   :  { %8492 = vmatpush.bf16.xpose.msrb.mxu2 %v8483_v23  ;;  %v6065_v23 = vpop.f32.mrf.mxu3 }
 0xdc6   :  { %v8429_v47 = vpack.c.b16 %v8427_v27, %v8426_v16 }
 0xdc9   :  { %8005 = vmax.xlane.f32.xlu1 %v8004_v49  ;;  %v6434_v49 = vpop.f32.mrf.mxu0 }
 0xdca   :  { %v6435_v32 = vadd.f32 %v6434_v49, %v6065_v23  ;;  %v6805_v45 = vpop.f32.mrf.mxu1 }
 0xdcc   :  { %v14411_v10 = vpop.f32.mrf.mxu2  ;;  %10695 = vmatmul.msk.bf16.vlgmr.msra.gmra.mxu2 %vm3956_vm3, %v8429_v47  ;;  %v6804_v33 = vadd.f32 %v6803_v11, %v6435_v32 }
 0xdcd   :  { %v6067_v26 = vpop.f32.mrf.mxu3  ;;  %6124 = vmatmul.bf16.gmra.mxu3 %v15742_v37  ;;  %6862 = vmatmul.bf16.gmra.mxu1 %v15744_v36 }
 0xdce   :  { %v7007_v50 = vpack.c.bf16 %v6804_v33, %v6804_v33 }
 0xdd0   :  { %v8428_v42 = vunpack.c.l.b16 %v7007_v50 }
 0xdd1   :  { %v6436_v35 = vpop.f32.mrf.mxu0  ;;  %6493 = vmatmul.bf16.gmra.mxu0 %v15743_v25 }
 0xdd2   :  { %v8430_v54 = vpack.c.b16 %v8428_v42, %v8428_v42  ;;  %v6437_v31 = vadd.f32 %v6436_v35, %v6067_v26  ;;  %v6808_v41 = vpop.f32.mrf.mxu1 }
 0xdd4   :  { %v14414_v14 = vpop.f32.mrf.mxu2  ;;  %v6806_v5 = vadd.f32 %v6805_v45, %v6437_v31 }
 0xdd5   :  { %v6070_v61 = vpop.f32.mrf.mxu3 }
 0xdd6   :  { %v7008_v57 = vpack.c.bf16 %v6806_v5, %v6806_v5 }
 0xdd8   :  { %v8466_v2 = vunpack.c.l.b16 %v7008_v57 }
 0xdd9   :  { %v6439_v9 = vpop.f32.mrf.mxu0 }
 0xdda   :  { %v6440_v59 = vadd.f32 %v6439_v9, %v6070_v61 }
 0xddc   :  { %v14416_v62 = vpop.f32.mrf.mxu2  ;;  %10696 = vmatmul.msk.bf16.gmra.mxu2 %vm3956_vm3, %v8430_v54  ;;  %v6809_v53 = vadd.f32 %v6808_v41, %v6440_v59  ;;  %v14440_v41 = vsel %vm12410_vm2, %v14405_v15, -inf }
 0xdde   :  { %v7009_v6 = vpack.c.bf16 %v6809_v53, %v6809_v53 }
 0xde0   :  { %v8467_v29 = vunpack.c.l.b16 %v7009_v6  ;;  %v8007_v6 = vsel %vm3956_vm3, %v14440_v41, -inf }
 0xde2   :  { %v8469_v47 = vpack.c.b16 %v8467_v29, %v8466_v2 }
 0xde4   :  { %v14422_v7 = vpop.f32.mrf.mxu2 }
 0xdec   :  { %v14425_v32 = vpop.f32.mrf.mxu2  ;;  %10697 = vmatmul.msk.bf16.vlgmr.msrb.gmra.mxu2 %vm3956_vm3, %v8469_v47 }
 0xe1c   :  { %v8177_v24 = vpop.xlane.xlu2 %8176 }
 0xe1d   :  { %11399 = vrcp.f32 %v8177_v24 }
 0xe23   :  { %v11400_v23 = vpop.eup %11399 }
 0xe24   :  { %v8180_v16 = vpop.xlane.xlu1 %8179  ;;  %v7997_v27 = vpop.xlane.xlu2 %7996  ;;  %v8287_v33 = vmul.f32 %v11400_v23, %v14356_v19 }
 0xe25   :  { %11401 = vrcp.f32 %v8180_v16  ;;  %v8067_v49 = vsub.f32 %v14364_v38, %v7997_v27  ;;  %v14453_v27 = vsel %vm12428_vm4, %v14411_v10, -inf }
 0xe26   :  { %v8319_v37 = vpack.c.bf16 %v8287_v33, %v8287_v33  ;;  %v8010_v33 = vsel %vm3956_vm3, %v14453_v27, -inf }
 0xe27   :  { %v8111_v11 = vmul.f32 1.442695, %v8067_v49 }
 0xe28   :  { %v8513_v61 = vunpack.c.l.b16 %v8319_v37 }
 0xe29   :  { %11403 = vpow2.f32 %v8111_v11 }
 0xe2b   :  { %v11402_v50 = vpop.eup %11401 }
 0xe2c   :  { %v8288_v42 = vmul.f32 %v11402_v50, %v14366_v17  ;;  %v8183_v26 = vpop.xlane.xlu2 %8182  ;;  %v8000_v35 = vpop.xlane.xlu1 %7999 }
 0xe2d   :  { %v8068_v25 = vsub.f32 %v14375_v12, %v8000_v35  ;;  %11405 = vrcp.f32 %v8183_v26 }
 0xe2e   :  { %v8320_v54 = vpack.c.bf16 %v8288_v42, %v8288_v42 }
 0xe2f   :  { %v14431_v45 = vpop.eup %11403  ;;  %v8113_v38 = vmul.f32 1.442695, %v8068_v25  ;;  %v14477_v25 = vsel %vm12428_vm4, %v14416_v62, -inf }
 0xe30   :  { %v8187_v36 = vsel %vm3956_vm3, %v14431_v45, 0.0  ;;  %v8514_v9 = vunpack.c.l.b16 %v8320_v54  ;;  %v14481_v54 = vpop.f32.mrf.mxu2 }
 0xe31   :  { %11407 = vpow2.f32 %v8113_v38  ;;  %8188 = vadd.xlane.f32.xlu2 %v8187_v36 }
 0xe32   :  { %v8515_v19 = vpack.c.b16 %v8514_v9, %v8513_v61  ;;  %v6072_v9 = vpop.f32.mrf.mxu3 }
 0xe33   :  { %v11406_v59 = vpop.eup %11405 }
 0xe34   :  { %v8003_v24 = vpop.xlane.xlu2 %8002  ;;  %v8186_v17 = vpop.xlane.xlu1 %8185  ;;  %v8523_v31 = vsel %vm3956_vm3, %v8515_v19, 0  ;;  %v8289_v57 = vmul.f32 %v11406_v59, %v14377_v1  ;;  %v15747_v59 = vld [vmem:[#allocation189_spill] sm:$0xff] }
 0xe35   :  { %v8069_v12 = vsub.f32 %v14389_v3, %v8003_v24  ;;  %11409 = vrcp.f32 %v8186_v17  ;;  %8532 = vmatpush.bf16.xpose.msra.mxu2 %v8523_v31  ;;  %v6441_v19 = vpop.f32.mrf.mxu0  ;;  %v15745_v24 = vld [vmem:[#allocation232_spill] sm:$0xff]  ;;  %v15746_v17 = vld [vmem:[#allocation233_spill] sm:$0xff]  ;;  %v6810_v31 = vpop.f32.mrf.mxu1  ;;  %6867 = vmatmul.bf16.gmra.mxu1 %v15747_v59 }
 0xe36   :  { %v8321_v16 = vpack.c.bf16 %v8289_v57, %v8289_v57  ;;  %6129 = vmatmul.bf16.gmra.mxu3 %v15745_v24  ;;  %6498 = vmatmul.bf16.gmra.mxu0 %v15746_v17  ;;  %v6442_v62 = vadd.f32 %v6441_v19, %v6072_v9 }
 0xe37   :  { %v14442_v5 = vpop.eup %11407  ;;  %v8115_v53 = vmul.f32 1.442695, %v8069_v12 }
 0xe38   :  { %v8190_v2 = vsel %vm3956_vm3, %v14442_v5, 0.0  ;;  %v14483_v38 = vpop.f32.mrf.mxu2  ;;  %v6811_v12 = vadd.f32 %v6810_v31, %v6442_v62 }
 0xe39   :  { %11411 = vpow2.f32 %v8115_v53  ;;  %8191 = vadd.xlane.f32.xlu1 %v8190_v2  ;;  %8008 = vmax.xlane.f32.xlu2 %v8007_v6 }
 0xe3a   :  { %v7010_v57 = vpack.c.bf16 %v6811_v12, %v6811_v12  ;;  %v6075_v2 = vpop.f32.mrf.mxu3 }
 0xe3b   :  { %v11410_v3 = vpop.eup %11409 }
 0xe3c   :  { %v8290_v15 = vmul.f32 %v11410_v3, %v14385_v34  ;;  %v8006_v29 = vpop.xlane.xlu1 %8005  ;;  %v8553_v34 = vunpack.c.l.b16 %v8321_v16  ;;  %v8468_v6 = vunpack.c.l.b16 %v7010_v57 }
 0xe3d   :  { %v8070_v1 = vsub.f32 %v14398_v60, %v8006_v29  ;;  %v14466_v60 = vsel %vm12410_vm2, %v14414_v14, -inf  ;;  %v8016_v14 = vsel %vm3956_vm3, %v14477_v25, -inf  ;;  %v6444_v3 = vpop.f32.mrf.mxu0  ;;  %v6813_v29 = vpop.f32.mrf.mxu1 }
 0xe3e   :  { %v8322_v47 = vpack.c.bf16 %v8290_v15, %v8290_v15  ;;  %v8013_v35 = vsel %vm3956_vm3, %v14466_v60, -inf  ;;  %v8470_v15 = vpack.c.b16 %v8468_v6, %v8468_v6 }
 0xe3f   :  { %v14456_v23 = vpop.eup %11411  ;;  %v8117_v49 = vmul.f32 1.442695, %v8070_v1 }
 0xe40   :  { %v8193_v11 = vsel %vm3956_vm3, %v14456_v23, 0.0  ;;  %v8554_v50 = vunpack.c.l.b16 %v8322_v47  ;;  %v14485_v36 = vpop.f32.mrf.mxu2  ;;  %10698 = vmatmul.msk.bf16.gmra.mxu2 %vm3956_vm3, %v8470_v15 }
 0xe41   :  { %8194 = vadd.xlane.f32.xlu2 %v8193_v11  ;;  %8011 = vmax.xlane.f32.xlu1 %v8010_v33  ;;  %11413 = vpow2.f32 %v8117_v49  ;;  %v15748_v49 = vld [vmem:[#allocation234_spill] sm:$0xff]  ;;  %v15749_v11 = vld [vmem:[#allocation235_spill] sm:$0xff]  ;;  %v6445_v33 = vadd.f32 %v6444_v3, %v6075_v2 }
 0xe42   :  { %v8555_v42 = vpack.c.b16 %v8554_v50, %v8553_v34  ;;  %v6077_v1 = vpop.f32.mrf.mxu3 }
 0xe44   :  { %v8563_v10 = vsel %vm3956_vm3, %v8555_v42, 0  ;;  %v15750_v42 = vld [vmem:[#allocation192_spill] sm:$0xff] }
 0xe45   :  { %8572 = vmatpush.bf16.xpose.msrb.mxu2 %v8563_v10  ;;  %v6446_v47 = vpop.f32.mrf.mxu0  ;;  %v6815_v50 = vpop.f32.mrf.mxu1  ;;  %6872 = vmatmul.bf16.gmra.mxu1 %v15750_v42  ;;  %v6814_v10 = vadd.f32 %v6813_v29, %v6445_v33 }
 0xe46   :  { %6134 = vmatmul.bf16.gmra.mxu3 %v15748_v49  ;;  %6503 = vmatmul.bf16.gmra.mxu0 %v15749_v11  ;;  %v6447_v34 = vadd.f32 %v6446_v47, %v6077_v1  ;;  %v15751_v47 = vld [vmem:[#allocation236_spill] sm:$0xff]  ;;  %v15752_v49 = vld [vmem:[#allocation237_spill] sm:$0xff] }
 0xe47   :  { %v14468_v26 = vpop.eup %11413 }
 0xe48   :  { %v8196_v37 = vsel %vm3956_vm3, %v14468_v26, 0.0  ;;  %v14487_v61 = vpop.f32.mrf.mxu2 }
 0xe49   :  { %8014 = vmax.xlane.f32.xlu2 %v8013_v35  ;;  %8197 = vadd.xlane.f32.xlu1 %v8196_v37  ;;  %v6816_v35 = vadd.f32 %v6815_v50, %v6447_v34  ;;  %v7011_v37 = vpack.c.bf16 %v6814_v10, %v6814_v10  ;;  %v15753_v34 = vld [vmem:[#allocation196_spill] sm:$0xff] }
 0xe4a   :  { %v6080_v31 = vpop.f32.mrf.mxu3 }
 0xe4b   :  { %v8506_v19 = vunpack.c.l.b16 %v7011_v37 }
 0xe4d   :  { %v6449_v59 = vpop.f32.mrf.mxu0  ;;  %v6818_v57 = vpop.f32.mrf.mxu1 }
 0xe4e   :  { %v6450_v12 = vadd.f32 %v6449_v59, %v6080_v31 }
 0xe50   :  { %v14492_v53 = vpop.f32.mrf.mxu2  ;;  %v6819_v6 = vadd.f32 %v6818_v57, %v6450_v12 }
 0xe51   :  { %8017 = vmax.xlane.f32.xlu1 %v8016_v14  ;;  %v7012_v14 = vpack.c.bf16 %v6816_v35, %v6816_v35 }
 0xe52   :  { %v7013_v2 = vpack.c.bf16 %v6819_v6, %v6819_v6  ;;  %v6082_v29 = vpop.f32.mrf.mxu3 }
 0xe53   :  { %v8507_v24 = vunpack.c.l.b16 %v7012_v14 }
 0xe54   :  { %v8508_v15 = vunpack.c.l.b16 %v7013_v2 }
 0xe55   :  { %v8509_v17 = vpack.c.b16 %v8507_v24, %v8506_v19  ;;  %v6451_v1 = vpop.f32.mrf.mxu0  ;;  %v6820_v33 = vpop.f32.mrf.mxu1  ;;  %6877 = vmatmul.bf16.gmra.mxu1 %v15753_v34 }
 0xe56   :  { %6139 = vmatmul.bf16.gmra.mxu3 %v15751_v47  ;;  %6508 = vmatmul.bf16.gmra.mxu0 %v15752_v49  ;;  %v8510_v11 = vpack.c.b16 %v8508_v15, %v8508_v15  ;;  %v6452_v37 = vadd.f32 %v6451_v1, %v6082_v29 }
 0xe57   :  { %10699 = vmatmul.msk.bf16.vlgmr.msra.gmra.mxu2 %vm3956_vm3, %v8509_v17 }
 0xe58   :  { %v14495_v16 = vpop.f32.mrf.mxu2  ;;  %v6821_v24 = vadd.f32 %v6820_v33, %v6452_v37 }
 0xe5a   :  { %v6085_v42 = vpop.f32.mrf.mxu3  ;;  %v7014_v31 = vpack.c.bf16 %v6821_v24, %v6821_v24 }
 0xe5c   :  { %v8546_v57 = vunpack.c.l.b16 %v7014_v31 }
 0xe5d   :  { %v6454_v10 = vpop.f32.mrf.mxu0  ;;  %v6823_v19 = vpop.f32.mrf.mxu1 }
 0xe5e   :  { %v6455_v14 = vadd.f32 %v6454_v10, %v6085_v42 }
 0xe60   :  { %v14500_v9 = vpop.f32.mrf.mxu2  ;;  %v6824_v17 = vadd.f32 %v6823_v19, %v6455_v14 }
 0xe62   :  { %v7015_v59 = vpack.c.bf16 %v6824_v17, %v6824_v17 }
 0xe64   :  { %v8547_v6 = vunpack.c.l.b16 %v7015_v59 }
 0xe66   :  { %v8549_v47 = vpack.c.b16 %v8547_v6, %v8546_v57 }
 0xe67   :  { %10700 = vmatmul.msk.bf16.gmra.mxu2 %vm3956_vm3, %v8510_v11 }
 0xe68   :  { %v14503_v62 = vpop.f32.mrf.mxu2 }
 0xe70   :  { %v14505_v3 = vpop.f32.mrf.mxu2 }
 0xe77   :  { %10701 = vmatmul.msk.bf16.vlgmr.msrb.gmra.mxu2 %vm3956_vm3, %v8549_v47  ;;  %v14533_v47 = vsel %vm12410_vm2, %v14422_v7, -inf }
 0xe78   :  { %v14511_v50 = vpop.f32.mrf.mxu2 }
 0xe80   :  { %v14513_v12 = vpop.f32.mrf.mxu2 }
 0xe88   :  { %v14518_v33 = vpop.f32.mrf.mxu2 }
 0xe90   :  { %v14526_v59 = vpop.f32.mrf.mxu2 }
 0xea4   :  { %v8189_v35 = vpop.xlane.xlu2 %8188 }
 0xea5   :  { %11415 = vrcp.f32 %v8189_v35 }
 0xeab   :  { %v11416_v49 = vpop.eup %11415 }
 0xeac   :  { %v8192_v2 = vpop.xlane.xlu1 %8191  ;;  %v8009_v15 = vpop.xlane.xlu2 %8008  ;;  %v8291_v1 = vmul.f32 %v11416_v49, %v14431_v45 }
 0xead   :  { %11417 = vrcp.f32 %v8192_v2  ;;  %v8071_v11 = vsub.f32 %v14440_v41, %v8009_v15 }
 0xeae   :  { %v8323_v37 = vpack.c.bf16 %v8291_v1, %v8291_v1  ;;  %v8019_v1 = vsel %vm3956_vm3, %v14533_v47, -inf }
 0xeaf   :  { %v8119_v29 = vmul.f32 1.442695, %v8071_v11 }
 0xeb0   :  { %v8593_v45 = vunpack.c.l.b16 %v8323_v37  ;;  %v14546_v37 = vsel %vm12428_vm4, %v14425_v32, -inf  ;;  %v6087_v32 = vpop.f32.mrf.mxu3 }
 0xeb1   :  { %11419 = vpow2.f32 %v8119_v29 }
 0xeb3   :  { %v11418_v34 = vpop.eup %11417 }
 0xeb4   :  { %v8292_v42 = vmul.f32 %v11418_v34, %v14442_v5  ;;  %v8195_v10 = vpop.xlane.xlu2 %8194  ;;  %v8012_v35 = vpop.xlane.xlu1 %8011 }
 0xeb5   :  { %v8072_v14 = vsub.f32 %v14453_v27, %v8012_v35  ;;  %11421 = vrcp.f32 %v8195_v10 }
 0xeb6   :  { %v8324_v19 = vpack.c.bf16 %v8292_v42, %v8292_v42  ;;  %v8381_v42 = vpop.f32.mrf.mxu2 }
 0xeb7   :  { %v14522_v24 = vpop.eup %11419  ;;  %v8121_v41 = vmul.f32 1.442695, %v8072_v14 }
 0xeb8   :  { %v8199_v17 = vsel %vm3956_vm3, %v14522_v24, 0.0  ;;  %v8594_v31 = vunpack.c.l.b16 %v8324_v19 }
 0xeb9   :  { %11423 = vpow2.f32 %v8121_v41  ;;  %8200 = vadd.xlane.f32.xlu2 %v8199_v17 }
 0xeba   :  { %v8595_v5 = vpack.c.b16 %v8594_v31, %v8593_v45  ;;  %v8022_v45 = vsel %vm3956_vm3, %v14546_v37, -inf }
 0xebb   :  { %v11422_v27 = vpop.eup %11421 }
 0xebc   :  { %v8015_v57 = vpop.xlane.xlu2 %8014  ;;  %v8198_v6 = vpop.xlane.xlu1 %8197  ;;  %v8603_v2 = vsel %vm3956_vm3, %v8595_v5, 0  ;;  %v8293_v29 = vmul.f32 %v11422_v27, %v14456_v23 }
 0xebd   :  { %v8073_v15 = vsub.f32 %v14466_v60, %v8015_v57  ;;  %11425 = vrcp.f32 %v8198_v6  ;;  %8612 = vmatpush.bf16.xpose.msra.mxu2 %v8603_v2  ;;  %v6456_v57 = vpop.f32.mrf.mxu0  ;;  %v15754_v6 = vld [vmem:[#allocation238_spill] sm:$0xff]  ;;  %v15755_v2 = vld [vmem:[#allocation239_spill] sm:$0xff] }
 0xebe   :  { %v8325_v35 = vpack.c.bf16 %v8293_v29, %v8293_v29  ;;  %6144 = vmatmul.bf16.gmra.mxu3 %v15754_v6  ;;  %6513 = vmatmul.bf16.gmra.mxu0 %v15755_v2  ;;  %v6457_v27 = vadd.f32 %v6456_v57, %v6087_v32  ;;  %v15756_v29 = vld [vmem:[#allocation200_spill] sm:$0xff] }
 0xebf   :  { %v14535_v49 = vpop.eup %11423  ;;  %v8123_v11 = vmul.f32 1.442695, %v8073_v15  ;;  %v6825_v15 = vpop.f32.mrf.mxu1  ;;  %6882 = vmatmul.bf16.gmra.mxu1 %v15756_v29  ;;  %v15758_v6 = vld [vmem:[#allocation12_spill] sm:$0xff] }
 0xec0   :  { %v8202_v34 = vsel %vm3956_vm3, %v14535_v49, 0.0  ;;  %v8633_v31 = vunpack.c.l.b16 %v8325_v35 }
 0xec1   :  { %11427 = vpow2.f32 %v8123_v11  ;;  %8203 = vadd.xlane.f32.xlu1 %v8202_v34  ;;  %8020 = vmax.xlane.f32.xlu2 %v8019_v1  ;;  %v14564_v1 = vsel %vm12410_vm2, %v14481_v54, -inf  ;;  %v6826_v34 = vadd.f32 %v6825_v15, %v6457_v27 }
 0xec3   :  { %v11426_v60 = vpop.eup %11425 }
 0xec4   :  { %v8294_v7 = vmul.f32 %v11426_v60, %v14468_v26  ;;  %v8018_v10 = vpop.xlane.xlu1 %8017  ;;  %v14555_v26 = vpop.f32.mrf.mxu2  ;;  %v7016_v60 = vpack.c.bf16 %v6826_v34, %v6826_v34 }
 0xec5   :  { %v8074_v23 = vsub.f32 %v14477_v25, %v8018_v10 }
 0xec6   :  { %v8326_v14 = vpack.c.bf16 %v8294_v7, %v8294_v7  ;;  %v8025_v7 = vsel %vm3956_vm3, %v14564_v1, -inf }
 0xec7   :  { %v14549_v19 = vpop.eup %11427  ;;  %v8125_v41 = vmul.f32 1.442695, %v8074_v23  ;;  %v8548_v23 = vunpack.c.l.b16 %v7016_v60 }
 0xec8   :  { %v8205_v17 = vsel %vm3956_vm3, %v14549_v19, 0.0  ;;  %v8634_v5 = vunpack.c.l.b16 %v8326_v14  ;;  %v6090_v14 = vpop.f32.mrf.mxu3 }
 0xec9   :  { %8206 = vadd.xlane.f32.xlu2 %v8205_v17  ;;  %8023 = vmax.xlane.f32.xlu1 %v8022_v45  ;;  %11429 = vpow2.f32 %v8125_v41  ;;  %v6459_v41 = vpop.f32.mrf.mxu0  ;;  %v8550_v54 = vpack.c.b16 %v8548_v23, %v8548_v23  ;;  %v6828_v17 = vpop.f32.mrf.mxu1  ;;  %v14577_v45 = vsel %vm12428_vm4, %v14483_v38, -inf  ;;  %v14590_v38 = vsel %vm12410_vm2, %v14485_v36, -inf }
 0xeca   :  { %v8635_v25 = vpack.c.b16 %v8634_v5, %v8633_v31  ;;  %v8028_v31 = vsel %vm3956_vm3, %v14577_v45, -inf  ;;  %v6460_v2 = vadd.f32 %v6459_v41, %v6090_v14 }
 0xecb   :  { %10702 = vmatmul.msk.bf16.gmra.mxu2 %vm3956_vm3, %v8550_v54 }
 0xecc   :  { %v8643_v11 = vsel %vm3956_vm3, %v8635_v25, 0  ;;  %v14572_v35 = vpop.f32.mrf.mxu2  ;;  %v15757_v25 = vld [vmem:[#allocation11_spill] sm:$0xff]  ;;  %v6829_v29 = vadd.f32 %v6828_v17, %v6460_v2 }
 0xecd   :  { %8652 = vmatpush.bf16.xpose.msrb.mxu2 %v8643_v11  ;;  %v15759_v11 = vld [vmem:[#allocation201_spill] sm:$0xff] }
 0xece   :  { %v7017_v60 = vpack.c.bf16 %v6829_v29, %v6829_v29  ;;  %v15760_v29 = vld [vmem:[#allocation15_spill] sm:$0xff] }
 0xecf   :  { %v14566_v42 = vpop.eup %11429 }
 0xed0   :  { %v8208_v10 = vsel %vm3956_vm3, %v14566_v42, 0.0  ;;  %v6092_v32 = vpop.f32.mrf.mxu3  ;;  %6149 = vmatmul.bf16.gmra.mxu3 %v15757_v25  ;;  %v8586_v54 = vunpack.c.l.b16 %v7017_v60 }
 0xed1   :  { %8026 = vmax.xlane.f32.xlu2 %v8025_v7  ;;  %8209 = vadd.xlane.f32.xlu1 %v8208_v10  ;;  %v6461_v57 = vpop.f32.mrf.mxu0  ;;  %v6830_v15 = vpop.f32.mrf.mxu1  ;;  %v8031_v10 = vsel %vm3956_vm3, %v14590_v38, -inf }
 0xed2   :  { %6518 = vmatmul.bf16.gmra.mxu0 %v15758_v6  ;;  %v6462_v27 = vadd.f32 %v6461_v57, %v6092_v32  ;;  %6887 = vmatmul.bf16.gmra.mxu1 %v15759_v11 }
 0xed4   :  { %v14582_v5 = vpop.f32.mrf.mxu2  ;;  %v6831_v34 = vadd.f32 %v6830_v15, %v6462_v27 }
 0xed6   :  { %v7018_v7 = vpack.c.bf16 %v6831_v34, %v6831_v34  ;;  %v15761_v34 = vld [vmem:[#allocation16_spill] sm:$0xff] }
 0xed8   :  { %v8587_v14 = vunpack.c.l.b16 %v7018_v7  ;;  %v6095_v32 = vpop.f32.mrf.mxu3 }
 0xed9   :  { %8029 = vmax.xlane.f32.xlu1 %v8028_v31  ;;  %v6464_v57 = vpop.f32.mrf.mxu0  ;;  %v6833_v25 = vpop.f32.mrf.mxu1 }
 0xeda   :  { %v8589_v41 = vpack.c.b16 %v8587_v14, %v8586_v54  ;;  %v6465_v36 = vadd.f32 %v6464_v57, %v6095_v32 }
 0xedc   :  { %v8421_v23 = vpop.f32.mrf.mxu2  ;;  %10703 = vmatmul.msk.bf16.vlgmr.msra.gmra.mxu2 %vm3956_vm3, %v8589_v41  ;;  %v6834_v17 = vadd.f32 %v6833_v25, %v6465_v36 }
 0xede   :  { %v7019_v6 = vpack.c.bf16 %v6834_v17, %v6834_v17 }
 0xee0   :  { %v8588_v27 = vunpack.c.l.b16 %v7019_v6  ;;  %v6097_v15 = vpop.f32.mrf.mxu3  ;;  %6154 = vmatmul.bf16.gmra.mxu3 %v15760_v29 }
 0xee1   :  { %8032 = vmax.xlane.f32.xlu1 %v8031_v10  ;;  %v6466_v11 = vpop.f32.mrf.mxu0  ;;  %v6835_v7 = vpop.f32.mrf.mxu1  ;;  %v15762_v10 = vld [vmem:[#allocation202_spill] sm:$0xff] }
 0xee2   :  { %6523 = vmatmul.bf16.gmra.mxu0 %v15761_v34  ;;  %v8590_v60 = vpack.c.b16 %v8588_v27, %v8588_v27  ;;  %6892 = vmatmul.bf16.gmra.mxu1 %v15762_v10  ;;  %v6467_v41 = vadd.f32 %v6466_v11, %v6097_v15  ;;  %v15764_v15 = vld [vmem:[#allocation20_spill] sm:$0xff] }
 0xee4   :  { %v14595_v31 = vpop.f32.mrf.mxu2  ;;  %v6836_v36 = vadd.f32 %v6835_v7, %v6467_v41 }
 0xee6   :  { %v7020_v17 = vpack.c.bf16 %v6836_v36, %v6836_v36 }
 0xee8   :  { %v6100_v54 = vpop.f32.mrf.mxu3  ;;  %v8626_v40 = vunpack.c.l.b16 %v7020_v17 }
 0xee9   :  { %v6469_v14 = vpop.f32.mrf.mxu0  ;;  %v6838_v57 = vpop.f32.mrf.mxu1 }
 0xeea   :  { %v6470_v32 = vadd.f32 %v6469_v14, %v6100_v54  ;;  %v15765_v54 = vld [vmem:[#allocation203_spill] sm:$0xff] }
 0xeec   :  { %v14597_v2 = vpop.f32.mrf.mxu2  ;;  %10704 = vmatmul.msk.bf16.gmra.mxu2 %vm3956_vm3, %v8590_v60  ;;  %v6839_v25 = vadd.f32 %v6838_v57, %v6470_v32 }
 0xeee   :  { %v7021_v6 = vpack.c.bf16 %v6839_v25, %v6839_v25 }
 0xef0   :  { %v8627_v34 = vunpack.c.l.b16 %v7021_v6  ;;  %v6102_v20 = vpop.f32.mrf.mxu3  ;;  %6159 = vmatmul.bf16.gmra.mxu3 %v15763_v48 }
 0xef1   :  { %v6471_v58 = vpop.f32.mrf.mxu0  ;;  %v6840_v7 = vpop.f32.mrf.mxu1 }
 0xef2   :  { %v8629_v27 = vpack.c.b16 %v8627_v34, %v8626_v40  ;;  %6528 = vmatmul.bf16.gmra.mxu0 %v15764_v15  ;;  %v6472_v11 = vadd.f32 %v6471_v58, %v6102_v20  ;;  %6897 = vmatmul.bf16.gmra.mxu1 %v15765_v54 }
 0xef4   :  { %v14603_v23 = vpop.f32.mrf.mxu2  ;;  %v6841_v14 = vadd.f32 %v6840_v7, %v6472_v11 }
 0xef6   :  { %v7022_v41 = vpack.c.bf16 %v6841_v14, %v6841_v14 }
 0xef8   :  { %v8628_v40 = vunpack.c.l.b16 %v7022_v41  ;;  %v6105_v17 = vpop.f32.mrf.mxu3 }
 0xef9   :  { %v6474_v6 = vpop.f32.mrf.mxu0 }
 0xefa   :  { %v8630_v57 = vpack.c.b16 %v8628_v40, %v8628_v40  ;;  %v6475_v14 = vadd.f32 %v6474_v6, %v6105_v17 }
 0xefc   :  { %v8461_v29 = vpop.f32.mrf.mxu2  ;;  %10705 = vmatmul.msk.bf16.vlgmr.msrb.gmra.mxu2 %vm3956_vm3, %v8629_v27 }
 0xefd   :  { %v6843_v29 = vpop.f32.mrf.mxu1 }
 0xefe   :  { %v6844_v8 = vadd.f32 %v6843_v29, %v6475_v14 }
 0xf00   :  { %v6107_v11 = vpop.f32.mrf.mxu3  ;;  %v7023_v17 = vpack.c.bf16 %v6844_v8, %v6844_v8 }
 0xf01   :  { %v6476_v7 = vpop.f32.mrf.mxu0 }
 0xf02   :  { %v6477_v40 = vadd.f32 %v6476_v7, %v6107_v11 }
 0xf04   :  { %v14606_v10 = vpop.f32.mrf.mxu2 }
 0xf0c   :  { %v14608_v60 = vpop.f32.mrf.mxu2  ;;  %10706 = vmatmul.msk.bf16.gmra.mxu2 %vm3956_vm3, %v8630_v57 }
 0xf14   :  { %v14613_v32 = vpop.f32.mrf.mxu2 }
 0xf1c   :  { %v8501_v36 = vpop.f32.mrf.mxu2 }
 0xf1d   :  { %v6845_v36 = vpop.f32.mrf.mxu1 }
 0xf24   :  { %v14616_v25 = vpop.f32.mrf.mxu2 }
 0xf2c   :  { %v8201_v48 = vpop.xlane.xlu2 %8200  ;;  %v14618_v58 = vpop.f32.mrf.mxu2 }
 0xf2d   :  { %11431 = vrcp.f32 %v8201_v48 }
 0xf33   :  { %v11432_v27 = vpop.eup %11431 }
 0xf34   :  { %v8204_v20 = vpop.xlane.xlu1 %8203  ;;  %v8021_v34 = vpop.xlane.xlu2 %8020  ;;  %v8295_v41 = vmul.f32 %v11432_v27, %v14522_v24 }
 0xf35   :  { %11433 = vrcp.f32 %v8204_v20  ;;  %v8075_v15 = vsub.f32 %v14533_v47, %v8021_v34  ;;  %v14622_v57 = vpop.f32.mrf.mxu2  ;;  %v6846_v20 = vadd.f32 %v6845_v36, %v6477_v40  ;;  %v6848_v36 = vpop.f32.mrf.mxu1 }
 0xf36   :  { %v8327_v18 = vpack.c.bf16 %v8295_v41, %v8295_v41 }
 0xf37   :  { %v8127_v54 = vmul.f32 1.442695, %v8075_v15  ;;  %v7024_v27 = vpack.c.bf16 %v6846_v20, %v6846_v20 }
 0xf38   :  { %v8673_v11 = vunpack.c.l.b16 %v8327_v18 }
 0xf39   :  { %11435 = vpow2.f32 %v8127_v54  ;;  %v6479_v54 = vpop.f32.mrf.mxu0  ;;  %v8667_v8 = vunpack.c.l.b16 %v7024_v27 }
 0xf3b   :  { %v11434_v48 = vpop.eup %11433 }
 0xf3c   :  { %v8296_v52 = vmul.f32 %v11434_v48, %v14535_v49  ;;  %v8207_v39 = vpop.xlane.xlu2 %8206  ;;  %v8024_v28 = vpop.xlane.xlu1 %8023 }
 0xf3d   :  { %v8076_v47 = vsub.f32 %v14546_v37, %v8024_v28  ;;  %11437 = vrcp.f32 %v8207_v39  ;;  %v8541_v7 = vpop.f32.mrf.mxu2  ;;  %v6110_v49 = vpop.f32.mrf.mxu3  ;;  %v14633_v28 = vsel %vm12428_vm4, %v14487_v61, -inf }
 0xf3e   :  { %v8328_v34 = vpack.c.bf16 %v8296_v52, %v8296_v52  ;;  %v8666_v52 = vunpack.c.l.b16 %v7023_v17  ;;  %v6480_v17 = vadd.f32 %v6479_v54, %v6110_v49 }
 0xf3f   :  { %v14626_v15 = vpop.eup %11435  ;;  %v8129_v24 = vmul.f32 1.442695, %v8076_v47  ;;  %v8034_v47 = vsel %vm3956_vm3, %v14633_v28, -inf }
 0xf40   :  { %v8211_v6 = vsel %vm3956_vm3, %v14626_v15, 0.0  ;;  %v8674_v29 = vunpack.c.l.b16 %v8328_v34 }
 0xf41   :  { %11439 = vpow2.f32 %v8129_v24  ;;  %8212 = vadd.xlane.f32.xlu2 %v8211_v6  ;;  %v8669_v24 = vpack.c.b16 %v8667_v8, %v8666_v52 }
 0xf42   :  { %v8675_v14 = vpack.c.b16 %v8674_v29, %v8673_v11  ;;  %v6481_v11 = vpop.f32.mrf.mxu0  ;;  %v14649_v29 = vsel %vm12410_vm2, %v14492_v53, -inf }
 0xf43   :  { %v11438_v40 = vpop.eup %11437  ;;  %v8037_v52 = vsel %vm3956_vm3, %v14649_v29, -inf }
 0xf44   :  { %v8027_v41 = vpop.xlane.xlu2 %8026  ;;  %v8210_v39 = vpop.xlane.xlu1 %8209  ;;  %v8683_v37 = vsel %vm3956_vm3, %v8675_v14, 0  ;;  %v8297_v61 = vmul.f32 %v11438_v40, %v14549_v19  ;;  %v6849_v14 = vadd.f32 %v6848_v36, %v6480_v17  ;;  %v14665_v36 = vsel %vm12428_vm4, %v14495_v16, -inf }
 0xf45   :  { %v8077_v18 = vsub.f32 %v14564_v1, %v8027_v41  ;;  %11441 = vrcp.f32 %v8210_v39  ;;  %8692 = vmatpush.bf16.xpose.msra.mxu2 %v8683_v37  ;;  %v14644_v6 = vpop.f32.mrf.mxu2  ;;  %v6112_v27 = vpop.f32.mrf.mxu3 }
 0xf46   :  { %v8329_v49 = vpack.c.bf16 %v8297_v61, %v8297_v61  ;;  %v6850_v37 = vpop.f32.mrf.mxu1  ;;  %v7025_v40 = vpack.c.bf16 %v6849_v14, %v6849_v14 }
 0xf47   :  { %v14637_v48 = vpop.eup %11439  ;;  %v8131_v20 = vmul.f32 1.442695, %v8077_v18 }
 0xf48   :  { %v8214_v34 = vsel %vm3956_vm3, %v14637_v48, 0.0  ;;  %v8668_v61 = vunpack.c.l.b16 %v7025_v40 }
 0xf49   :  { %11443 = vpow2.f32 %v8131_v20  ;;  %8215 = vadd.xlane.f32.xlu0 %v8214_v34  ;;  %8035 = vmax.xlane.f32.xlu2 %v8034_v47 }
 0xf4a   :  { %v8670_v16 = vpack.c.b16 %v8668_v61, %v8668_v61 }
 0xf4b   :  { %v11442_v1 = vpop.eup %11441 }
 0xf4c   :  { %v8298_v19 = vmul.f32 %v11442_v1, %v14566_v42  ;;  %v8030_v7 = vpop.xlane.xlu1 %8029  ;;  %10707 = vmatmul.msk.bf16.vlgmr.msra.gmra.mxu2 %vm3956_vm3, %v8669_v24  ;;  %v8713_v42 = vunpack.c.l.b16 %v8329_v49  ;;  %v6484_v1 = vpop.f32.mrf.mxu0 }
 0xf4d   :  { %v8078_v54 = vsub.f32 %v14577_v45, %v8030_v7  ;;  %v14660_v20 = vpop.f32.mrf.mxu2  ;;  %v6115_v17 = vpop.f32.mrf.mxu3  ;;  %v8040_v7 = vsel %vm3956_vm3, %v14665_v36, -inf }
 0xf4e   :  { %v8330_v41 = vpack.c.bf16 %v8298_v19, %v8298_v19 }
 0xf4f   :  { %v14654_v39 = vpop.eup %11443  ;;  %v8133_v8 = vmul.f32 1.442695, %v8078_v54  ;;  %v6482_v54 = vadd.f32 %v6481_v11, %v6112_v27 }
 0xf50   :  { %v8217_v53 = vsel %vm3956_vm3, %v14654_v39, 0.0  ;;  %v8714_v18 = vunpack.c.l.b16 %v8330_v41  ;;  %v6485_v41 = vadd.f32 %v6484_v1, %v6115_v17 }
 0xf51   :  { %8218 = vadd.xlane.f32.xlu0 %v8217_v53  ;;  %8038 = vmax.xlane.f32.xlu2 %v8037_v52  ;;  %11445 = vpow2.f32 %v8133_v8  ;;  %v14680_v8 = vsel %vm12410_vm2, %v14500_v9, -inf  ;;  %v6851_v53 = vadd.f32 %v6850_v37, %v6482_v54  ;;  %v14692_v9 = vsel %vm12428_vm4, %v14503_v62, -inf }
 0xf52   :  { %v8715_v45 = vpack.c.b16 %v8714_v18, %v8713_v42  ;;  %v8043_v42 = vsel %vm3956_vm3, %v14680_v8, -inf  ;;  %v8046_v17 = vsel %vm3956_vm3, %v14692_v9, -inf }
 0xf53   :  { %v7026_v18 = vpack.c.bf16 %v6851_v53, %v6851_v53 }
 0xf54   :  { %v8033_v47 = vpop.xlane.xlu1 %8032  ;;  %v8723_v34 = vsel %vm3956_vm3, %v8715_v45, 0 }
 0xf55   :  { %v8079_v24 = vsub.f32 %v14590_v38, %v8033_v47  ;;  %8732 = vmatpush.bf16.xpose.msrb.mxu2 %v8723_v34  ;;  %v14675_v52 = vpop.f32.mrf.mxu2  ;;  %v6853_v38 = vpop.f32.mrf.mxu1  ;;  %v8706_v37 = vunpack.c.l.b16 %v7026_v18 }
 0xf56   :  { %v6854_v40 = vadd.f32 %v6853_v38, %v6485_v41  ;;  %v6117_v34 = vpop.f32.mrf.mxu3 }
 0xf57   :  { %v14669_v19 = vpop.eup %11445  ;;  %v8135_v14 = vmul.f32 1.442695, %v8079_v24  ;;  %v6486_v24 = vpop.f32.mrf.mxu0 }
 0xf58   :  { %v8220_v49 = vsel %vm3956_vm3, %v14669_v19, 0.0  ;;  %v7027_v45 = vpack.c.bf16 %v6854_v40, %v6854_v40 }
 0xf59   :  { %8041 = vmax.xlane.f32.xlu0 %v8040_v7  ;;  %8221 = vadd.xlane.f32.xlu1 %v8220_v49  ;;  %11447 = vpow2.f32 %v8135_v14  ;;  %v6487_v7 = vadd.f32 %v6486_v24, %v6117_v34 }
 0xf5a   :  { %v8707_v61 = vunpack.c.l.b16 %v7027_v45 }
 0xf5c   :  { %10708 = vmatmul.msk.bf16.gmra.mxu2 %vm3956_vm3, %v8670_v16  ;;  %v8709_v1 = vpack.c.b16 %v8707_v61, %v8706_v37  ;;  %v14701_v16 = vsel %vm12410_vm2, %v14505_v3, -inf }
 0xf5d   :  { %v8581_v47 = vpop.f32.mrf.mxu2  ;;  %v6855_v49 = vpop.f32.mrf.mxu1  ;;  %v8049_v54 = vsel %vm3956_vm3, %v14701_v16, -inf }
 0xf5e   :  { %v6856_v62 = vadd.f32 %v6855_v49, %v6487_v7  ;;  %v6120_v47 = vpop.f32.mrf.mxu3 }
 0xf5f   :  { %v14685_v27 = vpop.eup %11447  ;;  %v6489_v37 = vpop.f32.mrf.mxu0 }
 0xf60   :  { %v8223_v11 = vsel %vm3956_vm3, %v14685_v27, 0.0  ;;  %v7028_v41 = vpack.c.bf16 %v6856_v62, %v6856_v62 }
 0xf61   :  { %8224 = vadd.xlane.f32.xlu1 %v8223_v11  ;;  %8044 = vmax.xlane.f32.xlu0 %v8043_v42 }
 0xf62   :  { %v8708_v53 = vunpack.c.l.b16 %v7028_v41  ;;  %v6490_v41 = vadd.f32 %v6489_v37, %v6120_v47 }
 0xf64   :  { %v8710_v40 = vpack.c.b16 %v8708_v53, %v8708_v53 }
 0xf65   :  { %v14696_v14 = vpop.f32.mrf.mxu2  ;;  %v6858_v34 = vpop.f32.mrf.mxu1 }
 0xf66   :  { %v6122_v49 = vpop.f32.mrf.mxu3  ;;  %v6859_v22 = vadd.f32 %v6858_v34, %v6490_v41 }
 0xf67   :  { %v6491_v62 = vpop.f32.mrf.mxu0 }
 0xf68   :  { %v7029_v37 = vpack.c.bf16 %v6859_v22, %v6859_v22 }
 0xf69   :  { %8047 = vmax.xlane.f32.xlu1 %v8046_v17 }
 0xf6c   :  { %10709 = vmatmul.msk.bf16.vlgmr.msrb.gmra.mxu2 %vm3956_vm3, %v8709_v1 }
 0xf6d   :  { %v14706_v38 = vpop.f32.mrf.mxu2 }
 0xf6e   :  { %v6125_v22 = vpop.f32.mrf.mxu3 }
 0xf71   :  { %8050 = vmax.xlane.f32.xlu1 %v8049_v54 }
 0xf75   :  { %v14708_v42 = vpop.f32.mrf.mxu2 }
 0xf7c   :  { %10710 = vmatmul.msk.bf16.gmra.mxu2 %vm3956_vm3, %v8710_v40  ;;  %v6492_v40 = vadd.f32 %v6491_v62, %v6122_v49 }
 0xf7d   :  { %v8621_v11 = vpop.f32.mrf.mxu2 }
 0xf7e   :  { %v6860_v11 = vpop.f32.mrf.mxu1 }
 0xf7f   :  { %v6861_v30 = vadd.f32 %v6860_v11, %v6492_v40 }
 0xf81   :  { %v7030_v34 = vpack.c.bf16 %v6861_v30, %v6861_v30 }
 0xf85   :  { %v14711_v0 = vpop.f32.mrf.mxu2 }
 0xf8d   :  { %v14713_v3 = vpop.f32.mrf.mxu2 }
 0xf95   :  { %v14715_v18 = vpop.f32.mrf.mxu2 }
 0xf9d   :  { %v8661_v45 = vpop.f32.mrf.mxu2 }
 0xfb4   :  { %v8213_v61 = vpop.xlane.xlu2 %8212 }
 0xfb5   :  { %11449 = vrcp.f32 %v8213_v61 }
 0xfbb   :  { %v11450_v1 = vpop.eup %11449 }
 0xfbc   :  { %v8216_v24 = vpop.xlane.xlu0 %8215  ;;  %v8036_v17 = vpop.xlane.xlu2 %8035  ;;  %v8299_v53 = vmul.f32 %v11450_v1, %v14626_v15 }
 0xfbd   :  { %11451 = vrcp.f32 %v8216_v24  ;;  %v8080_v7 = vsub.f32 %v14633_v28, %v8036_v17 }
 0xfbe   :  { %v8331_v46 = vpack.c.bf16 %v8299_v53, %v8299_v53  ;;  %v6494_v53 = vpop.f32.mrf.mxu0 }
 0xfbf   :  { %v8137_v54 = vmul.f32 1.442695, %v8080_v7 }
 0xfc0   :  { %v8753_v1 = vunpack.c.l.b16 %v8331_v46 }
 0xfc1   :  { %11453 = vpow2.f32 %v8137_v54 }
 0xfc3   :  { %v11452_v45 = vpop.eup %11451 }
 0xfc4   :  { %v8300_v61 = vmul.f32 %v11452_v45, %v14637_v48  ;;  %v8219_v13 = vpop.xlane.xlu0 %8218  ;;  %v8039_v51 = vpop.xlane.xlu2 %8038 }
 0xfc5   :  { %v8081_v24 = vsub.f32 %v14649_v29, %v8039_v51  ;;  %11455 = vrcp.f32 %v8219_v13  ;;  %v8746_v51 = vunpack.c.l.b16 %v7029_v37  ;;  %v8747_v29 = vunpack.c.l.b16 %v7030_v34 }
 0xfc6   :  { %v8332_v28 = vpack.c.bf16 %v8300_v61, %v8300_v61 }
 0xfc7   :  { %v14721_v17 = vpop.eup %11453  ;;  %v8139_v47 = vmul.f32 1.442695, %v8081_v24  ;;  %v8749_v61 = vpack.c.b16 %v8747_v29, %v8746_v51  ;;  %v6495_v24 = vadd.f32 %v6494_v53, %v6125_v22 }
 0xfc8   :  { %v8226_v15 = vsel %vm3956_vm3, %v14721_v17, 0.0  ;;  %v8754_v7 = vunpack.c.l.b16 %v8332_v28  ;;  %v6863_v28 = vpop.f32.mrf.mxu1 }
 0xfc9   :  { %11457 = vpow2.f32 %v8139_v47  ;;  %8227 = vadd.xlane.f32.xlu2 %v8226_v15  ;;  %v14737_v47 = vsel %vm12428_vm4, %v14511_v50, -inf }
 0xfca   :  { %v8755_v48 = vpack.c.b16 %v8754_v7, %v8753_v1  ;;  %v8052_v44 = vsel %vm3956_vm3, %v14737_v47, -inf }
 0xfcb   :  { %v11456_v41 = vpop.eup %11455 }
 0xfcc   :  { %v8042_v49 = vpop.xlane.xlu0 %8041  ;;  %v8222_v62 = vpop.xlane.xlu1 %8221  ;;  %v8763_v54 = vsel %vm3956_vm3, %v8755_v48, 0  ;;  %v8301_v11 = vmul.f32 %v11456_v41, %v14654_v39  ;;  %v6864_v39 = vadd.f32 %v6863_v28, %v6495_v24 }
 0xfcd   :  { %v8082_v13 = vsub.f32 %v14665_v36, %v8042_v49  ;;  %11459 = vrcp.f32 %v8222_v62  ;;  %8772 = vmatpush.bf16.xpose.msra.mxu2 %v8763_v54 }
 0xfce   :  { %v8333_v15 = vpack.c.bf16 %v8301_v11, %v8301_v11  ;;  %v7031_v29 = vpack.c.bf16 %v6864_v39, %v6864_v39 }
 0xfcf   :  { %v14727_v40 = vpop.eup %11457  ;;  %v8141_v46 = vmul.f32 1.442695, %v8082_v13  ;;  %v14729_v30 = vpop.f32.mrf.mxu2 }
 0xfd0   :  { %v8229_v45 = vsel %vm3956_vm3, %v14727_v40, 0.0  ;;  %v8793_v54 = vunpack.c.l.b16 %v8333_v15  ;;  %v8748_v13 = vunpack.c.l.b16 %v7031_v29  ;;  %v11189_v29 = vpack.i.bf16 %v14660_v20, %v14513_v12 }
 0xfd1   :  { %11461 = vpow2.f32 %v8141_v46  ;;  %8230 = vadd.xlane.f32.xlu2 %v8229_v45  ;;  %v11193_v12 = vpack.i.bf16 %v14696_v14, %v14526_v59 }
 0xfd3   :  { %v11460_v36 = vpop.eup %11459 }
 0xfd4   :  { %v8302_v37 = vmul.f32 %v11460_v36, %v14669_v19  ;;  %10711 = vmatmul.msk.bf16.vlgmr.msra.gmra.mxu2 %vm3956_vm3, %v8749_v61  ;;  %v14741_v1 = vpop.xlane.xlu1 %8224  ;;  %v8045_v7 = vpop.xlane.xlu0 %8044  ;;  %v8750_v61 = vpack.c.b16 %v8748_v13, %v8748_v13 }
 0xfd5   :  { %v8083_v34 = vsub.f32 %v14680_v8, %v8045_v7 }
 0xfd6   :  { %v8334_v48 = vpack.c.bf16 %v8302_v37, %v8302_v37 }
 0xfd7   :  { %v14744_v49 = vpop.eup %11461  ;;  %v8143_v62 = vmul.f32 1.442695, %v8083_v34  ;;  %v14748_v50 = vpop.f32.mrf.mxu2 }
 0xfd8   :  { %v8232_v19 = vsel %vm3956_vm3, %v14744_v49, 0.0  ;;  %v8794_v51 = vunpack.c.l.b16 %v8334_v48 }
 0xfd9   :  { %8233 = vadd.xlane.f32.xlu0 %v8232_v19  ;;  %11463 = vpow2.f32 %v8143_v62  ;;  %8053 = vmax.xlane.f32.xlu2 %v8052_v44  ;;  %v6127_v19 = vpop.f32.mrf.mxu3 }
 0xfda   :  { %v8795_v41 = vpack.c.b16 %v8794_v51, %v8793_v54  ;;  %v6496_v54 = vpop.f32.mrf.mxu0  ;;  %v6865_v51 = vpop.f32.mrf.mxu1 }
 0xfdb   :  { %v6497_v13 = vadd.f32 %v6496_v54, %v6127_v19 }
 0xfdc   :  { %v8803_v8 = vsel %vm3956_vm3, %v8795_v41, 0  ;;  %v8048_v22 = vpop.xlane.xlu1 %8047 }
 0xfdd   :  { %8812 = vmatpush.bf16.xpose.msrb.mxu2 %v8803_v8  ;;  %v8084_v53 = vsub.f32 %v14692_v9, %v8048_v22 }
 0xfdf   :  { %v14754_v46 = vpop.eup %11463  ;;  %v8145_v11 = vmul.f32 1.442695, %v8084_v53  ;;  %v14756_v45 = vpop.f32.mrf.mxu2 }
 0xfe0   :  { %v8235_v24 = vsel %vm3956_vm3, %v14754_v46, 0.0 }
 0xfe1   :  { %11465 = vpow2.f32 %v8145_v11  ;;  %8236 = vadd.xlane.f32.xlu0 %v8235_v24  ;;  %v6130_v41 = vpop.f32.mrf.mxu3  ;;  %v6866_v11 = vadd.f32 %v6865_v51, %v6497_v13 }
 0xfe2   :  { %v6499_v8 = vpop.f32.mrf.mxu0  ;;  %v6868_v53 = vpop.f32.mrf.mxu1 }
 0xfe3   :  { %v6500_v22 = vadd.f32 %v6499_v8, %v6130_v41  ;;  %v7032_v24 = vpack.c.bf16 %v6866_v11, %v6866_v11 }
 0xfe4   :  { %10712 = vmatmul.msk.bf16.gmra.mxu2 %vm3956_vm3, %v8750_v61  ;;  %v8051_v28 = vpop.xlane.xlu1 %8050 }
 0xfe5   :  { %v8085_v36 = vsub.f32 %v14701_v16, %v8051_v28  ;;  %v6869_v61 = vadd.f32 %v6868_v53, %v6500_v22 }
 0xfe7   :  { %v14762_v37 = vpop.eup %11465  ;;  %v8147_v15 = vmul.f32 1.442695, %v8085_v36  ;;  %v8701_v9 = vpop.f32.mrf.mxu2  ;;  %v7033_v28 = vpack.c.bf16 %v6869_v61, %v6869_v61  ;;  %v8786_v36 = vunpack.c.l.b16 %v7032_v24 }
 0xfe8   :  { %v8238_v39 = vsel %vm3956_vm3, %v14762_v37, 0.0  ;;  %v11191_v9 = vpack.i.bf16 %v14675_v52, %v14518_v33  ;;  %v11195_v33 = vpack.i.bf16 %v14706_v38, %v14555_v26 }
 0xfe9   :  { %8239 = vadd.xlane.f32.xlu1 %v8238_v39  ;;  %11467 = vpow2.f32 %v8147_v15  ;;  %v8787_v15 = vunpack.c.l.b16 %v7033_v28  ;;  %v6132_v20 = vpop.f32.mrf.mxu3 }
 0xfea   :  { %v6870_v19 = vpop.f32.mrf.mxu1  ;;  %11469 = vrcp.f32 %v14741_v1  ;;  %v11197_v1 = vpack.i.bf16 %v14708_v42, %v14572_v35  ;;  %v11199_v35 = vpack.i.bf16 %v14711_v0, %v14582_v5 }
 0xfeb   :  { %v8789_v39 = vpack.c.b16 %v8787_v15, %v8786_v36 }
 0xfef   :  { %v14766_v7 = vpop.eup %11467  ;;  %v14768_v34 = vpop.f32.mrf.mxu2 }
 0xff0   :  { %v8241_v48 = vsel %vm3956_vm3, %v14766_v7, 0.0  ;;  %v11470_v59 = vpop.eup %11469 }
 0xff1   :  { %8242 = vadd.xlane.f32.xlu2 %v8241_v48  ;;  %v6501_v48 = vpop.f32.mrf.mxu0  ;;  %v6135_v52 = vpop.f32.mrf.mxu3  ;;  %v8303_v14 = vmul.f32 %v11470_v59, %v14685_v27 }
 0xff2   :  { %v6873_v22 = vpop.f32.mrf.mxu1 }
 0xff3   :  { %v8335_v36 = vpack.c.bf16 %v8303_v14, %v8303_v14  ;;  %v11201_v14 = vpack.i.bf16 %v14713_v3, %v14595_v31 }
 0xff4   :  { %10713 = vmatmul.msk.bf16.vlgmr.msrb.gmra.mxu2 %vm3956_vm3, %v8789_v39 }
 0xff7   :  { %v14772_v62 = vpop.f32.mrf.mxu2 }
 0xff9   :  { %v6504_v41 = vpop.f32.mrf.mxu0  ;;  %v6137_v11 = vpop.f32.mrf.mxu3 }
 0xffa   :  { %v6505_v53 = vadd.f32 %v6504_v41, %v6135_v52 }
 0xffc   :  { %v6874_v15 = vadd.f32 %v6873_v22, %v6505_v53 }
 0xfff   :  { %v14774_v16 = vpop.f32.mrf.mxu2 }
0x1001   :  { %v6506_v61 = vpop.f32.mrf.mxu0  ;;  %v6140_v41 = vpop.f32.mrf.mxu3 }
0x1002   :  { %v6507_v26 = vadd.f32 %v6506_v61, %v6137_v11 }
0x1007   :  { %v8741_v44 = vpop.f32.mrf.mxu2 }
0x1008   :  { %v6502_v44 = vadd.f32 %v6501_v48, %v6132_v20  ;;  %v8833_v20 = vunpack.c.l.b16 %v8335_v36  ;;  %v7035_v48 = vpack.c.bf16 %v6874_v15, %v6874_v15 }
0x1009   :  { %v6142_v3 = vpop.f32.mrf.mxu3 }
0x100a   :  { %v6871_v54 = vadd.f32 %v6870_v19, %v6502_v44 }
0x100c   :  { %v7034_v51 = vpack.c.bf16 %v6871_v54, %v6871_v54 }
0x1023   :  { %11190 = vxpose.xlu1.b32.start [1/16] (narrow) %v11189_v29, 16  ;;  %v8788_v29 = vunpack.c.l.b16 %v7034_v51  ;;  %v8826_v51 = vunpack.c.l.b16 %v7035_v48 }
0x1025   :  { %v8790_v8 = vpack.c.b16 %v8788_v29, %v8788_v29 }
0x1027   :  { %10714 = vmatmul.msk.bf16.gmra.mxu2 %vm3956_vm3, %v8790_v8  ;;  %v6509_v8 = vpop.f32.mrf.mxu0 }
0x1028   :  { %v6510_v5 = vadd.f32 %v6509_v8, %v6140_v41 }
0x102b   :  { %11192 = vxpose.xlu1.b32.cont [2/16] (narrow) %v11191_v9, 16  ;;  %v6875_v9 = vpop.f32.mrf.mxu1 }
0x102c   :  { %v6876_v39 = vadd.f32 %v6875_v9, %v6507_v26 }
0x102e   :  { %v7036_v44 = vpack.c.bf16 %v6876_v39, %v6876_v39 }
0x102f   :  { %v6511_v31 = vpop.f32.mrf.mxu0 }
0x1030   :  { %v8827_v29 = vunpack.c.l.b16 %v7036_v44 }
0x1032   :  { %v8829_v59 = vpack.c.b16 %v8827_v29, %v8826_v51 }
0x1033   :  { %11194 = vxpose.xlu1.b32.cont [3/16] (narrow) %v11193_v12, 16  ;;  %v6878_v0 = vpop.f32.mrf.mxu1 }
0x103b   :  { %11196 = vxpose.xlu1.b32.cont [4/16] (narrow) %v11195_v33, 16  ;;  %v6880_v9 = vpop.f32.mrf.mxu1 }
0x103c   :  { %v8228_v13 = vpop.xlane.xlu2 %8227 }
0x103d   :  { %11471 = vrcp.f32 %v8228_v13 }
0x1043   :  { %v11472_v24 = vpop.eup %11471  ;;  %11198 = vxpose.xlu1.b32.cont [5/16] (narrow) %v11197_v1, 16 }
0x1044   :  { %v8304_v38 = vmul.f32 %v11472_v24, %v14721_v17  ;;  %v8231_v28 = vpop.xlane.xlu2 %8230 }
0x1045   :  { %11473 = vrcp.f32 %v8231_v28 }
0x1046   :  { %v8336_v12 = vpack.c.bf16 %v8304_v38, %v8304_v38 }
0x1048   :  { %v8834_v27 = vunpack.c.l.b16 %v8336_v12 }
0x104a   :  { %v8835_v42 = vpack.c.b16 %v8834_v27, %v8833_v20 }
0x104b   :  { %11200 = vxpose.xlu1.b32.cont [6/16] (narrow) %v11199_v35, 16  ;;  %v11474_v33 = vpop.eup %11473  ;;  %v6512_v35 = vadd.f32 %v6511_v31, %v6142_v3 }
0x104c   :  { %v8234_v19 = vpop.xlane.xlu0 %8233  ;;  %v8843_v54 = vsel %vm3956_vm3, %v8835_v42, 0  ;;  %v8054_v17 = vpop.xlane.xlu2 %8053  ;;  %v8305_v22 = vmul.f32 %v11474_v33, %v14727_v40  ;;  %v11205_v42 = vpack.i.bf16 %v14729_v30, %v14603_v23  ;;  %v11207_v23 = vpack.i.bf16 %v14748_v50, %v14606_v10 }
0x104d   :  { %11475 = vrcp.f32 %v8234_v19  ;;  %8852 = vmatpush.bf16.xpose.msra.mxu2 %v8843_v54  ;;  %v8086_v52 = vsub.f32 %v14737_v47, %v8054_v17  ;;  %v6879_v47 = vadd.f32 %v6878_v0, %v6510_v5  ;;  %v6514_v19 = vpop.f32.mrf.mxu0  ;;  %v6145_v54 = vpop.f32.mrf.mxu3  ;;  %v6881_v51 = vadd.f32 %v6880_v9, %v6512_v35 }
0x104e   :  { %v8337_v11 = vpack.c.bf16 %v8305_v22, %v8305_v22  ;;  %v6883_v33 = vpop.f32.mrf.mxu1  ;;  %v11211_v50 = vpack.i.bf16 %v14768_v34, %v14613_v32 }
0x104f   :  { %v8149_v13 = vmul.f32 1.442695, %v8086_v52  ;;  %v7037_v36 = vpack.c.bf16 %v6879_v47, %v6879_v47 }
0x1050   :  { %v8873_v40 = vunpack.c.l.b16 %v8337_v11 }
0x1051   :  { %11477 = vpow2.f32 %v8149_v13  ;;  %v8828_v20 = vunpack.c.l.b16 %v7037_v36  ;;  %v11215_v36 = vpack.i.bf16 %v14774_v16, %v14618_v58 }
0x1053   :  { %v11476_v53 = vpop.eup %11475  ;;  %11202 = vxpose.xlu1.b32.cont [7/16] (narrow) %v11201_v14, 16  ;;  %v8830_v44 = vpack.c.b16 %v8828_v20, %v8828_v20  ;;  %v11209_v14 = vpack.i.bf16 %v14756_v45, %v14608_v60 }
0x1054   :  { %v8306_v1 = vmul.f32 %v11476_v53, %v14744_v49  ;;  %v8237_v61 = vpop.xlane.xlu0 %8236  ;;  %10715 = vmatmul.msk.bf16.vlgmr.msra.gmra.mxu2 %vm3956_vm3, %v8829_v59  ;;  %v11203_v49 = vpack.i.bf16 %v14715_v18, %v14597_v2  ;;  %v6515_v18 = vadd.f32 %v6514_v19, %v6145_v54 }
0x1055   :  { %11479 = vrcp.f32 %v8237_v61  ;;  %v6147_v53 = vpop.f32.mrf.mxu3 }
0x1056   :  { %v8338_v24 = vpack.c.bf16 %v8306_v1, %v8306_v1  ;;  %v6884_v52 = vadd.f32 %v6883_v33, %v6515_v18  ;;  %v6516_v1 = vpop.f32.mrf.mxu0  ;;  %v6885_v61 = vpop.f32.mrf.mxu1 }
0x1057   :  { %v14800_v26 = vpop.eup %11477  ;;  %v6517_v11 = vadd.f32 %v6516_v1, %v6147_v53  ;;  %v8774_v34 = vpop.f32.mrf.mxu2 }
0x1058   :  { %v8874_v38 = vunpack.c.l.b16 %v8338_v24  ;;  %v8244_v28 = vsel %vm3956_vm3, %v14800_v26, 0.0  ;;  %v7039_v22 = vpack.c.bf16 %v6884_v52, %v6884_v52 }
0x1059   :  { %8245 = vadd.xlane.f32.xlu0 %v8244_v28  ;;  %v6886_v47 = vadd.f32 %v6885_v61, %v6517_v11 }
0x105a   :  { %v8875_v15 = vpack.c.b16 %v8874_v38, %v8873_v40  ;;  %v11213_v38 = vpack.i.bf16 %v14772_v62, %v14616_v25 }
0x105b   :  { %11204 = vxpose.xlu1.b32.cont [8/16] (narrow) %v11203_v49, 16  ;;  %v11480_v27 = vpop.eup %11479  ;;  %v7040_v10 = vpack.c.bf16 %v6886_v47, %v6886_v47 }
0x105c   :  { %v8883_v39 = vsel %vm3956_vm3, %v8875_v15, 0  ;;  %v8240_v12 = vpop.xlane.xlu1 %8239  ;;  %v8307_v48 = vmul.f32 %v11480_v27, %v14754_v46  ;;  %v7038_v46 = vpack.c.bf16 %v6881_v51, %v6881_v51  ;;  %v11217_v27 = vpack.i.bf16 %v8774_v34, %v14622_v57 }
0x105d   :  { %8892 = vmatpush.bf16.xpose.msrb.mxu2 %v8883_v39  ;;  %11481 = vrcp.f32 %v8240_v12  ;;  %v8868_v24 = vunpack.c.l.b16 %v7040_v10  ;;  %v6150_v28 = vpop.f32.mrf.mxu3 }
0x105e   :  { %v8339_v29 = vpack.c.bf16 %v8307_v48, %v8307_v48  ;;  %v8866_v59 = vunpack.c.l.b16 %v7038_v46  ;;  %v6519_v60 = vpop.f32.mrf.mxu0  ;;  %v6888_v45 = vpop.f32.mrf.mxu1 }
0x105f   :  { %v8870_v40 = vpack.c.b16 %v8868_v24, %v8868_v24  ;;  %v6520_v49 = vadd.f32 %v6519_v60, %v6150_v28  ;;  %v8776_v58 = vpop.f32.mrf.mxu2 }
0x1060   :  { %v8913_v8 = vunpack.c.l.b16 %v8339_v29  ;;  %v11219_v16 = vpack.i.bf16 %v8776_v58, %v14644_v6  ;;  %v15771_v58 = vld [vmem:[#allocation213_spill] sm:$0xff] }
0x1061   :  { %v6889_v9 = vadd.f32 %v6888_v45, %v6520_v49 }
0x1063   :  { %v11482_v2 = vpop.eup %11481  ;;  %11206 = vxpose.xlu1.b32.cont [9/16] (narrow) %v11205_v42, 16  ;;  %v7041_v12 = vpack.c.bf16 %v6889_v9, %v6889_v9 }
0x1064   :  { %v8308_v17 = vmul.f32 %v11482_v2, %v14762_v37  ;;  %10716 = vmatmul.msk.bf16.gmra.mxu2 %vm3956_vm3, %v8830_v44  ;;  %v8867_v37 = vunpack.c.l.b16 %v7039_v22  ;;  %v8243_v6 = vpop.xlane.xlu2 %8242 }
0x1065   :  { %v6152_v31 = vpop.f32.mrf.mxu3  ;;  %v8906_v62 = vunpack.c.l.b16 %v7041_v12  ;;  %11483 = vrcp.f32 %v8243_v6 }
0x1066   :  { %v8340_v41 = vpack.c.bf16 %v8308_v17, %v8308_v17  ;;  %v8869_v0 = vpack.c.b16 %v8867_v37, %v8866_v59  ;;  %v6521_v3 = vpop.f32.mrf.mxu0  ;;  %v6890_v32 = vpop.f32.mrf.mxu1 }
0x1067   :  { %v6522_v15 = vadd.f32 %v6521_v3, %v6152_v31  ;;  %v8779_v44 = vpop.f32.mrf.mxu2 }
0x1068   :  { %v8914_v13 = vunpack.c.l.b16 %v8340_v41  ;;  %9047 = vxpose.xlu2.b32.start [1/16] (narrow) %v8779_v44, 16  ;;  %v15773_v44 = vld [vmem:[#allocation216_spill] sm:$0xff] }
0x1069   :  { %v6891_v39 = vadd.f32 %v6890_v32, %v6522_v15 }
0x106a   :  { %v8915_v30 = vpack.c.b16 %v8914_v13, %v8913_v8 }
0x106b   :  { %11208 = vxpose.xlu1.b32.cont [10/16] (narrow) %v11207_v23, 16  ;;  %v7042_v25 = vpack.c.bf16 %v6891_v39, %v6891_v39  ;;  %v11484_v23 = vpop.eup %11483 }
0x106c   :  { %v8923_v5 = vsel %vm3956_vm3, %v8915_v30, 0 }
0x106d   :  { %8932 = vmatpush.bf16.xpose.msra.mxu2 %v8923_v5  ;;  %v8907_v20 = vunpack.c.l.b16 %v7042_v25  ;;  %v6155_v35 = vpop.f32.mrf.mxu3  ;;  %v8309_v5 = vmul.f32 %v11484_v23, %v14766_v7  ;;  %v15781_v23 = vld [vmem:[#allocation243_spill] sm:$0xff] }
0x106e   :  { %v6524_v42 = vpop.f32.mrf.mxu0  ;;  %v6893_v54 = vpop.f32.mrf.mxu1 }
0x106f   :  { %v8909_v48 = vpack.c.b16 %v8907_v20, %v8906_v62  ;;  %v6525_v19 = vadd.f32 %v6524_v42, %v6155_v35  ;;  %v8781_v17 = vpop.f32.mrf.mxu2  ;;  %v8341_v11 = vpack.c.bf16 %v8309_v5, %v8309_v5  ;;  %v15767_v20 = vld [vmem:[#allocation205_spill] sm:$0xff]  ;;  %v15774_v42 = vld [vmem:[#allocation148_spill] sm:$0xff] }
0x1070   :  { %v15783_v5 = vld [vmem:[#allocation245_spill] sm:$0xff] }
0x1071   :  { %v6894_v2 = vadd.f32 %v6893_v54, %v6525_v19  ;;  %v8953_v24 = vunpack.c.l.b16 %v8341_v11  ;;  %v15775_v54 = vld [vmem:[#allocation47_spill] sm:$0xff] }
0x1072   :  { %v15789_v11 = vld [vmem:[#allocation251_spill] sm:$0xff] }
0x1073   :  { %11210 = vxpose.xlu1.b32.cont [11/16] (narrow) %v11209_v14, 16  ;;  %v7043_v18 = vpack.c.bf16 %v6894_v2, %v6894_v2 }
0x1074   :  { %10717 = vmatmul.msk.bf16.vlgmr.msrb.gmra.mxu2 %vm3956_vm3, %v8869_v0 }
0x1075   :  { %v8908_v51 = vunpack.c.l.b16 %v7043_v18  ;;  %v6157_v41 = vpop.f32.mrf.mxu3 }
0x1076   :  { %v6526_v46 = vpop.f32.mrf.mxu0  ;;  %v6895_v13 = vpop.f32.mrf.mxu1 }
0x1077   :  { %v8910_v29 = vpack.c.b16 %v8908_v51, %v8908_v51  ;;  %v8814_v57 = vpop.f32.mrf.mxu2  ;;  %v6527_v37 = vadd.f32 %v6526_v46, %v6157_v41  ;;  %v15778_v41 = vld [vmem:[#allocation240_spill] sm:$0xff] }
0x1078   :  { %9048 = vxpose.xlu2.b32.cont [2/16] (narrow) %v8814_v57, 16 }
0x1079   :  { %v6896_v47 = vadd.f32 %v6895_v13, %v6527_v37  ;;  %v15780_v13 = vld [vmem:[#allocation242_spill] sm:$0xff] }
0x107a   :  { %v15784_v37 = vld [vmem:[#allocation246_spill] sm:$0xff] }
0x107b   :  { %11212 = vxpose.xlu1.b32.cont [12/16] (narrow) %v11211_v50, 16  ;;  %v7044_v28 = vpack.c.bf16 %v6896_v47, %v6896_v47  ;;  %v15791_v47 = vld [vmem:[#allocation253_spill] sm:$0xff] }
0x107d   :  { %v6160_v30 = vpop.f32.mrf.mxu3  ;;  %v8946_v7 = vunpack.c.l.b16 %v7044_v28 }
0x107e   :  { %v6529_v59 = vpop.f32.mrf.mxu0  ;;  %v6898_v53 = vpop.f32.mrf.mxu1 }
0x107f   :  { %v8816_v33 = vpop.f32.mrf.mxu2  ;;  %v6530_v0 = vadd.f32 %v6529_v59, %v6160_v30  ;;  %v15782_v30 = vld [vmem:[#allocation244_spill] sm:$0xff] }
0x1080   :  { %9049 = vxpose.xlu2.b32.cont [3/16] (narrow) %v8816_v33, 16  ;;  %v15777_v33 = vld [vmem:[#allocation221_spill] sm:$0xff] }
0x1081   :  { %v6899_v10 = vadd.f32 %v6898_v53, %v6530_v0  ;;  %v15785_v0 = vld [vmem:[#allocation247_spill] sm:$0xff]  ;;  %v15787_v53 = vld [vmem:[#allocation249_spill] sm:$0xff] }
0x1083   :  { %11214 = vxpose.xlu1.b32.cont [13/16] (narrow) %v11213_v38, 16  ;;  %v7045_v60 = vpack.c.bf16 %v6899_v10, %v6899_v10 }
0x1084   :  { %10718 = vmatmul.msk.bf16.gmra.mxu2 %vm3956_vm3, %v8870_v40 }
0x1085   :  { %v6162_v31 = vpop.f32.mrf.mxu3 }
0x1086   :  { %v6900_v32 = vpop.f32.mrf.mxu1 }
0x108b   :  { %11216 = vxpose.xlu1.b32.cont [14/16] (narrow) %v11215_v36, 16  ;;  %v8947_v36 = vunpack.c.l.b16 %v7045_v60 }
0x108d   :  { %v8949_v49 = vpack.c.b16 %v8947_v36, %v8946_v7  ;;  %v15793_v7 = vld [vmem:[#allocation255_spill] sm:$0xff]  ;;  %v15794_v36 = vld [vmem:[#allocation256_spill] sm:$0xff] }
0x1093   :  { %11218 = vxpose.xlu1.b32.cont [15/16] (narrow) %v11217_v27, 16 }
0x1094   :  { %10719 = vmatmul.msk.bf16.vlgmr.msra.gmra.mxu2 %vm3956_vm3, %v8909_v48  ;;  %v15769_v48 = vld [vmem:[#allocation209_spill] sm:$0xff] }
0x109b   :  { %11220 = vxpose.xlu1.b32.end [16/16] (narrow) %v11219_v16, 16 }
0x10a4   :  { %10720 = vmatmul.msk.bf16.gmra.mxu2 %vm3956_vm3, %v8910_v29  ;;  %v15776_v29 = vld [vmem:[#allocation222_spill] sm:$0xff] }
0x10aa   :  { %v8819_v52 = vpop.f32.mrf.mxu2 }
0x10ab   :  { %9050 = vxpose.xlu2.b32.cont [4/16] (narrow) %v8819_v52, 16 }
0x10b2   :  { %v8821_v8 = vpop.f32.mrf.mxu2 }
0x10b3   :  { %v15779_v8 = vld [vmem:[#allocation241_spill] sm:$0xff] }
0x10c7   :  { %v11221_v35 = vpop.trf.xlu1 }
0x10c8   :  { %v11222_v19 = vunpack.i.l.bf16 %v11221_v35  ;;  %v11225_v52 = vunpack.i.h.bf16 %v11221_v35  ;;  %v15818_v35 = vld [vmem:[#allocation280_spill] sm:$0xff] }
0x10cc   :  { %v8246_v22 = vpop.xlane.xlu0 %8245 }
0x10cd   :  { %11485 = vrcp.f32 %v8246_v22 }
0x10cf   :  { %v11226_v18 = vpop.trf.xlu1 }
0x10d0   :  { %v11227_v17 = vunpack.i.l.bf16 %v11226_v18  ;;  %v11230_v6 = vunpack.i.h.bf16 %v11226_v18  ;;  %v15822_v18 = vld [vmem:[#allocation284_spill] sm:$0xff] }
0x10d2   :  { %v14850_v51 = vpack.c.bf16 %v11227_v17, %v11222_v19  ;;  %v14856_v46 = vpack.c.bf16 %v11230_v6, %v11225_v52  ;;  %v15826_v52 = vld [vmem:[#allocation288_spill] sm:$0xff]  ;;  %v15827_v6 = vld [vmem:[#allocation289_spill] sm:$0xff] }
0x10d3   :  { %v11486_v14 = vpop.eup %11485 }
0x10d4   :  { %v8310_v1 = vmul.f32 %v11486_v14, %v14800_v26  ;;  %v6531_v26 = vpop.f32.mrf.mxu0  ;;  %v15786_v14 = vld [vmem:[#allocation248_spill] sm:$0xff] }
0x10d5   :  { %v6532_v15 = vadd.f32 %v6531_v26, %v6162_v31  ;;  %v15795_v31 = vld [vmem:[#allocation257_spill] sm:$0xff]  ;;  %v15796_v26 = vld [vmem:[#allocation258_spill] sm:$0xff] }
0x10d6   :  { %v8342_v61 = vpack.c.bf16 %v8310_v1, %v8310_v1  ;;  %v15788_v1 = vld [vmem:[#allocation250_spill] sm:$0xff] }
0x10d7   :  { %v8854_v50 = vpop.f32.mrf.mxu2  ;;  %v6901_v34 = vadd.f32 %v6900_v32, %v6532_v15  ;;  %v15799_v15 = vld [vmem:[#allocation261_spill] sm:$0xff]  ;;  %v15800_v32 = vld [vmem:[#allocation262_spill] sm:$0xff] }
0x10d8   :  { %v8954_v40 = vunpack.c.l.b16 %v8342_v61  ;;  %9051 = vxpose.xlu2.b32.cont [5/16] (narrow) %v8854_v50, 16  ;;  %v15790_v61 = vld [vmem:[#allocation252_spill] sm:$0xff] }
0x10d9   :  { %v7046_v39 = vpack.c.bf16 %v6901_v34, %v6901_v34  ;;  %v15801_v34 = vld [vmem:[#allocation263_spill] sm:$0xff] }
0x10da   :  { %v8955_v38 = vpack.c.b16 %v8954_v40, %v8953_v24 }
0x10db   :  { %v8948_v12 = vunpack.c.l.b16 %v7046_v39  ;;  %v15803_v39 = vld [vmem:[#allocation265_spill] sm:$0xff] }
0x10dc   :  { %v8963_v45 = vsel %vm3956_vm3, %v8955_v38, 0 }
0x10dd   :  { %8972 = vmatpush.bf16.xpose.msrb.mxu2 %v8963_v45  ;;  %v8950_v25 = vpack.c.b16 %v8948_v12, %v8948_v12  ;;  %v15792_v45 = vld [vmem:[#allocation254_spill] sm:$0xff] }
0x10de   :  { %v15804_v12 = vld [vmem:[#allocation266_spill] sm:$0xff] }
0x10df   :  { %v8856_v3 = vpop.f32.mrf.mxu2 }
0x10e0   :  { %9052 = vxpose.xlu2.b32.cont [6/16] (narrow) %v8856_v3, 16  ;;  %v15797_v3 = vld [vmem:[#allocation259_spill] sm:$0xff] }
0x10e4   :  { %10721 = vmatmul.msk.bf16.vlgmr.msrb.gmra.mxu2 %vm3956_vm3, %v8949_v49  ;;  %v15798_v49 = vld [vmem:[#allocation260_spill] sm:$0xff] }
0x10e5   :  { %9082 = vmatpush.bf16.msra.mxu2 %v13468_v43 }
0x10e7   :  { %v8859_v9 = vpop.f32.mrf.mxu2 }
0x10e8   :  { %9053 = vxpose.xlu2.b32.cont [7/16] (narrow) %v8859_v9, 16  ;;  %v15802_v9 = vld [vmem:[#allocation264_spill] sm:$0xff] }
0x10e9   :  { %9083 = vmatpush.bf16.msra.mxu2 %v13471_v63  ;;  %v15766_v63 = vld [vmem:[#allocation204_spill] sm:$0xff] }
0x10ed   :  { %9084 = vmatpush.bf16.msra.mxu2 %v13476_v56  ;;  %v15768_v56 = vld [vmem:[#allocation206_spill] sm:$0xff] }
0x10ef   :  { %v8861_v43 = vpop.f32.mrf.mxu2 }
0x10f0   :  { %v15805_v43 = vld [vmem:[#allocation267_spill] sm:$0xff] }
0x10f1   :  { %9085 = vmatpush.bf16.msra.mxu2 %v13479_v55  ;;  %v15770_v55 = vld [vmem:[#allocation210_spill] sm:$0xff] }
0x10f4   :  { %10722 = vmatmul.msk.bf16.gmra.mxu2 %vm3956_vm3, %v8950_v25  ;;  %v15806_v25 = vld [vmem:[#allocation268_spill] sm:$0xff] }
0x10f5   :  { %9086 = vmatpush.bf16.msra.mxu2 %v13482_v21 }
0x10f7   :  { %v8894_v62 = vpop.f32.mrf.mxu2 }
0x10f8   :  { %9054 = vxpose.xlu2.b32.cont [8/16] (narrow) %v8894_v62, 16  ;;  %v15808_v62 = vld [vmem:[#allocation270_spill] sm:$0xff] }
0x10f9   :  { %9087 = vmatpush.bf16.msra.mxu2 %v13485_v4  ;;  %v15772_v4 = vld [vmem:[#allocation42_spill] sm:$0xff] }
0x10fd   :  { %9088 = vmatpush.bf16.msra.mxu2 %v15766_v63  ;;  %v15807_v63 = vld [vmem:[#allocation269_spill] sm:$0xff] }
0x10ff   :  { %v8896_v27 = vpop.f32.mrf.mxu2 }
0x1100   :  { %9055 = vxpose.xlu2.b32.cont [9/16] (narrow) %v8896_v27, 16  ;;  %v15811_v27 = vld [vmem:[#allocation273_spill] sm:$0xff] }
0x1101   :  { %9089 = vmatpush.bf16.msra.mxu2 %v15767_v20  ;;  %v15809_v20 = vld [vmem:[#allocation271_spill] sm:$0xff] }
0x1104   :  { %9090 = vmatmul.bf16.vlgmr.msra.gmra.mxu2 %v14850_v51 }
0x1105   :  { %9096 = vmatpush.bf16.msrb.mxu2 %v15768_v56  ;;  %v15810_v56 = vld [vmem:[#allocation272_spill] sm:$0xff] }
0x1107   :  { %v8899_v21 = vpop.f32.mrf.mxu2 }
0x1108   :  { %9056 = vxpose.xlu2.b32.cont [10/16] (narrow) %v8899_v21, 16  ;;  %v15814_v21 = vld [vmem:[#allocation276_spill] sm:$0xff] }
0x1109   :  { %9097 = vmatpush.bf16.msrb.mxu2 %v15769_v48  ;;  %v15812_v48 = vld [vmem:[#allocation274_spill] sm:$0xff] }
0x110d   :  { %9098 = vmatpush.bf16.msrb.mxu2 %v15770_v55  ;;  %v15813_v55 = vld [vmem:[#allocation275_spill] sm:$0xff] }
0x110f   :  { %v8901_v16 = vpop.f32.mrf.mxu2 }
0x1110   :  { %v15817_v16 = vld [vmem:[#allocation279_spill] sm:$0xff] }
0x1111   :  { %9099 = vmatpush.bf16.msrb.mxu2 %v15771_v58  ;;  %v15815_v58 = vld [vmem:[#allocation277_spill] sm:$0xff] }
0x1115   :  { %9100 = vmatpush.bf16.msrb.mxu2 %v15772_v4  ;;  %v15816_v4 = vld [vmem:[#allocation278_spill] sm:$0xff] }
0x1117   :  { %v8934_v2 = vpop.f32.mrf.mxu2 }
0x1118   :  { %9057 = vxpose.xlu2.b32.cont [11/16] (narrow) %v8934_v2, 16  ;;  %v15821_v2 = vld [vmem:[#allocation283_spill] sm:$0xff] }
0x1119   :  { %9101 = vmatpush.bf16.msrb.mxu2 %v15773_v44 }
0x111d   :  { %9102 = vmatpush.bf16.msrb.mxu2 %v15774_v42  ;;  %v15819_v42 = vld [vmem:[#allocation281_spill] sm:$0xff] }
0x111f   :  { %v8936_v57 = vpop.f32.mrf.mxu2 }
0x1120   :  { %9058 = vxpose.xlu2.b32.cont [12/16] (narrow) %v8936_v57, 16  ;;  %v15824_v57 = vld [vmem:[#allocation286_spill] sm:$0xff] }
0x1121   :  { %9103 = vmatpush.bf16.msrb.mxu2 %v15775_v54  ;;  %v15820_v54 = vld [vmem:[#allocation282_spill] sm:$0xff] }
0x1124   :  { %9104 = vmatmul.bf16.vlgmr.msrb.gmra.mxu2 %v14856_v46 }
0x1125   :  { %9110 = vmatpush.bf16.msra.mxu2 %v15776_v29  ;;  %v15823_v29 = vld [vmem:[#allocation285_spill] sm:$0xff] }
0x1127   :  { %v8939_v22 = vpop.f32.mrf.mxu2 }
0x1128   :  { %9059 = vxpose.xlu2.b32.cont [13/16] (narrow) %v8939_v22, 16 }
0x1129   :  { %9111 = vmatpush.bf16.msra.mxu2 %v15777_v33 }
0x112d   :  { %9112 = vmatpush.bf16.msra.mxu2 %v15778_v41 }
0x112f   :  { %v8941_v59 = vpop.f32.mrf.mxu2 }
0x1131   :  { %9113 = vmatpush.bf16.msra.mxu2 %v15779_v8  ;;  %v15828_v8 = vld [vmem:[#allocation290_spill] sm:$0xff] }
0x1135   :  { %9114 = vmatpush.bf16.msra.mxu2 %v15780_v13 }
0x1139   :  { %9115 = vmatpush.bf16.msra.mxu2 %v15781_v23 }
0x113d   :  { %9116 = vmatpush.bf16.msra.mxu2 %v15782_v30  ;;  %v15829_v30 = vld [vmem:[#allocation291_spill] sm:$0xff] }
0x1141   :  { %9117 = vmatpush.bf16.msra.mxu2 %v15783_v5  ;;  %v15830_v5 = vld [vmem:[#allocation292_spill] sm:$0xff] }
0x1145   :  { %9124 = vmatpush.bf16.msrb.mxu2 %v15784_v37 }
0x1149   :  { %9125 = vmatpush.bf16.msrb.mxu2 %v15785_v0 }
0x114d   :  { %9126 = vmatpush.bf16.msrb.mxu2 %v15786_v14  ;;  %v15831_v14 = vld [vmem:[#allocation293_spill] sm:$0xff] }
0x1151   :  { %9127 = vmatpush.bf16.msrb.mxu2 %v15787_v53  ;;  %v15832_v53 = vld [vmem:[#allocation294_spill] sm:$0xff] }
0x1155   :  { %9128 = vmatpush.bf16.msrb.mxu2 %v15788_v1 }
0x1159   :  { %9129 = vmatpush.bf16.msrb.mxu2 %v15789_v11 }
0x115d   :  { %9130 = vmatpush.bf16.msrb.mxu2 %v15790_v61 }
0x1161   :  { %9131 = vmatpush.bf16.msrb.mxu2 %v15791_v47 }
0x1167   :  { %v8974_v10 = vpop.f32.mrf.mxu2 }
0x1168   :  { %9060 = vxpose.xlu2.b32.cont [14/16] (narrow) %v8974_v10, 16  ;;  %v15833_v10 = vld [vmem:[#allocation14_spill] sm:$0xff] }
0x116f   :  { %v8976_v50 = vpop.f32.mrf.mxu2 }
0x1170   :  { %9061 = vxpose.xlu2.b32.cont [15/16] (narrow) %v8976_v50, 16 }
0x1177   :  { %v8979_v24 = vpop.f32.mrf.mxu2 }
0x1178   :  { %9062 = vxpose.xlu2.b32.end [16/16] (narrow) %v8979_v24, 16 }
0x117f   :  { %v8981_v40 = vpop.f32.mrf.mxu2 }
0x1187   :  { %v9091_v44 = vpop.f32.mrf.mxu2 }
0x1188   :  { %v9092_v41 = vadd.f32 %v9091_v44, %v15827_v6 }
0x118f   :  { %v9093_v19 = vpop.f32.mrf.mxu2 }
0x1190   :  { %v9094_v59 = vadd.f32 %v9093_v19, %v15827_v6 }
0x1199   :  { %v9063_v38 = vpop.trf.xlu2 }
0x11a1   :  { %v9064_v28 = vpop.trf.xlu2 }
0x11a2   :  { %v9081_v60 = vpack.c.bf16 %v9064_v28, %v9063_v38 }
0x11a4   :  { %9118 = vmatmul.bf16.vlgmr.msra.gmra.mxu2 %v9081_v60 }
0x11a5   :  { %9138 = vmatpush.bf16.msra.mxu2 %v15792_v45 }
0x11a7   :  { %v9105_v17 = vpop.f32.mrf.mxu2 }
0x11a8   :  { %v9106_v13 = vadd.f32 %v9105_v17, %v9092_v41 }
0x11a9   :  { %9139 = vmatpush.bf16.msra.mxu2 %v15793_v7 }
0x11ad   :  { %9140 = vmatpush.bf16.msra.mxu2 %v15794_v36 }
0x11af   :  { %v9107_v33 = vpop.f32.mrf.mxu2 }
0x11b1   :  { %9141 = vmatpush.bf16.msra.mxu2 %v15795_v31 }
0x11b4   :  { %9132 = vmatmul.bf16.vlgmr.msrb.gmra.mxu2 %v14850_v51 }
0x11b5   :  { %9142 = vmatpush.bf16.msra.mxu2 %v15796_v26 }
0x11b9   :  { %9143 = vmatpush.bf16.msra.mxu2 %v15797_v3 }
0x11bd   :  { %9144 = vmatpush.bf16.msra.mxu2 %v15798_v49  ;;  %v15834_v49 = vld [vmem:[#allocation23_spill] sm:$0xff] }
0x11c1   :  { %9145 = vmatpush.bf16.msra.mxu2 %v15799_v15 }
0x11c4   :  { %9146 = vmatmul.bf16.vlgmr.msra.gmra.mxu2 %v14856_v46 }
0x11c5   :  { %9152 = vmatpush.bf16.msrb.mxu2 %v15800_v32 }
0x11c9   :  { %9153 = vmatpush.bf16.msrb.mxu2 %v15801_v34 }
0x11cd   :  { %9154 = vmatpush.bf16.msrb.mxu2 %v15802_v9 }
0x11d1   :  { %9155 = vmatpush.bf16.msrb.mxu2 %v15803_v39 }
0x11d5   :  { %9156 = vmatpush.bf16.msrb.mxu2 %v15804_v12 }
0x11d9   :  { %9157 = vmatpush.bf16.msrb.mxu2 %v15805_v43 }
0x11dd   :  { %9158 = vmatpush.bf16.msrb.mxu2 %v15806_v25 }
0x11e1   :  { %9159 = vmatpush.bf16.msrb.mxu2 %v15807_v63 }
0x11e4   :  { %9160 = vmatmul.bf16.vlgmr.msrb.gmra.mxu2 %v9081_v60 }
0x11e5   :  { %9166 = vmatpush.bf16.msra.mxu2 %v15808_v62 }
0x11e9   :  { %9167 = vmatpush.bf16.msra.mxu2 %v15809_v20 }
0x11ed   :  { %9168 = vmatpush.bf16.msra.mxu2 %v15810_v56 }
0x11f1   :  { %9169 = vmatpush.bf16.msra.mxu2 %v15811_v27 }
0x11f5   :  { %9170 = vmatpush.bf16.msra.mxu2 %v15812_v48 }
0x11f9   :  { %9171 = vmatpush.bf16.msra.mxu2 %v15813_v55 }
0x11fd   :  { %9172 = vmatpush.bf16.msra.mxu2 %v15814_v21 }
0x1201   :  { %9173 = vmatpush.bf16.msra.mxu2 %v15815_v58 }
0x1204   :  { %9174 = vmatmul.bf16.vlgmr.msra.gmra.mxu2 %v14850_v51  ;;  %v15825_v51 = vld [vmem:[#allocation287_spill] sm:$0xff] }
0x1205   :  { %9180 = vmatpush.bf16.msrb.mxu2 %v15816_v4 }
0x1209   :  { %9181 = vmatpush.bf16.msrb.mxu2 %v15817_v16 }
0x120d   :  { %9182 = vmatpush.bf16.msrb.mxu2 %v15818_v35 }
0x1211   :  { %9183 = vmatpush.bf16.msrb.mxu2 %v15819_v42 }
0x1215   :  { %9184 = vmatpush.bf16.msrb.mxu2 %v15820_v54 }
0x1219   :  { %9185 = vmatpush.bf16.msrb.mxu2 %v15821_v2 }
0x121d   :  { %9186 = vmatpush.bf16.msrb.mxu2 %v15822_v18 }
0x1221   :  { %9187 = vmatpush.bf16.msrb.mxu2 %v15823_v29 }
0x1224   :  { %9188 = vmatmul.bf16.vlgmr.msrb.gmra.mxu2 %v14856_v46  ;;  %v9108_v46 = vadd.f32 %v9107_v33, %v9094_v59 }
0x1225   :  { %9194 = vmatpush.bf16.msra.mxu2 %v15824_v57 }
0x1227   :  { %v9119_v22 = vpop.f32.mrf.mxu2 }
0x1228   :  { %v9120_v23 = vadd.f32 %v9119_v22, %v9106_v13 }
0x1229   :  { %9195 = vmatpush.bf16.msra.mxu2 %v15825_v51 }
0x122a   :  { %9209 = vst [vmem:[#allocation7 + $0x30] sm:$0xff] %v9120_v23 }
0x122d   :  { %9196 = vmatpush.bf16.msra.mxu2 %v15826_v52 }
0x122f   :  { %v9121_v37 = vpop.f32.mrf.mxu2 }
0x1230   :  { %v9122_v0 = vadd.f32 %v9121_v37, %v9108_v46 }
0x1231   :  { %9197 = vmatpush.bf16.msra.mxu2 %v15828_v8 }
0x1232   :  { %9212 = vst [vmem:[#allocation7 + $0x48] sm:$0xff] %v9122_v0 }
0x1235   :  { %9198 = vmatpush.bf16.msra.mxu2 %v15829_v30 }
0x1237   :  { %v9133_v1 = vpop.f32.mrf.mxu2 }
0x1238   :  { %v9134_v50 = vadd.f32 %v9133_v1, %v15833_v10 }
0x1239   :  { %9199 = vmatpush.bf16.msra.mxu2 %v15830_v5 }
0x123d   :  { %9200 = vmatpush.bf16.msra.mxu2 %v15831_v14 }
0x123f   :  { %v9135_v11 = vpop.f32.mrf.mxu2 }
0x1240   :  { %v9136_v28 = vadd.f32 %v9135_v11, %v15833_v10 }
0x1241   :  { %9201 = vmatpush.bf16.msra.mxu2 %v15832_v53 }
0x1244   :  { %9202 = vmatmul.bf16.vlgmr.msra.gmra.mxu2 %v9081_v60 }
0x1247   :  { %v9147_v61 = vpop.f32.mrf.mxu2 }
0x1248   :  { %v9148_v24 = vadd.f32 %v9147_v61, %v9134_v50 }
0x124f   :  { %v9149_v47 = vpop.f32.mrf.mxu2 }
0x1250   :  { %v9150_v45 = vadd.f32 %v9149_v47, %v9136_v28 }
0x1267   :  { %v9161_v40 = vpop.f32.mrf.mxu2 }
0x1268   :  { %v9162_v38 = vadd.f32 %v9161_v40, %v9148_v24 }
0x126a   :  { %9210 = vst [vmem:[#allocation7 + $0x38] sm:$0xff] %v9162_v38 }
0x126f   :  { %v9163_v7 = vpop.f32.mrf.mxu2 }
0x1270   :  { %v9164_v36 = vadd.f32 %v9163_v7, %v9150_v45 }
0x1272   :  { %9213 = vst [vmem:[#allocation7 + $0x50] sm:$0xff] %v9164_v36 }
0x1287   :  { %v9175_v31 = vpop.f32.mrf.mxu2 }
0x1288   :  { %v9176_v15 = vadd.f32 %v9175_v31, %v15834_v49 }
0x128f   :  { %v9177_v26 = vpop.f32.mrf.mxu2 }
0x1290   :  { %v9178_v39 = vadd.f32 %v9177_v26, %v15834_v49 }
0x12a7   :  { %v9189_v3 = vpop.f32.mrf.mxu2 }
0x12a8   :  { %v9190_v32 = vadd.f32 %v9189_v3, %v9176_v15 }
0x12af   :  { %v9191_v60 = vpop.f32.mrf.mxu2 }
0x12b0   :  { %v9192_v12 = vadd.f32 %v9191_v60, %v9178_v39 }
0x12c7   :  { %v9203_v34 = vpop.f32.mrf.mxu2 }
0x12c8   :  { %v9204_v9 = vadd.f32 %v9203_v34, %v9190_v32 }
0x12ca   :  { %9211 = vst [vmem:[#allocation7 + $0x40] sm:$0xff] %v9204_v9 }
0x12cf   :  { %v9205_v43 = vpop.f32.mrf.mxu2 }
0x12d0   :  { %v9206_v25 = vadd.f32 %v9205_v43, %v9192_v12 }
0x12d2   :  { %9214 = vst [vmem:[#allocation7 + $0x58] sm:$0xff] %v9206_v25 }
0x12d3   :  { %9227 = dma.vmem_to_hbm [thread:$0]  %s9220_s11, 1536, %s9222_s14, [#allocation4], %s11570_s15, %s11570_s15, %s11571_s16  }
0x12d4   :  { %11563 = dma.done.wait [#allocation4], 1536  }
0x12d5   :  { %11564 = vsyncadd [#allocation4], 4294965760 }
0x12d6   :  { %9232 = vsyncpa [#allocation3], 1 }
0x12d7   :  { %9233 = vsyncpa [#allocation6], 1 }
0x12d8   :  { %9234 = vsyncpa [#allocation4], 1 }

</bundles_post_ra>
